<compile_context>
chip_gen: v7x
topology: tpu7x:2x2x1
jax: 0.10.0
libtpu: 0.0.40
codegen_flags: <defaults>
</compile_context>

<pallas_src>
import functools

import jax
import jax.numpy as jnp
from jax import lax
from jax.experimental import pallas as pl
from jax.experimental.pallas import tpu as pltpu


# -----------------------------------------------------------------------------
# Fused conv block kernel:
#   3x3 conv (pad=1, BN scale folded into weight) + bias/BN shift + ReLU
#   + 2x2 max-pool, one K-concatenated MXU matmul per row-chunk.
# -----------------------------------------------------------------------------
def _conv_block_kernel(x_ref, w_ref, sh_ref, out_ref, lhs_ref, *,
                       n_chunks, THh, Wh, Cin2, Cout, pad_out):
    """One batch element per grid step.

    x_ref  : (1, Hp2, 2, Wp2, Cin2) bf16 zero-padded NHWC input, H/W paired:
             element (hp, i, wp, j*Cin+c) == xpad[2*hp+i, 2*wp+j, c]
    w_ref  : (8*Cin2, 4*Cout) bf16 fused conv+pool weight (BN scale folded in)
    sh_ref : (1, Cout) f32 conv bias + BN shift
    out_ref: pad_out -> (1, Hh+2, Wh+2, Cout) bf16 (zero halo; next conv's
                        padded input)
             else    -> (1, Hh*Wh, Cout) bf16, rows in NHWC (h2, w2) order
    lhs_ref: (THh*Wh, 8*Cin2) bf16 VMEM scratch (im2col LHS for one row-chunk)
    """
    if pad_out:
        out_ref[...] = jnp.zeros_like(out_ref)   # zero the 1-pixel halo

    def chunk(c, carry):
        base = pl.multiple_of(c * THh, THh)      # first pooled row of this chunk

        # Assemble the (THh*Wh, 8*Cin2) im2col LHS: 8 contiguous slabs, one per
        # (row-pair offset, row parity, col-pair offset) of the 4x4 footprint.
        k = 0
        for dhp in range(2):
            for ip in range(2):
                for dwp in range(2):
                    slab = x_ref[0, pl.ds(base + dhp, THh), ip,
                                 pl.ds(dwp, Wh), :]
                    lhs_ref[:, k * Cin2:(k + 1) * Cin2] = (
                        slab.reshape(THh * Wh, Cin2))
                    k += 1

        # One MXU matmul: K = 8*Cin2, N = 4*Cout (all four (dy,dx) conv outputs).
        y = jnp.dot(lhs_ref[...], w_ref[...],
                    preferred_element_type=jnp.float32)

        # 2x2 max-pool == lane-wise max over the four (dy,dx) column groups;
        # shift + ReLU commute with the max (same shift for all four groups).
        C = Cout
        pooled = jnp.maximum(
            jnp.maximum(y[:, 0 * C:1 * C], y[:, 1 * C:2 * C]),
            jnp.maximum(y[:, 2 * C:3 * C], y[:, 3 * C:4 * C]))
        pooled = jnp.maximum(pooled + sh_ref[...], 0.0).astype(out_ref.dtype)

        if pad_out:
            out_ref[0, pl.ds(1 + base, THh), pl.ds(1, Wh), :] = (
                pooled.reshape(THh, Wh, Cout))
        else:
            row0 = pl.multiple_of(c * (THh * Wh), THh * Wh)
            out_ref[0, pl.ds(row0, THh * Wh), :] = pooled
        return carry

    lax.fori_loop(0, n_chunks, chunk, 0)


def conv_block(xpad_nhwc, w_fused, shift, *, pad_out, row_tile=8):
    """Padded NHWC input (B, H+2, W+2, Cin) bf16 -> pooled conv output (bf16).

    pad_out=True : (B, H//2+2, W//2+2, Cout) with a zero 1-pixel halo
                   (directly usable as the next conv block's padded input).
    pad_out=False: (B, (H//2)*(W//2), Cout), rows in NHWC (h, w) order.
    """
    B, Hp, Wp, Cin = xpad_nhwc.shape
    H, W = Hp - 2, Wp - 2
    Cout = w_fused.shape[-1] // 4
    Hh, Wh = H // 2, W // 2
    Hp2, Wp2 = Hp // 2, Wp // 2
    Cin2 = 2 * Cin
    THh = min(row_tile, Hh)
    n_chunks = Hh // THh

    xp = xpad_nhwc.reshape(B, Hp2, 2, Wp2, Cin2)   # free view: pair H and W

    if pad_out:
        out_shape = jax.ShapeDtypeStruct((B, Hh + 2, Wh + 2, Cout), jnp.bfloat16)
        out_spec = pl.BlockSpec((1, Hh + 2, Wh + 2, Cout), lambda b: (b, 0, 0, 0))
    else:
        out_shape = jax.ShapeDtypeStruct((B, Hh * Wh, Cout), jnp.bfloat16)
        out_spec = pl.BlockSpec((1, Hh * Wh, Cout), lambda b: (b, 0, 0))

    kernel = functools.partial(_conv_block_kernel, n_chunks=n_chunks, THh=THh,
                               Wh=Wh, Cin2=Cin2, Cout=Cout, pad_out=pad_out)
    return pl.pallas_call(
        kernel,
        out_shape=out_shape,
        grid=(B,),
        in_specs=[
            pl.BlockSpec((1, Hp2, 2, Wp2, Cin2), lambda b: (b, 0, 0, 0, 0)),
            pl.BlockSpec((8 * Cin2, 4 * Cout), lambda b: (0, 0)),
            pl.BlockSpec((1, Cout), lambda b: (0, 0)),
        ],
        out_specs=out_spec,
        scratch_shapes=[pltpu.VMEM((THh * Wh, 8 * Cin2), jnp.bfloat16)],
        compiler_params=pltpu.CompilerParams(
            dimension_semantics=("parallel",)),
    )(xp, w_fused, shift)


# -----------------------------------------------------------------------------
# Fused FC head: fc1 (K-chunked weight stream) + ReLU + fc2 (lane reduce) + sigmoid
# -----------------------------------------------------------------------------
def _mlp_kernel(x_ref, w1_ref, b1_ref, w2_ref, b2_ref, out_ref, acc_ref):
    k = pl.program_id(0)

    @pl.when(k == 0)
    def _():
        acc_ref[...] = jnp.zeros_like(acc_ref)

    acc_ref[...] += jnp.dot(x_ref[...], w1_ref[...],
                            preferred_element_type=jnp.float32)

    @pl.when(k == pl.num_programs(0) - 1)
    def _():
        h = jnp.maximum(acc_ref[...] + b1_ref[...], 0.0)             # fc1 + ReLU
        logit = jnp.sum(h * w2_ref[...], axis=-1, keepdims=True) + b2_ref[...]
        out_ref[...] = 1.0 / (1.0 + jnp.exp(-logit))                 # sigmoid


def mlp_head(x, w1, b1, w2, b2, *, k_chunk=2048):
    B, K = x.shape
    H1 = w1.shape[1]
    kt = pl.cdiv(K, k_chunk)
    return pl.pallas_call(
        _mlp_kernel,
        out_shape=jax.ShapeDtypeStruct((B, 1), jnp.float32),
        grid=(kt,),
        in_specs=[
            pl.BlockSpec((B, k_chunk), lambda k: (0, k)),
            pl.BlockSpec((k_chunk, H1), lambda k: (k, 0)),
            pl.BlockSpec((1, H1), lambda k: (0, 0)),
            pl.BlockSpec((1, H1), lambda k: (0, 0)),
            pl.BlockSpec((1, 1), lambda k: (0, 0)),
        ],
        out_specs=pl.BlockSpec((B, 1), lambda k: (0, 0)),
        scratch_shapes=[pltpu.VMEM((B, H1), jnp.float32)],
        compiler_params=pltpu.CompilerParams(
            dimension_semantics=("arbitrary",)),
    )(x, w1, b1, w2, b2)


# -----------------------------------------------------------------------------
# Full forward pass
# -----------------------------------------------------------------------------
def cnn_forward(x_nchw, p):
    B = x_nchw.shape[0]
    # NCHW -> NHWC, bf16 cast, 1-pixel zero halo (a single tiny XLA fusion).
    # TODO(synk): this transpose/pad could be folded into the conv1 kernel with
    #             an in-kernel halo scratch; kept in the wrapper at this size.
    x = jnp.transpose(x_nchw, (0, 2, 3, 1)).astype(jnp.bfloat16)
    xpad = jnp.pad(x, ((0, 0), (1, 1), (1, 1), (0, 0)))
    # conv1+bn1+relu+pool; dropout2d = identity (eval).  Output carries a zero
    # halo so it is directly conv2's padded input (no jnp.pad round-trip).
    y = conv_block(xpad, p["conv1_wf"], p["bn1_shift"], pad_out=True)
    # conv2+bn2+relu+pool; dropout2d = identity (eval).  NHWC-flat rows.
    y = conv_block(y, p["conv2_wf"], p["bn2_shift"], pad_out=False)
    flat = y.reshape(B, -1)        # NHWC flatten; permutation folded into fc1_w
    return mlp_head(flat, p["fc1_w"], p["fc1_b"], p["fc2_w"], p["fc2_b"])


# -----------------------------------------------------------------------------
# Parameter preparation (all re-layout / folding is done once, offline)
# -----------------------------------------------------------------------------
def _make_fused_conv_pool_weight(w_oihw):
    """torch conv weight (Cout, Cin, 3, 3) -> (8, 2*Cin, 4*Cout) fused weight.

    Column group q = 2*dy + dx produces the conv output at (2*h2+dy, 2*w2+dx);
    slab k = (dhp*2 + i)*2 + dwp holds footprint row 2*dhp+i and paired cols
    (dwp, j) with per-slab features ordered (j, cin).
    """
    Cout, Cin, _, _ = w_oihw.shape
    w_hwio = jnp.transpose(w_oihw, (2, 3, 1, 0))              # (kh, kw, ci, co)
    wbig = jnp.zeros((2, 2, 4, 4, Cin, Cout), jnp.float32)    # (dy,dx,dh4,dw4,ci,co)
    for dy in range(2):
        for dx in range(2):
            wbig = wbig.at[dy, dx, dy:dy + 3, dx:dx + 3].set(w_hwio)
    wbig = wbig.reshape(2, 2, 2, 2, 2, 2, Cin, Cout)          # (dy,dx,dhp,i,dwp,j,ci,co)
    wbig = jnp.transpose(wbig, (2, 3, 4, 5, 6, 0, 1, 7))      # (dhp,i,dwp,j,ci,dy,dx,co)
    return wbig.reshape(8, 2 * Cin, 4 * Cout)


def _prep_conv_block(w_oihw, conv_b, gamma, beta, mean, var, eps=1e-5):
    Cout = w_oihw.shape[0]
    scale = gamma / jnp.sqrt(var + eps)                       # (Cout,)
    shift = (conv_b - mean) * scale + beta                    # (Cout,)
    wf = _make_fused_conv_pool_weight(w_oihw)                 # (8, 2*Cin, 4*Cout)
    wf = wf * jnp.tile(scale, (4,))[None, None, :]            # fold BN scale into w
    Cin2 = wf.shape[1]
    wf = wf.reshape(8 * Cin2, 4 * Cout).astype(jnp.bfloat16)
    return wf, shift.reshape(1, Cout).astype(jnp.float32)


def init_torch_params(key):
    """Random parameters in PyTorch layouts (the 'spec' parameters)."""
    ks = jax.random.split(key, 9)
    p = {
        "conv1_w": 0.2 * jax.random.normal(ks[0], (32, 3, 3, 3), jnp.float32),
        "conv1_b": 0.05 * jax.random.normal(ks[1], (32,), jnp.float32),
        "conv2_w": 0.05 * jax.random.normal(ks[2], (64, 32, 3, 3), jnp.float32),
        "conv2_b": 0.05 * jax.random.normal(ks[3], (64,), jnp.float32),
        "fc1_w": 0.02 * jax.random.normal(ks[4], (128, 64 * 16 * 16), jnp.float32),
        "fc1_b": 0.01 * jax.random.normal(ks[5], (128,), jnp.float32),
        "fc2_w": 0.1 * jax.random.normal(ks[6], (1, 128), jnp.float32),
        "fc2_b": jnp.zeros((1,), jnp.float32),
    }
    for name, c, k in (("bn1", 32, ks[7]), ("bn2", 64, ks[8])):
        kg, kb, km, kv = jax.random.split(k, 4)
        p[name + "_gamma"] = 1.0 + 0.1 * jax.random.normal(kg, (c,), jnp.float32)
        p[name + "_beta"] = 0.1 * jax.random.normal(kb, (c,), jnp.float32)
        p[name + "_mean"] = 0.1 * jax.random.normal(km, (c,), jnp.float32)
        p[name + "_var"] = jax.random.uniform(kv, (c,), jnp.float32, 0.5, 1.5)
    return p


def prepare_kernel_params(t, eps=1e-5):
    p = {}
    p["conv1_wf"], p["bn1_shift"] = _prep_conv_block(
        t["conv1_w"], t["conv1_b"], t["bn1_gamma"], t["bn1_beta"],
        t["bn1_mean"], t["bn1_var"], eps)
    p["conv2_wf"], p["bn2_shift"] = _prep_conv_block(
        t["conv2_w"], t["conv2_b"], t["bn2_gamma"], t["bn2_beta"],
        t["bn2_mean"], t["bn2_var"], eps)
    # fc1: absorb torch's NCHW flatten (c, h, w) into our NHWC flatten (h, w, c).
    w1 = t["fc1_w"].reshape(128, 64, 16, 16).transpose(2, 3, 1, 0).reshape(-1, 128)
    p["fc1_w"] = w1.astype(jnp.bfloat16)
    p["fc1_b"] = t["fc1_b"].reshape(1, 128)
    p["fc2_w"] = t["fc2_w"].reshape(1, 128)      # row vector for lane reduction
    p["fc2_b"] = t["fc2_b"].reshape(1, 1)
    return p


# -----------------------------------------------------------------------------
# Pure-JAX reference (PyTorch semantics, eval mode) for a numerical check
# -----------------------------------------------------------------------------
def cnn_reference(x_nchw, t, eps=1e-5):
    def block(x, w_oihw, b, g, beta, mean, var):
        y = jax.lax.conv_general_dilated(
            x, jnp.transpose(w_oihw, (2, 3, 1, 0)),
            window_strides=(1, 1), padding=((1, 1), (1, 1)),
            dimension_numbers=("NHWC", "HWIO", "NHWC"))
        y = y + b.reshape(1, 1, 1, -1)
        y = (y - mean) * (g / jnp.sqrt(var + eps)) + beta
        y = jnp.maximum(y, 0.0)
        B, H, W, C = y.shape
        return y.reshape(B, H // 2, 2, W // 2, 2, C).max(axis=(2, 4))

    x = jnp.transpose(x_nchw, (0, 2, 3, 1))
    y = block(x, t["conv1_w"], t["conv1_b"], t["bn1_gamma"], t["bn1_beta"],
              t["bn1_mean"], t["bn1_var"])
    y = block(y, t["conv2_w"], t["conv2_b"], t["bn2_gamma"], t["bn2_beta"],
              t["bn2_mean"], t["bn2_var"])
    flat = jnp.transpose(y, (0, 3, 1, 2)).reshape(y.shape[0], -1)  # torch view order
    h = jnp.maximum(flat @ t["fc1_w"].T + t["fc1_b"], 0.0)
    return jax.nn.sigmoid(h @ t["fc2_w"].T + t["fc2_b"])


if __name__ == "__main__":
    key = jax.random.PRNGKey(0)
    kx, kp = jax.random.split(key)
    # Input spatial size is forced to 64x64 by fc1 = Linear(64*16*16, 128).
    x = jax.random.normal(kx, (2, 3, 64, 64), jnp.float32)

    torch_params = init_torch_params(kp)
    params = prepare_kernel_params(torch_params)

    out = jax.block_until_ready(jax.jit(cnn_forward)(x, params))
    ref = jax.block_until_ready(jax.jit(cnn_reference)(x, torch_params))

    assert out.shape == (2, 1), out.shape
    assert bool(jnp.all(jnp.isfinite(out)))
    assert bool(jnp.all((out >= 0.0) & (out <= 1.0)))
    # bf16 matmul operands and bf16 intermediates -> loose tolerance vs f32 ref.
    assert bool(jnp.max(jnp.abs(out - ref)) < 5e-2), (out, ref)
    print("KERNEL_OK")
</pallas_src>

<mosaic_0001>
module attributes {stable_mosaic.version = 11 : i64} {
  func.func @_conv_block_kernel(%arg0: i32, %arg1: memref<1x33x2x33x6xbf16, #tpu.memory_space<vmem>>, %arg2: memref<48x128xbf16, #tpu.memory_space<vmem>>, %arg3: memref<1x32xf32, #tpu.memory_space<vmem>>, %arg4: memref<1x34x34x32xbf16, #tpu.memory_space<vmem>>, %arg5: memref<256x48xbf16, #tpu.memory_space<vmem>>) attributes {dimension_semantics = [#tpu.dimension_semantics<parallel>], iteration_bounds = array<i64: 2>, scalar_prefetch = 0 : i64, scratch_operands = 1 : i64, tpu.core_type = #tpu.core_type<tc>, window_params = [{transform_indices = @transform_0, window_bounds = array<i64: 1, 33, 2, 33, 6>}, {pipeline_mode = #tpu.pipeline_mode<synchronous>, transform_indices = @transform_1, window_bounds = array<i64: 48, 128>}, {pipeline_mode = #tpu.pipeline_mode<synchronous>, transform_indices = @transform_2, window_bounds = array<i64: 1, 32>}, {transform_indices = @transform_3, window_bounds = array<i64: 1, 34, 34, 32>}]} {
    %cst = arith.constant 0.000000e+00 : bf16
    %0 = vector.broadcast %cst : bf16 to vector<1x34x34x32xbf16>
    %c0 = arith.constant 0 : index
    %c0_0 = arith.constant 0 : index
    %c0_1 = arith.constant 0 : index
    %c0_2 = arith.constant 0 : index
    %1 = vector.load %arg4[%c0, %c0_0, %c0_1, %c0_2] : memref<1x34x34x32xbf16, #tpu.memory_space<vmem>>, vector<1x34x34x32xbf16>
    tpu.vector_store %arg4[%c0, %c0_0, %c0_1, %c0_2], %0 {strides = array<i32>} : memref<1x34x34x32xbf16, #tpu.memory_space<vmem>>, vector<1x34x34x32xbf16>,
    %c0_i32 = arith.constant 0 : i32
    %c4_i32 = arith.constant 4 : i32
    %2 = arith.addi %c0_i32, %c4_i32 : i32
    %c1_i32 = arith.constant 1 : i32
    scf.for %arg6 = %c0_i32 to %2 step %c1_i32  : i32 {
      %c8_i32 = arith.constant 8 : i32
      %3 = arith.muli %arg6, %c8_i32 : i32
      %4 = tpu.assume_multiple %3, 8 : i32
      %c0_i32_4 = arith.constant 0 : i32
      %5 = arith.addi %4, %c0_i32_4 : i32
      %c0_5 = arith.constant 0 : index
      %6 = arith.index_cast %5 : i32 to index
      %c0_6 = arith.constant 0 : index
      %c0_7 = arith.constant 0 : index
      %c0_8 = arith.constant 0 : index
      %7 = vector.load %arg1[%c0_5, %6, %c0_6, %c0_7, %c0_8] : memref<1x33x2x33x6xbf16, #tpu.memory_space<vmem>>, vector<1x8x1x32x6xbf16>
      %8 = vector.shape_cast %7 : vector<1x8x1x32x6xbf16> to vector<8x32x6xbf16>
      %9 = vector.shape_cast %8 : vector<8x32x6xbf16> to vector<256x6xbf16>
      %c0_9 = arith.constant 0 : index
      %c0_10 = arith.constant 0 : index
      %10 = vector.load %arg5[%c0_9, %c0_10] : memref<256x48xbf16, #tpu.memory_space<vmem>>, vector<256x6xbf16>
      tpu.vector_store %arg5[%c0_9, %c0_10], %9 {strides = array<i32>} : memref<256x48xbf16, #tpu.memory_space<vmem>>, vector<256x6xbf16>,
      %c0_i32_11 = arith.constant 0 : i32
      %11 = arith.addi %4, %c0_i32_11 : i32
      %c0_12 = arith.constant 0 : index
      %12 = arith.index_cast %11 : i32 to index
      %c0_13 = arith.constant 0 : index
      %c1 = arith.constant 1 : index
      %c0_14 = arith.constant 0 : index
      %13 = vector.load %arg1[%c0_12, %12, %c0_13, %c1, %c0_14] : memref<1x33x2x33x6xbf16, #tpu.memory_space<vmem>>, vector<1x8x1x32x6xbf16>
      %14 = vector.shape_cast %13 : vector<1x8x1x32x6xbf16> to vector<8x32x6xbf16>
      %15 = vector.shape_cast %14 : vector<8x32x6xbf16> to vector<256x6xbf16>
      %c0_15 = arith.constant 0 : index
      %c6 = arith.constant 6 : index
      %16 = vector.load %arg5[%c0_15, %c6] : memref<256x48xbf16, #tpu.memory_space<vmem>>, vector<256x6xbf16>
      tpu.vector_store %arg5[%c0_15, %c6], %15 {strides = array<i32>} : memref<256x48xbf16, #tpu.memory_space<vmem>>, vector<256x6xbf16>,
      %c0_i32_16 = arith.constant 0 : i32
      %17 = arith.addi %4, %c0_i32_16 : i32
      %c0_17 = arith.constant 0 : index
      %18 = arith.index_cast %17 : i32 to index
      %c1_18 = arith.constant 1 : index
      %c0_19 = arith.constant 0 : index
      %c0_20 = arith.constant 0 : index
      %19 = vector.load %arg1[%c0_17, %18, %c1_18, %c0_19, %c0_20] : memref<1x33x2x33x6xbf16, #tpu.memory_space<vmem>>, vector<1x8x1x32x6xbf16>
      %20 = vector.shape_cast %19 : vector<1x8x1x32x6xbf16> to vector<8x32x6xbf16>
      %21 = vector.shape_cast %20 : vector<8x32x6xbf16> to vector<256x6xbf16>
      %c0_21 = arith.constant 0 : index
      %c12 = arith.constant 12 : index
      %22 = vector.load %arg5[%c0_21, %c12] : memref<256x48xbf16, #tpu.memory_space<vmem>>, vector<256x6xbf16>
      tpu.vector_store %arg5[%c0_21, %c12], %21 {strides = array<i32>} : memref<256x48xbf16, #tpu.memory_space<vmem>>, vector<256x6xbf16>,
      %c0_i32_22 = arith.constant 0 : i32
      %23 = arith.addi %4, %c0_i32_22 : i32
      %c0_23 = arith.constant 0 : index
      %24 = arith.index_cast %23 : i32 to index
      %c1_24 = arith.constant 1 : index
      %c1_25 = arith.constant 1 : index
      %c0_26 = arith.constant 0 : index
      %25 = vector.load %arg1[%c0_23, %24, %c1_24, %c1_25, %c0_26] : memref<1x33x2x33x6xbf16, #tpu.memory_space<vmem>>, vector<1x8x1x32x6xbf16>
      %26 = vector.shape_cast %25 : vector<1x8x1x32x6xbf16> to vector<8x32x6xbf16>
      %27 = vector.shape_cast %26 : vector<8x32x6xbf16> to vector<256x6xbf16>
      %c0_27 = arith.constant 0 : index
      %c18 = arith.constant 18 : index
      %28 = vector.load %arg5[%c0_27, %c18] : memref<256x48xbf16, #tpu.memory_space<vmem>>, vector<256x6xbf16>
      tpu.vector_store %arg5[%c0_27, %c18], %27 {strides = array<i32>} : memref<256x48xbf16, #tpu.memory_space<vmem>>, vector<256x6xbf16>,
      %c1_i32_28 = arith.constant 1 : i32
      %29 = arith.addi %4, %c1_i32_28 : i32
      %c0_29 = arith.constant 0 : index
      %30 = arith.index_cast %29 : i32 to index
      %c0_30 = arith.constant 0 : index
      %c0_31 = arith.constant 0 : index
      %c0_32 = arith.constant 0 : index
      %31 = vector.load %arg1[%c0_29, %30, %c0_30, %c0_31, %c0_32] : memref<1x33x2x33x6xbf16, #tpu.memory_space<vmem>>, vector<1x8x1x32x6xbf16>
      %32 = vector.shape_cast %31 : vector<1x8x1x32x6xbf16> to vector<8x32x6xbf16>
      %33 = vector.shape_cast %32 : vector<8x32x6xbf16> to vector<256x6xbf16>
      %c0_33 = arith.constant 0 : index
      %c24 = arith.constant 24 : index
      %34 = vector.load %arg5[%c0_33, %c24] : memref<256x48xbf16, #tpu.memory_space<vmem>>, vector<256x6xbf16>
      tpu.vector_store %arg5[%c0_33, %c24], %33 {strides = array<i32>} : memref<256x48xbf16, #tpu.memory_space<vmem>>, vector<256x6xbf16>,
      %c1_i32_34 = arith.constant 1 : i32
      %35 = arith.addi %4, %c1_i32_34 : i32
      %c0_35 = arith.constant 0 : index
      %36 = arith.index_cast %35 : i32 to index
      %c0_36 = arith.constant 0 : index
      %c1_37 = arith.constant 1 : index
      %c0_38 = arith.constant 0 : index
      %37 = vector.load %arg1[%c0_35, %36, %c0_36, %c1_37, %c0_38] : memref<1x33x2x33x6xbf16, #tpu.memory_space<vmem>>, vector<1x8x1x32x6xbf16>
      %38 = vector.shape_cast %37 : vector<1x8x1x32x6xbf16> to vector<8x32x6xbf16>
      %39 = vector.shape_cast %38 : vector<8x32x6xbf16> to vector<256x6xbf16>
      %c0_39 = arith.constant 0 : index
      %c30 = arith.constant 30 : index
      %40 = vector.load %arg5[%c0_39, %c30] : memref<256x48xbf16, #tpu.memory_space<vmem>>, vector<256x6xbf16>
      tpu.vector_store %arg5[%c0_39, %c30], %39 {strides = array<i32>} : memref<256x48xbf16, #tpu.memory_space<vmem>>, vector<256x6xbf16>,
      %c1_i32_40 = arith.constant 1 : i32
      %41 = arith.addi %4, %c1_i32_40 : i32
      %c0_41 = arith.constant 0 : index
      %42 = arith.index_cast %41 : i32 to index
      %c1_42 = arith.constant 1 : index
      %c0_43 = arith.constant 0 : index
      %c0_44 = arith.constant 0 : index
      %43 = vector.load %arg1[%c0_41, %42, %c1_42, %c0_43, %c0_44] : memref<1x33x2x33x6xbf16, #tpu.memory_space<vmem>>, vector<1x8x1x32x6xbf16>
      %44 = vector.shape_cast %43 : vector<1x8x1x32x6xbf16> to vector<8x32x6xbf16>
      %45 = vector.shape_cast %44 : vector<8x32x6xbf16> to vector<256x6xbf16>
      %c0_45 = arith.constant 0 : index
      %c36 = arith.constant 36 : index
      %46 = vector.load %arg5[%c0_45, %c36] : memref<256x48xbf16, #tpu.memory_space<vmem>>, vector<256x6xbf16>
      tpu.vector_store %arg5[%c0_45, %c36], %45 {strides = array<i32>} : memref<256x48xbf16, #tpu.memory_space<vmem>>, vector<256x6xbf16>,
      %c1_i32_46 = arith.constant 1 : i32
      %47 = arith.addi %4, %c1_i32_46 : i32
      %c0_47 = arith.constant 0 : index
      %48 = arith.index_cast %47 : i32 to index
      %c1_48 = arith.constant 1 : index
      %c1_49 = arith.constant 1 : index
      %c0_50 = arith.constant 0 : index
      %49 = vector.load %arg1[%c0_47, %48, %c1_48, %c1_49, %c0_50] : memref<1x33x2x33x6xbf16, #tpu.memory_space<vmem>>, vector<1x8x1x32x6xbf16>
      %50 = vector.shape_cast %49 : vector<1x8x1x32x6xbf16> to vector<8x32x6xbf16>
      %51 = vector.shape_cast %50 : vector<8x32x6xbf16> to vector<256x6xbf16>
      %c0_51 = arith.constant 0 : index
      %c42 = arith.constant 42 : index
      %52 = vector.load %arg5[%c0_51, %c42] : memref<256x48xbf16, #tpu.memory_space<vmem>>, vector<256x6xbf16>
      tpu.vector_store %arg5[%c0_51, %c42], %51 {strides = array<i32>} : memref<256x48xbf16, #tpu.memory_space<vmem>>, vector<256x6xbf16>,
      %c0_52 = arith.constant 0 : index
      %c0_53 = arith.constant 0 : index
      %53 = vector.load %arg5[%c0_52, %c0_53] : memref<256x48xbf16, #tpu.memory_space<vmem>>, vector<256x48xbf16>
      %c0_54 = arith.constant 0 : index
      %c0_55 = arith.constant 0 : index
      %54 = vector.load %arg2[%c0_54, %c0_55] : memref<48x128xbf16, #tpu.memory_space<vmem>>, vector<48x128xbf16>
      %cst_56 = arith.constant dense<0.000000e+00> : vector<256x128xf32>
      %55 = tpu.matmul %53, %54, %cst_56 {dimension_numbers = #tpu.dot_dimension_numbers<[1], [0], [0], [1], [0, 0, 1, 1], [], []>} : vector<256x48xbf16>, vector<48x128xbf16>, vector<256x128xf32> -> vector<256x128xf32>
      %56 = vector.extract_strided_slice %55 {offsets = [0, 0], sizes = [256, 32], strides = [1, 1]} : vector<256x128xf32> to vector<256x32xf32>
      %57 = vector.extract_strided_slice %55 {offsets = [0, 32], sizes = [256, 32], strides = [1, 1]} : vector<256x128xf32> to vector<256x32xf32>
      %58 = arith.maximumf %56, %57 : vector<256x32xf32>
      %59 = vector.extract_strided_slice %55 {offsets = [0, 64], sizes = [256, 32], strides = [1, 1]} : vector<256x128xf32> to vector<256x32xf32>
      %60 = vector.extract_strided_slice %55 {offsets = [0, 96], sizes = [256, 32], strides = [1, 1]} : vector<256x128xf32> to vector<256x32xf32>
      %61 = arith.maximumf %59, %60 : vector<256x32xf32>
      %62 = arith.maximumf %58, %61 : vector<256x32xf32>
      %c0_57 = arith.constant 0 : index
      %c0_58 = arith.constant 0 : index
      %63 = vector.load %arg3[%c0_57, %c0_58] : memref<1x32xf32, #tpu.memory_space<vmem>>, vector<1x32xf32>
      %64 = vector.broadcast %63 : vector<1x32xf32> to vector<256x32xf32>
      %65 = arith.addf %62, %64 : vector<256x32xf32>
      %cst_59 = arith.constant 0.000000e+00 : f32
      %66 = vector.broadcast %cst_59 : f32 to vector<256x32xf32>
      %67 = arith.maximumf %65, %66 : vector<256x32xf32>
      %68 = arith.truncf %67 : vector<256x32xf32> to vector<256x32xbf16>
      %69 = vector.shape_cast %68 : vector<256x32xbf16> to vector<8x32x32xbf16>
      %c1_i32_60 = arith.constant 1 : i32
      %70 = arith.addi %c1_i32_60, %4 : i32
      %c0_61 = arith.constant 0 : index
      %71 = arith.index_cast %70 : i32 to index
      %c1_62 = arith.constant 1 : index
      %c0_63 = arith.constant 0 : index
      %72 = vector.load %arg4[%c0_61, %71, %c1_62, %c0_63] : memref<1x34x34x32xbf16, #tpu.memory_space<vmem>>, vector<1x8x32x32xbf16>
      %73 = vector.shape_cast %72 : vector<1x8x32x32xbf16> to vector<8x32x32xbf16>
      %74 = vector.shape_cast %69 : vector<8x32x32xbf16> to vector<1x8x32x32xbf16>
      tpu.vector_store %arg4[%c0_61, %71, %c1_62, %c0_63], %74 {strides = array<i32>} : memref<1x34x34x32xbf16, #tpu.memory_space<vmem>>, vector<1x8x32x32xbf16>,
    }
    %c4_i32_3 = arith.constant 4 : i32
    return
  }
  func.func @transform_0(%arg0: i32) -> (i32, i32, i32, i32, i32) {
    %c0_i32 = arith.constant 0 : i32
    %c0_i32_0 = arith.constant 0 : i32
    %c0_i32_1 = arith.constant 0 : i32
    %c0_i32_2 = arith.constant 0 : i32
    %c0_i32_3 = arith.constant 0 : i32
    return %arg0, %c0_i32, %c0_i32_0, %c0_i32_1, %c0_i32_2 : i32, i32, i32, i32, i32
  }
  func.func @transform_1(%arg0: i32) -> (i32, i32) {
    %c0_i32 = arith.constant 0 : i32
    %c0_i32_0 = arith.constant 0 : i32
    %c0_i32_1 = arith.constant 0 : i32
    return %c0_i32, %c0_i32_0 : i32, i32
  }
  func.func @transform_2(%arg0: i32) -> (i32, i32) {
    %c0_i32 = arith.constant 0 : i32
    %c0_i32_0 = arith.constant 0 : i32
    %c0_i32_1 = arith.constant 0 : i32
    return %c0_i32, %c0_i32_0 : i32, i32
  }
  func.func @transform_3(%arg0: i32) -> (i32, i32, i32, i32) {
    %c0_i32 = arith.constant 0 : i32
    %c0_i32_0 = arith.constant 0 : i32
    %c0_i32_1 = arith.constant 0 : i32
    %c0_i32_2 = arith.constant 0 : i32
    return %arg0, %c0_i32, %c0_i32_0, %c0_i32_1 : i32, i32, i32, i32
  }
}

module attributes {stable_mosaic.version = 11 : i64} {
  func.func @_conv_block_kernel(%arg0: i32, %arg1: memref<1x17x2x17x64xbf16, #tpu.memory_space<vmem>>, %arg2: memref<512x256xbf16, #tpu.memory_space<vmem>>, %arg3: memref<1x64xf32, #tpu.memory_space<vmem>>, %arg4: memref<1x256x64xbf16, #tpu.memory_space<vmem>>, %arg5: memref<128x512xbf16, #tpu.memory_space<vmem>>) attributes {dimension_semantics = [#tpu.dimension_semantics<parallel>], iteration_bounds = array<i64: 2>, scalar_prefetch = 0 : i64, scratch_operands = 1 : i64, tpu.core_type = #tpu.core_type<tc>, window_params = [{transform_indices = @transform_0, window_bounds = array<i64: 1, 17, 2, 17, 64>}, {pipeline_mode = #tpu.pipeline_mode<synchronous>, transform_indices = @transform_1, window_bounds = array<i64: 512, 256>}, {pipeline_mode = #tpu.pipeline_mode<synchronous>, transform_indices = @transform_2, window_bounds = array<i64: 1, 64>}, {transform_indices = @transform_3, window_bounds = array<i64: 1, 256, 64>}]} {
    %c0_i32 = arith.constant 0 : i32
    %c2_i32 = arith.constant 2 : i32
    %0 = arith.addi %c0_i32, %c2_i32 : i32
    %c1_i32 = arith.constant 1 : i32
    scf.for %arg6 = %c0_i32 to %0 step %c1_i32  : i32 {
      %c8_i32 = arith.constant 8 : i32
      %1 = arith.muli %arg6, %c8_i32 : i32
      %2 = tpu.assume_multiple %1, 8 : i32
      %c0_i32_1 = arith.constant 0 : i32
      %3 = arith.addi %2, %c0_i32_1 : i32
      %c0 = arith.constant 0 : index
      %4 = arith.index_cast %3 : i32 to index
      %c0_2 = arith.constant 0 : index
      %c0_3 = arith.constant 0 : index
      %c0_4 = arith.constant 0 : index
      %5 = vector.load %arg1[%c0, %4, %c0_2, %c0_3, %c0_4] : memref<1x17x2x17x64xbf16, #tpu.memory_space<vmem>>, vector<1x8x1x16x64xbf16>
      %6 = vector.shape_cast %5 : vector<1x8x1x16x64xbf16> to vector<8x16x64xbf16>
      %7 = vector.shape_cast %6 : vector<8x16x64xbf16> to vector<128x64xbf16>
      %c0_5 = arith.constant 0 : index
      %c0_6 = arith.constant 0 : index
      %8 = vector.load %arg5[%c0_5, %c0_6] : memref<128x512xbf16, #tpu.memory_space<vmem>>, vector<128x64xbf16>
      tpu.vector_store %arg5[%c0_5, %c0_6], %7 {strides = array<i32>} : memref<128x512xbf16, #tpu.memory_space<vmem>>, vector<128x64xbf16>,
      %c0_i32_7 = arith.constant 0 : i32
      %9 = arith.addi %2, %c0_i32_7 : i32
      %c0_8 = arith.constant 0 : index
      %10 = arith.index_cast %9 : i32 to index
      %c0_9 = arith.constant 0 : index
      %c1 = arith.constant 1 : index
      %c0_10 = arith.constant 0 : index
      %11 = vector.load %arg1[%c0_8, %10, %c0_9, %c1, %c0_10] : memref<1x17x2x17x64xbf16, #tpu.memory_space<vmem>>, vector<1x8x1x16x64xbf16>
      %12 = vector.shape_cast %11 : vector<1x8x1x16x64xbf16> to vector<8x16x64xbf16>
      %13 = vector.shape_cast %12 : vector<8x16x64xbf16> to vector<128x64xbf16>
      %c0_11 = arith.constant 0 : index
      %c64 = arith.constant 64 : index
      %14 = vector.load %arg5[%c0_11, %c64] : memref<128x512xbf16, #tpu.memory_space<vmem>>, vector<128x64xbf16>
      tpu.vector_store %arg5[%c0_11, %c64], %13 {strides = array<i32>} : memref<128x512xbf16, #tpu.memory_space<vmem>>, vector<128x64xbf16>,
      %c0_i32_12 = arith.constant 0 : i32
      %15 = arith.addi %2, %c0_i32_12 : i32
      %c0_13 = arith.constant 0 : index
      %16 = arith.index_cast %15 : i32 to index
      %c1_14 = arith.constant 1 : index
      %c0_15 = arith.constant 0 : index
      %c0_16 = arith.constant 0 : index
      %17 = vector.load %arg1[%c0_13, %16, %c1_14, %c0_15, %c0_16] : memref<1x17x2x17x64xbf16, #tpu.memory_space<vmem>>, vector<1x8x1x16x64xbf16>
      %18 = vector.shape_cast %17 : vector<1x8x1x16x64xbf16> to vector<8x16x64xbf16>
      %19 = vector.shape_cast %18 : vector<8x16x64xbf16> to vector<128x64xbf16>
      %c0_17 = arith.constant 0 : index
      %c128 = arith.constant 128 : index
      %20 = vector.load %arg5[%c0_17, %c128] : memref<128x512xbf16, #tpu.memory_space<vmem>>, vector<128x64xbf16>
      tpu.vector_store %arg5[%c0_17, %c128], %19 {strides = array<i32>} : memref<128x512xbf16, #tpu.memory_space<vmem>>, vector<128x64xbf16>,
      %c0_i32_18 = arith.constant 0 : i32
      %21 = arith.addi %2, %c0_i32_18 : i32
      %c0_19 = arith.constant 0 : index
      %22 = arith.index_cast %21 : i32 to index
      %c1_20 = arith.constant 1 : index
      %c1_21 = arith.constant 1 : index
      %c0_22 = arith.constant 0 : index
      %23 = vector.load %arg1[%c0_19, %22, %c1_20, %c1_21, %c0_22] : memref<1x17x2x17x64xbf16, #tpu.memory_space<vmem>>, vector<1x8x1x16x64xbf16>
      %24 = vector.shape_cast %23 : vector<1x8x1x16x64xbf16> to vector<8x16x64xbf16>
      %25 = vector.shape_cast %24 : vector<8x16x64xbf16> to vector<128x64xbf16>
      %c0_23 = arith.constant 0 : index
      %c192 = arith.constant 192 : index
      %26 = vector.load %arg5[%c0_23, %c192] : memref<128x512xbf16, #tpu.memory_space<vmem>>, vector<128x64xbf16>
      tpu.vector_store %arg5[%c0_23, %c192], %25 {strides = array<i32>} : memref<128x512xbf16, #tpu.memory_space<vmem>>, vector<128x64xbf16>,
      %c1_i32_24 = arith.constant 1 : i32
      %27 = arith.addi %2, %c1_i32_24 : i32
      %c0_25 = arith.constant 0 : index
      %28 = arith.index_cast %27 : i32 to index
      %c0_26 = arith.constant 0 : index
      %c0_27 = arith.constant 0 : index
      %c0_28 = arith.constant 0 : index
      %29 = vector.load %arg1[%c0_25, %28, %c0_26, %c0_27, %c0_28] : memref<1x17x2x17x64xbf16, #tpu.memory_space<vmem>>, vector<1x8x1x16x64xbf16>
      %30 = vector.shape_cast %29 : vector<1x8x1x16x64xbf16> to vector<8x16x64xbf16>
      %31 = vector.shape_cast %30 : vector<8x16x64xbf16> to vector<128x64xbf16>
      %c0_29 = arith.constant 0 : index
      %c256 = arith.constant 256 : index
      %32 = vector.load %arg5[%c0_29, %c256] : memref<128x512xbf16, #tpu.memory_space<vmem>>, vector<128x64xbf16>
      tpu.vector_store %arg5[%c0_29, %c256], %31 {strides = array<i32>} : memref<128x512xbf16, #tpu.memory_space<vmem>>, vector<128x64xbf16>,
      %c1_i32_30 = arith.constant 1 : i32
      %33 = arith.addi %2, %c1_i32_30 : i32
      %c0_31 = arith.constant 0 : index
      %34 = arith.index_cast %33 : i32 to index
      %c0_32 = arith.constant 0 : index
      %c1_33 = arith.constant 1 : index
      %c0_34 = arith.constant 0 : index
      %35 = vector.load %arg1[%c0_31, %34, %c0_32, %c1_33, %c0_34] : memref<1x17x2x17x64xbf16, #tpu.memory_space<vmem>>, vector<1x8x1x16x64xbf16>
      %36 = vector.shape_cast %35 : vector<1x8x1x16x64xbf16> to vector<8x16x64xbf16>
      %37 = vector.shape_cast %36 : vector<8x16x64xbf16> to vector<128x64xbf16>
      %c0_35 = arith.constant 0 : index
      %c320 = arith.constant 320 : index
      %38 = vector.load %arg5[%c0_35, %c320] : memref<128x512xbf16, #tpu.memory_space<vmem>>, vector<128x64xbf16>
      tpu.vector_store %arg5[%c0_35, %c320], %37 {strides = array<i32>} : memref<128x512xbf16, #tpu.memory_space<vmem>>, vector<128x64xbf16>,
      %c1_i32_36 = arith.constant 1 : i32
      %39 = arith.addi %2, %c1_i32_36 : i32
      %c0_37 = arith.constant 0 : index
      %40 = arith.index_cast %39 : i32 to index
      %c1_38 = arith.constant 1 : index
      %c0_39 = arith.constant 0 : index
      %c0_40 = arith.constant 0 : index
      %41 = vector.load %arg1[%c0_37, %40, %c1_38, %c0_39, %c0_40] : memref<1x17x2x17x64xbf16, #tpu.memory_space<vmem>>, vector<1x8x1x16x64xbf16>
      %42 = vector.shape_cast %41 : vector<1x8x1x16x64xbf16> to vector<8x16x64xbf16>
      %43 = vector.shape_cast %42 : vector<8x16x64xbf16> to vector<128x64xbf16>
      %c0_41 = arith.constant 0 : index
      %c384 = arith.constant 384 : index
      %44 = vector.load %arg5[%c0_41, %c384] : memref<128x512xbf16, #tpu.memory_space<vmem>>, vector<128x64xbf16>
      tpu.vector_store %arg5[%c0_41, %c384], %43 {strides = array<i32>} : memref<128x512xbf16, #tpu.memory_space<vmem>>, vector<128x64xbf16>,
      %c1_i32_42 = arith.constant 1 : i32
      %45 = arith.addi %2, %c1_i32_42 : i32
      %c0_43 = arith.constant 0 : index
      %46 = arith.index_cast %45 : i32 to index
      %c1_44 = arith.constant 1 : index
      %c1_45 = arith.constant 1 : index
      %c0_46 = arith.constant 0 : index
      %47 = vector.load %arg1[%c0_43, %46, %c1_44, %c1_45, %c0_46] : memref<1x17x2x17x64xbf16, #tpu.memory_space<vmem>>, vector<1x8x1x16x64xbf16>
      %48 = vector.shape_cast %47 : vector<1x8x1x16x64xbf16> to vector<8x16x64xbf16>
      %49 = vector.shape_cast %48 : vector<8x16x64xbf16> to vector<128x64xbf16>
      %c0_47 = arith.constant 0 : index
      %c448 = arith.constant 448 : index
      %50 = vector.load %arg5[%c0_47, %c448] : memref<128x512xbf16, #tpu.memory_space<vmem>>, vector<128x64xbf16>
      tpu.vector_store %arg5[%c0_47, %c448], %49 {strides = array<i32>} : memref<128x512xbf16, #tpu.memory_space<vmem>>, vector<128x64xbf16>,
      %c0_48 = arith.constant 0 : index
      %c0_49 = arith.constant 0 : index
      %51 = vector.load %arg5[%c0_48, %c0_49] : memref<128x512xbf16, #tpu.memory_space<vmem>>, vector<128x512xbf16>
      %c0_50 = arith.constant 0 : index
      %c0_51 = arith.constant 0 : index
      %52 = vector.load %arg2[%c0_50, %c0_51] : memref<512x256xbf16, #tpu.memory_space<vmem>>, vector<512x256xbf16>
      %cst = arith.constant dense<0.000000e+00> : vector<128x256xf32>
      %53 = tpu.matmul %51, %52, %cst {dimension_numbers = #tpu.dot_dimension_numbers<[1], [0], [0], [1], [0, 0, 1, 1], [], []>} : vector<128x512xbf16>, vector<512x256xbf16>, vector<128x256xf32> -> vector<128x256xf32>
      %54 = vector.extract_strided_slice %53 {offsets = [0, 0], sizes = [128, 64], strides = [1, 1]} : vector<128x256xf32> to vector<128x64xf32>
      %55 = vector.extract_strided_slice %53 {offsets = [0, 64], sizes = [128, 64], strides = [1, 1]} : vector<128x256xf32> to vector<128x64xf32>
      %56 = arith.maximumf %54, %55 : vector<128x64xf32>
      %57 = vector.extract_strided_slice %53 {offsets = [0, 128], sizes = [128, 64], strides = [1, 1]} : vector<128x256xf32> to vector<128x64xf32>
      %58 = vector.extract_strided_slice %53 {offsets = [0, 192], sizes = [128, 64], strides = [1, 1]} : vector<128x256xf32> to vector<128x64xf32>
      %59 = arith.maximumf %57, %58 : vector<128x64xf32>
      %60 = arith.maximumf %56, %59 : vector<128x64xf32>
      %c0_52 = arith.constant 0 : index
      %c0_53 = arith.constant 0 : index
      %61 = vector.load %arg3[%c0_52, %c0_53] : memref<1x64xf32, #tpu.memory_space<vmem>>, vector<1x64xf32>
      %62 = vector.broadcast %61 : vector<1x64xf32> to vector<128x64xf32>
      %63 = arith.addf %60, %62 : vector<128x64xf32>
      %cst_54 = arith.constant 0.000000e+00 : f32
      %64 = vector.broadcast %cst_54 : f32 to vector<128x64xf32>
      %65 = arith.maximumf %63, %64 : vector<128x64xf32>
      %66 = arith.truncf %65 : vector<128x64xf32> to vector<128x64xbf16>
      %c128_i32 = arith.constant 128 : i32
      %67 = arith.muli %arg6, %c128_i32 : i32
      %68 = tpu.assume_multiple %67, 128 : i32
      %c0_55 = arith.constant 0 : index
      %69 = arith.index_cast %68 : i32 to index
      %c0_56 = arith.constant 0 : index
      %70 = vector.load %arg4[%c0_55, %69, %c0_56] : memref<1x256x64xbf16, #tpu.memory_space<vmem>>, vector<1x128x64xbf16>
      %71 = vector.shape_cast %70 : vector<1x128x64xbf16> to vector<128x64xbf16>
      %72 = vector.shape_cast %66 : vector<128x64xbf16> to vector<1x128x64xbf16>
      tpu.vector_store %arg4[%c0_55, %69, %c0_56], %72 {strides = array<i32>} : memref<1x256x64xbf16, #tpu.memory_space<vmem>>, vector<1x128x64xbf16>,
    }
    %c2_i32_0 = arith.constant 2 : i32
    return
  }
  func.func @transform_0(%arg0: i32) -> (i32, i32, i32, i32, i32) {
    %c0_i32 = arith.constant 0 : i32
    %c0_i32_0 = arith.constant 0 : i32
    %c0_i32_1 = arith.constant 0 : i32
    %c0_i32_2 = arith.constant 0 : i32
    %c0_i32_3 = arith.constant 0 : i32
    return %arg0, %c0_i32, %c0_i32_0, %c0_i32_1, %c0_i32_2 : i32, i32, i32, i32, i32
  }
  func.func @transform_1(%arg0: i32) -> (i32, i32) {
    %c0_i32 = arith.constant 0 : i32
    %c0_i32_0 = arith.constant 0 : i32
    %c0_i32_1 = arith.constant 0 : i32
    return %c0_i32, %c0_i32_0 : i32, i32
  }
  func.func @transform_2(%arg0: i32) -> (i32, i32) {
    %c0_i32 = arith.constant 0 : i32
    %c0_i32_0 = arith.constant 0 : i32
    %c0_i32_1 = arith.constant 0 : i32
    return %c0_i32, %c0_i32_0 : i32, i32
  }
  func.func @transform_3(%arg0: i32) -> (i32, i32, i32) {
    %c0_i32 = arith.constant 0 : i32
    %c0_i32_0 = arith.constant 0 : i32
    %c0_i32_1 = arith.constant 0 : i32
    return %arg0, %c0_i32, %c0_i32_0 : i32, i32, i32
  }
}

module attributes {stable_mosaic.version = 11 : i64} {
  func.func @_mlp_kernel(%arg0: i32, %arg1: memref<2x2048xbf16, #tpu.memory_space<vmem>>, %arg2: memref<2048x128xbf16, #tpu.memory_space<vmem>>, %arg3: memref<1x128xf32, #tpu.memory_space<vmem>>, %arg4: memref<1x128xf32, #tpu.memory_space<vmem>>, %arg5: memref<1x1xf32, #tpu.memory_space<vmem>>, %arg6: memref<2x1xf32, #tpu.memory_space<vmem>>, %arg7: memref<2x128xf32, #tpu.memory_space<vmem>>) attributes {dimension_semantics = [#tpu.dimension_semantics<arbitrary>], iteration_bounds = array<i64: 8>, scalar_prefetch = 0 : i64, scratch_operands = 1 : i64, tpu.core_type = #tpu.core_type<tc>, window_params = [{transform_indices = @transform_0, window_bounds = array<i64: 2, 2048>}, {transform_indices = @transform_1, window_bounds = array<i64: 2048, 128>}, {pipeline_mode = #tpu.pipeline_mode<synchronous>, transform_indices = @transform_2, window_bounds = array<i64: 1, 128>}, {pipeline_mode = #tpu.pipeline_mode<synchronous>, transform_indices = @transform_3, window_bounds = array<i64: 1, 128>}, {pipeline_mode = #tpu.pipeline_mode<synchronous>, transform_indices = @transform_4, window_bounds = array<i64: 1, 1>}, {pipeline_mode = #tpu.pipeline_mode<synchronous>, transform_indices = @transform_5, window_bounds = array<i64: 2, 1>}]} {
    %c0_i32 = arith.constant 0 : i32
    %0 = arith.cmpi eq, %arg0, %c0_i32 : i32
    %1 = arith.extui %0 : i1 to i32
    %c0_i32_0 = arith.constant 0 : i32
    %2 = arith.cmpi ne, %1, %c0_i32_0 : i32
    scf.if %2 {
      %cst_9 = arith.constant 0.000000e+00 : f32
      %12 = vector.broadcast %cst_9 : f32 to vector<2x128xf32>
      %c0_10 = arith.constant 0 : index
      %c0_11 = arith.constant 0 : index
      %13 = vector.load %arg7[%c0_10, %c0_11] : memref<2x128xf32, #tpu.memory_space<vmem>>, vector<2x128xf32>
      tpu.vector_store %arg7[%c0_10, %c0_11], %12 {strides = array<i32>} : memref<2x128xf32, #tpu.memory_space<vmem>>, vector<2x128xf32>,
    } else {
    }
    %c0 = arith.constant 0 : index
    %c0_1 = arith.constant 0 : index
    %3 = vector.load %arg7[%c0, %c0_1] : memref<2x128xf32, #tpu.memory_space<vmem>>, vector<2x128xf32>
    %c0_2 = arith.constant 0 : index
    %c0_3 = arith.constant 0 : index
    %4 = vector.load %arg1[%c0_2, %c0_3] : memref<2x2048xbf16, #tpu.memory_space<vmem>>, vector<2x2048xbf16>
    %c0_4 = arith.constant 0 : index
    %c0_5 = arith.constant 0 : index
    %5 = vector.load %arg2[%c0_4, %c0_5] : memref<2048x128xbf16, #tpu.memory_space<vmem>>, vector<2048x128xbf16>
    %cst = arith.constant dense<0.000000e+00> : vector<2x128xf32>
    %6 = tpu.matmul %4, %5, %cst {dimension_numbers = #tpu.dot_dimension_numbers<[1], [0], [0], [1], [0, 0, 1, 1], [], []>} : vector<2x2048xbf16>, vector<2048x128xbf16>, vector<2x128xf32> -> vector<2x128xf32>
    %7 = arith.addf %3, %6 : vector<2x128xf32>
    %c0_6 = arith.constant 0 : index
    %c0_7 = arith.constant 0 : index
    %8 = vector.load %arg7[%c0_6, %c0_7] : memref<2x128xf32, #tpu.memory_space<vmem>>, vector<2x128xf32>
    tpu.vector_store %arg7[%c0_6, %c0_7], %7 {strides = array<i32>} : memref<2x128xf32, #tpu.memory_space<vmem>>, vector<2x128xf32>,
    %c7_i32 = arith.constant 7 : i32
    %9 = arith.cmpi eq, %arg0, %c7_i32 : i32
    %10 = arith.extui %9 : i1 to i32
    %c0_i32_8 = arith.constant 0 : i32
    %11 = arith.cmpi ne, %10, %c0_i32_8 : i32
    scf.if %11 {
      %c0_9 = arith.constant 0 : index
      %c0_10 = arith.constant 0 : index
      %12 = vector.load %arg7[%c0_9, %c0_10] : memref<2x128xf32, #tpu.memory_space<vmem>>, vector<2x128xf32>
      %c0_11 = arith.constant 0 : index
      %c0_12 = arith.constant 0 : index
      %13 = vector.load %arg3[%c0_11, %c0_12] : memref<1x128xf32, #tpu.memory_space<vmem>>, vector<1x128xf32>
      %14 = vector.broadcast %13 : vector<1x128xf32> to vector<2x128xf32>
      %15 = arith.addf %12, %14 : vector<2x128xf32>
      %cst_13 = arith.constant 0.000000e+00 : f32
      %16 = vector.broadcast %cst_13 : f32 to vector<2x128xf32>
      %17 = arith.maximumf %15, %16 : vector<2x128xf32>
      %c0_14 = arith.constant 0 : index
      %c0_15 = arith.constant 0 : index
      %18 = vector.load %arg4[%c0_14, %c0_15] : memref<1x128xf32, #tpu.memory_space<vmem>>, vector<1x128xf32>
      %19 = vector.broadcast %18 : vector<1x128xf32> to vector<2x128xf32>
      %20 = arith.mulf %17, %19 : vector<2x128xf32>
      %cst_16 = arith.constant dense<0.000000e+00> : vector<2xf32>
      %21 = vector.multi_reduction <add>, %20, %cst_16 [1] : vector<2x128xf32> to vector<2xf32>
      %22 = vector.shape_cast %21 : vector<2xf32> to vector<2x1xf32>
      %c0_17 = arith.constant 0 : index
      %c0_18 = arith.constant 0 : index
      %23 = vector.load %arg5[%c0_17, %c0_18] : memref<1x1xf32, #tpu.memory_space<vmem>>, vector<1x1xf32>
      %24 = vector.broadcast %23 : vector<1x1xf32> to vector<2x1xf32>
      %25 = arith.addf %22, %24 : vector<2x1xf32>
      %cst_19 = arith.constant 0.000000e+00 : f32
      %26 = vector.broadcast %cst_19 : f32 to vector<2x1xf32>
      %27 = arith.subf %26, %25 : vector<2x1xf32>
      %28 = math.exp %27 : vector<2x1xf32>
      %cst_20 = arith.constant 1.000000e+00 : f32
      %29 = vector.broadcast %cst_20 : f32 to vector<2x1xf32>
      %30 = arith.addf %29, %28 : vector<2x1xf32>
      %cst_21 = arith.constant 1.000000e+00 : f32
      %31 = vector.broadcast %cst_21 : f32 to vector<2x1xf32>
      %32 = arith.divf %31, %30 : vector<2x1xf32>
      %c0_22 = arith.constant 0 : index
      %c0_23 = arith.constant 0 : index
      %33 = vector.load %arg6[%c0_22, %c0_23] : memref<2x1xf32, #tpu.memory_space<vmem>>, vector<2x1xf32>
      tpu.vector_store %arg6[%c0_22, %c0_23], %32 {strides = array<i32>} : memref<2x1xf32, #tpu.memory_space<vmem>>, vector<2x1xf32>,
    } else {
    }
    return
  }
  func.func @transform_0(%arg0: i32) -> (i32, i32) {
    %c0_i32 = arith.constant 0 : i32
    %c0_i32_0 = arith.constant 0 : i32
    return %c0_i32, %arg0 : i32, i32
  }
  func.func @transform_1(%arg0: i32) -> (i32, i32) {
    %c0_i32 = arith.constant 0 : i32
    %c0_i32_0 = arith.constant 0 : i32
    return %arg0, %c0_i32 : i32, i32
  }
  func.func @transform_2(%arg0: i32) -> (i32, i32) {
    %c0_i32 = arith.constant 0 : i32
    %c0_i32_0 = arith.constant 0 : i32
    %c0_i32_1 = arith.constant 0 : i32
    return %c0_i32, %c0_i32_0 : i32, i32
  }
  func.func @transform_3(%arg0: i32) -> (i32, i32) {
    %c0_i32 = arith.constant 0 : i32
    %c0_i32_0 = arith.constant 0 : i32
    %c0_i32_1 = arith.constant 0 : i32
    return %c0_i32, %c0_i32_0 : i32, i32
  }
  func.func @transform_4(%arg0: i32) -> (i32, i32) {
    %c0_i32 = arith.constant 0 : i32
    %c0_i32_0 = arith.constant 0 : i32
    %c0_i32_1 = arith.constant 0 : i32
    return %c0_i32, %c0_i32_0 : i32, i32
  }
  func.func @transform_5(%arg0: i32) -> (i32, i32) {
    %c0_i32 = arith.constant 0 : i32
    %c0_i32_0 = arith.constant 0 : i32
    %c0_i32_1 = arith.constant 0 : i32
    return %c0_i32, %c0_i32_0 : i32, i32
  }
}

</mosaic_0001>

<bundles_post_ra>
// kernel: cnn_forward.3
= control target key start
LH: loop header
LB: loop body
LE: loop exit
PB: predicated region body
PF: predicated region fallthrough
CT: control target
= control target key end

     0   :  { %s4991_s12 = smov 0   ;;  %s6888_s0 = inlined_call_operand.vmem [shape: bf16[2,33,2,33,6], index: 0, kind: input, shape index: {}]   ;;  %s6889_s1 = inlined_call_operand.vmem [shape: bf16[48,128], index: 1, kind: input, shape index: {}]   ;;  %s6890_s2 = inlined_call_operand.vmem [shape: f32[1,32], index: 2, kind: input, shape index: {}]   ;;  %s6891_s3 = inlined_call_operand.vmem [shape: bf16[2,34,34,32], index: 3, kind: output, shape index: {}]  }
   0x1 LB: > { %s4282_s13 = sadd.s32 4294967295, %s4955_s12   ;;  %p4286_p0 = scmp.ge.s32.totalorder %s4955_s12, 1  ;;  %s4955_s12 = sphi %s4991_s12, %s13_s12  }
   0x2   : > { %p137_p1 = scmp.lt.s32.totalorder %s4955_s12, 3 }
   0x4   : > { %p138_p2 = pnand %p4286_p0, %p137_p1 }
   0x5   : > { %p161_p3 = scmp.lt.s32.totalorder (!%p138_p2), %s4282_s13, 1  ;;  %vm172_vm0 = vcmask (!%p138_p2), 257024   ;;  %vm177_vm1 = vcmask (!%p138_p2), 253952   ;;  %v4961_v0 = vmov (!%p138_p2), 0   ;;  %s5519_s22 = smov (!%p138_p2), 0  }
   0x6   : > { %141 = sbr.rel (%p138_p2) target bundleno = 968 (0x3c8), region = 32 }
   0xd   : > { %s6901_s13 = smov (!%p161_p3, %s4282_s13), 1 }
   0xe   : > { %s4850_s14 = smul.u32 1320, %s6901_s13 }
   0xf   : > { %s4851_s15 = smul.u32 680, %s6901_s13 }
  0x10   : > { %s5002_s18 = scalar_lea.vmem %s6888_s0, %s4850_s14 }
  0x11   : > { %s5007_s21 = scalar_lea.vmem %s6891_s3, %s4851_s15 }
  0x12   : > { %173 = vst.msk [vmem:[%s5007_s21] sm:$0xf] %vm172_vm0, %v4961_v0  ;;  %174 = vst.msk [vmem:[%s5007_s21 + $0x4] sm:$0xf] %vm172_vm0, %v4961_v0 }
  0x13   : > { %175 = vst.msk [vmem:[%s5007_s21 + $0x8] sm:$0xf] %vm172_vm0, %v4961_v0  ;;  %176 = vst.msk [vmem:[%s5007_s21 + $0xc] sm:$0xf] %vm172_vm0, %v4961_v0 }
  0x14   : > { %179 = vst.msk [vmem:[%s5007_s21 + $0x14] sm:$0xf] %vm172_vm0, %v4961_v0  ;;  %180 = vst.msk [vmem:[%s5007_s21 + $0x18] sm:$0xf] %vm172_vm0, %v4961_v0 }
  0x15   : > { %181 = vst.msk [vmem:[%s5007_s21 + $0x1c] sm:$0xf] %vm172_vm0, %v4961_v0  ;;  %182 = vst.msk [vmem:[%s5007_s21 + $0x20] sm:$0xf] %vm172_vm0, %v4961_v0 }
  0x16   : > { %184 = vst.msk [vmem:[%s5007_s21 + $0x28] sm:$0xf] %vm172_vm0, %v4961_v0  ;;  %185 = vst.msk [vmem:[%s5007_s21 + $0x2c] sm:$0xf] %vm172_vm0, %v4961_v0 }
  0x17   : > { %186 = vst.msk [vmem:[%s5007_s21 + $0x30] sm:$0xf] %vm172_vm0, %v4961_v0  ;;  %187 = vst.msk [vmem:[%s5007_s21 + $0x34] sm:$0xf] %vm172_vm0, %v4961_v0 }
  0x18   : > { %189 = vst.msk [vmem:[%s5007_s21 + $0x3c] sm:$0xf] %vm172_vm0, %v4961_v0  ;;  %190 = vst.msk [vmem:[%s5007_s21 + $0x40] sm:$0xf] %vm172_vm0, %v4961_v0 }
  0x19   : > { %191 = vst.msk [vmem:[%s5007_s21 + $0x44] sm:$0xf] %vm172_vm0, %v4961_v0  ;;  %192 = vst.msk [vmem:[%s5007_s21 + $0x48] sm:$0xf] %vm172_vm0, %v4961_v0 }
  0x1a   : > { %194 = vst.msk [vmem:[%s5007_s21 + $0x50] sm:$0xf] %vm172_vm0, %v4961_v0  ;;  %195 = vst.msk [vmem:[%s5007_s21 + $0x54] sm:$0xf] %vm172_vm0, %v4961_v0 }
  0x1b   : > { %196 = vst.msk [vmem:[%s5007_s21 + $0x58] sm:$0xf] %vm172_vm0, %v4961_v0  ;;  %197 = vst.msk [vmem:[%s5007_s21 + $0x5c] sm:$0xf] %vm172_vm0, %v4961_v0 }
  0x1c   : > { %199 = vst.msk [vmem:[%s5007_s21 + $0x64] sm:$0xf] %vm172_vm0, %v4961_v0  ;;  %200 = vst.msk [vmem:[%s5007_s21 + $0x68] sm:$0xf] %vm172_vm0, %v4961_v0 }
  0x1d   : > { %201 = vst.msk [vmem:[%s5007_s21 + $0x6c] sm:$0xf] %vm172_vm0, %v4961_v0  ;;  %202 = vst.msk [vmem:[%s5007_s21 + $0x70] sm:$0xf] %vm172_vm0, %v4961_v0 }
  0x1e   : > { %204 = vst.msk [vmem:[%s5007_s21 + $0x78] sm:$0xf] %vm172_vm0, %v4961_v0  ;;  %205 = vst.msk [vmem:[%s5007_s21 + $0x7c] sm:$0xf] %vm172_vm0, %v4961_v0 }
  0x1f   : > { %206 = vst.msk [vmem:[%s5007_s21 + $0x80] sm:$0xf] %vm172_vm0, %v4961_v0  ;;  %207 = vst.msk [vmem:[%s5007_s21 + $0x84] sm:$0xf] %vm172_vm0, %v4961_v0 }
  0x20   : > { %209 = vst.msk [vmem:[%s5007_s21 + $0x8c] sm:$0xf] %vm172_vm0, %v4961_v0  ;;  %210 = vst.msk [vmem:[%s5007_s21 + $0x90] sm:$0xf] %vm172_vm0, %v4961_v0 }
  0x21   : > { %211 = vst.msk [vmem:[%s5007_s21 + $0x94] sm:$0xf] %vm172_vm0, %v4961_v0  ;;  %212 = vst.msk [vmem:[%s5007_s21 + $0x98] sm:$0xf] %vm172_vm0, %v4961_v0 }
  0x22   : > { %214 = vst.msk [vmem:[%s5007_s21 + $0xa0] sm:$0xf] %vm172_vm0, %v4961_v0  ;;  %215 = vst.msk [vmem:[%s5007_s21 + $0xa4] sm:$0xf] %vm172_vm0, %v4961_v0 }
  0x23   : > { %216 = vst.msk [vmem:[%s5007_s21 + $0xa8] sm:$0xf] %vm172_vm0, %v4961_v0  ;;  %217 = vst.msk [vmem:[%s5007_s21 + $0xac] sm:$0xf] %vm172_vm0, %v4961_v0 }
  0x24   : > { %219 = vst.msk [vmem:[%s5007_s21 + $0xb4] sm:$0xf] %vm172_vm0, %v4961_v0  ;;  %220 = vst.msk [vmem:[%s5007_s21 + $0xb8] sm:$0xf] %vm172_vm0, %v4961_v0 }
  0x25   : > { %221 = vst.msk [vmem:[%s5007_s21 + $0xbc] sm:$0xf] %vm172_vm0, %v4961_v0  ;;  %222 = vst.msk [vmem:[%s5007_s21 + $0xc0] sm:$0xf] %vm172_vm0, %v4961_v0 }
  0x26   : > { %224 = vst.msk [vmem:[%s5007_s21 + $0xc8] sm:$0xf] %vm172_vm0, %v4961_v0  ;;  %225 = vst.msk [vmem:[%s5007_s21 + $0xcc] sm:$0xf] %vm172_vm0, %v4961_v0 }
  0x27   : > { %226 = vst.msk [vmem:[%s5007_s21 + $0xd0] sm:$0xf] %vm172_vm0, %v4961_v0  ;;  %227 = vst.msk [vmem:[%s5007_s21 + $0xd4] sm:$0xf] %vm172_vm0, %v4961_v0 }
  0x28   : > { %229 = vst.msk [vmem:[%s5007_s21 + $0xdc] sm:$0xf] %vm172_vm0, %v4961_v0  ;;  %230 = vst.msk [vmem:[%s5007_s21 + $0xe0] sm:$0xf] %vm172_vm0, %v4961_v0 }
  0x29   : > { %231 = vst.msk [vmem:[%s5007_s21 + $0xe4] sm:$0xf] %vm172_vm0, %v4961_v0  ;;  %232 = vst.msk [vmem:[%s5007_s21 + $0xe8] sm:$0xf] %vm172_vm0, %v4961_v0 }
  0x2a   : > { %234 = vst.msk [vmem:[%s5007_s21 + $0xf0] sm:$0xf] %vm172_vm0, %v4961_v0  ;;  %235 = vst.msk [vmem:[%s5007_s21 + $0xf4] sm:$0xf] %vm172_vm0, %v4961_v0 }
  0x2b   : > { %236 = vst.msk [vmem:[%s5007_s21 + $0xf8] sm:$0xf] %vm172_vm0, %v4961_v0  ;;  %237 = vst.msk [vmem:[%s5007_s21 + $0xfc] sm:$0xf] %vm172_vm0, %v4961_v0 }
  0x2c   : > { %239 = vst.msk [vmem:[%s5007_s21 + $0x104] sm:$0xf] %vm172_vm0, %v4961_v0  ;;  %240 = vst.msk [vmem:[%s5007_s21 + $0x108] sm:$0xf] %vm172_vm0, %v4961_v0 }
  0x2d   : > { %241 = vst.msk [vmem:[%s5007_s21 + $0x10c] sm:$0xf] %vm172_vm0, %v4961_v0  ;;  %242 = vst.msk [vmem:[%s5007_s21 + $0x110] sm:$0xf] %vm172_vm0, %v4961_v0 }
  0x2e   : > { %244 = vst.msk [vmem:[%s5007_s21 + $0x118] sm:$0xf] %vm172_vm0, %v4961_v0  ;;  %245 = vst.msk [vmem:[%s5007_s21 + $0x11c] sm:$0xf] %vm172_vm0, %v4961_v0 }
  0x2f   : > { %246 = vst.msk [vmem:[%s5007_s21 + $0x120] sm:$0xf] %vm172_vm0, %v4961_v0  ;;  %247 = vst.msk [vmem:[%s5007_s21 + $0x124] sm:$0xf] %vm172_vm0, %v4961_v0 }
  0x30   : > { %249 = vst.msk [vmem:[%s5007_s21 + $0x12c] sm:$0xf] %vm172_vm0, %v4961_v0  ;;  %250 = vst.msk [vmem:[%s5007_s21 + $0x130] sm:$0xf] %vm172_vm0, %v4961_v0 }
  0x31   : > { %251 = vst.msk [vmem:[%s5007_s21 + $0x134] sm:$0xf] %vm172_vm0, %v4961_v0  ;;  %252 = vst.msk [vmem:[%s5007_s21 + $0x138] sm:$0xf] %vm172_vm0, %v4961_v0 }
  0x32   : > { %254 = vst.msk [vmem:[%s5007_s21 + $0x140] sm:$0xf] %vm172_vm0, %v4961_v0  ;;  %255 = vst.msk [vmem:[%s5007_s21 + $0x144] sm:$0xf] %vm172_vm0, %v4961_v0 }
  0x33   : > { %256 = vst.msk [vmem:[%s5007_s21 + $0x148] sm:$0xf] %vm172_vm0, %v4961_v0  ;;  %257 = vst.msk [vmem:[%s5007_s21 + $0x14c] sm:$0xf] %vm172_vm0, %v4961_v0 }
  0x34   : > { %259 = vst.msk [vmem:[%s5007_s21 + $0x154] sm:$0xf] %vm172_vm0, %v4961_v0  ;;  %260 = vst.msk [vmem:[%s5007_s21 + $0x158] sm:$0xf] %vm172_vm0, %v4961_v0 }
  0x35   : > { %261 = vst.msk [vmem:[%s5007_s21 + $0x15c] sm:$0xf] %vm172_vm0, %v4961_v0  ;;  %262 = vst.msk [vmem:[%s5007_s21 + $0x160] sm:$0xf] %vm172_vm0, %v4961_v0 }
  0x36   : > { %264 = vst.msk [vmem:[%s5007_s21 + $0x168] sm:$0xf] %vm172_vm0, %v4961_v0  ;;  %265 = vst.msk [vmem:[%s5007_s21 + $0x16c] sm:$0xf] %vm172_vm0, %v4961_v0 }
  0x37   : > { %266 = vst.msk [vmem:[%s5007_s21 + $0x170] sm:$0xf] %vm172_vm0, %v4961_v0  ;;  %267 = vst.msk [vmem:[%s5007_s21 + $0x174] sm:$0xf] %vm172_vm0, %v4961_v0 }
  0x38   : > { %269 = vst.msk [vmem:[%s5007_s21 + $0x17c] sm:$0xf] %vm172_vm0, %v4961_v0  ;;  %270 = vst.msk [vmem:[%s5007_s21 + $0x180] sm:$0xf] %vm172_vm0, %v4961_v0 }
  0x39   : > { %271 = vst.msk [vmem:[%s5007_s21 + $0x184] sm:$0xf] %vm172_vm0, %v4961_v0  ;;  %272 = vst.msk [vmem:[%s5007_s21 + $0x188] sm:$0xf] %vm172_vm0, %v4961_v0 }
  0x3a   : > { %274 = vst.msk [vmem:[%s5007_s21 + $0x190] sm:$0xf] %vm172_vm0, %v4961_v0  ;;  %275 = vst.msk [vmem:[%s5007_s21 + $0x194] sm:$0xf] %vm172_vm0, %v4961_v0 }
  0x3b   : > { %276 = vst.msk [vmem:[%s5007_s21 + $0x198] sm:$0xf] %vm172_vm0, %v4961_v0  ;;  %277 = vst.msk [vmem:[%s5007_s21 + $0x19c] sm:$0xf] %vm172_vm0, %v4961_v0 }
  0x3c   : > { %279 = vst.msk [vmem:[%s5007_s21 + $0x1a4] sm:$0xf] %vm172_vm0, %v4961_v0  ;;  %280 = vst.msk [vmem:[%s5007_s21 + $0x1a8] sm:$0xf] %vm172_vm0, %v4961_v0 }
  0x3d   : > { %281 = vst.msk [vmem:[%s5007_s21 + $0x1ac] sm:$0xf] %vm172_vm0, %v4961_v0  ;;  %282 = vst.msk [vmem:[%s5007_s21 + $0x1b0] sm:$0xf] %vm172_vm0, %v4961_v0 }
  0x3e   : > { %284 = vst.msk [vmem:[%s5007_s21 + $0x1b8] sm:$0xf] %vm172_vm0, %v4961_v0  ;;  %285 = vst.msk [vmem:[%s5007_s21 + $0x1bc] sm:$0xf] %vm172_vm0, %v4961_v0 }
  0x3f   : > { %286 = vst.msk [vmem:[%s5007_s21 + $0x1c0] sm:$0xf] %vm172_vm0, %v4961_v0  ;;  %287 = vst.msk [vmem:[%s5007_s21 + $0x1c4] sm:$0xf] %vm172_vm0, %v4961_v0 }
  0x40   : > { %289 = vst.msk [vmem:[%s5007_s21 + $0x1cc] sm:$0xf] %vm172_vm0, %v4961_v0  ;;  %290 = vst.msk [vmem:[%s5007_s21 + $0x1d0] sm:$0xf] %vm172_vm0, %v4961_v0 }
  0x41   : > { %291 = vst.msk [vmem:[%s5007_s21 + $0x1d4] sm:$0xf] %vm172_vm0, %v4961_v0  ;;  %292 = vst.msk [vmem:[%s5007_s21 + $0x1d8] sm:$0xf] %vm172_vm0, %v4961_v0 }
  0x42   : > { %294 = vst.msk [vmem:[%s5007_s21 + $0x1e0] sm:$0xf] %vm172_vm0, %v4961_v0  ;;  %295 = vst.msk [vmem:[%s5007_s21 + $0x1e4] sm:$0xf] %vm172_vm0, %v4961_v0 }
  0x43   : > { %296 = vst.msk [vmem:[%s5007_s21 + $0x1e8] sm:$0xf] %vm172_vm0, %v4961_v0  ;;  %297 = vst.msk [vmem:[%s5007_s21 + $0x1ec] sm:$0xf] %vm172_vm0, %v4961_v0 }
  0x44   : > { %299 = vst.msk [vmem:[%s5007_s21 + $0x1f4] sm:$0xf] %vm172_vm0, %v4961_v0  ;;  %300 = vst.msk [vmem:[%s5007_s21 + $0x1f8] sm:$0xf] %vm172_vm0, %v4961_v0 }
  0x45   : > { %301 = vst.msk [vmem:[%s5007_s21 + $0x1fc] sm:$0xf] %vm172_vm0, %v4961_v0  ;;  %302 = vst.msk [vmem:[%s5007_s21 + $0x200] sm:$0xf] %vm172_vm0, %v4961_v0 }
  0x46   : > { %304 = vst.msk [vmem:[%s5007_s21 + $0x208] sm:$0xf] %vm172_vm0, %v4961_v0  ;;  %305 = vst.msk [vmem:[%s5007_s21 + $0x20c] sm:$0xf] %vm172_vm0, %v4961_v0 }
  0x47   : > { %306 = vst.msk [vmem:[%s5007_s21 + $0x210] sm:$0xf] %vm172_vm0, %v4961_v0  ;;  %307 = vst.msk [vmem:[%s5007_s21 + $0x214] sm:$0xf] %vm172_vm0, %v4961_v0 }
  0x48   : > { %309 = vst.msk [vmem:[%s5007_s21 + $0x21c] sm:$0xf] %vm172_vm0, %v4961_v0  ;;  %310 = vst.msk [vmem:[%s5007_s21 + $0x220] sm:$0xf] %vm172_vm0, %v4961_v0 }
  0x49   : > { %311 = vst.msk [vmem:[%s5007_s21 + $0x224] sm:$0xf] %vm172_vm0, %v4961_v0  ;;  %312 = vst.msk [vmem:[%s5007_s21 + $0x228] sm:$0xf] %vm172_vm0, %v4961_v0 }
  0x4a   : > { %314 = vst.msk [vmem:[%s5007_s21 + $0x230] sm:$0xf] %vm172_vm0, %v4961_v0  ;;  %315 = vst.msk [vmem:[%s5007_s21 + $0x234] sm:$0xf] %vm172_vm0, %v4961_v0 }
  0x4b   : > { %316 = vst.msk [vmem:[%s5007_s21 + $0x238] sm:$0xf] %vm172_vm0, %v4961_v0  ;;  %317 = vst.msk [vmem:[%s5007_s21 + $0x23c] sm:$0xf] %vm172_vm0, %v4961_v0 }
  0x4c   : > { %319 = vst.msk [vmem:[%s5007_s21 + $0x244] sm:$0xf] %vm172_vm0, %v4961_v0  ;;  %320 = vst.msk [vmem:[%s5007_s21 + $0x248] sm:$0xf] %vm172_vm0, %v4961_v0 }
  0x4d   : > { %321 = vst.msk [vmem:[%s5007_s21 + $0x24c] sm:$0xf] %vm172_vm0, %v4961_v0  ;;  %322 = vst.msk [vmem:[%s5007_s21 + $0x250] sm:$0xf] %vm172_vm0, %v4961_v0 }
  0x4e   : > { %324 = vst.msk [vmem:[%s5007_s21 + $0x258] sm:$0xf] %vm172_vm0, %v4961_v0  ;;  %325 = vst.msk [vmem:[%s5007_s21 + $0x25c] sm:$0xf] %vm172_vm0, %v4961_v0 }
  0x4f   : > { %326 = vst.msk [vmem:[%s5007_s21 + $0x260] sm:$0xf] %vm172_vm0, %v4961_v0  ;;  %327 = vst.msk [vmem:[%s5007_s21 + $0x264] sm:$0xf] %vm172_vm0, %v4961_v0 }
  0x50   : > { %329 = vst.msk [vmem:[%s5007_s21 + $0x26c] sm:$0xf] %vm172_vm0, %v4961_v0  ;;  %330 = vst.msk [vmem:[%s5007_s21 + $0x270] sm:$0xf] %vm172_vm0, %v4961_v0 }
  0x51   : > { %331 = vst.msk [vmem:[%s5007_s21 + $0x274] sm:$0xf] %vm172_vm0, %v4961_v0  ;;  %332 = vst.msk [vmem:[%s5007_s21 + $0x278] sm:$0xf] %vm172_vm0, %v4961_v0 }
  0x52   : > { %334 = vst.msk [vmem:[%s5007_s21 + $0x280] sm:$0xf] %vm172_vm0, %v4961_v0  ;;  %335 = vst.msk [vmem:[%s5007_s21 + $0x284] sm:$0xf] %vm172_vm0, %v4961_v0 }
  0x53   : > { %336 = vst.msk [vmem:[%s5007_s21 + $0x288] sm:$0xf] %vm172_vm0, %v4961_v0  ;;  %337 = vst.msk [vmem:[%s5007_s21 + $0x28c] sm:$0xf] %vm172_vm0, %v4961_v0 }
  0x54   : > { %339 = vst.msk [vmem:[%s5007_s21 + $0x294] sm:$0xf] %vm172_vm0, %v4961_v0  ;;  %340 = vst.msk [vmem:[%s5007_s21 + $0x298] sm:$0xf] %vm172_vm0, %v4961_v0 }
  0x55   : > { %341 = vst.msk [vmem:[%s5007_s21 + $0x29c] sm:$0xf] %vm172_vm0, %v4961_v0  ;;  %342 = vst.msk [vmem:[%s5007_s21 + $0x2a0] sm:$0xf] %vm172_vm0, %v4961_v0 }
  0x56   : > { %178 = vst.msk [vmem:[%s5007_s21 + $0x10] sm:$0x1] %vm177_vm1, %v4961_v0  ;;  %183 = vst.msk [vmem:[%s5007_s21 + $0x24] sm:$0x1] %vm177_vm1, %v4961_v0 }
  0x57   : > { %188 = vst.msk [vmem:[%s5007_s21 + $0x38] sm:$0x1] %vm177_vm1, %v4961_v0  ;;  %193 = vst.msk [vmem:[%s5007_s21 + $0x4c] sm:$0x1] %vm177_vm1, %v4961_v0 }
  0x58   : > { %198 = vst.msk [vmem:[%s5007_s21 + $0x60] sm:$0x1] %vm177_vm1, %v4961_v0  ;;  %203 = vst.msk [vmem:[%s5007_s21 + $0x74] sm:$0x1] %vm177_vm1, %v4961_v0 }
  0x59   : > { %208 = vst.msk [vmem:[%s5007_s21 + $0x88] sm:$0x1] %vm177_vm1, %v4961_v0  ;;  %213 = vst.msk [vmem:[%s5007_s21 + $0x9c] sm:$0x1] %vm177_vm1, %v4961_v0 }
  0x5a   : > { %218 = vst.msk [vmem:[%s5007_s21 + $0xb0] sm:$0x1] %vm177_vm1, %v4961_v0  ;;  %223 = vst.msk [vmem:[%s5007_s21 + $0xc4] sm:$0x1] %vm177_vm1, %v4961_v0 }
  0x5b   : > { %228 = vst.msk [vmem:[%s5007_s21 + $0xd8] sm:$0x1] %vm177_vm1, %v4961_v0  ;;  %233 = vst.msk [vmem:[%s5007_s21 + $0xec] sm:$0x1] %vm177_vm1, %v4961_v0 }
  0x5c   : > { %238 = vst.msk [vmem:[%s5007_s21 + $0x100] sm:$0x1] %vm177_vm1, %v4961_v0  ;;  %243 = vst.msk [vmem:[%s5007_s21 + $0x114] sm:$0x1] %vm177_vm1, %v4961_v0 }
  0x5d   : > { %248 = vst.msk [vmem:[%s5007_s21 + $0x128] sm:$0x1] %vm177_vm1, %v4961_v0  ;;  %253 = vst.msk [vmem:[%s5007_s21 + $0x13c] sm:$0x1] %vm177_vm1, %v4961_v0 }
  0x5e   : > { %258 = vst.msk [vmem:[%s5007_s21 + $0x150] sm:$0x1] %vm177_vm1, %v4961_v0  ;;  %263 = vst.msk [vmem:[%s5007_s21 + $0x164] sm:$0x1] %vm177_vm1, %v4961_v0 }
  0x5f   : > { %268 = vst.msk [vmem:[%s5007_s21 + $0x178] sm:$0x1] %vm177_vm1, %v4961_v0  ;;  %273 = vst.msk [vmem:[%s5007_s21 + $0x18c] sm:$0x1] %vm177_vm1, %v4961_v0 }
  0x60   : > { %278 = vst.msk [vmem:[%s5007_s21 + $0x1a0] sm:$0x1] %vm177_vm1, %v4961_v0  ;;  %283 = vst.msk [vmem:[%s5007_s21 + $0x1b4] sm:$0x1] %vm177_vm1, %v4961_v0 }
  0x61   : > { %288 = vst.msk [vmem:[%s5007_s21 + $0x1c8] sm:$0x1] %vm177_vm1, %v4961_v0  ;;  %293 = vst.msk [vmem:[%s5007_s21 + $0x1dc] sm:$0x1] %vm177_vm1, %v4961_v0 }
  0x62   : > { %298 = vst.msk [vmem:[%s5007_s21 + $0x1f0] sm:$0x1] %vm177_vm1, %v4961_v0  ;;  %303 = vst.msk [vmem:[%s5007_s21 + $0x204] sm:$0x1] %vm177_vm1, %v4961_v0 }
  0x63   : > { %308 = vst.msk [vmem:[%s5007_s21 + $0x218] sm:$0x1] %vm177_vm1, %v4961_v0  ;;  %313 = vst.msk [vmem:[%s5007_s21 + $0x22c] sm:$0x1] %vm177_vm1, %v4961_v0 }
  0x64   : > { %318 = vst.msk [vmem:[%s5007_s21 + $0x240] sm:$0x1] %vm177_vm1, %v4961_v0  ;;  %323 = vst.msk [vmem:[%s5007_s21 + $0x254] sm:$0x1] %vm177_vm1, %v4961_v0 }
  0x65   : > { %328 = vst.msk [vmem:[%s5007_s21 + $0x268] sm:$0x1] %vm177_vm1, %v4961_v0  ;;  %333 = vst.msk [vmem:[%s5007_s21 + $0x27c] sm:$0x1] %vm177_vm1, %v4961_v0 }
  0x66   : > { %338 = vst.msk [vmem:[%s5007_s21 + $0x290] sm:$0x1] %vm177_vm1, %v4961_v0  ;;  %343 = vst.msk [vmem:[%s5007_s21 + $0x2a4] sm:$0x1] %vm177_vm1, %v4961_v0 }
  0x67 LB: >> { %s4754_s23 = smul.u32 320, %s4959_s22  ;;  %vm539_vm2 = vsmask.f32 3328  ;;  %vm540_vm3 = vsmask.f32 7440  ;;  %s4962_s25 = smov 12   ;;  %s4959_s22 = sphi %s5519_s22, %s349_s22  }
  0x68   : >> { %vm5545_vm4 = vmor %vm539_vm2, %vm540_vm3  ;;  %s4963_s26 = smov 6   ;;  %s4964_s27 = smov 18   ;;  %vm482_vm5 = vcmask 48128   ;;  %vm990_vm6 = vcmask 97328   ;;  %vm1170_vm7 = vcmask 146528   ;;  %vm1675_vm8 = vcmask 195728  }
  0x69   : >> { %s5526_s24 = scalar_lea.vmem %s5002_s18, %s4754_s23  ;;  %s4965_s28 = smov 24   ;;  %vm1856_vm9 = vcmask 244928   ;;  %vm2361_vm10 = vcmask 294128   ;;  %vm2541_vm11 = vcmask 343328   ;;  %vm3046_vm12 = vcmask 392528  }
  0x6a   : >> { %v4878_v1 = vld [vmem:[%s5526_s24 + $0xb4] sm:$0xff]   ;;  %v4880_v3 = vld [vmem:[%s5526_s24 + $0xbc] sm:$0xff]   ;;  %v501_v5 = vld [vmem:[%s5526_s24 + $0x8] sm:$0xf]  ;;  %s4966_s29 = smov 30   ;;  %s4967_s30 = smov 36  }
  0x6b   : >> { %v4879_v2 = vld [vmem:[%s5526_s24 + $0x14] sm:$0xff]   ;;  %1138 = vrot.lane.b32.xlu1 %v4878_v1, %s4962_s25  ;;  %v4881_v4 = vld [vmem:[%s5526_s24 + $0x1c] sm:$0xff]   ;;  %v502_v6 = vld [vmem:[%s5526_s24 + $0xc] sm:$0xf]  ;;  %v562_v8 = vshll.u32 %v501_v5, 16  ;;  %v566_v9 = vshrl.u32 %v501_v5, 16 }
  0x6c   : >> { %1122 = vrot.lane.b32.xlu0 %v4879_v2, %s4962_s25  ;;  %v503_v7 = vld [vmem:[%s5526_s24 + $0x10] sm:$0x1]  ;;  %v572_v10 = vshll.u32 %v502_v6, 16  ;;  %v576_v11 = vshrl.u32 %v502_v6, 16  ;;  %v499_v12 = vld [vmem:[%s5526_s24] sm:$0xf] }
  0x6d   : >> { %v582_v13 = vshll.u32 %v503_v7, 16  ;;  %v500_v14 = vld [vmem:[%s5526_s24 + $0x4] sm:$0xf]  ;;  %v543_v15 = vshrl.u32 %v499_v12, 16  ;;  %v546_v16 = vshll.u32 %v499_v12, 16  ;;  %v564_v17 = vrot.slane %v562_v8, 5 }
  0x6e   : >> { %v568_v18 = vrot.slane %v566_v9, 4  ;;  %v574_v19 = vrot.slane %v572_v10, 5  ;;  %v578_v20 = vrot.slane %v576_v11, 4  ;;  %v521_v21 = vld [vmem:[%s5526_s24 + $0xa8] sm:$0xf]  ;;  %v552_v25 = vshll.u32 %v500_v14, 16 }
  0x6f   : >> { %1140 = vrot.lane.b32.xlu1 %v4880_v3, %s4962_s25  ;;  %v584_v22 = vrot.slane %v582_v13, 5  ;;  %v545_v23 = vrot.slane %v543_v15, 4  ;;  %v548_v24 = vrot.slane %v546_v16, 5  ;;  %v522_v26 = vld [vmem:[%s5526_s24 + $0xac] sm:$0xf]  ;;  %v556_v29 = vshrl.u32 %v500_v14, 16 }
  0x70   : >> { %1124 = vrot.lane.b32.xlu0 %v4881_v4, %s4962_s25  ;;  %v569_v27 = vor.u32 %v568_v18, %v564_v17  ;;  %v579_v28 = vor.u32 %v578_v20, %v574_v19  ;;  %v738_v30 = vshll.u32 %v521_v21, 16  ;;  %v554_v33 = vrot.slane %v552_v25, 5  ;;  %v523_v34 = vld [vmem:[%s5526_s24 + $0xb0] sm:$0x1]  ;;  %v519_v45 = vld [vmem:[%s5526_s24 + $0xa0] sm:$0xf] }
  0x71   : >> { %v549_v32 = vor.u32 %v548_v24, %v545_v23  ;;  %v742_v35 = vshrl.u32 %v521_v21, 16  ;;  %v748_v36 = vshll.u32 %v522_v26, 16  ;;  %v558_v39 = vrot.slane %v556_v29, 4  ;;  %v520_v50 = vld [vmem:[%s5526_s24 + $0xa4] sm:$0xf]  ;;  %s4968_s4 = smov 42  }
  0x72   : >> { %v570_v37 = vrot.slane %v569_v27, 4  ;;  %v580_v38 = vrot.slane %v579_v28, 4  ;;  %v5550_v40 = vrot.slane %v738_v30, 5  ;;  %v752_v44 = vshrl.u32 %v522_v26, 16  ;;  %v4373_v55 = vld [vmem:[%s5526_s24 + $0x14] sm:$0xf] }
  0x73   : >> { %v550_v41 = vrot.slane %v549_v32, 4  ;;  %v744_v42 = vrot.slane %v742_v35, 4  ;;  %v750_v43 = vrot.slane %v748_v36, 5  ;;  %v559_v48 = vor.u32 %v558_v39, %v554_v33  ;;  %v4374_v0 = vld [vmem:[%s5526_s24 + $0x18] sm:$0xf]  ;;  %s4969_s11 = smov 96  }
  0x74   : >> { %v575_v46 = vsel %vm5545_vm4, %v570_v37, %v574_v19  ;;  %v585_v47 = vsel %vm5545_vm4, %v580_v38, %v584_v22  ;;  %v758_v49 = vshll.u32 %v523_v34, 16  ;;  %v754_v54 = vrot.slane %v752_v44, 4  ;;  %v4375_v4 = vld [vmem:[%s5526_s24 + $0x1c] sm:$0xf]  ;;  %v4393_v10 = vld [vmem:[%s5526_s24 + $0xb4] sm:$0xf] }
  0x75   : >> { %v4309_v51 = vcombine.low %v575_v46, %v585_v47  ;;  %v555_v52 = vsel %vm5545_vm4, %v550_v41, %v554_v33  ;;  %v745_v53 = vor.u32 %v744_v42, %v5550_v40  ;;  %v560_v56 = vrot.slane %v559_v48, 4  ;;  %v4394_v15 = vld [vmem:[%s5526_s24 + $0xb8] sm:$0xf]  ;;  %v4395_v20 = vld [vmem:[%s5526_s24 + $0xbc] sm:$0xf]  ;;  %s4970_s13 = smov 64  }
  0x76   : >> { %v760_v57 = vrot.slane %v758_v49, 5  ;;  %v719_v58 = vshrl.u32 %v519_v45, 16  ;;  %v722_v59 = vshll.u32 %v519_v45, 16  ;;  %v755_v61 = vor.u32 %v754_v54, %v750_v43  ;;  %v4377_v48 = vld [vmem:[%s5526_s24 + $0x24] sm:$0x1]  ;;  %s4695_s16 = smul.u32 160, %s4959_s22 }
  0x77   : >> { %944 = vrot.lane.b32.xlu1 %v4309_v51, %s4963_s26  ;;  %v746_v60 = vrot.slane %v745_v53, 4  ;;  %v728_v62 = vshll.u32 %v520_v50, 16  ;;  %v732_v63 = vshrl.u32 %v520_v50, 16  ;;  %v565_v1 = vsel %vm5545_vm4, %v560_v56, %v564_v17  ;;  %v4396_v56 = vld [vmem:[%s5526_s24 + $0xc0] sm:$0xf]  ;;  %s349_s22 = sadd.s32 1, %s4959_s22  }
  0x78   : >> { %v721_v2 = vrot.slane %v719_v58, 4  ;;  %v724_v3 = vrot.slane %v722_v59, 5  ;;  %v1228_v5 = vshrl.u32 %v4373_v55, 16  ;;  %v4308_v6 = vcombine.low %v555_v52, %v565_v1  ;;  %s6621_s17 = scalar_lea.vmem %s5007_s21, %s4695_s16  ;;  %p346_p4 = scmp.ge.s32.totalorder %s349_s22, 4  }
  0x79   : >> { %v751_v7 = vsel %vm5545_vm4, %v746_v60, %v750_v43  ;;  %v756_v8 = vrot.slane %v755_v61, 4  ;;  %v730_v9 = vrot.slane %v728_v62, 5  ;;  %v734_v12 = vrot.slane %v732_v63, 4  ;;  %v4376_v43 = vld [vmem:[%s5526_s24 + $0x20] sm:$0xf] }
  0x7a   : >> { %v725_v11 = vor.u32 %v724_v3, %v721_v2  ;;  %v1230_v13 = vrot.slane %v1228_v5, 4  ;;  %v1231_v14 = vshll.u32 %v4373_v55, 16  ;;  %942 = vrot.lane.b32.xlu0 %v4308_v6, %s4963_s26  ;;  %v1237_v17 = vshll.u32 %v4374_v0, 16  ;;  %v4397_v61 = vld [vmem:[%s5526_s24 + $0xc4] sm:$0x1] }
  0x7b   : >> { %v761_v16 = vsel %vm5545_vm4, %v756_v8, %v760_v57  ;;  %v1241_v18 = vshrl.u32 %v4374_v0, 16  ;;  %v1247_v19 = vshll.u32 %v4375_v4, 16  ;;  %v735_v23 = vor.u32 %v734_v12, %v730_v9  ;;  %v4479_v2 = vld [vmem:[%s5526_s24 + $0x28] sm:$0xf]  ;;  %v4481_v12 = vld [vmem:[%s5526_s24 + $0x30] sm:$0xf] }
  0x7c   : >> { %v4317_v21 = vcombine.low %v751_v7, %v761_v16  ;;  %v726_v22 = vrot.slane %v725_v11, 4  ;;  %v1233_v24 = vrot.slane %v1231_v14, 5  ;;  %v1239_v25 = vrot.slane %v1237_v17, 5  ;;  %v4480_v7 = vld [vmem:[%s5526_s24 + $0x2c] sm:$0xf] }
  0x7d   : >> { %v1243_v26 = vrot.slane %v1241_v18, 4  ;;  %v1249_v27 = vrot.slane %v1247_v19, 5  ;;  %v1251_v28 = vshrl.u32 %v4375_v4, 16  ;;  %v736_v30 = vrot.slane %v735_v23, 4 }
  0x7e   : >> { %960 = vrot.lane.b32.xlu1 %v4317_v21, %s4963_s26  ;;  %v731_v29 = vsel %vm5545_vm4, %v726_v22, %v730_v9  ;;  %v1234_v32 = vor.u32 %v1233_v24, %v1230_v13  ;;  %v1404_v33 = vshrl.u32 %v4393_v10, 16  ;;  %v1407_v35 = vshll.u32 %v4393_v10, 16 }
  0x7f   : >> { %v1244_v34 = vor.u32 %v1243_v26, %v1239_v25  ;;  %v1413_v36 = vshll.u32 %v4394_v15, 16  ;;  %v1417_v37 = vshrl.u32 %v4394_v15, 16  ;;  %v741_v38 = vsel %vm5545_vm4, %v736_v30, %v5550_v40 }
  0x80   : >> { %v1235_v39 = vrot.slane %v1234_v32, 4  ;;  %v1406_v41 = vrot.slane %v1404_v33, 4  ;;  %v1423_v42 = vshll.u32 %v4395_v20, 16  ;;  %v4316_v44 = vcombine.low %v731_v29, %v741_v38  ;;  %v4499_v29 = vld [vmem:[%s5526_s24 + $0xc8] sm:$0xf] }
  0x81   : >> { %v1245_v45 = vrot.slane %v1244_v34, 4  ;;  %v1409_v46 = vrot.slane %v1407_v35, 5  ;;  %v1415_v47 = vrot.slane %v1413_v36, 5  ;;  %v1419_v50 = vrot.slane %v1417_v37, 4  ;;  %v4500_v35 = vld [vmem:[%s5526_s24 + $0xcc] sm:$0xf] }
  0x82   : >> { %v1240_v49 = vsel %vm5545_vm4, %v1235_v39, %v1239_v25  ;;  %v1425_v51 = vrot.slane %v1423_v42, 5  ;;  %v1427_v52 = vshrl.u32 %v4395_v20, 16  ;;  %958 = vrot.lane.b32.xlu0 %v4316_v44, %s4963_s26  ;;  %v1253_v54 = vrot.slane %v1251_v28, 4  ;;  %v4501_v44 = vld [vmem:[%s5526_s24 + $0xd0] sm:$0xf] }
  0x83   : >> { %v1250_v40 = vsel %vm5545_vm4, %v1245_v45, %v1249_v27  ;;  %v1410_v53 = vor.u32 %v1409_v46, %v1406_v41  ;;  %v1257_v55 = vshll.u32 %v4376_v43, 16  ;;  %v1420_v58 = vor.u32 %v1419_v50, %v1415_v47 }
  0x84   : >> { %v4413_v57 = vcombine.low %v1240_v49, %v1250_v40  ;;  %v1261_v59 = vshrl.u32 %v4376_v43, 16  ;;  %v1267_v60 = vshll.u32 %v4377_v48, 16  ;;  %v1254_v63 = vor.u32 %v1253_v54, %v1249_v27  ;;  %v4482_v54 = vld [vmem:[%s5526_s24 + $0x34] sm:$0xf] }
  0x85   : >> { %v1411_v62 = vrot.slane %v1410_v53, 4  ;;  %v1259_v0 = vrot.slane %v1257_v55, 5  ;;  %v1429_v1 = vrot.slane %v1427_v52, 4  ;;  %v1421_v3 = vrot.slane %v1420_v58, 4 }
  0x86   : >> { %v1263_v4 = vrot.slane %v1261_v59, 4  ;;  %v1269_v5 = vrot.slane %v1267_v60, 5  ;;  %v1433_v6 = vshll.u32 %v4396_v56, 16  ;;  %1627 = vrot.lane.b32.xlu0 %v4413_v57, %s4964_s27  ;;  %v1255_v9 = vrot.slane %v1254_v63, 4  ;;  %v4883_v59 = vld [vmem:[%s5526_s24 + $0xc8] sm:$0xff]  }
  0x87   : >> { %v1416_v8 = vsel %vm5545_vm4, %v1411_v62, %v1415_v47  ;;  %v1430_v10 = vor.u32 %v1429_v1, %v1425_v51  ;;  %v1437_v11 = vshrl.u32 %v4396_v56, 16  ;;  %v1426_v13 = vsel %vm5545_vm4, %v1421_v3, %v1425_v51  ;;  %v4882_v47 = vld [vmem:[%s5526_s24 + $0x28] sm:$0xff]   ;;  %v4483_v63 = vld [vmem:[%s5526_s24 + $0x38] sm:$0x1]  ;;  %v4884_v1 = vld [vmem:[%s5526_s24 + $0x30] sm:$0xff]  }
  0x88   : >> { %v1264_v14 = vor.u32 %v1263_v4, %v1259_v0  ;;  %v1435_v15 = vrot.slane %v1433_v6, 5  ;;  %v1443_v16 = vshll.u32 %v4397_v61, 16  ;;  %v4421_v17 = vcombine.low %v1416_v8, %v1426_v13  ;;  %v4502_v6 = vld [vmem:[%s5526_s24 + $0xd4] sm:$0xf] }
  0x89   : >> { %v1260_v18 = vsel %vm5545_vm4, %v1255_v9, %v1259_v0  ;;  %v1431_v19 = vrot.slane %v1430_v10, 4  ;;  %v1439_v20 = vrot.slane %v1437_v11, 4  ;;  %v1914_v23 = vshrl.u32 %v4479_v2, 16  ;;  %v4885_v11 = vld [vmem:[%s5526_s24 + $0xd0] sm:$0xff]  }
  0x8a   : >> { %v1265_v21 = vrot.slane %v1264_v14, 4  ;;  %v1445_v22 = vrot.slane %v1443_v16, 5  ;;  %v1917_v24 = vshll.u32 %v4479_v2, 16  ;;  %1643 = vrot.lane.b32.xlu1 %v4421_v17, %s4964_s27  ;;  %v1923_v27 = vshll.u32 %v4480_v7, 16 }
  0x8b   : >> { %v1436_v25 = vsel %vm5545_vm4, %v1431_v19, %v1435_v15  ;;  %v1440_v26 = vor.u32 %v1439_v20, %v1435_v15  ;;  %v1927_v28 = vshrl.u32 %v4480_v7, 16  ;;  %v1916_v32 = vrot.slane %v1914_v23, 4  ;;  %v4503_v19 = vld [vmem:[%s5526_s24 + $0xd8] sm:$0x1] }
  0x8c   : >> { %v1270_v30 = vsel %vm5545_vm4, %v1265_v21, %v1269_v5  ;;  %v1919_v33 = vrot.slane %v1917_v24, 5  ;;  %v1933_v34 = vshll.u32 %v4481_v12, 16  ;;  %v1925_v38 = vrot.slane %v1923_v27, 5 }
  0x8d   : >> { %v4414_v36 = vcombine.low %v1260_v18, %v1270_v30  ;;  %v1441_v37 = vrot.slane %v1440_v26, 4  ;;  %v1929_v39 = vrot.slane %v1927_v28, 4  ;;  %v1937_v43 = vshrl.u32 %v4481_v12, 16  ;;  %v4587_v26 = vld [vmem:[%s5526_s24 + $0x40] sm:$0xf] }
  0x8e   : >> { %v1920_v41 = vor.u32 %v1919_v33, %v1916_v32  ;;  %v1935_v42 = vrot.slane %v1933_v34, 5  ;;  %v2090_v45 = vshrl.u32 %v4499_v29, 16  ;;  %v2093_v49 = vshll.u32 %v4499_v29, 16  ;;  %v4588_v32 = vld [vmem:[%s5526_s24 + $0x44] sm:$0xf] }
  0x8f   : >> { %1629 = vrot.lane.b32.xlu0 %v4414_v36, %s4964_s27  ;;  %v1446_v46 = vsel %vm5545_vm4, %v1441_v37, %v1445_v22  ;;  %v1930_v48 = vor.u32 %v1929_v39, %v1925_v38  ;;  %v2099_v50 = vshll.u32 %v4500_v35, 16  ;;  %v2103_v53 = vshrl.u32 %v4500_v35, 16  ;;  %v4606_v37 = vld [vmem:[%s5526_s24 + $0xdc] sm:$0xf] }
  0x90   : >> { %v4422_v51 = vcombine.low %v1436_v25, %v1446_v46  ;;  %v1921_v52 = vrot.slane %v1920_v41, 4  ;;  %v2092_v40 = vrot.slane %v2090_v45, 4  ;;  %v2095_v56 = vrot.slane %v2093_v49, 5  ;;  %v4586_v25 = vld [vmem:[%s5526_s24 + $0x3c] sm:$0xf] }
  0x91   : >> { %v1931_v55 = vrot.slane %v1930_v48, 4  ;;  %v2101_v57 = vrot.slane %v2099_v50, 5  ;;  %v2109_v58 = vshll.u32 %v4501_v44, 16  ;;  %v2105_v61 = vrot.slane %v2103_v53, 4 }
  0x92   : >> { %1645 = vrot.lane.b32.xlu1 %v4422_v51, %s4964_s27  ;;  %v1926_v60 = vsel %vm5545_vm4, %v1921_v52, %v1925_v38  ;;  %v2113_v62 = vshrl.u32 %v4501_v44, 16  ;;  %v1939_v0 = vrot.slane %v1937_v43, 4  ;;  %v2096_v3 = vor.u32 %v2095_v56, %v2092_v40  ;;  %v4607_v43 = vld [vmem:[%s5526_s24 + $0xe0] sm:$0xf]  ;;  %v4608_v52 = vld [vmem:[%s5526_s24 + $0xe4] sm:$0xf] }
  0x93   : >> { %1808 = vrot.lane.b32.xlu0 %v4882_v47, %s4965_s28  ;;  %v1936_v2 = vsel %vm5545_vm4, %v1931_v55, %v1935_v42  ;;  %v2111_v4 = vrot.slane %v2109_v58, 5  ;;  %v1943_v5 = vshll.u32 %v4482_v54, 16  ;;  %v2106_v8 = vor.u32 %v2105_v61, %v2101_v57  ;;  %v4886_v56 = vld [vmem:[%s5526_s24 + $0x3c] sm:$0xff]  }
  0x94   : >> { %v4519_v7 = vcombine.low %v1926_v60, %v1936_v2  ;;  %v1940_v9 = vor.u32 %v1939_v0, %v1935_v42  ;;  %v1947_v10 = vshrl.u32 %v4482_v54, 16  ;;  %v2097_v12 = vrot.slane %v2096_v3, 4 }
  0x95   : >> { %v1945_v13 = vrot.slane %v1943_v5, 5  ;;  %v1953_v14 = vshll.u32 %v4483_v63, 16  ;;  %v2115_v15 = vrot.slane %v2113_v62, 4  ;;  %v2107_v16 = vrot.slane %v2106_v8, 4  ;;  %v4589_v5 = vld [vmem:[%s5526_s24 + $0x48] sm:$0xf] }
  0x96   : >> { %1824 = vrot.lane.b32.xlu1 %v4883_v59, %s4965_s28  ;;  %v1941_v17 = vrot.slane %v1940_v9, 4  ;;  %v1949_v18 = vrot.slane %v1947_v10, 4  ;;  %v2119_v20 = vshll.u32 %v4502_v6, 16  ;;  %v2102_v21 = vsel %vm5545_vm4, %v2097_v12, %v2101_v57  ;;  %v4887_v10 = vld [vmem:[%s5526_s24 + $0xdc] sm:$0xff]  }
  0x97   : >> { %1810 = vrot.lane.b32.xlu0 %v4884_v1, %s4965_s28  ;;  %v1955_v22 = vrot.slane %v1953_v14, 5  ;;  %v2116_v23 = vor.u32 %v2115_v15, %v2111_v4  ;;  %v2123_v24 = vshrl.u32 %v4502_v6, 16  ;;  %v2112_v27 = vsel %vm5545_vm4, %v2107_v16, %v2111_v4  ;;  %v4590_v14 = vld [vmem:[%s5526_s24 + $0x4c] sm:$0x1]  ;;  %v4888_v16 = vld [vmem:[%s5526_s24 + $0x44] sm:$0xff]  }
  0x98   : >> { %v1946_v28 = vsel %vm5545_vm4, %v1941_v17, %v1945_v13  ;;  %v1950_v29 = vor.u32 %v1949_v18, %v1945_v13  ;;  %v2121_v30 = vrot.slane %v2119_v20, 5  ;;  %v4527_v33 = vcombine.low %v2102_v21, %v2112_v27  ;;  %v4609_v21 = vld [vmem:[%s5526_s24 + $0xe8] sm:$0xf] }
  0x99   : >> { %v2117_v34 = vrot.slane %v2116_v23, 4  ;;  %v2125_v35 = vrot.slane %v2123_v24, 4  ;;  %v2129_v36 = vshll.u32 %v4503_v19, 16  ;;  %v2599_v39 = vshrl.u32 %v4586_v25, 16 }
  0x9a   : >> { %1826 = vrot.lane.b32.xlu1 %v4885_v11, %s4965_s28  ;;  %v1951_v38 = vrot.slane %v1950_v29, 4  ;;  %v2602_v41 = vshll.u32 %v4586_v25, 16  ;;  %v2608_v42 = vshll.u32 %v4587_v26, 16  ;;  %v2612_v47 = vshrl.u32 %v4587_v26, 16  ;;  %v4610_v26 = vld [vmem:[%s5526_s24 + $0xec] sm:$0x1] }
  0x9b   : >> { %2313 = vrot.lane.b32.xlu0 %v4519_v7, %s4966_s29  ;;  %v2122_v44 = vsel %vm5545_vm4, %v2117_v34, %v2121_v30  ;;  %v2126_v45 = vor.u32 %v2125_v35, %v2121_v30  ;;  %v2131_v46 = vrot.slane %v2129_v36, 5  ;;  %v2601_v49 = vrot.slane %v2599_v39, 4 }
  0x9c   : >> { %v1956_v48 = vsel %vm5545_vm4, %v1951_v38, %v1955_v22  ;;  %v2604_v50 = vrot.slane %v2602_v41, 5  ;;  %v2610_v51 = vrot.slane %v2608_v42, 5  ;;  %v2614_v54 = vrot.slane %v2612_v47, 4  ;;  %v505_v38 = vld [vmem:[%s5526_s24 + $0x2c] sm:$0xf] }
  0x9d   : >> { %v4520_v40 = vcombine.low %v1946_v28, %v1956_v48  ;;  %v2127_v53 = vrot.slane %v2126_v45, 4  ;;  %v2618_v55 = vshll.u32 %v4588_v32, 16  ;;  %v2622_v58 = vshrl.u32 %v4588_v32, 16  ;;  %v504_v32 = vld [vmem:[%s5526_s24 + $0x28] sm:$0xf] }
  0x9e   : >> { %2329 = vrot.lane.b32.xlu1 %v4527_v33, %s4966_s29  ;;  %v2605_v57 = vor.u32 %v2604_v50, %v2601_v49  ;;  %v2775_v59 = vshrl.u32 %v4606_v37, 16  ;;  %v2778_v60 = vshll.u32 %v4606_v37, 16  ;;  %v2615_v62 = vor.u32 %v2614_v54, %v2610_v51  ;;  %v4889_v33 = vld [vmem:[%s5526_s24 + $0xe4] sm:$0xff]  }
  0x9f   : >> { %2315 = vrot.lane.b32.xlu0 %v4520_v40, %s4966_s29  ;;  %v2132_v61 = vsel %vm5545_vm4, %v2127_v53, %v2131_v46  ;;  %v2620_v63 = vrot.slane %v2618_v55, 5  ;;  %v2784_v0 = vshll.u32 %v4607_v43, 16  ;;  %v2788_v8 = vshrl.u32 %v4607_v43, 16  ;;  %v524_v40 = vld [vmem:[%s5526_s24 + $0xc8] sm:$0xf] }
  0xa0   : >> { %v4528_v1 = vcombine.low %v2122_v44, %v2132_v61  ;;  %v2606_v2 = vrot.slane %v2605_v57, 4  ;;  %v2777_v3 = vrot.slane %v2775_v59, 4  ;;  %v2780_v4 = vrot.slane %v2778_v60, 5  ;;  %v506_v44 = vld [vmem:[%s5526_s24 + $0x30] sm:$0xf] }
  0xa1   : >> { %v2616_v6 = vrot.slane %v2615_v62, 4  ;;  %v2786_v7 = vrot.slane %v2784_v0, 5  ;;  %v2794_v9 = vshll.u32 %v4608_v52, 16  ;;  %v2798_v13 = vshrl.u32 %v4608_v52, 16  ;;  %v525_v57 = vld [vmem:[%s5526_s24 + $0xcc] sm:$0xf] }
  0xa2   : >> { %2331 = vrot.lane.b32.xlu1 %v4528_v1, %s4966_s29  ;;  %v2611_v11 = vsel %vm5545_vm4, %v2606_v2, %v2610_v51  ;;  %v2781_v12 = vor.u32 %v2780_v4, %v2777_v3  ;;  %v2624_v15 = vrot.slane %v2622_v58, 4  ;;  %v2790_v18 = vrot.slane %v2788_v8, 4 }
  0xa3   : >> { %2493 = vrot.lane.b32.xlu0 %v4886_v56, %s4967_s30  ;;  %v2621_v17 = vsel %vm5545_vm4, %v2616_v6, %v2620_v63  ;;  %v2796_v19 = vrot.slane %v2794_v9, 5  ;;  %v2628_v20 = vshll.u32 %v4589_v5, 16  ;;  %v2632_v25 = vshrl.u32 %v4589_v5, 16  ;;  %v526_v9 = vld [vmem:[%s5526_s24 + $0xd0] sm:$0xf] }
  0xa4   : >> { %v4626_v22 = vcombine.low %v2611_v11, %v2621_v17  ;;  %v2782_v23 = vrot.slane %v2781_v12, 4  ;;  %v2625_v24 = vor.u32 %v2624_v15, %v2620_v63  ;;  %v2791_v27 = vor.u32 %v2790_v18, %v2786_v7 }
  0xa5   : >> { %v2630_v28 = vrot.slane %v2628_v20, 5  ;;  %v2638_v29 = vshll.u32 %v4590_v14, 16  ;;  %v2800_v30 = vrot.slane %v2798_v13, 4  ;;  %v2634_v36 = vrot.slane %v2632_v25, 4 }
  0xa6   : >> { %2509 = vrot.lane.b32.xlu1 %v4887_v10, %s4967_s30  ;;  %v2787_v34 = vsel %vm5545_vm4, %v2782_v23, %v2786_v7  ;;  %v2626_v35 = vrot.slane %v2625_v24, 4  ;;  %v2804_v37 = vshll.u32 %v4609_v21, 16  ;;  %v2792_v39 = vrot.slane %v2791_v27, 4  ;;  %v508_v24 = vld [vmem:[%s5526_s24 + $0x38] sm:$0x1] }
  0xa7   : >> { %2495 = vrot.lane.b32.xlu0 %v4888_v16, %s4967_s30  ;;  %v2640_v41 = vrot.slane %v2638_v29, 5  ;;  %v2801_v42 = vor.u32 %v2800_v30, %v2796_v19  ;;  %v2808_v43 = vshrl.u32 %v4609_v21, 16  ;;  %v2635_v46 = vor.u32 %v2634_v36, %v2630_v28 }
  0xa8   : >> { %v2631_v45 = vsel %vm5545_vm4, %v2626_v35, %v2630_v28  ;;  %v2806_v47 = vrot.slane %v2804_v37, 5  ;;  %v2814_v48 = vshll.u32 %v4610_v26, 16  ;;  %v2797_v49 = vsel %vm5545_vm4, %v2792_v39, %v2796_v19  ;;  %v507_v19 = vld [vmem:[%s5526_s24 + $0x34] sm:$0xf]  ;;  %v528_v39 = vld [vmem:[%s5526_s24 + $0xd8] sm:$0x1] }
  0xa9   : >> { %v2802_v50 = vrot.slane %v2801_v42, 4  ;;  %v2810_v51 = vrot.slane %v2808_v43, 4  ;;  %v587_v52 = vshrl.u32 %v504_v32, 16  ;;  %v4634_v53 = vcombine.low %v2787_v34, %v2797_v49  ;;  %v527_v34 = vld [vmem:[%s5526_s24 + $0xd4] sm:$0xf] }
  0xaa   : >> { %2511 = vrot.lane.b32.xlu1 %v4889_v33, %s4967_s30  ;;  %v2636_v54 = vrot.slane %v2635_v46, 4  ;;  %v2816_v55 = vrot.slane %v2814_v48, 5  ;;  %v590_v56 = vshll.u32 %v504_v32, 16  ;;  %v596_v61 = vshll.u32 %v505_v38, 16  ;;  %v4379_v46 = vld [vmem:[%s5526_s24 + $0x40] sm:$0xf] }
  0xab   : >> { %2998 = vrot.lane.b32.xlu0 %v4626_v22, %s4968_s4  ;;  %v2807_v58 = vsel %vm5545_vm4, %v2802_v50, %v2806_v47  ;;  %v2811_v59 = vor.u32 %v2810_v51, %v2806_v47  ;;  %v589_v60 = vrot.slane %v587_v52, 4  ;;  %v600_v0 = vshrl.u32 %v505_v38, 16  ;;  %v4918_v47 = vld [vmem:[%s6889_s1] sm:$0xff]  }
  0xac   : >> { %v2641_v62 = vsel %vm5545_vm4, %v2636_v54, %v2640_v41  ;;  %v592_v63 = vrot.slane %v590_v56, 5  ;;  %v606_v1 = vshll.u32 %v506_v44, 16  ;;  %v598_v4 = vrot.slane %v596_v61, 5  ;;  %v4378_v41 = vld [vmem:[%s5526_s24 + $0x3c] sm:$0xf]  ;;  %4806 = vmatprep.subr.bf16.mxu0 %v4918_v47  ;;  %4844 = vmatprep.subr.bf16.mxu1 %v4918_v47 }
  0xad   : >> { %v4627_v2 = vcombine.low %v2631_v45, %v2641_v62  ;;  %v2812_v3 = vrot.slane %v2811_v59, 4  ;;  %v610_v5 = vshrl.u32 %v506_v44, 16  ;;  %v602_v7 = vrot.slane %v600_v0, 4  ;;  %4807 = vmatpush3.bf16.msra.mxu0 %v4918_v47  ;;  %4847 = vmatpush3.bf16.msra.mxu1 %v4918_v47  ;;  %v4892_v47 = vld [vmem:[%s5526_s24 + $0x44] sm:$0xff]  }
  0xae   : >> { %3014 = vrot.lane.b32.xlu1 %v4634_v53, %s4968_s4  ;;  %v593_v6 = vor.u32 %v592_v63, %v589_v60  ;;  %v608_v8 = vrot.slane %v606_v1, 5  ;;  %v763_v10 = vshrl.u32 %v524_v40, 16  ;;  %v766_v12 = vshll.u32 %v524_v40, 16  ;;  %v4380_v1 = vld [vmem:[%s5526_s24 + $0x44] sm:$0xf] }
  0xaf   : >> { %3000 = vrot.lane.b32.xlu0 %v4627_v2, %s4968_s4  ;;  %v2817_v11 = vsel %vm5545_vm4, %v2812_v3, %v2816_v55  ;;  %v772_v13 = vshll.u32 %v525_v57, 16  ;;  %v776_v14 = vshrl.u32 %v525_v57, 16  ;;  %v603_v17 = vor.u32 %v602_v7, %v598_v4 }
  0xb0   : >> { %v4635_v15 = vcombine.low %v2807_v58, %v2817_v11  ;;  %v594_v16 = vrot.slane %v593_v6, 4  ;;  %v765_v18 = vrot.slane %v763_v10, 4  ;;  %v768_v20 = vrot.slane %v766_v12, 5 }
  0xb1   : >> { %v774_v21 = vrot.slane %v772_v13, 5  ;;  %v778_v22 = vrot.slane %v776_v14, 4  ;;  %v782_v23 = vshll.u32 %v526_v9, 16  ;;  %v604_v26 = vrot.slane %v603_v17, 4  ;;  %v4399_v14 = vld [vmem:[%s5526_s24 + $0xe0] sm:$0xf] }
  0xb2   : >> { %3016 = vrot.lane.b32.xlu1 %v4635_v15, %s4968_s4  ;;  %v599_v25 = vsel %vm5545_vm4, %v594_v16, %v598_v4  ;;  %v786_v27 = vshrl.u32 %v526_v9, 16  ;;  %v612_v28 = vrot.slane %v610_v5, 4  ;;  %v769_v29 = vor.u32 %v768_v20, %v765_v18  ;;  %v4919_v9 = vld [vmem:[%s6889_s1 + $0x8] sm:$0xff]  }
  0xb3   : >> { %v779_v30 = vor.u32 %v778_v22, %v774_v21  ;;  %v784_v32 = vrot.slane %v782_v23, 5  ;;  %v616_v33 = vshll.u32 %v507_v19, 16  ;;  %v609_v35 = vsel %vm5545_vm4, %v604_v26, %v608_v8  ;;  %4808 = vmatprep.subr.bf16.mxu0 %v4919_v9  ;;  %4845 = vmatprep.subr.bf16.mxu1 %v4919_v9  ;;  %v4890_v26 = vld [vmem:[%s5526_s24 + $0x3c] sm:$0xff]  }
  0xb4   : >> { %v613_v36 = vor.u32 %v612_v28, %v608_v8  ;;  %v620_v37 = vshrl.u32 %v507_v19, 16  ;;  %v626_v38 = vshll.u32 %v508_v24, 16  ;;  %v4310_v42 = vcombine.low %v599_v25, %v609_v35  ;;  %v4398_v8 = vld [vmem:[%s5526_s24 + $0xdc] sm:$0xf]  ;;  %4809 = vmatpush3.bf16.msra.mxu0 %v4919_v9  ;;  %4848 = vmatpush3.bf16.msra.mxu1 %v4919_v9  ;;  %v4921_v24 = vld [vmem:[%s6889_s1 + $0x10] sm:$0xff]  }
  0xb5   : >> { %v770_v43 = vrot.slane %v769_v29, 4  ;;  %v780_v44 = vrot.slane %v779_v30, 4  ;;  %v618_v45 = vrot.slane %v616_v33, 5  ;;  %v788_v51 = vrot.slane %v786_v27, 4  ;;  %v4381_v35 = vld [vmem:[%s5526_s24 + $0x48] sm:$0xf]  ;;  %4810 = vmatprep.subr.bf16.mxu0 %v4921_v24  ;;  %4846 = vmatprep.subr.bf16.mxu1 %v4921_v24 }
  0xb6   : >> { %v614_v48 = vrot.slane %v613_v36, 4  ;;  %v622_v49 = vrot.slane %v620_v37, 4  ;;  %v628_v50 = vrot.slane %v626_v38, 5  ;;  %946 = vrot.lane.b32.xlu0 %v4310_v42, %s4963_s26  ;;  %v792_v53 = vshll.u32 %v527_v34, 16 }
  0xb7   : >> { %v775_v52 = vsel %vm5545_vm4, %v770_v43, %v774_v21  ;;  %v785_v40 = vsel %vm5545_vm4, %v780_v44, %v784_v32  ;;  %v796_v54 = vshrl.u32 %v527_v34, 16  ;;  %v789_v58 = vor.u32 %v788_v51, %v784_v32  ;;  %v4400_v21 = vld [vmem:[%s5526_s24 + $0xe4] sm:$0xf] }
  0xb8   : >> { %v4318_v55 = vcombine.low %v775_v52, %v785_v40  ;;  %v619_v56 = vsel %vm5545_vm4, %v614_v48, %v618_v45  ;;  %v623_v57 = vor.u32 %v622_v49, %v618_v45  ;;  %v794_v59 = vrot.slane %v792_v53, 5  ;;  %v4382_v45 = vld [vmem:[%s5526_s24 + $0x4c] sm:$0x1]  ;;  %4811 = vmatpush3.bf16.msra.mxu0 %v4921_v24  ;;  %v4401_v52 = vld [vmem:[%s5526_s24 + $0xe8] sm:$0xf]  ;;  %4849 = vmatpush3.bf16.msra.mxu1 %v4921_v24 }
  0xb9   : >> { %v798_v60 = vrot.slane %v796_v54, 4  ;;  %v802_v61 = vshll.u32 %v528_v39, 16  ;;  %v1272_v62 = vshrl.u32 %v4378_v41, 16  ;;  %v790_v0 = vrot.slane %v789_v58, 4 }
  0xba   : >> { %962 = vrot.lane.b32.xlu1 %v4318_v55, %s4963_s26  ;;  %v624_v63 = vrot.slane %v623_v57, 4  ;;  %v1275_v2 = vshll.u32 %v4378_v41, 16  ;;  %v1281_v3 = vshll.u32 %v4379_v46, 16  ;;  %v1285_v7 = vshrl.u32 %v4379_v46, 16  ;;  %v4891_v41 = vld [vmem:[%s5526_s24 + $0xdc] sm:$0xff]  }
  0xbb   : >> { %v799_v4 = vor.u32 %v798_v60, %v794_v59  ;;  %v804_v5 = vrot.slane %v802_v61, 5  ;;  %v1274_v6 = vrot.slane %v1272_v62, 4  ;;  %v795_v11 = vsel %vm5545_vm4, %v790_v0, %v794_v59  ;;  %v4402_v59 = vld [vmem:[%s5526_s24 + $0xec] sm:$0x1]  ;;  %v4893_v61 = vld [vmem:[%s5526_s24 + $0xe4] sm:$0xff]  }
  0xbc   : >> { %v629_v10 = vsel %vm5545_vm4, %v624_v63, %v628_v50  ;;  %v1277_v12 = vrot.slane %v1275_v2, 5  ;;  %v1283_v13 = vrot.slane %v1281_v3, 5  ;;  %v1287_v17 = vrot.slane %v1285_v7, 4  ;;  %v4484_v2 = vld [vmem:[%s5526_s24 + $0x50] sm:$0xf] }
  0xbd   : >> { %v4311_v15 = vcombine.low %v619_v56, %v629_v10  ;;  %v800_v16 = vrot.slane %v799_v4, 4  ;;  %v1291_v18 = vshll.u32 %v4380_v1, 16  ;;  %v1295_v20 = vshrl.u32 %v4380_v1, 16 }
  0xbe   : >> { %v1278_v19 = vor.u32 %v1277_v12, %v1274_v6  ;;  %v1448_v22 = vshrl.u32 %v4398_v8, 16  ;;  %v1451_v23 = vshll.u32 %v4398_v8, 16  ;;  %v1288_v27 = vor.u32 %v1287_v17, %v1283_v13  ;;  %v4486_v12 = vld [vmem:[%s5526_s24 + $0x58] sm:$0xf]  ;;  %v4504_v17 = vld [vmem:[%s5526_s24 + $0xf0] sm:$0xf] }
  0xbf   : >> { %948 = vrot.lane.b32.xlu0 %v4311_v15, %s4963_s26  ;;  %v805_v25 = vsel %vm5545_vm4, %v800_v16, %v804_v5  ;;  %v1293_v28 = vrot.slane %v1291_v18, 5  ;;  %v1457_v29 = vshll.u32 %v4399_v14, 16  ;;  %v1461_v38 = vshrl.u32 %v4399_v14, 16 }
  0xc0   : >> { %v4319_v30 = vcombine.low %v795_v11, %v805_v25  ;;  %v1279_v32 = vrot.slane %v1278_v19, 4  ;;  %v1450_v33 = vrot.slane %v1448_v22, 4  ;;  %v1453_v34 = vrot.slane %v1451_v23, 5  ;;  %v4485_v11 = vld [vmem:[%s5526_s24 + $0x54] sm:$0xf] }
  0xc1   : >> { %v1289_v36 = vrot.slane %v1288_v27, 4  ;;  %v1459_v37 = vrot.slane %v1457_v29, 5  ;;  %v1467_v39 = vshll.u32 %v4400_v21, 16  ;;  %v1471_v44 = vshrl.u32 %v4400_v21, 16  ;;  %v4505_v22 = vld [vmem:[%s5526_s24 + $0xf4] sm:$0xf] }
  0xc2   : >> { %964 = vrot.lane.b32.xlu1 %v4319_v30, %s4963_s26  ;;  %v1284_v42 = vsel %vm5545_vm4, %v1279_v32, %v1283_v13  ;;  %v1454_v43 = vor.u32 %v1453_v34, %v1450_v33  ;;  %v1297_v46 = vrot.slane %v1295_v20, 4  ;;  %v1463_v49 = vrot.slane %v1461_v38, 4  ;;  %v4506_v32 = vld [vmem:[%s5526_s24 + $0xf8] sm:$0xf] }
  0xc3   : >> { %1126 = vrot.lane.b32.xlu0 %v4890_v26, %s4962_s25  ;;  %v1294_v48 = vsel %vm5545_vm4, %v1289_v36, %v1293_v28  ;;  %v1469_v50 = vrot.slane %v1467_v39, 5  ;;  %v1301_v51 = vshll.u32 %v4381_v35, 16  ;;  %v1305_v55 = vshrl.u32 %v4381_v35, 16 }
  0xc4   : >> { %v4415_v40 = vcombine.low %v1284_v42, %v1294_v48  ;;  %v1455_v53 = vrot.slane %v1454_v43, 4  ;;  %v1298_v54 = vor.u32 %v1297_v46, %v1293_v28  ;;  %v1464_v56 = vor.u32 %v1463_v49, %v1459_v37  ;;  %v4487_v42 = vld [vmem:[%s5526_s24 + $0x5c] sm:$0xf]  ;;  %v4488_v48 = vld [vmem:[%s5526_s24 + $0x60] sm:$0x1] }
  0xc5   : >> { %v1303_v57 = vrot.slane %v1301_v51, 5  ;;  %v1311_v58 = vshll.u32 %v4382_v45, 16  ;;  %v1473_v60 = vrot.slane %v1471_v44, 4  ;;  %v1307_v0 = vrot.slane %v1305_v55, 4  ;;  %v4894_v44 = vld [vmem:[%s5526_s24 + $0x50] sm:$0xff]  }
  0xc6   : >> { %1142 = vrot.lane.b32.xlu1 %v4891_v41, %s4962_s25  ;;  %v1460_v62 = vsel %vm5545_vm4, %v1455_v53, %v1459_v37  ;;  %v1299_v63 = vrot.slane %v1298_v54, 4  ;;  %v1477_v1 = vshll.u32 %v4401_v52, 16  ;;  %v1465_v3 = vrot.slane %v1464_v56, 4 }
  0xc7   : >> { %1128 = vrot.lane.b32.xlu0 %v4892_v47, %s4962_s25  ;;  %v1313_v4 = vrot.slane %v1311_v58, 5  ;;  %v1474_v5 = vor.u32 %v1473_v60, %v1469_v50  ;;  %v1481_v6 = vshrl.u32 %v4401_v52, 16  ;;  %v1308_v8 = vor.u32 %v1307_v0, %v1303_v57 }
  0xc8   : >> { %v1304_v7 = vsel %vm5545_vm4, %v1299_v63, %v1303_v57  ;;  %v1479_v9 = vrot.slane %v1477_v1, 5  ;;  %v1487_v10 = vshll.u32 %v4402_v59, 16  ;;  %v1470_v13 = vsel %vm5545_vm4, %v1465_v3, %v1469_v50  ;;  %v4895_v50 = vld [vmem:[%s5526_s24 + $0xf0] sm:$0xff]   ;;  %v4896_v57 = vld [vmem:[%s5526_s24 + $0x58] sm:$0xff]  }
  0xc9   : >> { %v1475_v14 = vrot.slane %v1474_v5, 4  ;;  %v1483_v15 = vrot.slane %v1481_v6, 4  ;;  %v1958_v16 = vshrl.u32 %v4484_v2, 16  ;;  %v4423_v18 = vcombine.low %v1460_v62, %v1470_v13  ;;  %v4507_v62 = vld [vmem:[%s5526_s24 + $0xfc] sm:$0xf] }
  0xca   : >> { %1144 = vrot.lane.b32.xlu1 %v4893_v61, %s4962_s25  ;;  %v1309_v19 = vrot.slane %v1308_v8, 4  ;;  %v1489_v20 = vrot.slane %v1487_v10, 5  ;;  %v1961_v21 = vshll.u32 %v4484_v2, 16  ;;  %v1967_v26 = vshll.u32 %v4485_v11, 16 }
  0xcb   : >> { %1631 = vrot.lane.b32.xlu0 %v4415_v40, %s4964_s27  ;;  %v1480_v23 = vsel %vm5545_vm4, %v1475_v14, %v1479_v9  ;;  %v1484_v24 = vor.u32 %v1483_v15, %v1479_v9  ;;  %v1960_v25 = vrot.slane %v1958_v16, 4  ;;  %v1971_v29 = vshrl.u32 %v4485_v11, 16 }
  0xcc   : >> { %v1314_v27 = vsel %vm5545_vm4, %v1309_v19, %v1313_v4  ;;  %v1963_v28 = vrot.slane %v1961_v21, 5  ;;  %v1977_v30 = vshll.u32 %v4486_v12, 16  ;;  %v1969_v35 = vrot.slane %v1967_v26, 5 }
  0xcd   : >> { %v4416_v33 = vcombine.low %v1304_v7, %v1314_v27  ;;  %v1485_v34 = vrot.slane %v1484_v24, 4  ;;  %v1981_v36 = vshrl.u32 %v4486_v12, 16  ;;  %v1973_v38 = vrot.slane %v1971_v29, 4  ;;  %v4897_v7 = vld [vmem:[%s5526_s24 + $0xf8] sm:$0xff]   ;;  %v4508_v12 = vld [vmem:[%s5526_s24 + $0x100] sm:$0x1] }
  0xce   : >> { %1647 = vrot.lane.b32.xlu1 %v4423_v18, %s4964_s27  ;;  %v1964_v37 = vor.u32 %v1963_v28, %v1960_v25  ;;  %v1979_v39 = vrot.slane %v1977_v30, 5  ;;  %v2134_v41 = vshrl.u32 %v4504_v17, 16  ;;  %v2137_v45 = vshll.u32 %v4504_v17, 16  ;;  %v4591_v17 = vld [vmem:[%s5526_s24 + $0x64] sm:$0xf] }
  0xcf   : >> { %1633 = vrot.lane.b32.xlu0 %v4416_v33, %s4964_s27  ;;  %v1490_v43 = vsel %vm5545_vm4, %v1485_v34, %v1489_v20  ;;  %v2143_v46 = vshll.u32 %v4505_v22, 16  ;;  %v2147_v47 = vshrl.u32 %v4505_v22, 16  ;;  %v1974_v52 = vor.u32 %v1973_v38, %v1969_v35  ;;  %v4592_v22 = vld [vmem:[%s5526_s24 + $0x68] sm:$0xf]  ;;  %v4593_v30 = vld [vmem:[%s5526_s24 + $0x6c] sm:$0xf] }
  0xd0   : >> { %v4424_v49 = vcombine.low %v1480_v23, %v1490_v43  ;;  %v1965_v51 = vrot.slane %v1964_v37, 4  ;;  %v2136_v40 = vrot.slane %v2134_v41, 4  ;;  %v2139_v53 = vrot.slane %v2137_v45, 5  ;;  %v4611_v37 = vld [vmem:[%s5526_s24 + $0x104] sm:$0xf] }
  0xd1   : >> { %v2145_v54 = vrot.slane %v2143_v46, 5  ;;  %v2149_v55 = vrot.slane %v2147_v47, 4  ;;  %v2153_v56 = vshll.u32 %v4506_v32, 16  ;;  %v1975_v59 = vrot.slane %v1974_v52, 4  ;;  %v4612_v43 = vld [vmem:[%s5526_s24 + $0x108] sm:$0xf] }
  0xd2   : >> { %1649 = vrot.lane.b32.xlu1 %v4424_v49, %s4964_s27  ;;  %v1970_v58 = vsel %vm5545_vm4, %v1965_v51, %v1969_v35  ;;  %v2157_v60 = vshrl.u32 %v4506_v32, 16  ;;  %v1983_v61 = vrot.slane %v1981_v36, 4  ;;  %v2140_v63 = vor.u32 %v2139_v53, %v2136_v40  ;;  %v4898_v40 = vld [vmem:[%s5526_s24 + $0x64] sm:$0xff]  }
  0xd3   : >> { %1812 = vrot.lane.b32.xlu0 %v4894_v44, %s4965_s28  ;;  %v2150_v0 = vor.u32 %v2149_v55, %v2145_v54  ;;  %v2155_v1 = vrot.slane %v2153_v56, 5  ;;  %v1987_v2 = vshll.u32 %v4487_v42, 16  ;;  %v1980_v3 = vsel %vm5545_vm4, %v1975_v59, %v1979_v39 }
  0xd4   : >> { %v1984_v4 = vor.u32 %v1983_v61, %v1979_v39  ;;  %v1991_v5 = vshrl.u32 %v4487_v42, 16  ;;  %v1997_v6 = vshll.u32 %v4488_v48, 16  ;;  %v4521_v8 = vcombine.low %v1970_v58, %v1980_v3  ;;  %v4613_v48 = vld [vmem:[%s5526_s24 + $0x10c] sm:$0xf] }
  0xd5   : >> { %v2141_v9 = vrot.slane %v2140_v63, 4  ;;  %v2151_v10 = vrot.slane %v2150_v0, 4  ;;  %v1989_v11 = vrot.slane %v1987_v2, 5  ;;  %v2159_v16 = vrot.slane %v2157_v60, 4 }
  0xd6   : >> { %1828 = vrot.lane.b32.xlu1 %v4895_v50, %s4965_s28  ;;  %v1985_v13 = vrot.slane %v1984_v4, 4  ;;  %v1993_v14 = vrot.slane %v1991_v5, 4  ;;  %v1999_v15 = vrot.slane %v1997_v6, 5  ;;  %v2163_v20 = vshll.u32 %v4507_v62, 16  ;;  %v4899_v6 = vld [vmem:[%s5526_s24 + $0x104] sm:$0xff]  }
  0xd7   : >> { %1814 = vrot.lane.b32.xlu0 %v4896_v57, %s4965_s28  ;;  %v2146_v18 = vsel %vm5545_vm4, %v2141_v9, %v2145_v54  ;;  %v2156_v19 = vsel %vm5545_vm4, %v2151_v10, %v2155_v1  ;;  %v2167_v21 = vshrl.u32 %v4507_v62, 16  ;;  %v2160_v26 = vor.u32 %v2159_v16, %v2155_v1  ;;  %v4594_v57 = vld [vmem:[%s5526_s24 + $0x70] sm:$0xf]  ;;  %v4595_v10 = vld [vmem:[%s5526_s24 + $0x74] sm:$0x1] }
  0xd8   : >> { %v4529_v23 = vcombine.low %v2146_v18, %v2156_v19  ;;  %v1990_v24 = vsel %vm5545_vm4, %v1985_v13, %v1989_v11  ;;  %v1994_v25 = vor.u32 %v1993_v14, %v1989_v11  ;;  %v2165_v27 = vrot.slane %v2163_v20, 5 }
  0xd9   : >> { %v2169_v28 = vrot.slane %v2167_v21, 4  ;;  %v2173_v29 = vshll.u32 %v4508_v12, 16  ;;  %v2643_v32 = vshrl.u32 %v4591_v17, 16  ;;  %v2161_v34 = vrot.slane %v2160_v26, 4  ;;  %v4900_v12 = vld [vmem:[%s5526_s24 + $0x6c] sm:$0xff]  }
  0xda   : >> { %1830 = vrot.lane.b32.xlu1 %v4897_v7, %s4965_s28  ;;  %v1995_v33 = vrot.slane %v1994_v25, 4  ;;  %v2646_v35 = vshll.u32 %v4591_v17, 16  ;;  %v2652_v36 = vshll.u32 %v4592_v22, 16  ;;  %v2656_v42 = vshrl.u32 %v4592_v22, 16  ;;  %v4614_v17 = vld [vmem:[%s5526_s24 + $0x110] sm:$0xf] }
  0xdb   : >> { %2317 = vrot.lane.b32.xlu0 %v4521_v8, %s4966_s29  ;;  %v2170_v38 = vor.u32 %v2169_v28, %v2165_v27  ;;  %v2175_v39 = vrot.slane %v2173_v29, 5  ;;  %v2645_v41 = vrot.slane %v2643_v32, 4  ;;  %v2166_v45 = vsel %vm5545_vm4, %v2161_v34, %v2165_v27  ;;  %v4615_v26 = vld [vmem:[%s5526_s24 + $0x114] sm:$0x1]  ;;  %v4901_v28 = vld [vmem:[%s5526_s24 + $0x10c] sm:$0xff]  }
  0xdc   : >> { %v2000_v44 = vsel %vm5545_vm4, %v1995_v33, %v1999_v15  ;;  %v2648_v46 = vrot.slane %v2646_v35, 5  ;;  %v2654_v47 = vrot.slane %v2652_v36, 5  ;;  %v2658_v51 = vrot.slane %v2656_v42, 4  ;;  %v509_v34 = vld [vmem:[%s5526_s24 + $0x50] sm:$0xf] }
  0xdd   : >> { %v4522_v49 = vcombine.low %v1990_v24, %v2000_v44  ;;  %v2171_v50 = vrot.slane %v2170_v38, 4  ;;  %v2662_v52 = vshll.u32 %v4593_v30, 16  ;;  %v2666_v54 = vshrl.u32 %v4593_v30, 16  ;;  %v5822_v35 = vpop.permute.xlu1 %1138 }
  0xde   : >> { %2333 = vrot.lane.b32.xlu1 %v4529_v23, %s4966_s29  ;;  %v2649_v53 = vor.u32 %v2648_v46, %v2645_v41  ;;  %v2819_v55 = vshrl.u32 %v4611_v37, 16  ;;  %v2822_v56 = vshll.u32 %v4611_v37, 16  ;;  %v2659_v59 = vor.u32 %v2658_v51, %v2654_v47  ;;  %v5814_v18 = vpop.permute.xlu0 %1122  ;;  %v511_v46 = vld [vmem:[%s5526_s24 + $0x58] sm:$0xf]  ;;  %v529_v51 = vld [vmem:[%s5526_s24 + $0xf0] sm:$0xf] }
  0xdf   : >> { %2319 = vrot.lane.b32.xlu0 %v4522_v49, %s4966_s29  ;;  %v2176_v58 = vsel %vm5545_vm4, %v2171_v50, %v2175_v39  ;;  %v2664_v60 = vrot.slane %v2662_v52, 5  ;;  %v2828_v61 = vshll.u32 %v4612_v43, 16  ;;  %v2832_v4 = vshrl.u32 %v4612_v43, 16 }
  0xe0   : >> { %v4530_v62 = vcombine.low %v2166_v45, %v2176_v58  ;;  %v2650_v63 = vrot.slane %v2649_v53, 4  ;;  %v2821_v0 = vrot.slane %v2819_v55, 4  ;;  %v2824_v1 = vrot.slane %v2822_v56, 5  ;;  %v510_v45 = vld [vmem:[%s5526_s24 + $0x54] sm:$0xf] }
  0xe1   : >> { %v2660_v2 = vrot.slane %v2659_v59, 4  ;;  %v2830_v3 = vrot.slane %v2828_v61, 5  ;;  %v2838_v5 = vshll.u32 %v4613_v48, 16  ;;  %v2842_v9 = vshrl.u32 %v4613_v48, 16  ;;  %v530_v56 = vld [vmem:[%s5526_s24 + $0xf4] sm:$0xf] }
  0xe2   : >> { %2335 = vrot.lane.b32.xlu1 %v4530_v62, %s4966_s29  ;;  %v2655_v7 = vsel %vm5545_vm4, %v2650_v63, %v2654_v47  ;;  %v2825_v8 = vor.u32 %v2824_v1, %v2821_v0  ;;  %v2668_v11 = vrot.slane %v2666_v54, 4  ;;  %v2834_v14 = vrot.slane %v2832_v4, 4  ;;  %v5832_v52 = vpop.permute.xlu0 %1124  ;;  %v531_v1 = vld [vmem:[%s5526_s24 + $0xf8] sm:$0xf] }
  0xe3   : >> { %2497 = vrot.lane.b32.xlu0 %v4898_v40, %s4967_s30  ;;  %v2665_v13 = vsel %vm5545_vm4, %v2660_v2, %v2664_v60  ;;  %v2840_v15 = vrot.slane %v2838_v5, 5  ;;  %v2672_v16 = vshll.u32 %v4594_v57, 16  ;;  %v2676_v22 = vshrl.u32 %v4594_v57, 16  ;;  %v5842_v2 = vpop.permute.xlu1 %1140 }
  0xe4   : >> { %v4628_v19 = vcombine.low %v2655_v7, %v2665_v13  ;;  %v2826_v20 = vrot.slane %v2825_v8, 4  ;;  %v2669_v21 = vor.u32 %v2668_v11, %v2664_v60  ;;  %v2835_v23 = vor.u32 %v2834_v14, %v2830_v3 }
  0xe5   : >> { %v2674_v24 = vrot.slane %v2672_v16, 5  ;;  %v2682_v25 = vshll.u32 %v4595_v10, 16  ;;  %v2844_v27 = vrot.slane %v2842_v9, 4  ;;  %v2678_v32 = vrot.slane %v2676_v22, 4 }
  0xe6   : >> { %2513 = vrot.lane.b32.xlu1 %v4899_v6, %s4967_s30  ;;  %v2831_v29 = vsel %vm5545_vm4, %v2826_v20, %v2830_v3  ;;  %v2670_v30 = vrot.slane %v2669_v21, 4  ;;  %v2848_v33 = vshll.u32 %v4614_v17, 16  ;;  %v2836_v36 = vrot.slane %v2835_v23, 4  ;;  %v512_v21 = vld [vmem:[%s5526_s24 + $0x5c] sm:$0xf] }
  0xe7   : >> { %2499 = vrot.lane.b32.xlu0 %v4900_v12, %s4967_s30  ;;  %v2684_v37 = vrot.slane %v2682_v25, 5  ;;  %v2845_v38 = vor.u32 %v2844_v27, %v2840_v15  ;;  %v2852_v39 = vshrl.u32 %v4614_v17, 16  ;;  %v2679_v42 = vor.u32 %v2678_v32, %v2674_v24 }
  0xe8   : >> { %v2675_v41 = vsel %vm5545_vm4, %v2670_v30, %v2674_v24  ;;  %v2850_v43 = vrot.slane %v2848_v33, 5  ;;  %v2858_v44 = vshll.u32 %v4615_v26, 16  ;;  %v2841_v47 = vsel %vm5545_vm4, %v2836_v36, %v2840_v15  ;;  %v513_v26 = vld [vmem:[%s5526_s24 + $0x60] sm:$0x1] }
  0xe9   : >> { %v2846_v48 = vrot.slane %v2845_v38, 4  ;;  %v2854_v49 = vrot.slane %v2852_v39, 4  ;;  %v631_v50 = vshrl.u32 %v509_v34, 16  ;;  %v4636_v40 = vcombine.low %v2831_v29, %v2841_v47  ;;  %v5855_v32 = vpop.permute.xlu1 %944  ;;  %v4909_v47 = vld [vmem:[%s5526_s24 + $0xa0] sm:$0xff]  }
  0xea   : >> { %2515 = vrot.lane.b32.xlu1 %v4901_v28, %s4967_s30  ;;  %v2680_v53 = vrot.slane %v2679_v42, 4  ;;  %v2860_v54 = vrot.slane %v2858_v44, 5  ;;  %v634_v55 = vshll.u32 %v509_v34, 16  ;;  %v640_v60 = vshll.u32 %v510_v45, 16  ;;  %v4904_v44 = vld [vmem:[%s5526_s24 + $0x8] sm:$0xff]   ;;  %491 = vst.msk [vmem:[#allocation2 + $0x40] sm:$0xff] %vm482_vm5, %v4909_v47 }
  0xeb   : >> { %3002 = vrot.lane.b32.xlu0 %v4628_v19, %s4968_s4  ;;  %v2851_v57 = vsel %vm5545_vm4, %v2846_v48, %v2850_v43  ;;  %v2855_v58 = vor.u32 %v2854_v49, %v2850_v43  ;;  %v633_v59 = vrot.slane %v631_v50, 4  ;;  %v644_v63 = vshrl.u32 %v510_v45, 16  ;;  %v532_v43 = vld [vmem:[%s5526_s24 + $0xfc] sm:$0xf]  ;;  %v4905_v45 = vld [vmem:[%s5526_s24] sm:$0xff]   ;;  %v4920_v48 = vld [vmem:[%s5526_s24 + $0x28] sm:$0xff]  }
  0xec   : >> { %v2685_v61 = vsel %vm5545_vm4, %v2680_v53, %v2684_v37  ;;  %v636_v62 = vrot.slane %v634_v55, 5  ;;  %v650_v0 = vshll.u32 %v511_v46, 16  ;;  %v642_v5 = vrot.slane %v640_v60, 5  ;;  %v5848_v15 = vpop.permute.xlu0 %942  ;;  %v4922_v49 = vld [vmem:[%s5526_s24 + $0xc8] sm:$0xff]   ;;  %484 = vst.msk [vmem:[#allocation2 + $0x8] sm:$0xff] %vm482_vm5, %v4904_v44  ;;  %483 = vst.msk [vmem:[#allocation2] sm:$0xff] %vm482_vm5, %v4905_v45 }
  0xed   : >> { %v4629_v3 = vcombine.low %v2675_v41, %v2685_v61  ;;  %v2856_v4 = vrot.slane %v2855_v58, 4  ;;  %v654_v6 = vshrl.u32 %v511_v46, 16  ;;  %v646_v8 = vrot.slane %v644_v63, 4  ;;  %v4908_v46 = vld [vmem:[%s5526_s24 + $0xa8] sm:$0xff]   ;;  %v4924_v61 = vld [vmem:[%s5526_s24 + $0xd0] sm:$0xff]   ;;  %485 = vst.msk [vmem:[#allocation2 + $0x10] sm:$0xff] %vm482_vm5, %v4920_v48 }
  0xee   : >> { %3018 = vrot.lane.b32.xlu1 %v4636_v40, %s4968_s4  ;;  %v637_v7 = vor.u32 %v636_v62, %v633_v59  ;;  %v652_v9 = vrot.slane %v650_v0, 5  ;;  %v807_v10 = vshrl.u32 %v529_v51, 16  ;;  %v810_v12 = vshll.u32 %v529_v51, 16  ;;  %v4937_v62 = vld [vmem:[%s5526_s24 + $0x50] sm:$0xff]   ;;  %492 = vst.msk [vmem:[#allocation2 + $0x48] sm:$0xff] %vm482_vm5, %v4908_v46  ;;  %493 = vst.msk [vmem:[#allocation2 + $0x50] sm:$0xff] %vm482_vm5, %v4922_v49 }
  0xef   : >> { %3004 = vrot.lane.b32.xlu0 %v4629_v3, %s4968_s4  ;;  %v2861_v11 = vsel %vm5545_vm4, %v2856_v4, %v2860_v54  ;;  %v816_v13 = vshll.u32 %v530_v56, 16  ;;  %v820_v14 = vshrl.u32 %v530_v56, 16  ;;  %v647_v19 = vor.u32 %v646_v8, %v642_v5  ;;  %v533_v54 = vld [vmem:[%s5526_s24 + $0x100] sm:$0x1]  ;;  %v4923_v56 = vld [vmem:[%s5526_s24 + $0x30] sm:$0xff]   ;;  %494 = vst.msk [vmem:[#allocation2 + $0x58] sm:$0xff] %vm482_vm5, %v4924_v61 }
  0xf0   : >> { %v4637_v16 = vcombine.low %v2851_v57, %v2861_v11  ;;  %v638_v17 = vrot.slane %v637_v7, 4  ;;  %v809_v20 = vrot.slane %v807_v10, 4  ;;  %v812_v22 = vrot.slane %v810_v12, 5  ;;  %v4383_v4 = vld [vmem:[%s5526_s24 + $0x64] sm:$0xf]  ;;  %486 = vst.msk [vmem:[#allocation2 + $0x18] sm:$0xff] %vm482_vm5, %v4923_v56 }
  0xf1   : >> { %v818_v23 = vrot.slane %v816_v13, 5  ;;  %v822_v24 = vrot.slane %v820_v14, 4  ;;  %v826_v25 = vshll.u32 %v531_v1, 16  ;;  %v648_v28 = vrot.slane %v647_v19, 4  ;;  %v4384_v10 = vld [vmem:[%s5526_s24 + $0x68] sm:$0xf] }
  0xf2   : >> { %3020 = vrot.lane.b32.xlu1 %v4637_v16, %s4968_s4  ;;  %v643_v27 = vsel %vm5545_vm4, %v638_v17, %v642_v5  ;;  %v830_v29 = vshrl.u32 %v531_v1, 16  ;;  %v656_v30 = vrot.slane %v654_v6, 4  ;;  %v813_v33 = vor.u32 %v812_v22, %v809_v20  ;;  %v5880_v14 = vld [vmem:[%s5526_s24 + $0x6c] sm:$0xf]  ;;  %v4403_v16 = vld [vmem:[%s5526_s24 + $0x104] sm:$0xf] }
  0xf3   : >> { %v823_v34 = vor.u32 %v822_v24, %v818_v23  ;;  %v828_v36 = vrot.slane %v826_v25, 5  ;;  %v660_v37 = vshll.u32 %v512_v21, 16  ;;  %v653_v38 = vsel %vm5545_vm4, %v648_v28, %v652_v9  ;;  %487 = vst.msk [vmem:[#allocation2 + $0x20] sm:$0xff] %vm482_vm5, %v4937_v62  ;;  %v4405_v47 = vld [vmem:[%s5526_s24 + $0x10c] sm:$0xf] }
  0xf4   : >> { %v657_v39 = vor.u32 %v656_v30, %v652_v9  ;;  %v664_v41 = vshrl.u32 %v512_v21, 16  ;;  %v670_v42 = vshll.u32 %v513_v26, 16  ;;  %v4312_v50 = vcombine.low %v643_v27, %v653_v38  ;;  %v959_v55 = vpop.permute.xlu0 %958  ;;  %v961_v9 = vpop.permute.xlu1 %960  ;;  %v4404_v21 = vld [vmem:[%s5526_s24 + $0x108] sm:$0xf]  ;;  %992 = vst.msk [vmem:[#allocation2 + $0x8] sm:$0xff] %vm990_vm6, %v5855_v32  ;;  %991 = vst.msk [vmem:[#allocation2] sm:$0xff] %vm990_vm6, %v5848_v15 }
  0xf5   : >> { %v814_v51 = vrot.slane %v813_v33, 4  ;;  %v824_v40 = vrot.slane %v823_v34, 4  ;;  %v662_v53 = vrot.slane %v660_v37, 5  ;;  %v832_v60 = vrot.slane %v830_v29, 4  ;;  %1000 = vst.msk [vmem:[#allocation2 + $0x48] sm:$0xff] %vm990_vm6, %v961_v9  ;;  %999 = vst.msk [vmem:[#allocation2 + $0x40] sm:$0xff] %vm990_vm6, %v959_v55 }
  0xf6   : >> { %v658_v57 = vrot.slane %v657_v39, 4  ;;  %v666_v58 = vrot.slane %v664_v41, 4  ;;  %v672_v59 = vrot.slane %v670_v42, 5  ;;  %950 = vrot.lane.b32.xlu0 %v4312_v50, %s4963_s26  ;;  %v836_v1 = vshll.u32 %v532_v43, 16  ;;  %v4938_v27 = vld [vmem:[%s5526_s24 + $0xf0] sm:$0xff]   ;;  %v4939_v37 = vld [vmem:[%s5526_s24 + $0x58] sm:$0xff]  }
  0xf7   : >> { %v819_v63 = vsel %vm5545_vm4, %v814_v51, %v818_v23  ;;  %v829_v0 = vsel %vm5545_vm4, %v824_v40, %v828_v36  ;;  %v840_v3 = vshrl.u32 %v532_v43, 16  ;;  %v833_v8 = vor.u32 %v832_v60, %v828_v36  ;;  %495 = vst.msk [vmem:[#allocation2 + $0x60] sm:$0xff] %vm482_vm5, %v4938_v27  ;;  %v4902_v38 = vld [vmem:[%s5526_s24 + $0x64] sm:$0xff]   ;;  %v4386_v50 = vld [vmem:[%s5526_s24 + $0x70] sm:$0xf]  ;;  %488 = vst.msk [vmem:[#allocation2 + $0x28] sm:$0xff] %vm482_vm5, %v4939_v37 }
  0xf8   : >> { %v4320_v5 = vcombine.low %v819_v63, %v829_v0  ;;  %v663_v6 = vsel %vm5545_vm4, %v658_v57, %v662_v53  ;;  %v667_v7 = vor.u32 %v666_v58, %v662_v53  ;;  %v838_v11 = vrot.slane %v836_v1, 5  ;;  %v1628_v26 = vpop.permute.xlu0 %1627  ;;  %v4903_v40 = vld [vmem:[%s5526_s24 + $0x104] sm:$0xff]   ;;  %v4906_v56 = vld [vmem:[%s5526_s24 + $0x6c] sm:$0xff]   ;;  %v4387_v61 = vld [vmem:[%s5526_s24 + $0x74] sm:$0x1]  ;;  %1171 = vst.msk [vmem:[#allocation2] sm:$0xff] %vm1170_vm7, %v5814_v18 }
  0xf9   : >> { %v842_v12 = vrot.slane %v840_v3, 4  ;;  %v846_v13 = vshll.u32 %v533_v54, 16  ;;  %v834_v19 = vrot.slane %v833_v8, 4  ;;  %v1316_v20 = vshrl.u32 %v4383_v4, 16  ;;  %v4406_v3 = vld [vmem:[%s5526_s24 + $0x110] sm:$0xf] }
  0xfa   : >> { %966 = vrot.lane.b32.xlu1 %v4320_v5, %s4963_s26  ;;  %v668_v17 = vrot.slane %v667_v7, 4  ;;  %v1319_v24 = vshll.u32 %v4383_v4, 16  ;;  %v1325_v25 = vshll.u32 %v4384_v10, 16  ;;  %v1329_v32 = vshrl.u32 %v4384_v10, 16  ;;  %1172 = vst.msk [vmem:[#allocation2 + $0x8] sm:$0xff] %vm1170_vm7, %v5832_v52  ;;  %1179 = vst.msk [vmem:[#allocation2 + $0x40] sm:$0xff] %vm1170_vm7, %v5822_v35 }
  0xfb   : >> { %v843_v22 = vor.u32 %v842_v12, %v838_v11  ;;  %v848_v23 = vrot.slane %v846_v13, 5  ;;  %v839_v29 = vsel %vm5545_vm4, %v834_v19, %v838_v11  ;;  %v1318_v30 = vrot.slane %v1316_v20, 4  ;;  %1180 = vst.msk [vmem:[#allocation2 + $0x48] sm:$0xff] %vm1170_vm7, %v5842_v2  ;;  %v4407_v10 = vld [vmem:[%s5526_s24 + $0x114] sm:$0x1]  ;;  %v4940_v35 = vld [vmem:[%s5526_s24 + $0xf8] sm:$0xff]  }
  0xfc   : >> { %v673_v28 = vsel %vm5545_vm4, %v668_v17, %v672_v59  ;;  %v1321_v34 = vrot.slane %v1319_v24, 5  ;;  %v1327_v36 = vrot.slane %v1325_v25, 5  ;;  %v1331_v39 = vrot.slane %v1329_v32, 4  ;;  %v1644_v44 = vpop.permute.xlu1 %1643  ;;  %1676 = vst.msk [vmem:[#allocation2] sm:$0xff] %vm1675_vm8, %v1628_v26 }
  0xfd   : >> { %v4313_v15 = vcombine.low %v663_v6, %v673_v28  ;;  %v844_v33 = vrot.slane %v843_v22, 4  ;;  %v1335_v41 = vshll.u32 %v5880_v14, 16  ;;  %v1339_v42 = vshrl.u32 %v5880_v14, 16  ;;  %1684 = vst.msk [vmem:[#allocation2 + $0x40] sm:$0xff] %vm1675_vm8, %v1644_v44  ;;  %v4489_v22 = vld [vmem:[%s5526_s24 + $0x78] sm:$0xf] }
  0xfe   : >> { %v1492_v43 = vshrl.u32 %v4403_v16, 16  ;;  %v1322_v46 = vor.u32 %v1321_v34, %v1318_v30  ;;  %v1495_v48 = vshll.u32 %v4403_v16, 16  ;;  %v1501_v49 = vshll.u32 %v4404_v21, 16  ;;  %v4907_v16 = vld [vmem:[%s5526_s24 + $0x10c] sm:$0xff]   ;;  %496 = vst.msk [vmem:[#allocation2 + $0x68] sm:$0xff] %vm482_vm5, %v4940_v35 }
  0xff   : >> { %952 = vrot.lane.b32.xlu0 %v4313_v15, %s4963_s26  ;;  %v849_v45 = vsel %vm5545_vm4, %v844_v33, %v848_v23  ;;  %v1332_v53 = vor.u32 %v1331_v39, %v1327_v36  ;;  %v1337_v54 = vrot.slane %v1335_v41, 5  ;;  %v1505_v60 = vshrl.u32 %v4404_v21, 16  ;;  %v5954_v44 = vld [vmem:[%s5526_s24 + $0x80] sm:$0xf] }
 0x100   : >> { %v4321_v51 = vcombine.low %v839_v29, %v849_v45  ;;  %v1494_v55 = vrot.slane %v1492_v43, 4  ;;  %v1323_v57 = vrot.slane %v1322_v46, 4  ;;  %v1497_v58 = vrot.slane %v1495_v48, 5 }
 0x101   : >> { %v1503_v59 = vrot.slane %v1501_v49, 5  ;;  %v1630_v62 = vpop.permute.xlu0 %1629  ;;  %v1333_v63 = vrot.slane %v1332_v53, 4  ;;  %v1511_v0 = vshll.u32 %v4405_v47, 16  ;;  %v1515_v1 = vshrl.u32 %v4405_v47, 16  ;;  %v4509_v53 = vld [vmem:[%s5526_s24 + $0x118] sm:$0xf] }
 0x102   : >> { %968 = vrot.lane.b32.xlu1 %v4321_v51, %s4963_s26  ;;  %v1328_v4 = vsel %vm5545_vm4, %v1323_v57, %v1327_v36  ;;  %v1498_v5 = vor.u32 %v1497_v58, %v1494_v55  ;;  %v1507_v6 = vrot.slane %v1505_v60, 4  ;;  %v1341_v9 = vrot.slane %v1339_v42, 4  ;;  %1677 = vst.msk [vmem:[#allocation2 + $0x8] sm:$0xff] %vm1675_vm8, %v1630_v62  ;;  %v4510_v58 = vld [vmem:[%s5526_s24 + $0x11c] sm:$0xf] }
 0x103   : >> { %1130 = vrot.lane.b32.xlu0 %v4902_v38, %s4962_s25  ;;  %v1338_v7 = vsel %vm5545_vm4, %v1333_v63, %v1337_v54  ;;  %v1513_v8 = vrot.slane %v1511_v0, 5  ;;  %v1345_v18 = vshll.u32 %v4386_v50, 16  ;;  %v1349_v13 = vshrl.u32 %v4386_v50, 16  ;;  %v4490_v38 = vld [vmem:[%s5526_s24 + $0x7c] sm:$0xf] }
 0x104   : >> { %v1646_v52 = vpop.permute.xlu1 %1645  ;;  %v4417_v11 = vcombine.low %v1328_v4, %v1338_v7  ;;  %v1499_v12 = vrot.slane %v1498_v5, 4  ;;  %v1508_v2 = vor.u32 %v1507_v6, %v1503_v59  ;;  %v1342_v17 = vor.u32 %v1341_v9, %v1337_v54  ;;  %v4910_v62 = vld [vmem:[%s5526_s24 + $0x78] sm:$0xff]   ;;  %v4511_v5 = vld [vmem:[%s5526_s24 + $0x120] sm:$0xf] }
 0x105   : >> { %1685 = vst.msk [vmem:[#allocation2 + $0x48] sm:$0xff] %vm1675_vm8, %v1646_v52  ;;  %v1809_v14 = vpop.permute.xlu0 %1808  ;;  %v1347_v19 = vrot.slane %v1345_v18, 5  ;;  %v1355_v20 = vshll.u32 %v4387_v61, 16  ;;  %v1517_v21 = vrot.slane %v1515_v1, 4  ;;  %v1351_v25 = vrot.slane %v1349_v13, 4 }
 0x106   : >> { %1146 = vrot.lane.b32.xlu1 %v4903_v40, %s4962_s25  ;;  %v1504_v23 = vsel %vm5545_vm4, %v1499_v12, %v1503_v59  ;;  %v1509_v24 = vrot.slane %v1508_v2, 4  ;;  %v1521_v26 = vshll.u32 %v4406_v3, 16  ;;  %v1343_v27 = vrot.slane %v1342_v17, 4  ;;  %1857 = vst.msk [vmem:[#allocation2] sm:$0xff] %vm1856_vm9, %v1809_v14  ;;  %v4492_v52 = vld [vmem:[%s5526_s24 + $0x84] sm:$0xf] }
 0x107   : >> { %1132 = vrot.lane.b32.xlu0 %v4906_v56, %s4962_s25  ;;  %v1357_v28 = vrot.slane %v1355_v20, 5  ;;  %v1518_v29 = vor.u32 %v1517_v21, %v1513_v8  ;;  %v1525_v30 = vshrl.u32 %v4406_v3, 16  ;;  %v1352_v33 = vor.u32 %v1351_v25, %v1347_v19  ;;  %v4493_v14 = vld [vmem:[%s5526_s24 + $0x88] sm:$0x1]  ;;  %v4912_v17 = vld [vmem:[%s5526_s24 + $0x80] sm:$0xff]  }
 0x108   : >> { %v1825_v32 = vpop.permute.xlu1 %1824  ;;  %v1514_v15 = vsel %vm5545_vm4, %v1509_v24, %v1513_v8  ;;  %v1523_v34 = vrot.slane %v1521_v26, 5  ;;  %v1531_v36 = vshll.u32 %v4407_v10, 16  ;;  %v1348_v41 = vsel %vm5545_vm4, %v1343_v27, %v1347_v19 }
 0x109   : >> { %v1811_v37 = vpop.permute.xlu0 %1810  ;;  %v4425_v39 = vcombine.low %v1504_v23, %v1514_v15  ;;  %v1519_v42 = vrot.slane %v1518_v29, 4  ;;  %v1527_v43 = vrot.slane %v1525_v30, 4  ;;  %v1353_v45 = vrot.slane %v1352_v33, 4  ;;  %1865 = vst.msk [vmem:[#allocation2 + $0x40] sm:$0xff] %vm1856_vm9, %v1825_v32 }
 0x10a   : >> { %1148 = vrot.lane.b32.xlu1 %v4907_v16, %s4962_s25  ;;  %v1533_v46 = vrot.slane %v1531_v36, 5  ;;  %v2002_v47 = vshrl.u32 %v4489_v22, 16  ;;  %1858 = vst.msk [vmem:[#allocation2 + $0x8] sm:$0xff] %vm1856_vm9, %v1811_v37  ;;  %v2005_v51 = vshll.u32 %v4489_v22, 16  ;;  %v2011_v40 = vshll.u32 %v4490_v38, 16 }
 0x10b   : >> { %1635 = vrot.lane.b32.xlu0 %v4417_v11, %s4964_s27  ;;  %v1524_v48 = vsel %vm5545_vm4, %v1519_v42, %v1523_v34  ;;  %v1528_v49 = vor.u32 %v1527_v43, %v1523_v34  ;;  %v1358_v54 = vsel %vm5545_vm4, %v1353_v45, %v1357_v28  ;;  %v2015_v56 = vshrl.u32 %v4490_v38, 16  ;;  %v4911_v11 = vld [vmem:[%s5526_s24 + $0x118] sm:$0xff]   ;;  %v4512_v36 = vld [vmem:[%s5526_s24 + $0x124] sm:$0xf] }
 0x10c   : >> { %v1827_v50 = vpop.permute.xlu1 %1826  ;;  %v2004_v55 = vrot.slane %v2002_v47, 4  ;;  %v2021_v57 = vshll.u32 %v5954_v44, 16  ;;  %v4418_v60 = vcombine.low %v1348_v41, %v1358_v54  ;;  %v2007_v63 = vrot.slane %v2005_v51, 5  ;;  %v4913_v38 = vld [vmem:[%s5526_s24 + $0x120] sm:$0xff]   ;;  %v4513_v47 = vld [vmem:[%s5526_s24 + $0x128] sm:$0x1] }
 0x10d   : >> { %1866 = vst.msk [vmem:[#allocation2 + $0x48] sm:$0xff] %vm1856_vm9, %v1827_v50  ;;  %v2314_v59 = vpop.permute.xlu0 %2313  ;;  %v1529_v61 = vrot.slane %v1528_v49, 4  ;;  %v2013_v0 = vrot.slane %v2011_v40, 5  ;;  %v2017_v1 = vrot.slane %v2015_v56, 4  ;;  %v2025_v4 = vshrl.u32 %v5954_v44, 16 }
 0x10e   : >> { %1651 = vrot.lane.b32.xlu1 %v4425_v39, %s4964_s27  ;;  %v2023_v3 = vrot.slane %v2021_v57, 5  ;;  %v2178_v6 = vshrl.u32 %v4509_v53, 16  ;;  %v2008_v8 = vor.u32 %v2007_v63, %v2004_v55  ;;  %v2181_v9 = vshll.u32 %v4509_v53, 16  ;;  %2362 = vst.msk [vmem:[#allocation2] sm:$0xff] %vm2361_vm10, %v2314_v59  ;;  %v4596_v59 = vld [vmem:[%s5526_s24 + $0x8c] sm:$0xf] }
 0x10f   : >> { %1637 = vrot.lane.b32.xlu0 %v4418_v60, %s4964_s27  ;;  %v1534_v7 = vsel %vm5545_vm4, %v1529_v61, %v1533_v46  ;;  %v2187_v18 = vshll.u32 %v4510_v58, 16  ;;  %v2018_v12 = vor.u32 %v2017_v1, %v2013_v0  ;;  %v2191_v13 = vshrl.u32 %v4510_v58, 16  ;;  %v4597_v60 = vld [vmem:[%s5526_s24 + $0x90] sm:$0xf]  ;;  %v6003_v1 = vld [vmem:[%s5526_s24 + $0x94] sm:$0xf] }
 0x110   : >> { %v2330_v10 = vpop.permute.xlu1 %2329  ;;  %v4426_v35 = vcombine.low %v1524_v48, %v1534_v7  ;;  %v2180_v2 = vrot.slane %v2178_v6, 4  ;;  %v2009_v19 = vrot.slane %v2008_v8, 4  ;;  %v2183_v20 = vrot.slane %v2181_v9, 5  ;;  %v4616_v6 = vld [vmem:[%s5526_s24 + $0x12c] sm:$0xf] }
 0x111   : >> { %v2316_v16 = vpop.permute.xlu0 %2315  ;;  %v2189_v21 = vrot.slane %v2187_v18, 5  ;;  %v2197_v22 = vshll.u32 %v4511_v5, 16  ;;  %v2019_v23 = vrot.slane %v2018_v12, 4  ;;  %v2193_v24 = vrot.slane %v2191_v13, 4  ;;  %2370 = vst.msk [vmem:[#allocation2 + $0x40] sm:$0xff] %vm2361_vm10, %v2330_v10 }
 0x112   : >> { %1653 = vrot.lane.b32.xlu1 %v4426_v35, %s4964_s27  ;;  %v2201_v25 = vshrl.u32 %v4511_v5, 16  ;;  %v2014_v26 = vsel %vm5545_vm4, %v2009_v19, %v2013_v0  ;;  %v2184_v27 = vor.u32 %v2183_v20, %v2180_v2  ;;  %v2027_v29 = vrot.slane %v2025_v4, 4  ;;  %2363 = vst.msk [vmem:[#allocation2 + $0x8] sm:$0xff] %vm2361_vm10, %v2316_v16  ;;  %v4617_v7 = vld [vmem:[%s5526_s24 + $0x130] sm:$0xf] }
 0x113   : >> { %1816 = vrot.lane.b32.xlu0 %v4910_v62, %s4965_s28  ;;  %v2199_v28 = vrot.slane %v2197_v22, 5  ;;  %v2024_v32 = vsel %vm5545_vm4, %v2019_v23, %v2023_v3  ;;  %v2194_v15 = vor.u32 %v2193_v24, %v2189_v21  ;;  %v2031_v33 = vshll.u32 %v4492_v52, 16  ;;  %v4618_v20 = vld [vmem:[%s5526_s24 + $0x134] sm:$0xf] }
 0x114   : >> { %v2332_v30 = vpop.permute.xlu1 %2331  ;;  %v2035_v34 = vshrl.u32 %v4492_v52, 16  ;;  %v4523_v39 = vcombine.low %v2014_v26, %v2024_v32  ;;  %v2185_v41 = vrot.slane %v2184_v27, 4  ;;  %v2028_v42 = vor.u32 %v2027_v29, %v2023_v3 }
 0x115   : >> { %2371 = vst.msk [vmem:[#allocation2 + $0x48] sm:$0xff] %vm2361_vm10, %v2332_v30  ;;  %v2494_v37 = vpop.permute.xlu0 %2493  ;;  %v2041_v43 = vshll.u32 %v4493_v14, 16  ;;  %v2195_v44 = vrot.slane %v2194_v15, 4  ;;  %v2033_v45 = vrot.slane %v2031_v33, 5  ;;  %v2203_v48 = vrot.slane %v2201_v25, 4  ;;  %v4914_v25 = vld [vmem:[%s5526_s24 + $0x8c] sm:$0xff]  }
 0x116   : >> { %1832 = vrot.lane.b32.xlu1 %v4911_v11, %s4965_s28  ;;  %v2037_v46 = vrot.slane %v2035_v34, 4  ;;  %v2190_v49 = vsel %vm5545_vm4, %v2185_v41, %v2189_v21  ;;  %v2029_v50 = vrot.slane %v2028_v42, 4  ;;  %v2207_v40 = vshll.u32 %v4512_v36, 16  ;;  %2542 = vst.msk [vmem:[#allocation2] sm:$0xff] %vm2541_vm11, %v2494_v37  ;;  %v4915_v37 = vld [vmem:[%s5526_s24 + $0x12c] sm:$0xff]  }
 0x117   : >> { %1818 = vrot.lane.b32.xlu0 %v4912_v17, %s4965_s28  ;;  %v2043_v51 = vrot.slane %v2041_v43, 5  ;;  %v2200_v54 = vsel %vm5545_vm4, %v2195_v44, %v2199_v28  ;;  %v2204_v56 = vor.u32 %v2203_v48, %v2199_v28  ;;  %v2211_v57 = vshrl.u32 %v4512_v36, 16  ;;  %v4916_v48 = vld [vmem:[%s5526_s24 + $0x94] sm:$0xff]  }
 0x118   : >> { %v2510_v53 = vpop.permute.xlu1 %2509  ;;  %v2038_v55 = vor.u32 %v2037_v46, %v2033_v45  ;;  %v4531_v61 = vcombine.low %v2190_v49, %v2200_v54  ;;  %v2034_v62 = vsel %vm5545_vm4, %v2029_v50, %v2033_v45  ;;  %v2209_v63 = vrot.slane %v2207_v40, 5  ;;  %v4600_v40 = vld [vmem:[%s5526_s24 + $0x9c] sm:$0x1] }
 0x119   : >> { %v2496_v58 = vpop.permute.xlu0 %2495  ;;  %v2217_v0 = vshll.u32 %v4513_v47, 16  ;;  %v2205_v4 = vrot.slane %v2204_v56, 4  ;;  %v2213_v5 = vrot.slane %v2211_v57, 4  ;;  %2550 = vst.msk [vmem:[#allocation2 + $0x40] sm:$0xff] %vm2541_vm11, %v2510_v53  ;;  %v2687_v18 = vshrl.u32 %v4596_v59, 16 }
 0x11a   : >> { %1834 = vrot.lane.b32.xlu1 %v4913_v38, %s4965_s28  ;;  %v2039_v3 = vrot.slane %v2038_v55, 4  ;;  %2543 = vst.msk [vmem:[#allocation2 + $0x8] sm:$0xff] %vm2541_vm11, %v2496_v58  ;;  %v2690_v10 = vshll.u32 %v4596_v59, 16  ;;  %v2696_v52 = vshll.u32 %v4597_v60, 16  ;;  %v2700_v2 = vshrl.u32 %v4597_v60, 16 }
 0x11b   : >> { %2321 = vrot.lane.b32.xlu0 %v4523_v39, %s4966_s29  ;;  %v2219_v8 = vrot.slane %v2217_v0, 5  ;;  %v2210_v11 = vsel %vm5545_vm4, %v2205_v4, %v2209_v63  ;;  %v2214_v12 = vor.u32 %v2213_v5, %v2209_v63  ;;  %v2689_v16 = vrot.slane %v2687_v18, 4  ;;  %v4599_v47 = vld [vmem:[%s5526_s24 + $0x98] sm:$0xf]  ;;  %v4620_v63 = vld [vmem:[%s5526_s24 + $0x13c] sm:$0x1] }
 0x11c   : >> { %v2512_v9 = vpop.permute.xlu1 %2511  ;;  %v2044_v35 = vsel %vm5545_vm4, %v2039_v3, %v2043_v51  ;;  %v2692_v17 = vrot.slane %v2690_v10, 5  ;;  %v2698_v19 = vrot.slane %v2696_v52, 5  ;;  %v2702_v22 = vrot.slane %v2700_v2, 4  ;;  %v4619_v58 = vld [vmem:[%s5526_s24 + $0x138] sm:$0xf] }
 0x11d   : >> { %2551 = vst.msk [vmem:[#allocation2 + $0x48] sm:$0xff] %vm2541_vm11, %v2512_v9  ;;  %v2999_v13 = vpop.permute.xlu0 %2998  ;;  %v4524_v14 = vcombine.low %v2034_v62, %v2044_v35  ;;  %v2215_v21 = vrot.slane %v2214_v12, 4  ;;  %v2706_v23 = vshll.u32 %v6003_v1, 16  ;;  %v2710_v24 = vshrl.u32 %v6003_v1, 16  ;;  %v514_v5 = vld [vmem:[%s5526_s24 + $0x78] sm:$0xf] }
 0x11e   : >> { %2337 = vrot.lane.b32.xlu1 %v4531_v61, %s4966_s29  ;;  %v2693_v26 = vor.u32 %v2692_v17, %v2689_v16  ;;  %v2863_v27 = vshrl.u32 %v4616_v6, 16  ;;  %v2866_v28 = vshll.u32 %v4616_v6, 16  ;;  %v2872_v29 = vshll.u32 %v4617_v7, 16  ;;  %3047 = vst.msk [vmem:[#allocation2] sm:$0xff] %vm3046_vm12, %v2999_v13  ;;  %v4917_v6 = vld [vmem:[%s5526_s24 + $0x134] sm:$0xff]  }
 0x11f   : >> { %2323 = vrot.lane.b32.xlu0 %v4524_v14, %s4966_s29  ;;  %v2220_v32 = vsel %vm5545_vm4, %v2215_v21, %v2219_v8  ;;  %v2703_v15 = vor.u32 %v2702_v22, %v2698_v19  ;;  %v2708_v33 = vrot.slane %v2706_v23, 5  ;;  %v2876_v34 = vshrl.u32 %v4617_v7, 16  ;;  %v515_v10 = vld [vmem:[%s5526_s24 + $0x7c] sm:$0xf] }
 0x120   : >> { %v3015_v30 = vpop.permute.xlu1 %3014  ;;  %v4532_v36 = vcombine.low %v2210_v11, %v2220_v32  ;;  %v2694_v38 = vrot.slane %v2693_v26, 4  ;;  %v2865_v39 = vrot.slane %v2863_v27, 4  ;;  %v2868_v41 = vrot.slane %v2866_v28, 5 }
 0x121   : >> { %v3001_v42 = vpop.permute.xlu0 %3000  ;;  %v2704_v43 = vrot.slane %v2703_v15, 4  ;;  %v2874_v44 = vrot.slane %v2872_v29, 5  ;;  %v2878_v45 = vrot.slane %v2876_v34, 4  ;;  %v2882_v46 = vshll.u32 %v4618_v20, 16  ;;  %3055 = vst.msk [vmem:[#allocation2 + $0x40] sm:$0xff] %vm3046_vm12, %v3015_v30 }
 0x122   : >> { %2339 = vrot.lane.b32.xlu1 %v4532_v36, %s4966_s29  ;;  %v2699_v49 = vsel %vm5545_vm4, %v2694_v38, %v2698_v19  ;;  %v2869_v50 = vor.u32 %v2868_v41, %v2865_v39  ;;  %v2886_v51 = vshrl.u32 %v4618_v20, 16  ;;  %v2712_v57 = vrot.slane %v2710_v24, 4  ;;  %3048 = vst.msk [vmem:[#allocation2 + $0x8] sm:$0xff] %vm3046_vm12, %v3001_v42  ;;  %v6051_v19 = vld [vmem:[%s5526_s24 + $0x80] sm:$0xf]  ;;  %v4941_v24 = vld [vmem:[%s5526_s24 + $0x78] sm:$0xff]  }
 0x123   : >> { %2501 = vrot.lane.b32.xlu0 %v4914_v25, %s4967_s30  ;;  %v2709_v54 = vsel %vm5545_vm4, %v2704_v43, %v2708_v33  ;;  %v2879_v55 = vor.u32 %v2878_v45, %v2874_v44  ;;  %v2884_v56 = vrot.slane %v2882_v46, 5  ;;  %v2716_v61 = vshll.u32 %v4599_v47, 16  ;;  %v534_v29 = vld [vmem:[%s5526_s24 + $0x118] sm:$0xf]  ;;  %v535_v36 = vld [vmem:[%s5526_s24 + $0x11c] sm:$0xf] }
 0x124   : >> { %v3017_v53 = vpop.permute.xlu1 %3016  ;;  %v4630_v59 = vcombine.low %v2699_v49, %v2709_v54  ;;  %v2870_v60 = vrot.slane %v2869_v50, 4  ;;  %v2720_v62 = vshrl.u32 %v4599_v47, 16  ;;  %v2713_v1 = vor.u32 %v2712_v57, %v2708_v33  ;;  %489 = vst.msk [vmem:[#allocation2 + $0x30] sm:$0xff] %vm482_vm5, %v4941_v24  ;;  %v536_v46 = vld [vmem:[%s5526_s24 + $0x120] sm:$0xf]  ;;  %v4942_v47 = vld [vmem:[%s5526_s24 + $0x118] sm:$0xff]  }
 0x125   : >> { %3056 = vst.msk [vmem:[#allocation2 + $0x48] sm:$0xff] %vm3046_vm12, %v3017_v53  ;;  %v2880_v0 = vrot.slane %v2879_v55, 4  ;;  %v2726_v3 = vshll.u32 %v4600_v40, 16  ;;  %v2888_v4 = vrot.slane %v2886_v51, 4  ;;  %v2718_v8 = vrot.slane %v2716_v61, 5 }
 0x126   : >> { %2517 = vrot.lane.b32.xlu1 %v4915_v37, %s4967_s30  ;;  %v2875_v7 = vsel %vm5545_vm4, %v2870_v60, %v2874_v44  ;;  %v2722_v9 = vrot.slane %v2720_v62, 4  ;;  %v2892_v18 = vshll.u32 %v4619_v58, 16  ;;  %v2714_v35 = vrot.slane %v2713_v1, 4  ;;  %v517_v57 = vld [vmem:[%s5526_s24 + $0x84] sm:$0xf]  ;;  %497 = vst.msk [vmem:[#allocation2 + $0x70] sm:$0xff] %vm482_vm5, %v4942_v47 }
 0x127   : >> { %2503 = vrot.lane.b32.xlu0 %v4916_v48, %s4967_s30  ;;  %v2885_v52 = vsel %vm5545_vm4, %v2880_v0, %v2884_v56  ;;  %v2728_v11 = vrot.slane %v2726_v3, 5  ;;  %v2889_v12 = vor.u32 %v2888_v4, %v2884_v56  ;;  %v2896_v17 = vshrl.u32 %v4619_v58, 16  ;;  %v3063_v56 = vld [vmem:[#allocation2] sm:$0xff] }
 0x128   : >> { %v947_v2 = vpop.permute.xlu0 %946  ;;  %v4638_v13 = vcombine.low %v2875_v7, %v2885_v52  ;;  %v2723_v14 = vor.u32 %v2722_v9, %v2718_v8  ;;  %v2894_v16 = vrot.slane %v2892_v18, 5  ;;  %v2719_v20 = vsel %vm5545_vm4, %v2714_v35, %v2718_v8  ;;  %v3071_v1 = vld [vmem:[#allocation2 + $0x40] sm:$0xff] }
 0x129   : >> { %993 = vst.msk [vmem:[#allocation2 + $0x10] sm:$0xff] %vm990_vm6, %v947_v2  ;;  %v2890_v21 = vrot.slane %v2889_v12, 4  ;;  %v2902_v22 = vshll.u32 %v4620_v63, 16  ;;  %v675_v23 = vshrl.u32 %v514_v5, 16  ;;  %v2898_v26 = vrot.slane %v2896_v17, 4  ;;  %v3064_v0 = vld [vmem:[#allocation2 + $0x8] sm:$0xff] }
 0x12a   : >> { %2519 = vrot.lane.b32.xlu1 %v4917_v6, %s4967_s30  ;;  %v2724_v25 = vrot.slane %v2723_v14, 4  ;;  %v678_v27 = vshll.u32 %v514_v5, 16  ;;  %v684_v28 = vshll.u32 %v515_v10, 16  ;;  %v688_v34 = vshrl.u32 %v515_v10, 16  ;;  %v518_v63 = vld [vmem:[%s5526_s24 + $0x88] sm:$0x1] }
 0x12b   : >> { %3006 = vrot.lane.b32.xlu0 %v4630_v59, %s4968_s4  ;;  %v2895_v32 = vsel %vm5545_vm4, %v2890_v21, %v2894_v16  ;;  %v2904_v15 = vrot.slane %v2902_v22, 5  ;;  %v677_v33 = vrot.slane %v675_v23, 4  ;;  %v2899_v38 = vor.u32 %v2898_v26, %v2894_v16  ;;  %v537_v7 = vld [vmem:[%s5526_s24 + $0x124] sm:$0xf] }
 0x12c   : >> { %v963_v30 = vpop.permute.xlu1 %962  ;;  %v2729_v37 = vsel %vm5545_vm4, %v2724_v25, %v2728_v11  ;;  %v680_v39 = vrot.slane %v678_v27, 5  ;;  %v686_v41 = vrot.slane %v684_v28, 5  ;;  %v690_v43 = vrot.slane %v688_v34, 4  ;;  %v3072_v8 = vld [vmem:[#allocation2 + $0x48] sm:$0xff]  ;;  %v4943_v14 = vld [vmem:[%s5526_s24 + $0x80] sm:$0xff]  }
 0x12d   : >> { %1001 = vst.msk [vmem:[#allocation2 + $0x50] sm:$0xff] %vm990_vm6, %v963_v30  ;;  %v4631_v42 = vcombine.low %v2719_v20, %v2729_v37  ;;  %v694_v44 = vshll.u32 %v6051_v19, 16  ;;  %v698_v45 = vshrl.u32 %v6051_v19, 16  ;;  %v2900_v48 = vrot.slane %v2899_v38, 4  ;;  %v538_v25 = vld [vmem:[%s5526_s24 + $0x128] sm:$0x1] }
 0x12e   : >> { %3022 = vrot.lane.b32.xlu1 %v4638_v13, %s4968_s4  ;;  %v681_v49 = vor.u32 %v680_v39, %v677_v33  ;;  %v851_v50 = vshrl.u32 %v534_v29, 16  ;;  %v854_v51 = vshll.u32 %v534_v29, 16  ;;  %v691_v40 = vor.u32 %v690_v43, %v686_v41  ;;  %490 = vst.msk [vmem:[#allocation2 + $0x38] sm:$0xff] %vm482_vm5, %v4943_v14  ;;  %v4944_v26 = vld [vmem:[%s5526_s24 + $0x120] sm:$0xff]   ;;  %v4389_v39 = vld [vmem:[%s5526_s24 + $0x90] sm:$0xf] }
 0x12f   : >> { %3008 = vrot.lane.b32.xlu0 %v4631_v42, %s4968_s4  ;;  %v696_v53 = vrot.slane %v694_v44, 5  ;;  %v860_v54 = vshll.u32 %v535_v36, 16  ;;  %v864_v55 = vshrl.u32 %v535_v36, 16  ;;  %v2905_v59 = vsel %vm5545_vm4, %v2900_v48, %v2904_v15  ;;  %v4388_v15 = vld [vmem:[%s5526_s24 + $0x8c] sm:$0xf]  ;;  %498 = vst.msk [vmem:[#allocation2 + $0x78] sm:$0xff] %vm482_vm5, %v4944_v26 }
 0x130   : >> { %v682_v60 = vrot.slane %v681_v49, 4  ;;  %v853_v61 = vrot.slane %v851_v50, 4  ;;  %v856_v62 = vrot.slane %v854_v51, 5  ;;  %v4639_v3 = vcombine.low %v2895_v32, %v2905_v59  ;;  %v4408_v59 = vld [vmem:[%s5526_s24 + $0x12c] sm:$0xf] }
 0x131   : >> { %v949_v58 = vpop.permute.xlu0 %948  ;;  %v692_v4 = vrot.slane %v691_v40, 4  ;;  %v862_v5 = vrot.slane %v860_v54, 5  ;;  %v866_v6 = vrot.slane %v864_v55, 4  ;;  %v870_v10 = vshll.u32 %v536_v46, 16  ;;  %v4390_v40 = vld [vmem:[%s5526_s24 + $0x94] sm:$0xf] }
 0x132   : >> { %994 = vst.msk [vmem:[#allocation2 + $0x18] sm:$0xff] %vm990_vm6, %v949_v58  ;;  %v687_v9 = vsel %vm5545_vm4, %v682_v60, %v686_v41  ;;  %v857_v18 = vor.u32 %v856_v62, %v853_v61  ;;  %v874_v52 = vshrl.u32 %v536_v46, 16  ;;  %3024 = vrot.lane.b32.xlu1 %v4639_v3, %s4968_s4  ;;  %vm3103_vm13 = vcmask 392192  }
 0x133   : >> { %v697_v11 = vsel %vm5545_vm4, %v692_v4, %v696_v53  ;;  %v867_v12 = vor.u32 %v866_v6, %v862_v5  ;;  %v700_v2 = vrot.slane %v698_v45, 4  ;;  %v872_v19 = vrot.slane %v870_v10, 5  ;;  %4812 = vmatprep.mubr.msk.bf16.mxu0 %vm3103_vm13, %v3063_v56  ;;  %4828 = vmatprep.mubr.msk.bf16.mxu1 %vm3103_vm13, %v3071_v1  ;;  %v4409_v1 = vld [vmem:[%s5526_s24 + $0x130] sm:$0xf] }
 0x134   : >> { %v965_v35 = vpop.permute.xlu1 %964  ;;  %v4314_v16 = vcombine.low %v687_v9, %v697_v11  ;;  %v858_v17 = vrot.slane %v857_v18, 4  ;;  %v704_v20 = vshll.u32 %v517_v57, 16  ;;  %v708_v23 = vshrl.u32 %v517_v57, 16  ;;  %4813 = vmatmul.mubr.msk.bf16.vlgmr.msra.gmra.mrb[0].mxu0 %vm3103_vm13, %v3064_v0  ;;  %4829 = vmatmul.mubr.msk.bf16.vlgmr.msra.gmra.mrb[0].mxu1 %vm3103_vm13, %v3072_v8  ;;  %v4410_v11 = vld [vmem:[%s5526_s24 + $0x134] sm:$0xf] }
 0x135   : >> { %1002 = vst.msk [vmem:[#allocation2 + $0x58] sm:$0xff] %vm990_vm6, %v965_v35  ;;  %v1127_v13 = vpop.permute.xlu0 %1126  ;;  %v868_v21 = vrot.slane %v867_v12, 4  ;;  %v701_v22 = vor.u32 %v700_v2, %v696_v53  ;;  %v714_v24 = vshll.u32 %v518_v63, 16  ;;  %v876_v29 = vrot.slane %v874_v52, 4 }
 0x136   : >> { %1173 = vst.msk [vmem:[#allocation2 + $0x10] sm:$0xff] %vm1170_vm7, %v1127_v13  ;;  %954 = vrot.lane.b32.xlu0 %v4314_v16, %s4963_s26  ;;  %v863_v27 = vsel %vm5545_vm4, %v858_v17, %v862_v5  ;;  %v706_v28 = vrot.slane %v704_v20, 5  ;;  %v880_v30 = vshll.u32 %v537_v7, 16  ;;  %v710_v36 = vrot.slane %v708_v23, 4  ;;  %v4925_v16 = vld [vmem:[%s5526_s24 + $0x8c] sm:$0xff]  }
 0x137   : >> { %v873_v33 = vsel %vm5545_vm4, %v868_v21, %v872_v19  ;;  %v702_v34 = vrot.slane %v701_v22, 4  ;;  %v716_v37 = vrot.slane %v714_v24, 5  ;;  %v877_v42 = vor.u32 %v876_v29, %v872_v19  ;;  %v4391_v21 = vld [vmem:[%s5526_s24 + $0x98] sm:$0xf] }
 0x138   : >> { %v1143_v32 = vpop.permute.xlu1 %1142  ;;  %v4322_v41 = vcombine.low %v863_v27, %v873_v33  ;;  %v882_v43 = vrot.slane %v880_v30, 5  ;;  %v884_v44 = vshrl.u32 %v537_v7, 16  ;;  %v711_v46 = vor.u32 %v710_v36, %v706_v28  ;;  %v4392_v30 = vld [vmem:[%s5526_s24 + $0x9c] sm:$0x1] }
 0x139   : >> { %1181 = vst.msk [vmem:[#allocation2 + $0x50] sm:$0xff] %vm1170_vm7, %v1143_v32  ;;  %v1129_v38 = vpop.permute.xlu0 %1128  ;;  %v707_v45 = vsel %vm5545_vm4, %v702_v34, %v706_v28  ;;  %v890_v47 = vshll.u32 %v538_v25, 16  ;;  %v1360_v48 = vshrl.u32 %v4388_v15, 16  ;;  %v878_v49 = vrot.slane %v877_v42, 4 }
 0x13a   : >> { %1174 = vst.msk [vmem:[#allocation2 + $0x18] sm:$0xff] %vm1170_vm7, %v1129_v38  ;;  %970 = vrot.lane.b32.xlu1 %v4322_v41, %s4963_s26  ;;  %v886_v50 = vrot.slane %v884_v44, 4  ;;  %v1363_v53 = vshll.u32 %v4388_v15, 16  ;;  %v1369_v54 = vshll.u32 %v4389_v39, 16  ;;  %v712_v55 = vrot.slane %v711_v46, 4  ;;  %v4926_v15 = vld [vmem:[%s5526_s24 + $0x12c] sm:$0xff]  }
 0x13b   : >> { %v892_v56 = vrot.slane %v890_v47, 5  ;;  %v1362_v57 = vrot.slane %v1360_v48, 4  ;;  %v1373_v58 = vshrl.u32 %v4389_v39, 16  ;;  %v883_v61 = vsel %vm5545_vm4, %v878_v49, %v882_v43  ;;  %v4411_v38 = vld [vmem:[%s5526_s24 + $0x138] sm:$0xf] }
 0x13c   : >> { %v1145_v51 = vpop.permute.xlu1 %1144  ;;  %v887_v62 = vor.u32 %v886_v50, %v882_v43  ;;  %v1365_v63 = vrot.slane %v1363_v53, 5  ;;  %v1371_v0 = vrot.slane %v1369_v54, 5  ;;  %v717_v3 = vsel %vm5545_vm4, %v712_v55, %v716_v37  ;;  %v4927_v41 = vld [vmem:[%s5526_s24 + $0x94] sm:$0xff]  }
 0x13d   : >> { %1182 = vst.msk [vmem:[#allocation2 + $0x58] sm:$0xff] %vm1170_vm7, %v1145_v51  ;;  %v1632_v60 = vpop.permute.xlu0 %1631  ;;  %v1375_v4 = vrot.slane %v1373_v58, 4  ;;  %v1379_v5 = vshll.u32 %v4390_v40, 16  ;;  %v1383_v6 = vshrl.u32 %v4390_v40, 16  ;;  %v4315_v7 = vcombine.low %v707_v45, %v717_v3  ;;  %v4412_v40 = vld [vmem:[%s5526_s24 + $0x13c] sm:$0x1] }
 0x13e   : >> { %1678 = vst.msk [vmem:[#allocation2 + $0x10] sm:$0xff] %vm1675_vm8, %v1632_v60  ;;  %v888_v8 = vrot.slane %v887_v62, 4  ;;  %v1366_v9 = vor.u32 %v1365_v63, %v1362_v57  ;;  %v1536_v18 = vshrl.u32 %v4408_v59, 16  ;;  %v1539_v12 = vshll.u32 %v4408_v59, 16  ;;  %v4494_v62 = vld [vmem:[%s5526_s24 + $0xa0] sm:$0xf] }
 0x13f   : >> { %v1376_v52 = vor.u32 %v1375_v4, %v1371_v0  ;;  %v1381_v35 = vrot.slane %v1379_v5, 5  ;;  %v1545_v2 = vshll.u32 %v4409_v1, 16  ;;  %956 = vrot.lane.b32.xlu0 %v4315_v7, %s4963_s26  ;;  %v1549_v20 = vshrl.u32 %v4409_v1, 16  ;;  %v4495_v4 = vld [vmem:[%s5526_s24 + $0xa4] sm:$0xf] }
 0x140   : >> { %v1648_v10 = vpop.permute.xlu1 %1647  ;;  %v893_v14 = vsel %vm5545_vm4, %v888_v8, %v892_v56  ;;  %v1367_v17 = vrot.slane %v1366_v9, 4  ;;  %v1538_v19 = vrot.slane %v1536_v18, 4  ;;  %v1541_v24 = vrot.slane %v1539_v12, 5  ;;  %v4928_v56 = vld [vmem:[%s5526_s24 + $0x134] sm:$0xff]  }
 0x141   : >> { %1686 = vst.msk [vmem:[#allocation2 + $0x50] sm:$0xff] %vm1675_vm8, %v1648_v10  ;;  %v1634_v13 = vpop.permute.xlu0 %1633  ;;  %v4323_v22 = vcombine.low %v883_v61, %v893_v14  ;;  %v1377_v23 = vrot.slane %v1376_v52, 4  ;;  %v1547_v25 = vrot.slane %v1545_v2, 5  ;;  %v1551_v27 = vrot.slane %v1549_v20, 4  ;;  %v4496_v52 = vld [vmem:[%s5526_s24 + $0xa8] sm:$0xf] }
 0x142   : >> { %1679 = vst.msk [vmem:[#allocation2 + $0x18] sm:$0xff] %vm1675_vm8, %v1634_v13  ;;  %v1372_v26 = vsel %vm5545_vm4, %v1367_v17, %v1371_v0  ;;  %v1555_v28 = vshll.u32 %v4410_v11, 16  ;;  %v1559_v29 = vshrl.u32 %v4410_v11, 16  ;;  %v1542_v34 = vor.u32 %v1541_v24, %v1538_v19 }
 0x143   : >> { %972 = vrot.lane.b32.xlu1 %v4323_v22, %s4963_s26  ;;  %v1382_v33 = vsel %vm5545_vm4, %v1377_v23, %v1381_v35  ;;  %v1385_v36 = vrot.slane %v1383_v6, 4  ;;  %v1389_v37 = vshll.u32 %v4391_v21, 16  ;;  %1134 = vrot.lane.b32.xlu0 %v4925_v16, %s4962_s25  ;;  %v1552_v43 = vor.u32 %v1551_v27, %v1547_v25  ;;  %v4514_v16 = vld [vmem:[%s5526_s24 + $0x140] sm:$0xf]  ;;  %v4515_v23 = vld [vmem:[%s5526_s24 + $0x144] sm:$0xf] }
 0x144   : >> { %v1650_v32 = vpop.permute.xlu1 %1649  ;;  %v4419_v42 = vcombine.low %v1372_v26, %v1382_v33  ;;  %v1557_v44 = vrot.slane %v1555_v28, 5  ;;  %v1393_v45 = vshrl.u32 %v4391_v21, 16  ;;  %v1543_v46 = vrot.slane %v1542_v34, 4 }
 0x145   : >> { %1687 = vst.msk [vmem:[#allocation2 + $0x58] sm:$0xff] %vm1675_vm8, %v1650_v32  ;;  %v1813_v39 = vpop.permute.xlu0 %1812  ;;  %v1386_v47 = vor.u32 %v1385_v36, %v1381_v35  ;;  %v1391_v48 = vrot.slane %v1389_v37, 5  ;;  %v1399_v49 = vshll.u32 %v4392_v30, 16  ;;  %v1553_v50 = vrot.slane %v1552_v43, 4  ;;  %v4516_v36 = vld [vmem:[%s5526_s24 + $0x148] sm:$0xf] }
 0x146   : >> { %1859 = vst.msk [vmem:[#allocation2 + $0x10] sm:$0xff] %vm1856_vm9, %v1813_v39  ;;  %v1395_v51 = vrot.slane %v1393_v45, 4  ;;  %v1561_v53 = vrot.slane %v1559_v29, 4  ;;  %v1565_v54 = vshll.u32 %v4411_v38, 16  ;;  %v1548_v57 = vsel %vm5545_vm4, %v1543_v46, %v1547_v25  ;;  %v4497_v46 = vld [vmem:[%s5526_s24 + $0xac] sm:$0xf] }
 0x147   : >> { %1150 = vrot.lane.b32.xlu1 %v4926_v15, %s4962_s25  ;;  %v1387_v58 = vrot.slane %v1386_v47, 4  ;;  %v1401_v59 = vrot.slane %v1399_v49, 5  ;;  %v1569_v60 = vshrl.u32 %v4411_v38, 16  ;;  %1136 = vrot.lane.b32.xlu0 %v4927_v41, %s4962_s25  ;;  %v1558_v63 = vsel %vm5545_vm4, %v1553_v50, %v1557_v44 }
 0x148   : >> { %v1829_v55 = vpop.permute.xlu1 %1828  ;;  %v1396_v0 = vor.u32 %v1395_v51, %v1391_v48  ;;  %v1562_v1 = vor.u32 %v1561_v53, %v1557_v44  ;;  %v1567_v3 = vrot.slane %v1565_v54, 5  ;;  %v4427_v5 = vcombine.low %v1548_v57, %v1558_v63  ;;  %v4498_v54 = vld [vmem:[%s5526_s24 + $0xb0] sm:$0x1]  ;;  %v4930_v57 = vld [vmem:[%s5526_s24 + $0x140] sm:$0xff]  }
 0x149   : >> { %1867 = vst.msk [vmem:[#allocation2 + $0x50] sm:$0xff] %vm1856_vm9, %v1829_v55  ;;  %v1815_v61 = vpop.permute.xlu0 %1814  ;;  %v1392_v6 = vsel %vm5545_vm4, %v1387_v58, %v1391_v48  ;;  %v1571_v7 = vrot.slane %v1569_v60, 4  ;;  %v1575_v8 = vshll.u32 %v4412_v40, 16  ;;  %v2046_v35 = vshrl.u32 %v4494_v62, 16 }
 0x14a   : >> { %1860 = vst.msk [vmem:[#allocation2 + $0x18] sm:$0xff] %vm1856_vm9, %v1815_v61  ;;  %v1397_v9 = vrot.slane %v1396_v0, 4  ;;  %v1563_v18 = vrot.slane %v1562_v1, 4  ;;  %v2049_v11 = vshll.u32 %v4494_v62, 16  ;;  %v2055_v13 = vshll.u32 %v4495_v4, 16  ;;  %v4931_v0 = vld [vmem:[%s5526_s24 + $0xa8] sm:$0xff]  }
 0x14b   : >> { %1152 = vrot.lane.b32.xlu1 %v4928_v56, %s4962_s25  ;;  %v1572_v12 = vor.u32 %v1571_v7, %v1567_v3  ;;  %v1577_v2 = vrot.slane %v1575_v8, 5  ;;  %v2059_v14 = vshrl.u32 %v4495_v4, 16  ;;  %1639 = vrot.lane.b32.xlu0 %v4419_v42, %s4964_s27  ;;  %v2048_v21 = vrot.slane %v2046_v35, 4  ;;  %v4929_v42 = vld [vmem:[%s5526_s24 + $0xa0] sm:$0xff]   ;;  %v4517_v62 = vld [vmem:[%s5526_s24 + $0x14c] sm:$0xf] }
 0x14c   : >> { %v1831_v10 = vpop.permute.xlu1 %1830  ;;  %v1402_v19 = vsel %vm5545_vm4, %v1397_v9, %v1401_v59  ;;  %v1568_v20 = vsel %vm5545_vm4, %v1563_v18, %v1567_v3  ;;  %v2051_v22 = vrot.slane %v2049_v11, 5  ;;  %v2057_v26 = vrot.slane %v2055_v13, 5  ;;  %v4518_v18 = vld [vmem:[%s5526_s24 + $0x150] sm:$0x1]  ;;  %v4932_v13 = vld [vmem:[%s5526_s24 + $0x148] sm:$0xff]  }
 0x14d   : >> { %1868 = vst.msk [vmem:[#allocation2 + $0x58] sm:$0xff] %vm1856_vm9, %v1831_v10  ;;  %v2318_v17 = vpop.permute.xlu0 %2317  ;;  %v4420_v24 = vcombine.low %v1392_v6, %v1402_v19  ;;  %v1573_v25 = vrot.slane %v1572_v12, 4  ;;  %v2061_v27 = vrot.slane %v2059_v14, 4  ;;  %v2065_v29 = vshll.u32 %v4496_v52, 16 }
 0x14e   : >> { %2364 = vst.msk [vmem:[#allocation2 + $0x10] sm:$0xff] %vm2361_vm10, %v2318_v17  ;;  %v2052_v28 = vor.u32 %v2051_v22, %v2048_v21  ;;  %v2069_v30 = vshrl.u32 %v4496_v52, 16  ;;  %v2222_v32 = vshrl.u32 %v4514_v16, 16  ;;  %v2225_v37 = vshll.u32 %v4514_v16, 16 }
 0x14f   : >> { %1655 = vrot.lane.b32.xlu1 %v4427_v5, %s4964_s27  ;;  %v1578_v33 = vsel %vm5545_vm4, %v1573_v25, %v1577_v2  ;;  %v2062_v34 = vor.u32 %v2061_v27, %v2057_v26  ;;  %v2231_v38 = vshll.u32 %v4515_v23, 16  ;;  %1641 = vrot.lane.b32.xlu0 %v4420_v24, %s4964_s27  ;;  %v2067_v44 = vrot.slane %v2065_v29, 5  ;;  %v4601_v2 = vld [vmem:[%s5526_s24 + $0xb4] sm:$0xf]  ;;  %v4602_v25 = vld [vmem:[%s5526_s24 + $0xb8] sm:$0xf] }
 0x150   : >> { %v2334_v15 = vpop.permute.xlu1 %2333  ;;  %v4428_v41 = vcombine.low %v1568_v20, %v1578_v33  ;;  %v2053_v43 = vrot.slane %v2052_v28, 4  ;;  %v2224_v45 = vrot.slane %v2222_v32, 4  ;;  %v2227_v48 = vrot.slane %v2225_v37, 5 }
 0x151   : >> { %2372 = vst.msk [vmem:[#allocation2 + $0x50] sm:$0xff] %vm2361_vm10, %v2334_v15  ;;  %v2320_v39 = vpop.permute.xlu0 %2319  ;;  %v2063_v47 = vrot.slane %v2062_v34, 4  ;;  %v2233_v49 = vrot.slane %v2231_v38, 5  ;;  %v2235_v50 = vshrl.u32 %v4515_v23, 16  ;;  %v2241_v40 = vshll.u32 %v4516_v36, 16 }
 0x152   : >> { %2365 = vst.msk [vmem:[#allocation2 + $0x18] sm:$0xff] %vm2361_vm10, %v2320_v39  ;;  %v2058_v51 = vsel %vm5545_vm4, %v2053_v43, %v2057_v26  ;;  %v2245_v53 = vshrl.u32 %v4516_v36, 16  ;;  %v2071_v55 = vrot.slane %v2069_v30, 4  ;;  %v2228_v59 = vor.u32 %v2227_v48, %v2224_v45  ;;  %v4603_v34 = vld [vmem:[%s5526_s24 + $0xbc] sm:$0xf] }
 0x153   : >> { %1657 = vrot.lane.b32.xlu1 %v4428_v41, %s4964_s27  ;;  %v2068_v58 = vsel %vm5545_vm4, %v2063_v47, %v2067_v44  ;;  %v2237_v60 = vrot.slane %v2235_v50, 4  ;;  %v2075_v61 = vshll.u32 %v4497_v46, 16  ;;  %1820 = vrot.lane.b32.xlu0 %v4929_v42, %s4965_s28  ;;  %v2243_v3 = vrot.slane %v2241_v40, 5  ;;  %v4621_v42 = vld [vmem:[%s5526_s24 + $0x154] sm:$0xf] }
 0x154   : >> { %v2336_v56 = vpop.permute.xlu1 %2335  ;;  %v4525_v1 = vcombine.low %v2058_v51, %v2068_v58  ;;  %v2072_v4 = vor.u32 %v2071_v55, %v2067_v44  ;;  %v2079_v5 = vshrl.u32 %v4497_v46, 16  ;;  %v2229_v6 = vrot.slane %v2228_v59, 4  ;;  %v4622_v48 = vld [vmem:[%s5526_s24 + $0x158] sm:$0xf] }
 0x155   : >> { %2373 = vst.msk [vmem:[#allocation2 + $0x58] sm:$0xff] %vm2361_vm10, %v2336_v56  ;;  %v2498_v63 = vpop.permute.xlu0 %2497  ;;  %v2238_v7 = vor.u32 %v2237_v60, %v2233_v49  ;;  %v2077_v8 = vrot.slane %v2075_v61, 5  ;;  %v2085_v9 = vshll.u32 %v4498_v54, 16  ;;  %v2247_v35 = vrot.slane %v2245_v53, 4  ;;  %v4623_v56 = vld [vmem:[%s5526_s24 + $0x15c] sm:$0xf] }
 0x156   : >> { %2544 = vst.msk [vmem:[#allocation2 + $0x10] sm:$0xff] %vm2541_vm11, %v2498_v63  ;;  %v2073_v10 = vrot.slane %v2072_v4, 4  ;;  %v2081_v52 = vrot.slane %v2079_v5, 4  ;;  %v2251_v11 = vshll.u32 %v4517_v62, 16  ;;  %v2234_v14 = vsel %vm5545_vm4, %v2229_v6, %v2233_v49  ;;  %v4604_v6 = vld [vmem:[%s5526_s24 + $0xc0] sm:$0xf] }
 0x157   : >> { %1836 = vrot.lane.b32.xlu1 %v4930_v57, %s4965_s28  ;;  %v2239_v16 = vrot.slane %v2238_v7, 4  ;;  %v2087_v17 = vrot.slane %v2085_v9, 5  ;;  %v2255_v19 = vshrl.u32 %v4517_v62, 16  ;;  %1822 = vrot.lane.b32.xlu0 %v4931_v0, %s4965_s28  ;;  %v2248_v23 = vor.u32 %v2247_v35, %v2243_v3 }
 0x158   : >> { %v2514_v12 = vpop.permute.xlu1 %2513  ;;  %v2078_v21 = vsel %vm5545_vm4, %v2073_v10, %v2077_v8  ;;  %v2082_v22 = vor.u32 %v2081_v52, %v2077_v8  ;;  %v2253_v24 = vrot.slane %v2251_v11, 5  ;;  %v2261_v28 = vshll.u32 %v4518_v18, 16  ;;  %v4605_v10 = vld [vmem:[%s5526_s24 + $0xc4] sm:$0x1] }
 0x159   : >> { %2552 = vst.msk [vmem:[#allocation2 + $0x50] sm:$0xff] %vm2541_vm11, %v2514_v12  ;;  %v2500_v20 = vpop.permute.xlu0 %2499  ;;  %v2244_v26 = vsel %vm5545_vm4, %v2239_v16, %v2243_v3  ;;  %v2257_v27 = vrot.slane %v2255_v19, 4  ;;  %v2731_v29 = vshrl.u32 %v4601_v2, 16  ;;  %v2249_v15 = vrot.slane %v2248_v23, 4 }
 0x15a   : >> { %2545 = vst.msk [vmem:[#allocation2 + $0x18] sm:$0xff] %vm2541_vm11, %v2500_v20  ;;  %v4533_v30 = vcombine.low %v2234_v14, %v2244_v26  ;;  %v2083_v32 = vrot.slane %v2082_v22, 4  ;;  %v2734_v36 = vshll.u32 %v4601_v2, 16  ;;  %v2263_v38 = vrot.slane %v2261_v28, 5  ;;  %v4624_v26 = vld [vmem:[%s5526_s24 + $0x160] sm:$0xf] }
 0x15b   : >> { %1838 = vrot.lane.b32.xlu1 %v4932_v13, %s4965_s28  ;;  %v2258_v37 = vor.u32 %v2257_v27, %v2253_v24  ;;  %v2733_v39 = vrot.slane %v2731_v29, 4  ;;  %v2740_v41 = vshll.u32 %v4602_v25, 16  ;;  %2325 = vrot.lane.b32.xlu0 %v4525_v1, %s4966_s29  ;;  %v2254_v45 = vsel %vm5545_vm4, %v2249_v15, %v2253_v24  ;;  %v4933_v1 = vld [vmem:[%s5526_s24 + $0xb4] sm:$0xff]  }
 0x15c   : >> { %v2516_v33 = vpop.permute.xlu1 %2515  ;;  %v2088_v44 = vsel %vm5545_vm4, %v2083_v32, %v2087_v17  ;;  %v2736_v46 = vrot.slane %v2734_v36, 5  ;;  %v2744_v47 = vshrl.u32 %v4602_v25, 16  ;;  %v2750_v40 = vshll.u32 %v4603_v34, 16  ;;  %v4934_v13 = vld [vmem:[%s5526_s24 + $0x154] sm:$0xff]  }
 0x15d   : >> { %2553 = vst.msk [vmem:[#allocation2 + $0x58] sm:$0xff] %vm2541_vm11, %v2516_v33  ;;  %v3003_v43 = vpop.permute.xlu0 %3002  ;;  %v4526_v49 = vcombine.low %v2078_v21, %v2088_v44  ;;  %v2259_v50 = vrot.slane %v2258_v37, 4  ;;  %v2742_v51 = vrot.slane %v2740_v41, 5  ;;  %v2754_v55 = vshrl.u32 %v4603_v34, 16  ;;  %v4935_v21 = vld [vmem:[%s5526_s24 + $0xbc] sm:$0xff]  }
 0x15e   : >> { %3049 = vst.msk [vmem:[#allocation2 + $0x10] sm:$0xff] %vm3046_vm12, %v3003_v43  ;;  %v2737_v53 = vor.u32 %v2736_v46, %v2733_v39  ;;  %v2746_v54 = vrot.slane %v2744_v47, 4  ;;  %v2907_v57 = vshrl.u32 %v4621_v42, 16  ;;  %v2752_v60 = vrot.slane %v2750_v40, 5  ;;  %v4936_v37 = vld [vmem:[%s5526_s24 + $0x15c] sm:$0xff]  }
 0x15f   : >> { %2341 = vrot.lane.b32.xlu1 %v4533_v30, %s4966_s29  ;;  %v2264_v59 = vsel %vm5545_vm4, %v2259_v50, %v2263_v38  ;;  %v2910_v61 = vshll.u32 %v4621_v42, 16  ;;  %v2916_v62 = vshll.u32 %v4622_v48, 16  ;;  %2327 = vrot.lane.b32.xlu0 %v4526_v49, %s4966_s29  ;;  %v2920_v9 = vshrl.u32 %v4622_v48, 16  ;;  %v4625_v30 = vld [vmem:[%s5526_s24 + $0x164] sm:$0x1] }
 0x160   : >> { %v3019_v58 = vpop.permute.xlu1 %3018  ;;  %v4534_v0 = vcombine.low %v2254_v45, %v2264_v59  ;;  %v2738_v3 = vrot.slane %v2737_v53, 4  ;;  %v2747_v4 = vor.u32 %v2746_v54, %v2742_v51  ;;  %v2909_v5 = vrot.slane %v2907_v57, 4 }
 0x161   : >> { %3057 = vst.msk [vmem:[#allocation2 + $0x50] sm:$0xff] %vm3046_vm12, %v3019_v58  ;;  %v3005_v63 = vpop.permute.xlu0 %3004  ;;  %v2912_v7 = vrot.slane %v2910_v61, 5  ;;  %v2918_v8 = vrot.slane %v2916_v62, 5  ;;  %v2926_v18 = vshll.u32 %v4623_v56, 16  ;;  %v2930_v11 = vshrl.u32 %v4623_v56, 16 }
 0x162   : >> { %3050 = vst.msk [vmem:[#allocation2 + $0x18] sm:$0xff] %vm3046_vm12, %v3005_v63  ;;  %v2743_v52 = vsel %vm5545_vm4, %v2738_v3, %v2742_v51  ;;  %v2748_v35 = vrot.slane %v2747_v4, 4  ;;  %v2756_v12 = vrot.slane %v2754_v55, 4  ;;  %v2922_v16 = vrot.slane %v2920_v9, 4 }
 0x163   : >> { %2343 = vrot.lane.b32.xlu1 %v4534_v0, %s4966_s29  ;;  %v2913_v14 = vor.u32 %v2912_v7, %v2909_v5  ;;  %v2928_v17 = vrot.slane %v2926_v18, 5  ;;  %v2760_v19 = vshll.u32 %v4604_v6, 16  ;;  %2505 = vrot.lane.b32.xlu0 %v4933_v1, %s4967_s30  ;;  %v2764_v24 = vshrl.u32 %v4604_v6, 16 }
 0x164   : >> { %v3021_v2 = vpop.permute.xlu1 %3020  ;;  %v2753_v22 = vsel %vm5545_vm4, %v2748_v35, %v2752_v60  ;;  %v2757_v23 = vor.u32 %v2756_v12, %v2752_v60  ;;  %v2770_v25 = vshll.u32 %v4605_v10, 16  ;;  %v2923_v28 = vor.u32 %v2922_v16, %v2918_v8 }
 0x165   : >> { %3058 = vst.msk [vmem:[#allocation2 + $0x58] sm:$0xff] %vm3046_vm12, %v3021_v2  ;;  %v3065_v20 = vld [vmem:[#allocation2 + $0x10] sm:$0xff]  ;;  %v2914_v27 = vrot.slane %v2913_v14, 4  ;;  %v2762_v29 = vrot.slane %v2760_v19, 5  ;;  %v4632_v32 = vcombine.low %v2743_v52, %v2753_v22  ;;  %v2766_v33 = vrot.slane %v2764_v24, 4 }
 0x166   : >> { %4816 = vmatprep.mubr.msk.bf16.mxu0 %vm3103_vm13, %v3065_v20  ;;  %v2758_v15 = vrot.slane %v2757_v23, 4  ;;  %v2932_v34 = vrot.slane %v2930_v11, 4  ;;  %v2924_v38 = vrot.slane %v2923_v28, 4  ;;  %v2772_v39 = vrot.slane %v2770_v25, 5 }
 0x167   : >> { %2521 = vrot.lane.b32.xlu1 %v4934_v13, %s4967_s30  ;;  %v2936_v41 = vshll.u32 %v4624_v26, 16  ;;  %v2940_v42 = vshrl.u32 %v4624_v26, 16  ;;  %2507 = vrot.lane.b32.xlu0 %v4935_v21, %s4967_s30  ;;  %v2919_v45 = vsel %vm5545_vm4, %v2914_v27, %v2918_v8  ;;  %v2767_v46 = vor.u32 %v2766_v33, %v2762_v29 }
 0x168   : >> { %v3073_v36 = vld [vmem:[#allocation2 + $0x50] sm:$0xff]  ;;  %v951_v43 = vpop.permute.xlu0 %950  ;;  %v2933_v47 = vor.u32 %v2932_v34, %v2928_v17  ;;  %v2946_v48 = vshll.u32 %v4625_v30, 16  ;;  %v2929_v49 = vsel %vm5545_vm4, %v2924_v38, %v2928_v17  ;;  %v2763_v40 = vsel %vm5545_vm4, %v2758_v15, %v2762_v29 }
 0x169   : >> { %v3066_v44 = vld [vmem:[#allocation2 + $0x18] sm:$0xff]  ;;  %4832 = vmatprep.mubr.msk.bf16.mxu1 %vm3103_vm13, %v3073_v36  ;;  %995 = vst.msk [vmem:[#allocation2 + $0x20] sm:$0xff] %vm990_vm6, %v951_v43  ;;  %v2938_v50 = vrot.slane %v2936_v41, 5  ;;  %v2942_v51 = vrot.slane %v2940_v42, 4  ;;  %v2768_v53 = vrot.slane %v2767_v46, 4  ;;  %v4640_v57 = vcombine.low %v2919_v45, %v2929_v49 }
 0x16a   : >> { %4817 = vmatmul.mubr.msk.bf16.gmra.mrb[4].mxu0 %vm3103_vm13, %v3066_v44  ;;  %v2934_v54 = vrot.slane %v2933_v47, 4  ;;  %v2948_v59 = vrot.slane %v2946_v48, 5  ;;  %vm3800_vm14 = vsmask.f32 256  ;;  %vm3801_vm15 = vsmask.f32 4368 }
 0x16b   : >> { %2523 = vrot.lane.b32.xlu1 %v4936_v37, %s4967_s30  ;;  %v2943_v58 = vor.u32 %v2942_v51, %v2938_v50  ;;  %3010 = vrot.lane.b32.xlu0 %v4632_v32, %s4968_s4  ;;  %v2773_v60 = vsel %vm5545_vm4, %v2768_v53, %v2772_v39  ;;  %vm4127_vm2 = vsmask.f32 7938  ;;  %vm6631_vm3 = vmor %vm3800_vm14, %vm3801_vm15 }
 0x16c   : >> { %v967_v55 = vpop.permute.xlu1 %966  ;;  %v3074_v56 = vld [vmem:[#allocation2 + $0x58] sm:$0xff]  ;;  %v4633_v61 = vcombine.low %v2763_v40, %v2773_v60  ;;  %v2939_v62 = vsel %vm5545_vm4, %v2934_v54, %v2938_v50  ;;  %vm6663_vm5 = vmand %vm172_vm0, %vm4127_vm2 }
 0x16d   : >> { %1003 = vst.msk [vmem:[#allocation2 + $0x60] sm:$0xff] %vm990_vm6, %v967_v55  ;;  %4833 = vmatmul.mubr.msk.bf16.gmra.mrb[4].mxu1 %vm3103_vm13, %v3074_v56  ;;  %v2944_v63 = vrot.slane %v2943_v58, 4 }
 0x16f   : >> { %3026 = vrot.lane.b32.xlu1 %v4640_v57, %s4968_s4  ;;  %v2949_v0 = vsel %vm5545_vm4, %v2944_v63, %v2948_v59  ;;  %3012 = vrot.lane.b32.xlu0 %v4633_v61, %s4968_s4  ;;  %vm6638_vm4 = vmand %vm177_vm1, %vm3800_vm14 }
 0x170   : >> { %v4641_v3 = vcombine.low %v2939_v62, %v2949_v0 }
 0x171   : >> { %v953_v1 = vpop.permute.xlu0 %952 }
 0x172   : >> { %996 = vst.msk [vmem:[#allocation2 + $0x28] sm:$0xff] %vm990_vm6, %v953_v1 }
 0x173   : >> { %3028 = vrot.lane.b32.xlu1 %v4641_v3, %s4968_s4 }
 0x174   : >> { %v969_v4 = vpop.permute.xlu1 %968 }
 0x175   : >> { %1004 = vst.msk [vmem:[#allocation2 + $0x68] sm:$0xff] %vm990_vm6, %v969_v4  ;;  %v1131_v5 = vpop.permute.xlu0 %1130 }
 0x176   : >> { %1175 = vst.msk [vmem:[#allocation2 + $0x20] sm:$0xff] %vm1170_vm7, %v1131_v5 }
 0x178   : >> { %v1147_v6 = vpop.permute.xlu1 %1146 }
 0x179   : >> { %1183 = vst.msk [vmem:[#allocation2 + $0x60] sm:$0xff] %vm1170_vm7, %v1147_v6  ;;  %v1133_v7 = vpop.permute.xlu0 %1132 }
 0x17a   : >> { %1176 = vst.msk [vmem:[#allocation2 + $0x28] sm:$0xff] %vm1170_vm7, %v1133_v7 }
 0x17c   : >> { %v1149_v31 = vpop.permute.xlu1 %1148 }
 0x17d   : >> { %1184 = vst.msk [vmem:[#allocation2 + $0x68] sm:$0xff] %vm1170_vm7, %v1149_v31  ;;  %v1636_v8 = vpop.permute.xlu0 %1635 }
 0x17e   : >> { %1680 = vst.msk [vmem:[#allocation2 + $0x20] sm:$0xff] %vm1675_vm8, %v1636_v8 }
 0x180   : >> { %v1652_v9 = vpop.permute.xlu1 %1651 }
 0x181   : >> { %1688 = vst.msk [vmem:[#allocation2 + $0x60] sm:$0xff] %vm1675_vm8, %v1652_v9  ;;  %v1638_v18 = vpop.permute.xlu0 %1637 }
 0x182   : >> { %1681 = vst.msk [vmem:[#allocation2 + $0x28] sm:$0xff] %vm1675_vm8, %v1638_v18 }
 0x184   : >> { %v1654_v10 = vpop.permute.xlu1 %1653 }
 0x185   : >> { %1689 = vst.msk [vmem:[#allocation2 + $0x68] sm:$0xff] %vm1675_vm8, %v1654_v10  ;;  %v1817_v52 = vpop.permute.xlu0 %1816 }
 0x186   : >> { %1861 = vst.msk [vmem:[#allocation2 + $0x20] sm:$0xff] %vm1856_vm9, %v1817_v52 }
 0x188   : >> { %v1833_v35 = vpop.permute.xlu1 %1832 }
 0x189   : >> { %1869 = vst.msk [vmem:[#allocation2 + $0x60] sm:$0xff] %vm1856_vm9, %v1833_v35  ;;  %v1819_v11 = vpop.permute.xlu0 %1818 }
 0x18a   : >> { %1862 = vst.msk [vmem:[#allocation2 + $0x28] sm:$0xff] %vm1856_vm9, %v1819_v11 }
 0x18c   : >> { %v1835_v12 = vpop.permute.xlu1 %1834 }
 0x18d   : >> { %1870 = vst.msk [vmem:[#allocation2 + $0x68] sm:$0xff] %vm1856_vm9, %v1835_v12  ;;  %v2322_v2 = vpop.permute.xlu0 %2321 }
 0x18e   : >> { %2366 = vst.msk [vmem:[#allocation2 + $0x20] sm:$0xff] %vm2361_vm10, %v2322_v2 }
 0x190   : >> { %v2338_v13 = vpop.permute.xlu1 %2337 }
 0x191   : >> { %2374 = vst.msk [vmem:[#allocation2 + $0x60] sm:$0xff] %vm2361_vm10, %v2338_v13  ;;  %v2324_v14 = vpop.permute.xlu0 %2323 }
 0x192   : >> { %2367 = vst.msk [vmem:[#allocation2 + $0x28] sm:$0xff] %vm2361_vm10, %v2324_v14 }
 0x194   : >> { %v2340_v16 = vpop.permute.xlu1 %2339 }
 0x195   : >> { %v2502_v17 = vpop.permute.xlu0 %2501  ;;  %2375 = vst.msk [vmem:[#allocation2 + $0x68] sm:$0xff] %vm2361_vm10, %v2340_v16 }
 0x196   : >> { %2546 = vst.msk [vmem:[#allocation2 + $0x20] sm:$0xff] %vm2541_vm11, %v2502_v17 }
 0x198   : >> { %v2518_v19 = vpop.permute.xlu1 %2517 }
 0x199   : >> { %v2504_v20 = vpop.permute.xlu0 %2503  ;;  %2554 = vst.msk [vmem:[#allocation2 + $0x60] sm:$0xff] %vm2541_vm11, %v2518_v19 }
 0x19a   : >> { %2547 = vst.msk [vmem:[#allocation2 + $0x28] sm:$0xff] %vm2541_vm11, %v2504_v20 }
 0x19c   : >> { %v2520_v21 = vpop.permute.xlu1 %2519 }
 0x19d   : >> { %v3007_v22 = vpop.permute.xlu0 %3006  ;;  %2555 = vst.msk [vmem:[#allocation2 + $0x68] sm:$0xff] %vm2541_vm11, %v2520_v21 }
 0x19e   : >> { %3051 = vst.msk [vmem:[#allocation2 + $0x20] sm:$0xff] %vm3046_vm12, %v3007_v22 }
 0x1a0   : >> { %v3023_v23 = vpop.permute.xlu1 %3022 }
 0x1a1   : >> { %3059 = vst.msk [vmem:[#allocation2 + $0x60] sm:$0xff] %vm3046_vm12, %v3023_v23  ;;  %v3009_v24 = vpop.permute.xlu0 %3008 }
 0x1a2   : >> { %3052 = vst.msk [vmem:[#allocation2 + $0x28] sm:$0xff] %vm3046_vm12, %v3009_v24 }
 0x1a4   : >> { %v3025_v26 = vpop.permute.xlu1 %3024 }
 0x1a5   : >> { %v3067_v25 = vld [vmem:[#allocation2 + $0x20] sm:$0xff]  ;;  %3060 = vst.msk [vmem:[#allocation2 + $0x68] sm:$0xff] %vm3046_vm12, %v3025_v26 }
 0x1a6   : >> { %4820 = vmatprep.mubr.msk.bf16.mxu0 %vm3103_vm13, %v3067_v25 }
 0x1a8   : >> { %v955_v27 = vpop.permute.xlu0 %954  ;;  %v3075_v28 = vld [vmem:[#allocation2 + $0x60] sm:$0xff] }
 0x1a9   : >> { %997 = vst.msk [vmem:[#allocation2 + $0x30] sm:$0xff] %vm990_vm6, %v955_v27  ;;  %v3068_v29 = vld [vmem:[#allocation2 + $0x28] sm:$0xff]  ;;  %4836 = vmatprep.mubr.msk.bf16.mxu1 %vm3103_vm13, %v3075_v28 }
 0x1aa   : >> { %4821 = vmatmul.mubr.msk.bf16.gmra.mrb[8].mxu0 %vm3103_vm13, %v3068_v29 }
 0x1ac   : >> { %v971_v30 = vpop.permute.xlu1 %970  ;;  %v3076_v32 = vld [vmem:[#allocation2 + $0x68] sm:$0xff] }
 0x1ad   : >> { %1005 = vst.msk [vmem:[#allocation2 + $0x70] sm:$0xff] %vm990_vm6, %v971_v30  ;;  %4837 = vmatmul.mubr.msk.bf16.gmra.mrb[8].mxu1 %vm3103_vm13, %v3076_v32 }
 0x1b1   : >> { %v957_v15 = vpop.permute.xlu0 %956 }
 0x1b2   : >> { %998 = vst.msk [vmem:[#allocation2 + $0x38] sm:$0xff] %vm990_vm6, %v957_v15 }
 0x1b5   : >> { %v973_v33 = vpop.permute.xlu1 %972  ;;  %v1135_v34 = vpop.permute.xlu0 %1134 }
 0x1b6   : >> { %1006 = vst.msk [vmem:[#allocation2 + $0x78] sm:$0xff] %vm990_vm6, %v973_v33 }
 0x1b7   : >> { %1177 = vst.msk [vmem:[#allocation2 + $0x30] sm:$0xff] %vm1170_vm7, %v1135_v34 }
 0x1b9   : >> { %v1151_v36 = vpop.permute.xlu1 %1150  ;;  %v1137_v37 = vpop.permute.xlu0 %1136 }
 0x1ba   : >> { %1185 = vst.msk [vmem:[#allocation2 + $0x70] sm:$0xff] %vm1170_vm7, %v1151_v36  ;;  %1178 = vst.msk [vmem:[#allocation2 + $0x38] sm:$0xff] %vm1170_vm7, %v1137_v37 }
 0x1bd   : >> { %v1153_v38 = vpop.permute.xlu1 %1152  ;;  %v1640_v39 = vpop.permute.xlu0 %1639 }
 0x1be   : >> { %1186 = vst.msk [vmem:[#allocation2 + $0x78] sm:$0xff] %vm1170_vm7, %v1153_v38 }
 0x1bf   : >> { %1682 = vst.msk [vmem:[#allocation2 + $0x30] sm:$0xff] %vm1675_vm8, %v1640_v39 }
 0x1c1   : >> { %v1656_v41 = vpop.permute.xlu1 %1655  ;;  %v1642_v42 = vpop.permute.xlu0 %1641 }
 0x1c2   : >> { %1690 = vst.msk [vmem:[#allocation2 + $0x70] sm:$0xff] %vm1675_vm8, %v1656_v41  ;;  %1683 = vst.msk [vmem:[#allocation2 + $0x38] sm:$0xff] %vm1675_vm8, %v1642_v42 }
 0x1c5   : >> { %v1658_v43 = vpop.permute.xlu1 %1657  ;;  %v1821_v44 = vpop.permute.xlu0 %1820 }
 0x1c6   : >> { %1691 = vst.msk [vmem:[#allocation2 + $0x78] sm:$0xff] %vm1675_vm8, %v1658_v43 }
 0x1c7   : >> { %1863 = vst.msk [vmem:[#allocation2 + $0x30] sm:$0xff] %vm1856_vm9, %v1821_v44 }
 0x1c9   : >> { %v1837_v45 = vpop.permute.xlu1 %1836  ;;  %v1823_v46 = vpop.permute.xlu0 %1822 }
 0x1ca   : >> { %1871 = vst.msk [vmem:[#allocation2 + $0x70] sm:$0xff] %vm1856_vm9, %v1837_v45  ;;  %1864 = vst.msk [vmem:[#allocation2 + $0x38] sm:$0xff] %vm1856_vm9, %v1823_v46 }
 0x1cd   : >> { %v1839_v47 = vpop.permute.xlu1 %1838  ;;  %v2326_v48 = vpop.permute.xlu0 %2325 }
 0x1ce   : >> { %1872 = vst.msk [vmem:[#allocation2 + $0x78] sm:$0xff] %vm1856_vm9, %v1839_v47 }
 0x1cf   : >> { %2368 = vst.msk [vmem:[#allocation2 + $0x30] sm:$0xff] %vm2361_vm10, %v2326_v48 }
 0x1d1   : >> { %v2342_v49 = vpop.permute.xlu1 %2341  ;;  %v2328_v50 = vpop.permute.xlu0 %2327 }
 0x1d2   : >> { %2376 = vst.msk [vmem:[#allocation2 + $0x70] sm:$0xff] %vm2361_vm10, %v2342_v49  ;;  %2369 = vst.msk [vmem:[#allocation2 + $0x38] sm:$0xff] %vm2361_vm10, %v2328_v50 }
 0x1d5   : >> { %v2344_v51 = vpop.permute.xlu1 %2343  ;;  %v2506_v40 = vpop.permute.xlu0 %2505 }
 0x1d6   : >> { %2377 = vst.msk [vmem:[#allocation2 + $0x78] sm:$0xff] %vm2361_vm10, %v2344_v51 }
 0x1d7   : >> { %2548 = vst.msk [vmem:[#allocation2 + $0x30] sm:$0xff] %vm2541_vm11, %v2506_v40 }
 0x1d9   : >> { %v2522_v53 = vpop.permute.xlu1 %2521  ;;  %v2508_v54 = vpop.permute.xlu0 %2507 }
 0x1da   : >> { %2556 = vst.msk [vmem:[#allocation2 + $0x70] sm:$0xff] %vm2541_vm11, %v2522_v53  ;;  %2549 = vst.msk [vmem:[#allocation2 + $0x38] sm:$0xff] %vm2541_vm11, %v2508_v54 }
 0x1dd   : >> { %v2524_v55 = vpop.permute.xlu1 %2523  ;;  %v3011_v56 = vpop.permute.xlu0 %3010 }
 0x1de   : >> { %2557 = vst.msk [vmem:[#allocation2 + $0x78] sm:$0xff] %vm2541_vm11, %v2524_v55 }
 0x1df   : >> { %3053 = vst.msk [vmem:[#allocation2 + $0x30] sm:$0xff] %vm3046_vm12, %v3011_v56 }
 0x1e1   : >> { %v3027_v57 = vpop.permute.xlu1 %3026  ;;  %v3013_v58 = vpop.permute.xlu0 %3012 }
 0x1e2   : >> { %3061 = vst.msk [vmem:[#allocation2 + $0x70] sm:$0xff] %vm3046_vm12, %v3027_v57  ;;  %3054 = vst.msk [vmem:[#allocation2 + $0x38] sm:$0xff] %vm3046_vm12, %v3013_v58 }
 0x1e5   : >> { %v3029_v59 = vpop.permute.xlu1 %3028 }
 0x1e6   : >> { %3062 = vst.msk [vmem:[#allocation2 + $0x78] sm:$0xff] %vm3046_vm12, %v3029_v59  ;;  %v3069_v60 = vld [vmem:[#allocation2 + $0x30] sm:$0xff] }
 0x1e7   : >> { %4824 = vmatprep.mubr.msk.bf16.mxu0 %vm3103_vm13, %v3069_v60 }
 0x1e9   : >> { %v3077_v61 = vld [vmem:[#allocation2 + $0x70] sm:$0xff]  ;;  %v3070_v62 = vld [vmem:[#allocation2 + $0x38] sm:$0xff] }
 0x1ea   : >> { %4840 = vmatprep.mubr.msk.bf16.mxu1 %vm3103_vm13, %v3077_v61  ;;  %4825 = vmatmul.mubr.msk.bf16.gmra.mrb[12].mxu0 %vm3103_vm13, %v3070_v62 }
 0x1ed   : >> { %v3078_v63 = vld [vmem:[#allocation2 + $0x78] sm:$0xff] }
 0x1ee   : >> { %4841 = vmatmul.mubr.msk.bf16.gmra.mrb[12].mxu1 %vm3103_vm13, %v3078_v63 }
 0x207   : >> { %v6317_v0 = vpop.f32.mrb[0].mxu0  ;;  %v6319_v1 = vpop.f32.mrb[0].mxu1 }
 0x208   : >> { %3349 = vrot.lane.b32.xlu0 %v6317_v0, %s4969_s11  ;;  %v6323_v3 = vpop.f32.mrb[1].mxu0  ;;  %v6325_v4 = vpop.f32.mrb[1].mxu1 }
 0x209   : >> { %v6327_v5 = vpop.f32.mrb[2].mxu0  ;;  %v6329_v6 = vpop.f32.mrb[2].mxu1 }
 0x20a   : >> { %3351 = vrot.lane.b32.xlu1 %v6327_v5, %s4969_s11  ;;  %v6333_v7 = vpop.f32.mrb[3].mxu0  ;;  %v6335_v31 = vpop.f32.mrb[3].mxu1 }
 0x20c   : >> { %3381 = vrot.lane.b32.xlu0 %v6319_v1, %s4969_s11 }
 0x20e   : >> { %3383 = vrot.lane.b32.xlu1 %v6329_v6, %s4969_s11 }
 0x210   : >> { %3345 = vrot.lane.b32.xlu0 %v6323_v3, %s4969_s11 }
 0x212   : >> { %3347 = vrot.lane.b32.xlu1 %v6333_v7, %s4969_s11 }
 0x214   : >> { %3377 = vrot.lane.b32.xlu0 %v6325_v4, %s4969_s11 }
 0x216   : >> { %3379 = vrot.lane.b32.xlu1 %v6335_v31, %s4969_s11 }
 0x23d   : >> { %v6349_v8 = vpop.f32.mrb[4].mxu0 }
 0x23e   : >> { %3357 = vrot.lane.b32.xlu0 %v6349_v8, %s4969_s11  ;;  %v6353_v9 = vpop.f32.mrb[5].mxu0 }
 0x23f   : >> { %v6355_v18 = vpop.f32.mrb[6].mxu0 }
 0x240   : >> { %v6357_v10 = vpop.f32.mrb[4].mxu1  ;;  %3359 = vrot.lane.b32.xlu1 %v6355_v18, %s4969_s11  ;;  %v6361_v52 = vpop.f32.mrb[7].mxu0 }
 0x241   : >> { %v6363_v35 = vpop.f32.mrb[5].mxu1 }
 0x242   : >> { %v6365_v11 = vpop.f32.mrb[6].mxu1  ;;  %3389 = vrot.lane.b32.xlu0 %v6357_v10, %s4969_s11 }
 0x243   : >> { %v6369_v12 = vpop.f32.mrb[7].mxu1 }
 0x244   : >> { %3391 = vrot.lane.b32.xlu1 %v6365_v11, %s4969_s11 }
 0x246   : >> { %3353 = vrot.lane.b32.xlu0 %v6353_v9, %s4969_s11 }
 0x248   : >> { %3355 = vrot.lane.b32.xlu1 %v6361_v52, %s4969_s11 }
 0x24a   : >> { %3385 = vrot.lane.b32.xlu0 %v6363_v35, %s4969_s11 }
 0x24c   : >> { %3387 = vrot.lane.b32.xlu1 %v6369_v12, %s4969_s11 }
 0x27a   : >> { %v3350_v22 = vpop.permute.xlu0 %3349 }
 0x27b   : >> { %v6444_v37 = vmax.f32 %v6317_v0, %v3350_v22 }
 0x27c   : >> { %v3352_v25 = vpop.permute.xlu1 %3351 }
 0x27d   : >> { %v6381_v2 = vpop.f32.mrb[8].mxu0  ;;  %v6449_v38 = vmax.f32 %v6327_v5, %v3352_v25 }
 0x27e   : >> { %3365 = vrot.lane.b32.xlu0 %v6381_v2, %s4969_s11  ;;  %v6385_v13 = vpop.f32.mrb[9].mxu0  ;;  %v3382_v32 = vpop.permute.xlu0 %3381 }
 0x27f   : >> { %v6387_v14 = vpop.f32.mrb[10].mxu0  ;;  %v6454_v41 = vmax.f32 %v6319_v1, %v3382_v32 }
 0x280   : >> { %3367 = vrot.lane.b32.xlu1 %v6387_v14, %s4969_s11  ;;  %v6391_v16 = vpop.f32.mrb[11].mxu0  ;;  %v6393_v17 = vpop.f32.mrb[8].mxu1 }
 0x281   : >> { %v6395_v19 = vpop.f32.mrb[9].mxu1  ;;  %v3384_v33 = vpop.permute.xlu1 %3383 }
 0x282   : >> { %3397 = vrot.lane.b32.xlu0 %v6393_v17, %s4969_s11  ;;  %v6399_v20 = vpop.f32.mrb[10].mxu1  ;;  %v3346_v34 = vpop.permute.xlu0 %3345  ;;  %v6459_v43 = vmax.f32 %v6329_v6, %v3384_v33 }
 0x283   : >> { %v6401_v21 = vpop.f32.mrb[11].mxu1  ;;  %v6464_v45 = vmax.f32 %v6323_v3, %v3346_v34 }
 0x284   : >> { %3399 = vrot.lane.b32.xlu1 %v6399_v20, %s4969_s11 }
 0x285   : >> { %v3348_v36 = vpop.permute.xlu1 %3347 }
 0x286   : >> { %3361 = vrot.lane.b32.xlu0 %v6385_v13, %s4969_s11  ;;  %v3378_v39 = vpop.permute.xlu0 %3377  ;;  %v6469_v47 = vmax.f32 %v6333_v7, %v3348_v36 }
 0x287   : >> { %v6474_v48 = vmax.f32 %v6325_v4, %v3378_v39 }
 0x288   : >> { %3363 = vrot.lane.b32.xlu1 %v6391_v16, %s4969_s11 }
 0x289   : >> { %v3380_v42 = vpop.permute.xlu1 %3379 }
 0x28a   : >> { %3393 = vrot.lane.b32.xlu0 %v6395_v19, %s4969_s11  ;;  %v6479_v50 = vmax.f32 %v6335_v31, %v3380_v42 }
 0x28c   : >> { %3395 = vrot.lane.b32.xlu1 %v6401_v21, %s4969_s11 }
 0x2b0   : >> { %v3358_v44 = vpop.permute.xlu0 %3357 }
 0x2b1   : >> { %v6484_v40 = vmax.f32 %v6349_v8, %v3358_v44 }
 0x2b2   : >> { %v3360_v46 = vpop.permute.xlu1 %3359 }
 0x2b3   : >> { %v6489_v53 = vmax.f32 %v6355_v18, %v3360_v46 }
 0x2b4   : >> { %v3390_v49 = vpop.permute.xlu0 %3389 }
 0x2b5   : >> { %v6494_v55 = vmax.f32 %v6357_v10, %v3390_v49 }
 0x2b6   : >> { %v3392_v51 = vpop.permute.xlu1 %3391 }
 0x2b7   : >> { %v6499_v57 = vmax.f32 %v6365_v11, %v3392_v51 }
 0x2b8   : >> { %v3354_v54 = vpop.permute.xlu0 %3353 }
 0x2b9   : >> { %v6504_v58 = vmax.f32 %v6353_v9, %v3354_v54 }
 0x2ba   : >> { %v3356_v56 = vpop.permute.xlu1 %3355 }
 0x2bb   : >> { %v6509_v60 = vmax.f32 %v6361_v52, %v3356_v56 }
 0x2bc   : >> { %v3386_v59 = vpop.permute.xlu0 %3385 }
 0x2bd   : >> { %v6413_v23 = vpop.f32.mrb[12].mxu0  ;;  %v6514_v62 = vmax.f32 %v6363_v35, %v3386_v59 }
 0x2be   : >> { %3373 = vrot.lane.b32.xlu0 %v6413_v23, %s4969_s11  ;;  %v6417_v24 = vpop.f32.mrb[13].mxu0  ;;  %v3388_v61 = vpop.permute.xlu1 %3387 }
 0x2bf   : >> { %v6419_v26 = vpop.f32.mrb[14].mxu0  ;;  %v6519_v63 = vmax.f32 %v6369_v12, %v3388_v61 }
 0x2c0   : >> { %3375 = vrot.lane.b32.xlu1 %v6419_v26, %s4969_s11  ;;  %v6425_v28 = vpop.f32.mrb[15].mxu0 }
 0x2c1   : >> { %v6421_v27 = vpop.f32.mrb[12].mxu1 }
 0x2c2   : >> { %v6427_v29 = vpop.f32.mrb[13].mxu1  ;;  %3405 = vrot.lane.b32.xlu0 %v6421_v27, %s4969_s11 }
 0x2c3   : >> { %v6429_v30 = vpop.f32.mrb[14].mxu1 }
 0x2c4   : >> { %v6433_v15 = vpop.f32.mrb[15].mxu1  ;;  %3407 = vrot.lane.b32.xlu1 %v6429_v30, %s4969_s11 }
 0x2c6   : >> { %3369 = vrot.lane.b32.xlu0 %v6417_v24, %s4969_s11 }
 0x2c8   : >> { %3371 = vrot.lane.b32.xlu1 %v6425_v28, %s4969_s11 }
 0x2ca   : >> { %3401 = vrot.lane.b32.xlu0 %v6427_v29, %s4969_s11 }
 0x2cc   : >> { %3403 = vrot.lane.b32.xlu1 %v6433_v15, %s4969_s11 }
 0x2ce   : >> { %3509 = vrot.lane.b32.xlu0 %v6444_v37, %s4970_s13 }
 0x2d0   : >> { %3511 = vrot.lane.b32.xlu1 %v6449_v38, %s4970_s13 }
 0x2d2   : >> { %3541 = vrot.lane.b32.xlu0 %v6454_v41, %s4970_s13 }
 0x2d4   : >> { %3543 = vrot.lane.b32.xlu1 %v6459_v43, %s4970_s13 }
 0x2d6   : >> { %3505 = vrot.lane.b32.xlu0 %v6464_v45, %s4970_s13 }
 0x2d8   : >> { %3507 = vrot.lane.b32.xlu1 %v6469_v47, %s4970_s13 }
 0x2da   : >> { %3537 = vrot.lane.b32.xlu0 %v6474_v48, %s4970_s13 }
 0x2dc   : >> { %3539 = vrot.lane.b32.xlu1 %v6479_v50, %s4970_s13 }
 0x2de   : >> { %3517 = vrot.lane.b32.xlu0 %v6484_v40, %s4970_s13 }
 0x2e0   : >> { %3519 = vrot.lane.b32.xlu1 %v6489_v53, %s4970_s13 }
 0x2e2   : >> { %3549 = vrot.lane.b32.xlu0 %v6494_v55, %s4970_s13 }
 0x2e4   : >> { %3551 = vrot.lane.b32.xlu1 %v6499_v57, %s4970_s13 }
 0x2e6   : >> { %3513 = vrot.lane.b32.xlu0 %v6504_v58, %s4970_s13 }
 0x2e8   : >> { %3515 = vrot.lane.b32.xlu1 %v6509_v60, %s4970_s13 }
 0x2ea   : >> { %3545 = vrot.lane.b32.xlu0 %v6514_v62, %s4970_s13 }
 0x2ec   : >> { %3547 = vrot.lane.b32.xlu1 %v6519_v63, %s4970_s13 }
 0x2f0   : >> { %v3366_v0 = vpop.permute.xlu0 %3365 }
 0x2f1   : >> { %v6526_v1 = vmax.f32 %v6381_v2, %v3366_v0 }
 0x2f2   : >> { %v3368_v3 = vpop.permute.xlu1 %3367 }
 0x2f3   : >> { %v6529_v4 = vmax.f32 %v6387_v14, %v3368_v3  ;;  %3525 = vrot.lane.b32.xlu0 %v6526_v1, %s4970_s13 }
 0x2f4   : >> { %v3398_v5 = vpop.permute.xlu0 %3397 }
 0x2f5   : >> { %v6534_v6 = vmax.f32 %v6393_v17, %v3398_v5  ;;  %3527 = vrot.lane.b32.xlu1 %v6529_v4, %s4970_s13 }
 0x2f6   : >> { %v3400_v7 = vpop.permute.xlu1 %3399 }
 0x2f7   : >> { %v6539_v31 = vmax.f32 %v6399_v20, %v3400_v7  ;;  %3557 = vrot.lane.b32.xlu0 %v6534_v6, %s4970_s13 }
 0x2f8   : >> { %v3362_v8 = vpop.permute.xlu0 %3361 }
 0x2f9   : >> { %v6544_v9 = vmax.f32 %v6385_v13, %v3362_v8  ;;  %3559 = vrot.lane.b32.xlu1 %v6539_v31, %s4970_s13 }
 0x2fa   : >> { %v3364_v18 = vpop.permute.xlu1 %3363 }
 0x2fb   : >> { %v6549_v10 = vmax.f32 %v6391_v16, %v3364_v18  ;;  %3521 = vrot.lane.b32.xlu0 %v6544_v9, %s4970_s13 }
 0x2fc   : >> { %v3394_v52 = vpop.permute.xlu0 %3393 }
 0x2fd   : >> { %v6554_v35 = vmax.f32 %v6395_v19, %v3394_v52  ;;  %3523 = vrot.lane.b32.xlu1 %v6549_v10, %s4970_s13 }
 0x2fe   : >> { %v3396_v11 = vpop.permute.xlu1 %3395 }
 0x2ff   : >> { %v6559_v12 = vmax.f32 %v6401_v21, %v3396_v11  ;;  %3553 = vrot.lane.b32.xlu0 %v6554_v35, %s4970_s13 }
 0x301   : >> { %3555 = vrot.lane.b32.xlu1 %v6559_v12, %s4970_s13 }
 0x330   : >> { %v3374_v2 = vpop.permute.xlu0 %3373 }
 0x331   : >> { %v6566_v13 = vmax.f32 %v6413_v23, %v3374_v2 }
 0x332   : >> { %v3376_v14 = vpop.permute.xlu1 %3375 }
 0x333   : >> { %v6569_v16 = vmax.f32 %v6419_v26, %v3376_v14  ;;  %3533 = vrot.lane.b32.xlu0 %v6566_v13, %s4970_s13 }
 0x334   : >> { %v3406_v17 = vpop.permute.xlu0 %3405 }
 0x335   : >> { %3535 = vrot.lane.b32.xlu1 %v6569_v16, %s4970_s13 }
 0x336   : >> { %v3408_v19 = vpop.permute.xlu1 %3407 }
 0x337   : >> { %v6605_v36 = vmax.f32 %v6429_v30, %v3408_v19 }
 0x338   : >> { %v3370_v20 = vpop.permute.xlu0 %3369 }
 0x339   : >> { %v6576_v21 = vmax.f32 %v6417_v24, %v3370_v20  ;;  %v6596_v24 = vld [vmem:[%s6890_s2] ss:$0 sm:$0xff] }
 0x33a   : >> { %v3372_v22 = vpop.permute.xlu1 %3371 }
 0x33b   : >> { %v6579_v23 = vmax.f32 %v6425_v28, %v3372_v22  ;;  %3529 = vrot.lane.b32.xlu0 %v6576_v21, %s4970_s13 }
 0x33c   : >> { %v3402_v25 = vpop.permute.xlu0 %3401 }
 0x33d   : >> { %v6584_v26 = vmax.f32 %v6427_v29, %v3402_v25  ;;  %3531 = vrot.lane.b32.xlu1 %v6579_v23, %s4970_s13  ;;  %v6599_v29 = vmax.f32 %v6421_v27, %v3406_v17 }
 0x33e   : >> { %v3404_v32 = vpop.permute.xlu1 %3403 }
 0x33f   : >> { %v6589_v33 = vmax.f32 %v6433_v15, %v3404_v32  ;;  %3561 = vrot.lane.b32.xlu0 %v6584_v26, %s4970_s13 }
 0x340   : >> { %v3510_v28 = vpop.permute.xlu0 %3509 }
 0x341   : >> { %v3603_v34 = vmax.f32 %v6444_v37, %v3510_v28  ;;  %3563 = vrot.lane.b32.xlu1 %v6589_v33, %s4970_s13 }
 0x342   : >> { %v3512_v15 = vpop.permute.xlu1 %3511 }
 0x343   : >> { %v3642_v39 = vadd.f32 %v6596_v24, %v3603_v34  ;;  %v3604_v42 = vmax.f32 %v6449_v38, %v3512_v15  ;;  %3565 = vrot.lane.b32.xlu0 %v6599_v29, %s4970_s13 }
 0x344   : >> { %v3542_v44 = vpop.permute.xlu0 %3541 }
 0x345   : >> { %v3674_v46 = vmax.f32 %v3642_v39, 0.0  ;;  %v3643_v27 = vadd.f32 %v6596_v24, %v3604_v42  ;;  %v3619_v37 = vmax.f32 %v6454_v41, %v3542_v44  ;;  %3567 = vrot.lane.b32.xlu1 %v6605_v36, %s4970_s13 }
 0x346   : >> { %v3544_v49 = vpop.permute.xlu1 %3543 }
 0x347   : >> { %v4757_v51 = vpack.c.bf16 %v3674_v46, %v3674_v46  ;;  %v3675_v30 = vmax.f32 %v3643_v27, 0.0  ;;  %v3658_v54 = vadd.f32 %v6596_v24, %v3619_v37  ;;  %v3620_v38 = vmax.f32 %v6459_v43, %v3544_v49 }
 0x348   : >> { %v3506_v56 = vpop.permute.xlu0 %3505 }
 0x349   : >> { %v3821_v59 = vshrl.u32 %v4757_v51, 16  ;;  %v4758_v61 = vpack.c.bf16 %v3675_v30, %v3675_v30  ;;  %v3690_v0 = vmax.f32 %v3658_v54, 0.0  ;;  %v3659_v41 = vadd.f32 %v6596_v24, %v3620_v38 }
 0x34a   : >> { %v3601_v3 = vmax.f32 %v6464_v45, %v3506_v56  ;;  %v3508_v5 = vpop.permute.xlu1 %3507  ;;  %v3824_v8 = vshll.u32 %v4757_v51, 16 }
 0x34b   : >> { %v3823_v7 = vrot.slane %v3821_v59, 7  ;;  %v3830_v18 = vshrl.u32 %v4758_v61, 16  ;;  %v6623_v52 = vpack.c.bf16 %v3690_v0, %v3690_v0  ;;  %v3691_v43 = vmax.f32 %v3659_v41, 0.0 }
 0x34c   : >> { %v3640_v11 = vadd.f32 %v6596_v24, %v3601_v3  ;;  %v3602_v2 = vmax.f32 %v6469_v47, %v3508_v5  ;;  %v3538_v14 = vpop.permute.xlu0 %3537  ;;  %v3833_v20 = vshll.u32 %v4758_v61, 16  ;;  %v4701_v47 = vld [vmem:[%s6621_s17 + $0x24] sm:$0x1] }
 0x34d   : >> { %v6627_v17 = vor.u32 %v3824_v8, %v3823_v7  ;;  %v3832_v19 = vrot.slane %v3830_v18, 7  ;;  %v3961_v22 = vshrl.u32 %v6623_v52, 16  ;;  %v3828_v25 = vrot.slane %v3823_v7, 4  ;;  %v4729_v7 = vld [vmem:[%s6621_s17 + $0x74] sm:$0x1] }
 0x34e   : >> { %v4774_v28 = vpack.c.bf16 %v3691_v43, %v3691_v43  ;;  %v3672_v34 = vmax.f32 %v3640_v11, 0.0  ;;  %v3641_v15 = vadd.f32 %v6596_v24, %v3602_v2  ;;  %v3540_v39 = vpop.permute.xlu1 %3539  ;;  %v3617_v27 = vmax.f32 %v6474_v48, %v3538_v14 }
 0x34f   : >> { %v3835_v42 = vor.u32 %v3833_v20, %v3832_v19  ;;  %v3837_v44 = vrot.slane %v3832_v19, 4  ;;  %v6644_v46 = vrot.slane %v3961_v22, 7  ;;  %v3964_v37 = vshll.u32 %v6623_v52, 16 }
 0x350   : >> { %v3970_v49 = vshrl.u32 %v4774_v28, 16  ;;  %v4755_v51 = vpack.c.bf16 %v3672_v34, %v3672_v34  ;;  %v3673_v30 = vmax.f32 %v3641_v15, 0.0  ;;  %v3518_v54 = vpop.permute.xlu0 %3517  ;;  %v3973_v61 = vshll.u32 %v4774_v28, 16 }
 0x351   : >> { %v3836_v38 = vsel %vm6631_vm3, %v3828_v25, %v3835_v42  ;;  %v4138_v56 = vsel %vm6638_vm4, %v3837_v44, %v4701_v47  ;;  %v3968_v59 = vrot.slane %v6644_v46, 4  ;;  %v3656_v8 = vadd.f32 %v6596_v24, %v3617_v27  ;;  %v4696_v25 = vld [vmem:[%s6621_s17 + $0x14] sm:$0xf] }
 0x352   : >> { %4700 = vst.msk [vmem:[%s6621_s17 + $0x20] sm:$0xf] %vm172_vm0, %v3836_v38  ;;  %4702 = vst [vmem:[%s6621_s17 + $0x24] sm:$0x1] %v4138_v56  ;;  %v3972_v48 = vrot.slane %v3970_v49, 7  ;;  %v3804_v0 = vshrl.u32 %v4755_v51, 16  ;;  %v4756_v3 = vpack.c.bf16 %v3673_v30, %v3673_v30  ;;  %v3520_v5 = vpop.permute.xlu1 %3519  ;;  %v3618_v18 = vmax.f32 %v6479_v50, %v3540_v39 }
 0x353   : >> { %v3807_v41 = vshll.u32 %v4755_v51, 16  ;;  %v3607_v52 = vmax.f32 %v6484_v40, %v3518_v54  ;;  %v3608_v43 = vmax.f32 %v6489_v53, %v3520_v5  ;;  %v3688_v50 = vmax.f32 %v3656_v8, 0.0 }
 0x354   : >> { %v3975_v11 = vor.u32 %v3973_v61, %v3972_v48  ;;  %v3977_v2 = vrot.slane %v3972_v48, 4  ;;  %v3806_v14 = vrot.slane %v3804_v0, 7  ;;  %v3812_v19 = vshrl.u32 %v4756_v3, 16  ;;  %v3550_v20 = vpop.permute.xlu0 %3549 }
 0x355   : >> { %v3815_v47 = vshll.u32 %v4756_v3, 16  ;;  %v3657_v40 = vadd.f32 %v6596_v24, %v3618_v18  ;;  %v3646_v53 = vadd.f32 %v6596_v24, %v3607_v52  ;;  %v4771_v27 = vpack.c.bf16 %v3688_v50, %v3688_v50 }
 0x356   : >> { %v3976_v28 = vsel %vm6631_vm3, %v3968_v59, %v3975_v11  ;;  %v4174_v34 = vsel %vm6638_vm4, %v3977_v2, %v4729_v7  ;;  %v3809_v15 = vor.u32 %v3807_v41, %v3806_v14  ;;  %v3810_v39 = vrot.slane %v3806_v14, 4  ;;  %v3552_v42 = vpop.permute.xlu1 %3551  ;;  %v4724_v11 = vld [vmem:[%s6621_s17 + $0x64] sm:$0xf] }
 0x357   : >> { %4728 = vst.msk [vmem:[%s6621_s17 + $0x70] sm:$0xf] %vm172_vm0, %v3976_v28  ;;  %4730 = vst [vmem:[%s6621_s17 + $0x74] sm:$0x1] %v4174_v34  ;;  %v3814_v44 = vrot.slane %v3812_v19, 7  ;;  %v3689_v49 = vmax.f32 %v3657_v40, 0.0  ;;  %v3647_v54 = vadd.f32 %v6596_v24, %v3608_v43  ;;  %v3623_v38 = vmax.f32 %v6494_v55, %v3550_v20 }
 0x358   : >> { %v3678_v51 = vmax.f32 %v3646_v53, 0.0  ;;  %v4130_v30 = vsel %vm6663_vm5, %v3809_v15, %v4696_v25  ;;  %v3624_v56 = vmax.f32 %v6499_v57, %v3552_v42  ;;  %v3944_v48 = vshrl.u32 %v4771_v27, 16  ;;  %v3514_v8 = vpop.permute.xlu0 %3513 }
 0x359   : >> { %4697 = vst [vmem:[%s6621_s17 + $0x14] sm:$0xf] %v4130_v30  ;;  %v3817_v59 = vor.u32 %v3815_v47, %v3814_v44  ;;  %v3819_v61 = vrot.slane %v3814_v44, 4  ;;  %v3947_v0 = vshll.u32 %v4771_v27, 16  ;;  %v4772_v41 = vpack.c.bf16 %v3689_v49, %v3689_v49 }
 0x35a   : >> { %v4761_v3 = vpack.c.bf16 %v3678_v51, %v3678_v51  ;;  %v3679_v5 = vmax.f32 %v3647_v54, 0.0  ;;  %v3662_v7 = vadd.f32 %v6596_v24, %v3623_v38  ;;  %v3946_v57 = vrot.slane %v3944_v48, 7  ;;  %v3516_v19 = vpop.permute.xlu1 %3515 }
 0x35b   : >> { %v3818_v18 = vsel %vm6631_vm3, %v3810_v39, %v3817_v59  ;;  %v3827_v55 = vsel %vm6631_vm3, %v3819_v61, %v6627_v17  ;;  %v3663_v52 = vadd.f32 %v6596_v24, %v3624_v56  ;;  %v3966_v43 = vor.u32 %v3964_v37, %v6644_v46  ;;  %v4708_v59 = vld [vmem:[%s6621_s17 + $0x38] sm:$0x1] }
 0x35c   : >> { %4698 = vst.msk [vmem:[%s6621_s17 + $0x18] sm:$0xf] %vm172_vm0, %v3818_v18  ;;  %4699 = vst.msk [vmem:[%s6621_s17 + $0x1c] sm:$0xf] %vm172_vm0, %v3827_v55  ;;  %v3952_v2 = vshrl.u32 %v4772_v41, 16  ;;  %v3856_v14 = vshrl.u32 %v4761_v3, 16  ;;  %v3949_v20 = vor.u32 %v3947_v0, %v3946_v57  ;;  %v4762_v47 = vpack.c.bf16 %v3679_v5, %v3679_v5  ;;  %v3546_v49 = vpop.permute.xlu0 %3545 }
 0x35d   : >> { %v3955_v25 = vshll.u32 %v4772_v41, 16  ;;  %v3694_v50 = vmax.f32 %v3662_v7, 0.0  ;;  %v3695_v53 = vmax.f32 %v3663_v52, 0.0  ;;  %v3605_v28 = vmax.f32 %v6504_v58, %v3514_v8 }
 0x35e   : >> { %v3954_v40 = vrot.slane %v3952_v2, 7  ;;  %v3858_v17 = vrot.slane %v3856_v14, 7  ;;  %v4168_v46 = vsel %vm6663_vm5, %v3949_v20, %v4724_v11  ;;  %v3859_v37 = vshll.u32 %v4761_v3, 16  ;;  %v3548_v0 = vpop.permute.xlu1 %3547 }
 0x35f   : >> { %v3865_v34 = vshrl.u32 %v4762_v47, 16  ;;  %v6699_v15 = vpack.c.bf16 %v3694_v50, %v3694_v50  ;;  %v3950_v39 = vrot.slane %v3946_v57, 4  ;;  %4725 = vst [vmem:[%s6621_s17 + $0x64] sm:$0xf] %v4168_v46  ;;  %v3868_v27 = vshll.u32 %v4762_v47, 16 }
 0x360   : >> { %v3957_v42 = vor.u32 %v3955_v25, %v3954_v40  ;;  %v3959_v44 = vrot.slane %v3954_v40, 4  ;;  %v3863_v51 = vrot.slane %v3858_v17, 4  ;;  %v4778_v54 = vpack.c.bf16 %v3695_v53, %v3695_v53  ;;  %v4736_v50 = vld [vmem:[%s6621_s17 + $0x88] sm:$0x1] }
 0x361   : >> { %v3867_v30 = vrot.slane %v3865_v34, 7  ;;  %v3996_v58 = vshrl.u32 %v6699_v15, 16  ;;  %v3644_v61 = vadd.f32 %v6596_v24, %v3605_v28  ;;  %v3606_v48 = vmax.f32 %v6509_v60, %v3516_v19 }
 0x362   : >> { %v3958_v38 = vsel %vm6631_vm3, %v3950_v39, %v3957_v42  ;;  %v3967_v56 = vsel %vm6631_vm3, %v3959_v44, %v3966_v43  ;;  %v4005_v7 = vshrl.u32 %v4778_v54, 16  ;;  %v6716_v8 = vor.u32 %v3859_v37, %v3858_v17 }
 0x363   : >> { %4726 = vst.msk [vmem:[%s6621_s17 + $0x68] sm:$0xf] %vm172_vm0, %v3958_v38  ;;  %4727 = vst.msk [vmem:[%s6621_s17 + $0x6c] sm:$0xf] %vm172_vm0, %v3967_v56  ;;  %v3870_v41 = vor.u32 %v3868_v27, %v3867_v30  ;;  %v3872_v3 = vrot.slane %v3867_v30, 4  ;;  %v6714_v5 = vrot.slane %v3996_v58, 7  ;;  %v3645_v55 = vadd.f32 %v6596_v24, %v3606_v48 }
 0x364   : >> { %v3676_v18 = vmax.f32 %v3644_v61, 0.0  ;;  %v3621_v60 = vmax.f32 %v6514_v62, %v3546_v49  ;;  %v3999_v11 = vshll.u32 %v6699_v15, 16  ;;  %v4008_v2 = vshll.u32 %v4778_v54, 16  ;;  %v4703_v30 = vld [vmem:[%s6621_s17 + $0x28] sm:$0xf] }
 0x365   : >> { %v3526_v57 = vpop.permute.xlu0 %3525  ;;  %v3871_v52 = vsel %vm6631_vm3, %v3863_v51, %v3870_v41  ;;  %v4147_v43 = vsel %vm6638_vm4, %v3872_v3, %v4708_v59  ;;  %v4007_v14 = vrot.slane %v4005_v7, 7  ;;  %v3677_v20 = vmax.f32 %v3645_v55, 0.0 }
 0x366   : >> { %4707 = vst.msk [vmem:[%s6621_s17 + $0x34] sm:$0xf] %vm172_vm0, %v3871_v52  ;;  %4709 = vst [vmem:[%s6621_s17 + $0x38] sm:$0x1] %v4147_v43  ;;  %v4759_v19 = vpack.c.bf16 %v3676_v18, %v3676_v18  ;;  %v3660_v25 = vadd.f32 %v6596_v24, %v3621_v60  ;;  %v4003_v62 = vrot.slane %v6714_v5, 4  ;;  %v3622_v40 = vmax.f32 %v6519_v63, %v3548_v0 }
 0x367   : >> { %v3528_v47 = vpop.permute.xlu1 %3527  ;;  %v3611_v17 = vmax.f32 %v6526_v1, %v3526_v57  ;;  %v4010_v28 = vor.u32 %v4008_v2, %v4007_v14  ;;  %v4012_v46 = vrot.slane %v4007_v14, 4  ;;  %v4760_v15 = vpack.c.bf16 %v3677_v20, %v3677_v20 }
 0x368   : >> { %v3612_v53 = vmax.f32 %v6529_v4, %v3528_v47  ;;  %v3839_v37 = vshrl.u32 %v4759_v19, 16  ;;  %v3842_v34 = vshll.u32 %v4759_v19, 16  ;;  %v3692_v39 = vmax.f32 %v3660_v25, 0.0 }
 0x369   : >> { %v3661_v42 = vadd.f32 %v6596_v24, %v3622_v40  ;;  %v3650_v44 = vadd.f32 %v6596_v24, %v3611_v17  ;;  %v3558_v27 = vpop.permute.xlu0 %3557  ;;  %v4011_v63 = vsel %vm6631_vm3, %v4003_v62, %v4010_v28  ;;  %v4183_v1 = vsel %vm6638_vm4, %v4012_v46, %v4736_v50  ;;  %v4731_v62 = vld [vmem:[%s6621_s17 + $0x78] sm:$0xf] }
 0x36a   : >> { %v3841_v4 = vrot.slane %v3839_v37, 7  ;;  %v3651_v49 = vadd.f32 %v6596_v24, %v3612_v53  ;;  %4735 = vst.msk [vmem:[%s6621_s17 + $0x84] sm:$0xf] %vm172_vm0, %v4011_v63  ;;  %4737 = vst [vmem:[%s6621_s17 + $0x88] sm:$0x1] %v4183_v1  ;;  %v3847_v58 = vshrl.u32 %v4760_v15, 16  ;;  %v4775_v38 = vpack.c.bf16 %v3692_v39, %v3692_v39 }
 0x36b   : >> { %v3560_v51 = vpop.permute.xlu1 %3559  ;;  %v3850_v54 = vshll.u32 %v4760_v15, 16  ;;  %v3693_v56 = vmax.f32 %v3661_v42, 0.0  ;;  %v3682_v48 = vmax.f32 %v3650_v44, 0.0  ;;  %v3627_v52 = vmax.f32 %v6534_v6, %v3558_v27  ;;  %v4715_v1 = vld [vmem:[%s6621_s17 + $0x4c] sm:$0x1] }
 0x36c   : >> { %v3844_v59 = vor.u32 %v3842_v34, %v3841_v4  ;;  %v3845_v61 = vrot.slane %v3841_v4, 4  ;;  %v3683_v0 = vmax.f32 %v3651_v49, 0.0  ;;  %v3849_v41 = vrot.slane %v3847_v58, 7 }
 0x36d   : >> { %v3979_v3 = vshrl.u32 %v4775_v38, 16  ;;  %v3982_v7 = vshll.u32 %v4775_v38, 16  ;;  %v4776_v18 = vpack.c.bf16 %v3693_v56, %v3693_v56  ;;  %v6747_v60 = vpack.c.bf16 %v3682_v48, %v3682_v48  ;;  %v3522_v20 = vpop.permute.xlu0 %3521 }
 0x36e   : >> { %v4141_v55 = vsel %vm6663_vm5, %v3844_v59, %v4703_v30  ;;  %v4766_v57 = vpack.c.bf16 %v3683_v0, %v3683_v0  ;;  %v3852_v43 = vor.u32 %v3850_v54, %v3849_v41  ;;  %v3854_v2 = vrot.slane %v3849_v41, 4 }
 0x36f   : >> { %4704 = vst [vmem:[%s6621_s17 + $0x28] sm:$0xf] %v4141_v55  ;;  %v3981_v14 = vrot.slane %v3979_v3, 7  ;;  %v3987_v19 = vshrl.u32 %v4776_v18, 16  ;;  %v3524_v25 = vpop.permute.xlu1 %3523  ;;  %v4001_v47 = vor.u32 %v3999_v11, %v6714_v5  ;;  %v3891_v50 = vshrl.u32 %v6747_v60, 16 }
 0x370   : >> { %v3900_v40 = vshrl.u32 %v4766_v57, 16  ;;  %v3853_v17 = vsel %vm6631_vm3, %v3845_v61, %v3852_v43  ;;  %v3862_v6 = vsel %vm6631_vm3, %v3854_v2, %v6716_v8  ;;  %v3990_v28 = vshll.u32 %v4776_v18, 16 }
 0x371   : >> { %v3984_v53 = vor.u32 %v3982_v7, %v3981_v14  ;;  %4705 = vst.msk [vmem:[%s6621_s17 + $0x2c] sm:$0xf] %vm172_vm0, %v3853_v17  ;;  %4706 = vst.msk [vmem:[%s6621_s17 + $0x30] sm:$0xf] %vm172_vm0, %v3862_v6  ;;  %v3989_v5 = vrot.slane %v3987_v19, 7  ;;  %v3893_v11 = vrot.slane %v3891_v50, 7  ;;  %v3666_v15 = vadd.f32 %v6596_v24, %v3627_v52  ;;  %v3554_v54 = vpop.permute.xlu0 %3553 }
 0x372   : >> { %v3902_v46 = vrot.slane %v3900_v40, 7  ;;  %v3903_v37 = vshll.u32 %v4766_v57, 16  ;;  %v3628_v39 = vmax.f32 %v6539_v31, %v3560_v51  ;;  %v3609_v8 = vmax.f32 %v6544_v9, %v3522_v20  ;;  %v4743_v6 = vld [vmem:[%s6621_s17 + $0x9c] sm:$0x1] }
 0x373   : >> { %v4177_v34 = vsel %vm6663_vm5, %v3984_v53, %v4731_v62  ;;  %v3985_v42 = vrot.slane %v3981_v14, 4  ;;  %v3992_v44 = vor.u32 %v3990_v28, %v3989_v5  ;;  %v3994_v27 = vrot.slane %v3989_v5, 4  ;;  %v3556_v38 = vpop.permute.xlu1 %3555 }
 0x374   : >> { %4732 = vst [vmem:[%s6621_s17 + $0x78] sm:$0xf] %v4177_v34  ;;  %v3898_v63 = vrot.slane %v3893_v11, 4  ;;  %v3905_v4 = vor.u32 %v3903_v37, %v3902_v46  ;;  %v3907_v49 = vrot.slane %v3902_v46, 4  ;;  %v3698_v30 = vmax.f32 %v3666_v15, 0.0 }
 0x375   : >> { %v3667_v58 = vadd.f32 %v6596_v24, %v3628_v39  ;;  %v3993_v31 = vsel %vm6631_vm3, %v3985_v42, %v3992_v44  ;;  %v4002_v9 = vsel %vm6631_vm3, %v3994_v27, %v4001_v47  ;;  %v3648_v51 = vadd.f32 %v6596_v24, %v3609_v8  ;;  %v4710_v34 = vld [vmem:[%s6621_s17 + $0x3c] sm:$0xf] }
 0x376   : >> { %v3610_v56 = vmax.f32 %v6549_v10, %v3524_v25  ;;  %4733 = vst.msk [vmem:[%s6621_s17 + $0x7c] sm:$0xf] %vm172_vm0, %v3993_v31  ;;  %4734 = vst.msk [vmem:[%s6621_s17 + $0x80] sm:$0xf] %vm172_vm0, %v4002_v9  ;;  %v3906_v59 = vsel %vm6631_vm3, %v3898_v63, %v3905_v4  ;;  %v4156_v61 = vsel %vm6638_vm4, %v3907_v49, %v4715_v1  ;;  %v3894_v18 = vshll.u32 %v6747_v60, 16 }
 0x377   : >> { %v4781_v48 = vpack.c.bf16 %v3698_v30, %v3698_v30  ;;  %v3699_v0 = vmax.f32 %v3667_v58, 0.0  ;;  %4714 = vst.msk [vmem:[%s6621_s17 + $0x48] sm:$0xf] %vm172_vm0, %v3906_v59  ;;  %4716 = vst [vmem:[%s6621_s17 + $0x4c] sm:$0x1] %v4156_v61  ;;  %v3680_v41 = vmax.f32 %v3648_v51, 0.0  ;;  %v3625_v10 = vmax.f32 %v6554_v35, %v3554_v54 }
 0x378   : >> { %v3649_v3 = vadd.f32 %v6596_v24, %v3610_v56  ;;  %v3626_v7 = vmax.f32 %v6559_v12, %v3556_v38  ;;  %v3896_v25 = vor.u32 %v3894_v18, %v3893_v11  ;;  %v4738_v31 = vld [vmem:[%s6621_s17 + $0x8c] sm:$0xf] }
 0x379   : >> { %v4031_v55 = vshrl.u32 %v4781_v48, 16  ;;  %v4782_v57 = vpack.c.bf16 %v3699_v0, %v3699_v0  ;;  %v4763_v52 = vpack.c.bf16 %v3680_v41, %v3680_v41  ;;  %v3664_v2 = vadd.f32 %v6596_v24, %v3625_v10 }
 0x37a   : >> { %v3681_v43 = vmax.f32 %v3649_v3, 0.0  ;;  %v3665_v14 = vadd.f32 %v6596_v24, %v3626_v7  ;;  %v4034_v38 = vshll.u32 %v4781_v48, 16 }
 0x37b   : >> { %v4033_v19 = vrot.slane %v4031_v55, 7  ;;  %v4040_v20 = vshrl.u32 %v4782_v57, 16  ;;  %v3874_v47 = vshrl.u32 %v4763_v52, 16  ;;  %v3696_v35 = vmax.f32 %v3664_v2, 0.0 }
 0x37c   : >> { %v4764_v62 = vpack.c.bf16 %v3681_v43, %v3681_v43  ;;  %v4043_v12 = vshll.u32 %v4782_v57, 16  ;;  %v3877_v40 = vshll.u32 %v4763_v52, 16  ;;  %v3697_v60 = vmax.f32 %v3665_v14, 0.0 }
 0x37d   : >> { %v4042_v50 = vrot.slane %v4040_v20, 7  ;;  %v4038_v17 = vrot.slane %v4033_v19, 4  ;;  %v3876_v53 = vrot.slane %v3874_v47, 7  ;;  %v4779_v5 = vpack.c.bf16 %v3696_v35, %v3696_v35 }
 0x37e   : >> { %v3882_v28 = vshrl.u32 %v4764_v62, 16  ;;  %v3885_v15 = vshll.u32 %v4764_v62, 16  ;;  %v4780_v39 = vpack.c.bf16 %v3697_v60, %v3697_v60  ;;  %v4036_v0 = vor.u32 %v4034_v38, %v4033_v19 }
 0x37f   : >> { %v4045_v46 = vor.u32 %v4043_v12, %v4042_v50  ;;  %v4047_v37 = vrot.slane %v4042_v50, 4  ;;  %v3879_v11 = vor.u32 %v3877_v40, %v3876_v53  ;;  %v3880_v8 = vrot.slane %v3876_v53, 4 }
 0x380   : >> { %v3884_v42 = vrot.slane %v3882_v28, 7  ;;  %v4014_v44 = vshrl.u32 %v4779_v5, 16  ;;  %v4017_v1 = vshll.u32 %v4779_v5, 16  ;;  %v4022_v4 = vshrl.u32 %v4780_v39, 16 }
 0x381   : >> { %v4046_v27 = vsel %vm6631_vm3, %v4038_v17, %v4045_v46  ;;  %v4192_v63 = vsel %vm6638_vm4, %v4047_v37, %v4743_v6  ;;  %v4150_v49 = vsel %vm6663_vm5, %v3879_v11, %v4710_v34  ;;  %v4025_v51 = vshll.u32 %v4780_v39, 16  ;;  %v4722_v46 = vld [vmem:[%s6621_s17 + $0x60] sm:$0x1] }
 0x382   : >> { %4742 = vst.msk [vmem:[%s6621_s17 + $0x98] sm:$0xf] %vm172_vm0, %v4046_v27  ;;  %4744 = vst [vmem:[%s6621_s17 + $0x9c] sm:$0x1] %v4192_v63  ;;  %v3887_v30 = vor.u32 %v3885_v15, %v3884_v42  ;;  %v3889_v58 = vrot.slane %v3884_v42, 4  ;;  %v4016_v54 = vrot.slane %v4014_v44, 7 }
 0x383   : >> { %4711 = vst [vmem:[%s6621_s17 + $0x3c] sm:$0xf] %v4150_v49  ;;  %v4024_v9 = vrot.slane %v4022_v4, 7 }
 0x384   : >> { %v3888_v56 = vsel %vm6631_vm3, %v3880_v8, %v3887_v30  ;;  %v3897_v59 = vsel %vm6631_vm3, %v3889_v58, %v3896_v25  ;;  %v4019_v61 = vor.u32 %v4017_v1, %v4016_v54  ;;  %v4020_v41 = vrot.slane %v4016_v54, 4 }
 0x385   : >> { %4712 = vst.msk [vmem:[%s6621_s17 + $0x40] sm:$0xf] %vm172_vm0, %v3888_v56  ;;  %4713 = vst.msk [vmem:[%s6621_s17 + $0x44] sm:$0xf] %vm172_vm0, %v3897_v59  ;;  %v4027_v48 = vor.u32 %v4025_v51, %v4024_v9  ;;  %v4029_v3 = vrot.slane %v4024_v9, 4 }
 0x386   : >> { %v4186_v10 = vsel %vm6663_vm5, %v4019_v61, %v4738_v31  ;;  %v4717_v51 = vld [vmem:[%s6621_s17 + $0x50] sm:$0xf] }
 0x387   : >> { %4739 = vst [vmem:[%s6621_s17 + $0x8c] sm:$0xf] %v4186_v10  ;;  %v4028_v7 = vsel %vm6631_vm3, %v4020_v41, %v4027_v48  ;;  %v4037_v18 = vsel %vm6631_vm3, %v4029_v3, %v4036_v0 }
 0x388   : >> { %4740 = vst.msk [vmem:[%s6621_s17 + $0x90] sm:$0xf] %vm172_vm0, %v4028_v7  ;;  %4741 = vst.msk [vmem:[%s6621_s17 + $0x94] sm:$0xf] %vm172_vm0, %v4037_v18 }
 0x3a5   : >> { %v3534_v55 = vpop.permute.xlu0 %3533 }
 0x3a6   : >> { %v3615_v57 = vmax.f32 %v6566_v13, %v3534_v55 }
 0x3a7   : >> { %v3536_v52 = vpop.permute.xlu1 %3535 }
 0x3a8   : >> { %v3654_v43 = vadd.f32 %v6596_v24, %v3615_v57  ;;  %v3616_v2 = vmax.f32 %v6569_v16, %v3536_v52 }
 0x3aa   : >> { %v3686_v14 = vmax.f32 %v3654_v43, 0.0  ;;  %v3655_v19 = vadd.f32 %v6596_v24, %v3616_v2 }
 0x3ac   : >> { %v4769_v20 = vpack.c.bf16 %v3686_v14, %v3686_v14  ;;  %v3687_v25 = vmax.f32 %v3655_v19, 0.0 }
 0x3ad   : >> { %v3530_v47 = vpop.permute.xlu0 %3529 }
 0x3ae   : >> { %v3926_v62 = vshrl.u32 %v4769_v20, 16  ;;  %v4770_v35 = vpack.c.bf16 %v3687_v25, %v3687_v25  ;;  %v3613_v50 = vmax.f32 %v6576_v21, %v3530_v47  ;;  %v3929_v27 = vshll.u32 %v4769_v20, 16  ;;  %v4745_v20 = vld [vmem:[%s6621_s17 + $0xa0] sm:$0xf] }
 0x3af   : >> { %v3532_v12 = vpop.permute.xlu1 %3531 }
 0x3b0   : >> { %v3928_v40 = vrot.slane %v3926_v62, 7  ;;  %v3935_v60 = vshrl.u32 %v4770_v35, 16  ;;  %v3652_v13 = vadd.f32 %v6596_v24, %v3613_v50  ;;  %v3614_v17 = vmax.f32 %v6579_v23, %v3532_v12 }
 0x3b1   : >> { %v3562_v6 = vpop.permute.xlu0 %3561  ;;  %v3938_v53 = vshll.u32 %v4770_v35, 16 }
 0x3b2   : >> { %v3937_v16 = vrot.slane %v3935_v60, 7  ;;  %v3684_v28 = vmax.f32 %v3652_v13, 0.0  ;;  %v3933_v5 = vrot.slane %v3928_v40, 4  ;;  %v3653_v37 = vadd.f32 %v6596_v24, %v3614_v17 }
 0x3b3   : >> { %v3629_v34 = vmax.f32 %v6584_v26, %v3562_v6  ;;  %v3564_v21 = vpop.permute.xlu1 %3563  ;;  %v3931_v9 = vor.u32 %v3929_v27, %v3928_v40 }
 0x3b4   : >> { %v3940_v15 = vor.u32 %v3938_v53, %v3937_v16  ;;  %v3942_v39 = vrot.slane %v3937_v16, 4  ;;  %v4767_v11 = vpack.c.bf16 %v3684_v28, %v3684_v28  ;;  %v3630_v8 = vmax.f32 %v6589_v33, %v3564_v21 }
 0x3b5   : >> { %v3685_v42 = vmax.f32 %v3653_v37, 0.0  ;;  %v3668_v23 = vadd.f32 %v6596_v24, %v3629_v34  ;;  %v3566_v44 = vpop.permute.xlu0 %3565 }
 0x3b6   : >> { %v3941_v63 = vsel %vm6631_vm3, %v3933_v5, %v3940_v15  ;;  %v4165_v1 = vsel %vm6638_vm4, %v3942_v39, %v4722_v46  ;;  %v3909_v4 = vshrl.u32 %v4767_v11, 16  ;;  %v3669_v33 = vadd.f32 %v6596_v24, %v3630_v8  ;;  %v4750_v15 = vld [vmem:[%s6621_s17 + $0xb0] sm:$0x1] }
 0x3b7   : >> { %4721 = vst.msk [vmem:[%s6621_s17 + $0x5c] sm:$0xf] %vm172_vm0, %v3941_v63  ;;  %4723 = vst [vmem:[%s6621_s17 + $0x60] sm:$0x1] %v4165_v1  ;;  %v4768_v26 = vpack.c.bf16 %v3685_v42, %v3685_v42  ;;  %v3700_v49 = vmax.f32 %v3668_v23, 0.0  ;;  %v3631_v30 = vmax.f32 %v6599_v29, %v3566_v44  ;;  %v3568_v58 = vpop.permute.xlu1 %3567  ;;  %v3912_v38 = vshll.u32 %v4767_v11, 16 }
 0x3b8   : >> { %v3911_v54 = vrot.slane %v3909_v4, 7  ;;  %v3632_v31 = vmax.f32 %v6605_v36, %v3568_v58  ;;  %v3701_v61 = vmax.f32 %v3669_v33, 0.0 }
 0x3b9   : >> { %v3917_v56 = vshrl.u32 %v4768_v26, 16  ;;  %v4783_v59 = vpack.c.bf16 %v3700_v49, %v3700_v49  ;;  %v3920_v41 = vshll.u32 %v4768_v26, 16  ;;  %v3670_v48 = vadd.f32 %v6596_v24, %v3631_v30 }
 0x3ba   : >> { %v3914_v0 = vor.u32 %v3912_v38, %v3911_v54  ;;  %v3671_v3 = vadd.f32 %v6596_v24, %v3632_v31  ;;  %v3915_v10 = vrot.slane %v3911_v54, 4  ;;  %v4784_v18 = vpack.c.bf16 %v3701_v61, %v3701_v61 }
 0x3bb   : >> { %v3919_v29 = vrot.slane %v3917_v56, 7  ;;  %v4049_v7 = vshrl.u32 %v4783_v59, 16  ;;  %v4052_v55 = vshll.u32 %v4783_v59, 16  ;;  %v3702_v57 = vmax.f32 %v3670_v48, 0.0 }
 0x3bc   : >> { %v4159_v36 = vsel %vm6663_vm5, %v3914_v0, %v4717_v51  ;;  %v3703_v52 = vmax.f32 %v3671_v3, 0.0  ;;  %v4057_v19 = vshrl.u32 %v4784_v18, 16  ;;  %v4060_v12 = vshll.u32 %v4784_v18, 16 }
 0x3bd   : >> { %4718 = vst [vmem:[%s6621_s17 + $0x50] sm:$0xf] %v4159_v36  ;;  %v3922_v43 = vor.u32 %v3920_v41, %v3919_v29  ;;  %v3924_v2 = vrot.slane %v3919_v29, 4  ;;  %v4051_v14 = vrot.slane %v4049_v7, 7  ;;  %v4785_v24 = vpack.c.bf16 %v3702_v57, %v3702_v57 }
 0x3be   : >> { %v4786_v25 = vpack.c.bf16 %v3703_v52, %v3703_v52  ;;  %v4059_v50 = vrot.slane %v4057_v19, 7 }
 0x3bf   : >> { %v3923_v47 = vsel %vm6631_vm3, %v3915_v10, %v3922_v43  ;;  %v3932_v62 = vsel %vm6631_vm3, %v3924_v2, %v3931_v9  ;;  %v4054_v35 = vor.u32 %v4052_v55, %v4051_v14  ;;  %v4066_v40 = vshrl.u32 %v4785_v24, 16 }
 0x3c0   : >> { %4719 = vst.msk [vmem:[%s6621_s17 + $0x54] sm:$0xf] %vm172_vm0, %v3923_v47  ;;  %4720 = vst.msk [vmem:[%s6621_s17 + $0x58] sm:$0xf] %vm172_vm0, %v3932_v62  ;;  %v4075_v60 = vshrl.u32 %v4786_v25, 16  ;;  %v4055_v13 = vrot.slane %v4051_v14, 4  ;;  %v4062_v16 = vor.u32 %v4060_v12, %v4059_v50 }
 0x3c1   : >> { %v4195_v17 = vsel %vm6663_vm5, %v4054_v35, %v4745_v20  ;;  %v4069_v6 = vshll.u32 %v4785_v24, 16  ;;  %v4068_v53 = vrot.slane %v4066_v40, 7  ;;  %v4078_v5 = vshll.u32 %v4786_v25, 16  ;;  %348 = sbr.rel (!%p346_p4) target bundleno = 103 (0x67), region = 74 }
 0x3c2   : >> { %4746 = vst [vmem:[%s6621_s17 + $0xa0] sm:$0xf] %v4195_v17  ;;  %v4077_v28 = vrot.slane %v4075_v60, 7  ;;  %v4064_v46 = vrot.slane %v4059_v50, 4  ;;  %v4063_v37 = vsel %vm6631_vm3, %v4055_v13, %v4062_v16 }
 0x3c3   : >> { %v4071_v34 = vor.u32 %v4069_v6, %v4068_v53  ;;  %v4073_v21 = vrot.slane %v4068_v53, 4  ;;  %4747 = vst.msk [vmem:[%s6621_s17 + $0xa4] sm:$0xf] %vm172_vm0, %v4063_v37 }
 0x3c4   : >> { %v4080_v39 = vor.u32 %v4078_v5, %v4077_v28  ;;  %v4082_v22 = vrot.slane %v4077_v28, 4 }
 0x3c5   : >> { %v4072_v11 = vsel %vm6631_vm3, %v4064_v46, %v4071_v34 }
 0x3c6   : >> { %v4081_v8 = vsel %vm6631_vm3, %v4073_v21, %v4080_v39  ;;  %4748 = vst.msk [vmem:[%s6621_s17 + $0xa8] sm:$0xf] %vm172_vm0, %v4072_v11  ;;  %v4201_v42 = vsel %vm6638_vm4, %v4082_v22, %v4750_v15 }
 0x3c7   : >> { %4749 = vst.msk [vmem:[%s6621_s17 + $0xac] sm:$0xf] %vm172_vm0, %v4081_v8  ;;  %4751 = vst [vmem:[%s6621_s17 + $0xb0] sm:$0x1] %v4201_v42 }
 0x3c8 PF: > { %s13_s12 = sadd.s32 1, %s4955_s12  }
 0x3c9   : > { %p10_p5 = scmp.ge.s32.totalorder %s13_s12, 4  }
 0x3cb   :  { %12 = sbr.rel (!%p10_p5) target bundleno = 1 (0x1), region = 85 }

// kernel: cnn_forward.4
= control target key start
LH: loop header
LB: loop body
LE: loop exit
PB: predicated region body
PF: predicated region fallthrough
CT: control target
= control target key end

     0   :  { %s3111_s12 = smov 0   ;;  %s3948_s0 = inlined_call_operand.vmem [shape: bf16[2,17,2,17,64], index: 0, kind: input, shape index: {}]   ;;  %s3949_s1 = inlined_call_operand.vmem [shape: bf16[512,256], index: 1, kind: input, shape index: {}]   ;;  %s3950_s2 = inlined_call_operand.vmem [shape: f32[1,64], index: 2, kind: input, shape index: {}]   ;;  %s3951_s3 = inlined_call_operand.vmem [shape: bf16[2,256,64], index: 3, kind: output, shape index: {}]  }
   0x1 LB: > { %s2592_s13 = sadd.s32 4294967295, %s3084_s12   ;;  %p2596_p0 = scmp.ge.s32.totalorder %s3084_s12, 1  ;;  %s3084_s12 = sphi %s3111_s12, %s13_s12  }
   0x2   : > { %p137_p1 = scmp.lt.s32.totalorder %s3084_s12, 3 }
   0x4   : > { %p138_p2 = pnand %p2596_p0, %p137_p1 }
   0x5   : > { %p161_p3 = scmp.lt.s32.totalorder (!%p138_p2), %s2592_s13, 1  ;;  %s3129_s22 = smov (!%p138_p2), 0  }
   0x6   : > { %141 = sbr.rel (%p138_p2) target bundleno = 643 (0x283), region = 32 }
   0xd   : > { %s3955_s13 = smov (!%p161_p3, %s2592_s13), 1 }
   0xe   : > { %s2928_s14 = smul.u32 408, %s3955_s13  ;;  %s2878_s15 = sshll.u32 %s3955_s13, 7 }
   0xf   : > { %s3122_s18 = scalar_lea.vmem %s3951_s3, %s2878_s15 }
  0x10   : > { %s3127_s21 = scalar_lea.vmem %s3948_s0, %s2928_s14 }
  0x11 LB: >> { %s2879_s23 = smul.u32 192, %s3088_s22  ;;  %vm278_vm0 = vsmask.f32 3328  ;;  %vm279_vm1 = vsmask.f32 7440  ;;  %s3090_s25 = smov 64   ;;  %s3088_s22 = sphi %s3129_s22, %s176_s22  }
  0x12   : >> { %vm3148_vm2 = vmor %vm278_vm0, %vm279_vm1  ;;  %vm245_vm3 = vcmask 523264   ;;  %vm521_vm4 = vcmask 1048064   ;;  %vm2498_vm5 = vcmask 519168  }
  0x13   : >> { %s3136_s24 = scalar_lea.vmem %s3127_s21, %s2879_s23 }
  0x14   : >> { %v2644_v0 = vld [vmem:[%s3136_s24 + $0xc] sm:$0xf]  ;;  %v2645_v1 = vld [vmem:[%s3136_s24 + $0x10] sm:$0xf]  ;;  %v2646_v2 = vld [vmem:[%s3136_s24 + $0x14] sm:$0x1] }
  0x15   : >> { %v630_v3 = vshrl.u32 %v2644_v0, 16  ;;  %v633_v4 = vshll.u32 %v2644_v0, 16  ;;  %v639_v5 = vshll.u32 %v2645_v1, 16  ;;  %v643_v6 = vshrl.u32 %v2645_v1, 16  ;;  %v254_v7 = vld [vmem:[%s3136_s24] sm:$0xf] }
  0x16   : >> { %v649_v8 = vshll.u32 %v2646_v2, 16  ;;  %v255_v9 = vld [vmem:[%s3136_s24 + $0x4] sm:$0xf]  ;;  %v256_v10 = vld [vmem:[%s3136_s24 + $0x8] sm:$0x1]  ;;  %v282_v11 = vshrl.u32 %v254_v7, 16 }
  0x17   : >> { %v632_v12 = vrot.slane %v630_v3, 4  ;;  %v635_v13 = vrot.slane %v633_v4, 5  ;;  %v641_v14 = vrot.slane %v639_v5, 5  ;;  %v645_v15 = vrot.slane %v643_v6, 4  ;;  %v2761_v16 = vld [vmem:[%s3136_s24 + $0x24] sm:$0xf] }
  0x18   : >> { %v651_v17 = vrot.slane %v649_v8, 5  ;;  %v284_v18 = vrot.slane %v282_v11, 4  ;;  %v285_v19 = vshll.u32 %v254_v7, 16  ;;  %v291_v20 = vshll.u32 %v255_v9, 16  ;;  %v2762_v25 = vld [vmem:[%s3136_s24 + $0x28] sm:$0xf] }
  0x19   : >> { %v636_v21 = vor.u32 %v635_v13, %v632_v12  ;;  %v646_v22 = vor.u32 %v645_v15, %v641_v14  ;;  %v295_v23 = vshrl.u32 %v255_v9, 16  ;;  %v301_v24 = vshll.u32 %v256_v10, 16  ;;  %v2763_v35 = vld [vmem:[%s3136_s24 + $0x2c] sm:$0x1]  ;;  %v2702_v40 = vld [vmem:[%s3136_s24 + $0x18] sm:$0xf] }
  0x1a   : >> { %v287_v27 = vrot.slane %v285_v19, 5  ;;  %v293_v28 = vrot.slane %v291_v20, 5  ;;  %v1325_v29 = vshrl.u32 %v2761_v16, 16  ;;  %v1328_v30 = vshll.u32 %v2761_v16, 16  ;;  %v2703_v45 = vld [vmem:[%s3136_s24 + $0x1c] sm:$0xf] }
  0x1b   : >> { %v637_v31 = vrot.slane %v636_v21, 4  ;;  %v647_v32 = vrot.slane %v646_v22, 4  ;;  %v297_v33 = vrot.slane %v295_v23, 4  ;;  %v303_v34 = vrot.slane %v301_v24, 5  ;;  %v2704_v53 = vld [vmem:[%s3136_s24 + $0x20] sm:$0x1] }
  0x1c   : >> { %v288_v36 = vor.u32 %v287_v27, %v284_v18  ;;  %v1327_v37 = vrot.slane %v1325_v29, 4  ;;  %v1330_v38 = vrot.slane %v1328_v30, 5  ;;  %v1334_v39 = vshll.u32 %v2762_v25, 16  ;;  %v2647_v59 = vld [vmem:[%s3136_s24 + $0x24] sm:$0xf] }
  0x1d   : >> { %v642_v41 = vsel %vm3148_vm2, %v637_v31, %v641_v14  ;;  %v652_v42 = vsel %vm3148_vm2, %v647_v32, %v651_v17  ;;  %v298_v43 = vor.u32 %v297_v33, %v293_v28  ;;  %v1338_v44 = vshrl.u32 %v2762_v25, 16  ;;  %v2648_v0 = vld [vmem:[%s3136_s24 + $0x28] sm:$0xf]  ;;  %v2649_v8 = vld [vmem:[%s3136_s24 + $0x2c] sm:$0x1] }
  0x1e   : >> { %v2668_v46 = vcombine.low %v642_v41, %v652_v42  ;;  %v289_v47 = vrot.slane %v288_v36, 4  ;;  %v1331_v48 = vor.u32 %v1330_v38, %v1327_v37  ;;  %v1336_v49 = vrot.slane %v1334_v39, 5  ;;  %v2764_v14 = vld [vmem:[%s3136_s24 + $0x3c] sm:$0xf]  ;;  %v2765_v19 = vld [vmem:[%s3136_s24 + $0x40] sm:$0xf] }
  0x1f   : >> { %v299_v50 = vrot.slane %v298_v43, 4  ;;  %v1340_v51 = vrot.slane %v1338_v44, 4  ;;  %v1344_v52 = vshll.u32 %v2763_v35, 16  ;;  %v978_v54 = vshrl.u32 %v2702_v40, 16  ;;  %v2766_v31 = vld [vmem:[%s3136_s24 + $0x44] sm:$0x1] }
  0x20   : >> { %845 = vrot.lane.b32.xlu0 %v2668_v46, %s3090_s25  ;;  %v294_v55 = vsel %vm3148_vm2, %v289_v47, %v293_v28  ;;  %v1332_v56 = vrot.slane %v1331_v48, 4  ;;  %v981_v57 = vshll.u32 %v2702_v40, 16  ;;  %v987_v58 = vshll.u32 %v2703_v45, 16  ;;  %v258_v46 = vld [vmem:[%s3136_s24 + $0x1c] sm:$0xf] }
  0x21   : >> { %v304_v60 = vsel %vm3148_vm2, %v299_v50, %v303_v34  ;;  %v1341_v61 = vor.u32 %v1340_v51, %v1336_v49  ;;  %v1346_v62 = vrot.slane %v1344_v52, 5  ;;  %v980_v63 = vrot.slane %v978_v54, 4  ;;  %v257_v34 = vld [vmem:[%s3136_s24 + $0x18] sm:$0xf]  ;;  %v259_v52 = vld [vmem:[%s3136_s24 + $0x20] sm:$0x1] }
  0x22   : >> { %v2611_v1 = vcombine.low %v294_v55, %v304_v60  ;;  %v1337_v2 = vsel %vm3148_vm2, %v1332_v56, %v1336_v49  ;;  %v983_v3 = vrot.slane %v981_v57, 5  ;;  %v989_v4 = vrot.slane %v987_v58, 5 }
  0x23   : >> { %v1342_v5 = vrot.slane %v1341_v61, 4  ;;  %v991_v6 = vshrl.u32 %v2703_v45, 16  ;;  %v997_v7 = vshll.u32 %v2704_v53, 16  ;;  %v654_v9 = vshrl.u32 %v2647_v59, 16  ;;  %v2705_v53 = vld [vmem:[%s3136_s24 + $0x30] sm:$0xf] }
  0x24   : >> { %497 = vrot.lane.b32.xlu1 %v2611_v1, %s3090_s25  ;;  %v984_v10 = vor.u32 %v983_v3, %v980_v63  ;;  %v657_v11 = vshll.u32 %v2647_v59, 16  ;;  %v663_v12 = vshll.u32 %v2648_v0, 16  ;;  %v667_v13 = vshrl.u32 %v2648_v0, 16  ;;  %v2706_v1 = vld [vmem:[%s3136_s24 + $0x34] sm:$0xf] }
  0x25   : >> { %v1347_v15 = vsel %vm3148_vm2, %v1342_v5, %v1346_v62  ;;  %v993_v16 = vrot.slane %v991_v6, 4  ;;  %v999_v17 = vrot.slane %v997_v7, 5  ;;  %v656_v18 = vrot.slane %v654_v9, 4  ;;  %v2707_v6 = vld [vmem:[%s3136_s24 + $0x38] sm:$0x1] }
  0x26   : >> { %v2785_v20 = vcombine.low %v1337_v2, %v1347_v15  ;;  %v985_v21 = vrot.slane %v984_v10, 4  ;;  %v659_v22 = vrot.slane %v657_v11, 5  ;;  %v665_v23 = vrot.slane %v663_v12, 5  ;;  %v2650_v12 = vld [vmem:[%s3136_s24 + $0x3c] sm:$0xf] }
  0x27   : >> { %v994_v24 = vor.u32 %v993_v16, %v989_v4  ;;  %v669_v25 = vrot.slane %v667_v13, 4  ;;  %v673_v27 = vshll.u32 %v2649_v8, 16  ;;  %v1349_v28 = vshrl.u32 %v2764_v14, 16 }
  0x28   : >> { %1540 = vrot.lane.b32.xlu0 %v2785_v20, %s3090_s25  ;;  %v990_v29 = vsel %vm3148_vm2, %v985_v21, %v989_v4  ;;  %v660_v30 = vor.u32 %v659_v22, %v656_v18  ;;  %v1352_v32 = vshll.u32 %v2764_v14, 16  ;;  %v1358_v33 = vshll.u32 %v2765_v19, 16  ;;  %v2651_v21 = vld [vmem:[%s3136_s24 + $0x40] sm:$0xf] }
  0x29   : >> { %v995_v35 = vrot.slane %v994_v24, 4  ;;  %v670_v36 = vor.u32 %v669_v25, %v665_v23  ;;  %v675_v37 = vrot.slane %v673_v27, 5  ;;  %v1351_v38 = vrot.slane %v1349_v28, 4  ;;  %v2652_v25 = vld [vmem:[%s3136_s24 + $0x44] sm:$0x1] }
  0x2a   : >> { %v661_v39 = vrot.slane %v660_v30, 4  ;;  %v1354_v40 = vrot.slane %v1352_v32, 5  ;;  %v1360_v41 = vrot.slane %v1358_v33, 5  ;;  %v1362_v42 = vshrl.u32 %v2765_v19, 16 }
  0x2b   : >> { %v1000_v43 = vsel %vm3148_vm2, %v995_v35, %v999_v17  ;;  %v671_v44 = vrot.slane %v670_v36, 4  ;;  %v1368_v45 = vshll.u32 %v2766_v31, 16  ;;  %v306_v47 = vshrl.u32 %v257_v34, 16  ;;  %v2767_v36 = vld [vmem:[%s3136_s24 + $0x54] sm:$0xf] }
  0x2c   : >> { %v2726_v48 = vcombine.low %v990_v29, %v1000_v43  ;;  %v666_v49 = vsel %vm3148_vm2, %v661_v39, %v665_v23  ;;  %v1355_v50 = vor.u32 %v1354_v40, %v1351_v38  ;;  %v1364_v51 = vrot.slane %v1362_v42, 4 }
  0x2d   : >> { %v676_v54 = vsel %vm3148_vm2, %v671_v44, %v675_v37  ;;  %v1370_v55 = vrot.slane %v1368_v45, 5  ;;  %v308_v56 = vrot.slane %v306_v47, 4  ;;  %v309_v57 = vshll.u32 %v257_v34, 16 }
  0x2e   : >> { %1193 = vrot.lane.b32.xlu1 %v2726_v48, %s3090_s25  ;;  %v2669_v58 = vcombine.low %v666_v49, %v676_v54  ;;  %v1356_v59 = vrot.slane %v1355_v50, 4  ;;  %v1365_v60 = vor.u32 %v1364_v51, %v1360_v41  ;;  %v315_v61 = vshll.u32 %v258_v46, 16  ;;  %v2769_v49 = vld [vmem:[%s3136_s24 + $0x5c] sm:$0x1] }
  0x2f   : >> { %v311_v62 = vrot.slane %v309_v57, 5  ;;  %v319_v63 = vshrl.u32 %v258_v46, 16  ;;  %v325_v0 = vshll.u32 %v259_v52, 16  ;;  %v1002_v2 = vshrl.u32 %v2705_v53, 16 }
  0x30   : >> { %847 = vrot.lane.b32.xlu0 %v2669_v58, %s3090_s25  ;;  %v1361_v3 = vsel %vm3148_vm2, %v1356_v59, %v1360_v41  ;;  %v1366_v4 = vrot.slane %v1365_v60, 4  ;;  %v317_v5 = vrot.slane %v315_v61, 5  ;;  %v1005_v7 = vshll.u32 %v2705_v53, 16  ;;  %v2768_v41 = vld [vmem:[%s3136_s24 + $0x58] sm:$0xf] }
  0x31   : >> { %v312_v8 = vor.u32 %v311_v62, %v308_v56  ;;  %v321_v9 = vrot.slane %v319_v63, 4  ;;  %v327_v10 = vrot.slane %v325_v0, 5  ;;  %v1004_v11 = vrot.slane %v1002_v2, 4  ;;  %v261_v60 = vld [vmem:[%s3136_s24 + $0x34] sm:$0xf] }
  0x32   : >> { %v1371_v13 = vsel %vm3148_vm2, %v1366_v4, %v1370_v55  ;;  %v1007_v14 = vrot.slane %v1005_v7, 5  ;;  %v1011_v15 = vshll.u32 %v2706_v1, 16  ;;  %v1015_v16 = vshrl.u32 %v2706_v1, 16  ;;  %v260_v55 = vld [vmem:[%s3136_s24 + $0x30] sm:$0xf] }
  0x33   : >> { %v2786_v17 = vcombine.low %v1361_v3, %v1371_v13  ;;  %v313_v18 = vrot.slane %v312_v8, 4  ;;  %v322_v19 = vor.u32 %v321_v9, %v317_v5  ;;  %v1021_v20 = vshll.u32 %v2707_v6, 16  ;;  %v262_v8 = vld [vmem:[%s3136_s24 + $0x38] sm:$0x1] }
  0x34   : >> { %v1008_v22 = vor.u32 %v1007_v14, %v1004_v11  ;;  %v1013_v23 = vrot.slane %v1011_v15, 5  ;;  %v1017_v24 = vrot.slane %v1015_v16, 4  ;;  %v678_v27 = vshrl.u32 %v2650_v12, 16  ;;  %v2709_v15 = vld [vmem:[%s3136_s24 + $0x4c] sm:$0xf] }
  0x35   : >> { %1542 = vrot.lane.b32.xlu1 %v2786_v17, %s3090_s25  ;;  %v318_v28 = vsel %vm3148_vm2, %v313_v18, %v317_v5  ;;  %v323_v29 = vrot.slane %v322_v19, 4  ;;  %v1023_v30 = vrot.slane %v1021_v20, 5  ;;  %v681_v31 = vshll.u32 %v2650_v12, 16 }
  0x36   : >> { %v1009_v32 = vrot.slane %v1008_v22, 4  ;;  %v1018_v33 = vor.u32 %v1017_v24, %v1013_v23  ;;  %v680_v34 = vrot.slane %v678_v27, 4  ;;  %v687_v35 = vshll.u32 %v2651_v21, 16  ;;  %v2710_v27 = vld [vmem:[%s3136_s24 + $0x50] sm:$0x1] }
  0x37   : >> { %v328_v37 = vsel %vm3148_vm2, %v323_v29, %v327_v10  ;;  %v683_v38 = vrot.slane %v681_v31, 5  ;;  %v691_v39 = vshrl.u32 %v2651_v21, 16  ;;  %v697_v40 = vshll.u32 %v2652_v25, 16  ;;  %v2708_v10 = vld [vmem:[%s3136_s24 + $0x48] sm:$0xf] }
  0x38   : >> { %v2612_v42 = vcombine.low %v318_v28, %v328_v37  ;;  %v1014_v43 = vsel %vm3148_vm2, %v1009_v32, %v1013_v23  ;;  %v1019_v44 = vrot.slane %v1018_v33, 4  ;;  %v689_v45 = vrot.slane %v687_v35, 5  ;;  %v2654_v35 = vld [vmem:[%s3136_s24 + $0x58] sm:$0xf] }
  0x39   : >> { %v684_v46 = vor.u32 %v683_v38, %v680_v34  ;;  %v693_v47 = vrot.slane %v691_v39, 4  ;;  %v699_v48 = vrot.slane %v697_v40, 5  ;;  %v1373_v50 = vshrl.u32 %v2767_v36, 16 }
  0x3a   : >> { %499 = vrot.lane.b32.xlu0 %v2612_v42, %s3090_s25  ;;  %v1024_v51 = vsel %vm3148_vm2, %v1019_v44, %v1023_v30  ;;  %v1376_v52 = vshll.u32 %v2767_v36, 16  ;;  %v1382_v53 = vshll.u32 %v2768_v41, 16  ;;  %v1386_v54 = vshrl.u32 %v2768_v41, 16  ;;  %v2653_v30 = vld [vmem:[%s3136_s24 + $0x54] sm:$0xf] }
  0x3b   : >> { %v2727_v56 = vcombine.low %v1014_v43, %v1024_v51  ;;  %v685_v57 = vrot.slane %v684_v46, 4  ;;  %v694_v58 = vor.u32 %v693_v47, %v689_v45  ;;  %v1375_v59 = vrot.slane %v1373_v50, 4  ;;  %v2655_v43 = vld [vmem:[%s3136_s24 + $0x5c] sm:$0x1] }
  0x3c   : >> { %v1378_v61 = vrot.slane %v1376_v52, 5  ;;  %v1384_v62 = vrot.slane %v1382_v53, 5  ;;  %v1388_v63 = vrot.slane %v1386_v54, 4  ;;  %v1392_v0 = vshll.u32 %v2769_v49, 16  ;;  %v2770_v49 = vld [vmem:[%s3136_s24 + $0x6c] sm:$0xf] }
  0x3d   : >> { %1195 = vrot.lane.b32.xlu1 %v2727_v56, %s3090_s25  ;;  %v690_v1 = vsel %vm3148_vm2, %v685_v57, %v689_v45  ;;  %v695_v2 = vrot.slane %v694_v58, 4  ;;  %v330_v3 = vshrl.u32 %v260_v55, 16  ;;  %v333_v4 = vshll.u32 %v260_v55, 16  ;;  %v2771_v58 = vld [vmem:[%s3136_s24 + $0x70] sm:$0xf] }
  0x3e   : >> { %v1379_v5 = vor.u32 %v1378_v61, %v1375_v59  ;;  %v1389_v6 = vor.u32 %v1388_v63, %v1384_v62  ;;  %v1394_v7 = vrot.slane %v1392_v0, 5  ;;  %v339_v9 = vshll.u32 %v261_v60, 16 }
  0x3f   : >> { %v700_v11 = vsel %vm3148_vm2, %v695_v2, %v699_v48  ;;  %v332_v12 = vrot.slane %v330_v3, 4  ;;  %v335_v13 = vrot.slane %v333_v4, 5  ;;  %v343_v14 = vshrl.u32 %v261_v60, 16  ;;  %v2772_v2 = vld [vmem:[%s3136_s24 + $0x74] sm:$0x1] }
  0x40   : >> { %v2670_v16 = vcombine.low %v690_v1, %v700_v11  ;;  %v1380_v17 = vrot.slane %v1379_v5, 4  ;;  %v1390_v18 = vrot.slane %v1389_v6, 4  ;;  %v341_v19 = vrot.slane %v339_v9, 5 }
  0x41   : >> { %v336_v20 = vor.u32 %v335_v13, %v332_v12  ;;  %v345_v21 = vrot.slane %v343_v14, 4  ;;  %v349_v22 = vshll.u32 %v262_v8, 16  ;;  %v1026_v23 = vshrl.u32 %v2708_v10, 16  ;;  %v263_v8 = vld [vmem:[%s3136_s24 + $0x48] sm:$0xf] }
  0x42   : >> { %849 = vrot.lane.b32.xlu0 %v2670_v16, %s3090_s25  ;;  %v1385_v24 = vsel %vm3148_vm2, %v1380_v17, %v1384_v62  ;;  %v1395_v25 = vsel %vm3148_vm2, %v1390_v18, %v1394_v7  ;;  %v1029_v28 = vshll.u32 %v2708_v10, 16  ;;  %v1035_v29 = vshll.u32 %v2709_v15, 16  ;;  %v264_v13 = vld [vmem:[%s3136_s24 + $0x4c] sm:$0xf] }
  0x43   : >> { %v2787_v31 = vcombine.low %v1385_v24, %v1395_v25  ;;  %v337_v32 = vrot.slane %v336_v20, 4  ;;  %v346_v33 = vor.u32 %v345_v21, %v341_v19  ;;  %v351_v34 = vrot.slane %v349_v22, 5  ;;  %v265_v21 = vld [vmem:[%s3136_s24 + $0x50] sm:$0x1] }
  0x44   : >> { %v1028_v36 = vrot.slane %v1026_v23, 4  ;;  %v1031_v37 = vrot.slane %v1029_v28, 5  ;;  %v1037_v38 = vrot.slane %v1035_v29, 5  ;;  %v1039_v39 = vshrl.u32 %v2709_v15, 16  ;;  %v2711_v28 = vld [vmem:[%s3136_s24 + $0x60] sm:$0xf] }
  0x45   : >> { %1544 = vrot.lane.b32.xlu1 %v2787_v31, %s3090_s25  ;;  %v342_v40 = vsel %vm3148_vm2, %v337_v32, %v341_v19  ;;  %v347_v41 = vrot.slane %v346_v33, 4  ;;  %v1045_v42 = vshll.u32 %v2710_v27, 16  ;;  %v702_v44 = vshrl.u32 %v2653_v30, 16  ;;  %v2712_v33 = vld [vmem:[%s3136_s24 + $0x64] sm:$0xf] }
  0x46   : >> { %v1032_v45 = vor.u32 %v1031_v37, %v1028_v36  ;;  %v1041_v46 = vrot.slane %v1039_v39, 4  ;;  %v705_v47 = vshll.u32 %v2653_v30, 16  ;;  %v711_v48 = vshll.u32 %v2654_v35, 16 }
  0x47   : >> { %v352_v50 = vsel %vm3148_vm2, %v347_v41, %v351_v34  ;;  %v1047_v51 = vrot.slane %v1045_v42, 5  ;;  %v704_v52 = vrot.slane %v702_v44, 4  ;;  %v715_v53 = vshrl.u32 %v2654_v35, 16 }
  0x48   : >> { %v2613_v54 = vcombine.low %v342_v40, %v352_v50  ;;  %v1033_v55 = vrot.slane %v1032_v45, 4  ;;  %v1042_v56 = vor.u32 %v1041_v46, %v1037_v38  ;;  %v707_v57 = vrot.slane %v705_v47, 5  ;;  %v2713_v40 = vld [vmem:[%s3136_s24 + $0x68] sm:$0x1]  ;;  %v2656_v47 = vld [vmem:[%s3136_s24 + $0x6c] sm:$0xf] }
  0x49   : >> { %v713_v59 = vrot.slane %v711_v48, 5  ;;  %v717_v60 = vrot.slane %v715_v53, 4  ;;  %v721_v61 = vshll.u32 %v2655_v43, 16  ;;  %v1397_v62 = vshrl.u32 %v2770_v49, 16 }
  0x4a   : >> { %501 = vrot.lane.b32.xlu0 %v2613_v54, %s3090_s25  ;;  %v1038_v63 = vsel %vm3148_vm2, %v1033_v55, %v1037_v38  ;;  %v1043_v0 = vrot.slane %v1042_v56, 4  ;;  %v708_v1 = vor.u32 %v707_v57, %v704_v52  ;;  %v1400_v3 = vshll.u32 %v2770_v49, 16  ;;  %v2657_v52 = vld [vmem:[%s3136_s24 + $0x70] sm:$0xf] }
  0x4b   : >> { %v718_v4 = vor.u32 %v717_v60, %v713_v59  ;;  %v723_v5 = vrot.slane %v721_v61, 5  ;;  %v1399_v6 = vrot.slane %v1397_v62, 4  ;;  %v1406_v7 = vshll.u32 %v2771_v58, 16  ;;  %v2658_v60 = vld [vmem:[%s3136_s24 + $0x74] sm:$0x1] }
  0x4c   : >> { %v1048_v9 = vsel %vm3148_vm2, %v1043_v0, %v1047_v51  ;;  %v709_v10 = vrot.slane %v708_v1, 4  ;;  %v1402_v11 = vrot.slane %v1400_v3, 5  ;;  %v1410_v12 = vshrl.u32 %v2771_v58, 16 }
  0x4d   : >> { %v2728_v14 = vcombine.low %v1038_v63, %v1048_v9  ;;  %v719_v15 = vrot.slane %v718_v4, 4  ;;  %v1408_v16 = vrot.slane %v1406_v7, 5  ;;  %v1416_v17 = vshll.u32 %v2772_v2, 16  ;;  %v2773_v2 = vld [vmem:[%s3136_s24 + $0x84] sm:$0xf] }
  0x4e   : >> { %v714_v18 = vsel %vm3148_vm2, %v709_v10, %v713_v59  ;;  %v1403_v19 = vor.u32 %v1402_v11, %v1399_v6  ;;  %v1412_v20 = vrot.slane %v1410_v12, 4  ;;  %v354_v22 = vshrl.u32 %v263_v8, 16  ;;  %v2946_v7 = vld [vmem:[%s3949_s1 + $0x4] ss:$8 sps:$4 sm:$0xff]   ;;  %v2774_v12 = vld [vmem:[%s3136_s24 + $0x88] sm:$0xf] }
  0x4f   : >> { %1197 = vrot.lane.b32.xlu1 %v2728_v14, %s3090_s25  ;;  %v724_v23 = vsel %vm3148_vm2, %v719_v15, %v723_v5  ;;  %v1418_v24 = vrot.slane %v1416_v17, 5  ;;  %v357_v25 = vshll.u32 %v263_v8, 16  ;;  %v363_v27 = vshll.u32 %v264_v13, 16  ;;  %v2775_v17 = vld [vmem:[%s3136_s24 + $0x8c] sm:$0x1]  ;;  %1988 = vmatprep.subr.bf16.mxu1 %v2946_v7 }
  0x50   : >> { %v2671_v29 = vcombine.low %v714_v18, %v724_v23  ;;  %v1404_v30 = vrot.slane %v1403_v19, 4  ;;  %v1413_v31 = vor.u32 %v1412_v20, %v1408_v16  ;;  %v356_v32 = vrot.slane %v354_v22, 4  ;;  %v2948_v22 = vld [vmem:[%s3949_s1] ss:$8 sps:$4 sm:$0xff]  }
  0x51   : >> { %v359_v34 = vrot.slane %v357_v25, 5  ;;  %v365_v35 = vrot.slane %v363_v27, 5  ;;  %v367_v36 = vshrl.u32 %v264_v13, 16  ;;  %v373_v37 = vshll.u32 %v265_v21, 16  ;;  %1989 = vmatpush1.bf16.msra.mxu1 %v2948_v22 }
  0x52   : >> { %851 = vrot.lane.b32.xlu0 %v2671_v29, %s3090_s25  ;;  %v1409_v38 = vsel %vm3148_vm2, %v1404_v30, %v1408_v16  ;;  %v1414_v39 = vrot.slane %v1413_v31, 4  ;;  %v1050_v41 = vshrl.u32 %v2711_v28, 16  ;;  %v1053_v42 = vshll.u32 %v2711_v28, 16  ;;  %v266_v28 = vld [vmem:[%s3136_s24 + $0x60] sm:$0xf] }
  0x53   : >> { %v360_v43 = vor.u32 %v359_v34, %v356_v32  ;;  %v369_v44 = vrot.slane %v367_v36, 4  ;;  %v375_v45 = vrot.slane %v373_v37, 5  ;;  %v1059_v46 = vshll.u32 %v2712_v33, 16 }
  0x54   : >> { %v1419_v48 = vsel %vm3148_vm2, %v1414_v39, %v1418_v24  ;;  %v1052_v49 = vrot.slane %v1050_v41, 4  ;;  %v1055_v50 = vrot.slane %v1053_v42, 5  ;;  %v1063_v51 = vshrl.u32 %v2712_v33, 16  ;;  %v267_v33 = vld [vmem:[%s3136_s24 + $0x64] sm:$0xf] }
  0x55   : >> { %v2788_v53 = vcombine.low %v1409_v38, %v1419_v48  ;;  %v361_v54 = vrot.slane %v360_v43, 4  ;;  %v370_v55 = vor.u32 %v369_v44, %v365_v35  ;;  %v1061_v56 = vrot.slane %v1059_v46, 5  ;;  %v268_v38 = vld [vmem:[%s3136_s24 + $0x68] sm:$0x1]  ;;  %v2714_v39 = vld [vmem:[%s3136_s24 + $0x78] sm:$0xf] }
  0x56   : >> { %v1056_v57 = vor.u32 %v1055_v50, %v1052_v49  ;;  %v1065_v58 = vrot.slane %v1063_v51, 4  ;;  %v1069_v59 = vshll.u32 %v2713_v40, 16  ;;  %v726_v61 = vshrl.u32 %v2656_v47, 16  ;;  %v2949_v40 = vld [vmem:[%s3949_s1 + $0x14] ss:$8 sps:$4 sm:$0xff]  }
  0x57   : >> { %1546 = vrot.lane.b32.xlu1 %v2788_v53, %s3090_s25  ;;  %v366_v62 = vsel %vm3148_vm2, %v361_v54, %v365_v35  ;;  %v371_v63 = vrot.slane %v370_v55, 4  ;;  %v729_v0 = vshll.u32 %v2656_v47, 16  ;;  %v735_v1 = vshll.u32 %v2657_v52, 16  ;;  %v2951_v46 = vld [vmem:[%s3949_s1 + $0x104] ss:$8 sps:$4 sm:$0xff]   ;;  %1990 = vmatprep.subr.bf16.mxu1 %v2949_v40 }
  0x58   : >> { %v1057_v3 = vrot.slane %v1056_v57, 4  ;;  %v1066_v4 = vor.u32 %v1065_v58, %v1061_v56  ;;  %v1071_v5 = vrot.slane %v1069_v59, 5  ;;  %v728_v6 = vrot.slane %v726_v61, 4  ;;  %v2953_v51 = vld [vmem:[%s3949_s1 + $0x10] ss:$8 sps:$4 sm:$0xff]   ;;  %2101 = vmatprep.subr.bf16.mxu0 %v2951_v46 }
  0x59   : >> { %v376_v8 = vsel %vm3148_vm2, %v371_v63, %v375_v45  ;;  %v731_v9 = vrot.slane %v729_v0, 5  ;;  %v737_v10 = vrot.slane %v735_v1, 5  ;;  %v739_v11 = vshrl.u32 %v2657_v52, 16  ;;  %v2715_v45 = vld [vmem:[%s3136_s24 + $0x7c] sm:$0xf]  ;;  %1991 = vmatpush1.bf16.msra.mxu1 %v2953_v51 }
  0x5a   : >> { %v2614_v13 = vcombine.low %v366_v62, %v376_v8  ;;  %v1062_v14 = vsel %vm3148_vm2, %v1057_v3, %v1061_v56  ;;  %v1067_v15 = vrot.slane %v1066_v4, 4  ;;  %v745_v16 = vshll.u32 %v2658_v60, 16  ;;  %v2954_v52 = vld [vmem:[%s3949_s1 + $0x100] ss:$8 sps:$4 sm:$0xff]   ;;  %v2955_v57 = vld [vmem:[%s3949_s1 + $0x24] ss:$8 sps:$4 sm:$0xff]  }
  0x5b   : >> { %v732_v18 = vor.u32 %v731_v9, %v728_v6  ;;  %v741_v19 = vrot.slane %v739_v11, 4  ;;  %v1421_v20 = vshrl.u32 %v2773_v2, 16  ;;  %v1424_v21 = vshll.u32 %v2773_v2, 16  ;;  %v2716_v62 = vld [vmem:[%s3136_s24 + $0x80] sm:$0x1]  ;;  %2102 = vmatpush1.bf16.msra.mxu0 %v2954_v52  ;;  %1992 = vmatprep.subr.bf16.mxu1 %v2955_v57 }
  0x5c   : >> { %503 = vrot.lane.b32.xlu0 %v2614_v13, %s3090_s25  ;;  %v1072_v23 = vsel %vm3148_vm2, %v1067_v15, %v1071_v5  ;;  %v747_v24 = vrot.slane %v745_v16, 5  ;;  %v1430_v25 = vshll.u32 %v2774_v12, 16  ;;  %v1434_v27 = vshrl.u32 %v2774_v12, 16  ;;  %v2659_v63 = vld [vmem:[%s3136_s24 + $0x84] sm:$0xf] }
  0x5d   : >> { %v2729_v29 = vcombine.low %v1062_v14, %v1072_v23  ;;  %v733_v30 = vrot.slane %v732_v18, 4  ;;  %v742_v31 = vor.u32 %v741_v19, %v737_v10  ;;  %v1423_v32 = vrot.slane %v1421_v20, 4  ;;  %v2957_v0 = vld [vmem:[%s3949_s1 + $0x114] ss:$8 sps:$4 sm:$0xff]   ;;  %v2660_v5 = vld [vmem:[%s3136_s24 + $0x88] sm:$0xf] }
  0x5e   : >> { %v1426_v34 = vrot.slane %v1424_v21, 5  ;;  %v1432_v35 = vrot.slane %v1430_v25, 5  ;;  %v1436_v36 = vrot.slane %v1434_v27, 4  ;;  %v1440_v37 = vshll.u32 %v2775_v17, 16  ;;  %v2959_v6 = vld [vmem:[%s3949_s1 + $0x20] ss:$8 sps:$4 sm:$0xff]   ;;  %2103 = vmatprep.subr.bf16.mxu0 %v2957_v0 }
  0x5f   : >> { %1199 = vrot.lane.b32.xlu1 %v2729_v29, %s3090_s25  ;;  %v738_v41 = vsel %vm3148_vm2, %v733_v30, %v737_v10  ;;  %v743_v42 = vrot.slane %v742_v31, 4  ;;  %v378_v43 = vshrl.u32 %v266_v28, 16  ;;  %v381_v44 = vshll.u32 %v266_v28, 16  ;;  %v2960_v11 = vld [vmem:[%s3949_s1 + $0x110] ss:$8 sps:$4 sm:$0xff]   ;;  %1993 = vmatpush1.bf16.msra.mxu1 %v2959_v6 }
  0x60   : >> { %v1427_v47 = vor.u32 %v1426_v34, %v1423_v32  ;;  %v1437_v48 = vor.u32 %v1436_v36, %v1432_v35  ;;  %v1442_v49 = vrot.slane %v1440_v37, 5  ;;  %v387_v50 = vshll.u32 %v267_v33, 16  ;;  %v2961_v12 = vld [vmem:[%s3949_s1 + $0x34] ss:$8 sps:$4 sm:$0xff]   ;;  %v2963_v17 = vld [vmem:[%s3949_s1 + $0x124] ss:$8 sps:$4 sm:$0xff]   ;;  %2104 = vmatpush1.bf16.msra.mxu0 %v2960_v11 }
  0x61   : >> { %v748_v53 = vsel %vm3148_vm2, %v743_v42, %v747_v24  ;;  %v380_v54 = vrot.slane %v378_v43, 4  ;;  %v383_v55 = vrot.slane %v381_v44, 5  ;;  %v391_v56 = vshrl.u32 %v267_v33, 16  ;;  %v2965_v18 = vld [vmem:[%s3949_s1 + $0x30] ss:$8 sps:$4 sm:$0xff]   ;;  %1994 = vmatprep.subr.bf16.mxu1 %v2961_v12  ;;  %2105 = vmatprep.subr.bf16.mxu0 %v2963_v17 }
  0x62   : >> { %v2672_v58 = vcombine.low %v738_v41, %v748_v53  ;;  %v1428_v59 = vrot.slane %v1427_v47, 4  ;;  %v1438_v60 = vrot.slane %v1437_v48, 4  ;;  %v389_v61 = vrot.slane %v387_v50, 5  ;;  %v2661_v23 = vld [vmem:[%s3136_s24 + $0x8c] sm:$0x1] }
  0x63   : >> { %v384_v1 = vor.u32 %v383_v55, %v380_v54  ;;  %v393_v2 = vrot.slane %v391_v56, 4  ;;  %v397_v3 = vshll.u32 %v268_v38, 16  ;;  %v1074_v4 = vshrl.u32 %v2714_v39, 16  ;;  %v2776_v24 = vld [vmem:[%s3136_s24 + $0x9c] sm:$0xf]  ;;  %1995 = vmatpush1.bf16.msra.mxu1 %v2965_v18 }
  0x64   : >> { %853 = vrot.lane.b32.xlu0 %v2672_v58, %s3090_s25  ;;  %v1433_v7 = vsel %vm3148_vm2, %v1428_v59, %v1432_v35  ;;  %v1443_v8 = vsel %vm3148_vm2, %v1438_v60, %v1442_v49  ;;  %v1077_v9 = vshll.u32 %v2714_v39, 16  ;;  %v1083_v10 = vshll.u32 %v2715_v45, 16  ;;  %v2966_v25 = vld [vmem:[%s3949_s1 + $0x120] ss:$8 sps:$4 sm:$0xff]   ;;  %v2967_v31 = vld [vmem:[%s3949_s1 + $0x44] ss:$8 sps:$4 sm:$0xff]  }
  0x65   : >> { %v2789_v13 = vcombine.low %v1433_v7, %v1443_v8  ;;  %v385_v14 = vrot.slane %v384_v1, 4  ;;  %v394_v15 = vor.u32 %v393_v2, %v389_v61  ;;  %v399_v16 = vrot.slane %v397_v3, 5  ;;  %v2777_v36 = vld [vmem:[%s3136_s24 + $0xa0] sm:$0xf]  ;;  %v2969_v37 = vld [vmem:[%s3949_s1 + $0x134] ss:$8 sps:$4 sm:$0xff]   ;;  %2106 = vmatpush1.bf16.msra.mxu0 %v2966_v25  ;;  %1996 = vmatprep.subr.bf16.mxu1 %v2967_v31 }
  0x66   : >> { %v1076_v19 = vrot.slane %v1074_v4, 4  ;;  %v1079_v20 = vrot.slane %v1077_v9, 5  ;;  %v3334_v21 = vrot.slane %v1083_v10, 5  ;;  %v1087_v22 = vshrl.u32 %v2715_v45, 16  ;;  %v2971_v42 = vld [vmem:[%s3949_s1 + $0x40] ss:$8 sps:$4 sm:$0xff]   ;;  %2107 = vmatprep.subr.bf16.mxu0 %v2969_v37 }
  0x67   : >> { %1548 = vrot.lane.b32.xlu1 %v2789_v13, %s3090_s25  ;;  %v390_v27 = vsel %vm3148_vm2, %v385_v14, %v389_v61  ;;  %v395_v28 = vrot.slane %v394_v15, 4  ;;  %v1093_v29 = vshll.u32 %v2716_v62, 16  ;;  %v750_v30 = vshrl.u32 %v2659_v63, 16  ;;  %v2778_v47 = vld [vmem:[%s3136_s24 + $0xa4] sm:$0x1]  ;;  %1997 = vmatpush1.bf16.msra.mxu1 %v2971_v42 }
  0x68   : >> { %v1080_v32 = vor.u32 %v1079_v20, %v1076_v19  ;;  %v1089_v33 = vrot.slane %v1087_v22, 4  ;;  %v753_v34 = vshll.u32 %v2659_v63, 16  ;;  %v759_v35 = vshll.u32 %v2660_v5, 16  ;;  %v2972_v48 = vld [vmem:[%s3949_s1 + $0x130] ss:$8 sps:$4 sm:$0xff]  }
  0x69   : >> { %v400_v38 = vsel %vm3148_vm2, %v395_v28, %v399_v16  ;;  %v1095_v39 = vrot.slane %v1093_v29, 5  ;;  %v752_v40 = vrot.slane %v750_v30, 4  ;;  %v763_v41 = vshrl.u32 %v2660_v5, 16  ;;  %v2973_v49 = vld [vmem:[%s3949_s1 + $0x54] ss:$8 sps:$4 sm:$0xff]   ;;  %2108 = vmatpush1.bf16.msra.mxu0 %v2972_v48 }
  0x6a   : >> { %v2615_v43 = vcombine.low %v390_v27, %v400_v38  ;;  %v1081_v44 = vrot.slane %v1080_v32, 4  ;;  %v1090_v45 = vor.u32 %v1089_v33, %v3334_v21  ;;  %v755_v46 = vrot.slane %v753_v34, 5  ;;  %v269_v54 = vld [vmem:[%s3136_s24 + $0x78] sm:$0xf]  ;;  %v2975_v55 = vld [vmem:[%s3949_s1 + $0x144] ss:$8 sps:$4 sm:$0xff]   ;;  %1998 = vmatprep.subr.bf16.mxu1 %v2973_v49 }
  0x6b   : >> { %v761_v50 = vrot.slane %v759_v35, 5  ;;  %v765_v51 = vrot.slane %v763_v41, 4  ;;  %v769_v52 = vshll.u32 %v2661_v23, 16  ;;  %v1445_v53 = vshrl.u32 %v2776_v24, 16  ;;  %v270_v60 = vld [vmem:[%s3136_s24 + $0x7c] sm:$0xf]  ;;  %2109 = vmatprep.subr.bf16.mxu0 %v2975_v55 }
  0x6c   : >> { %505 = vrot.lane.b32.xlu0 %v2615_v43, %s3090_s25  ;;  %v1086_v56 = vsel %vm3148_vm2, %v1081_v44, %v3334_v21  ;;  %v1091_v57 = vrot.slane %v1090_v45, 4  ;;  %v756_v58 = vor.u32 %v755_v46, %v752_v40  ;;  %v1448_v59 = vshll.u32 %v2776_v24, 16  ;;  %v2977_v61 = vld [vmem:[%s3949_s1 + $0x50] ss:$8 sps:$4 sm:$0xff]   ;;  %v2978_v2 = vld [vmem:[%s3949_s1 + $0x140] ss:$8 sps:$4 sm:$0xff]  }
  0x6d   : >> { %v766_v62 = vor.u32 %v765_v51, %v761_v50  ;;  %v771_v63 = vrot.slane %v769_v52, 5  ;;  %v1447_v0 = vrot.slane %v1445_v53, 4  ;;  %v1454_v1 = vshll.u32 %v2777_v36, 16  ;;  %v271_v7 = vld [vmem:[%s3136_s24 + $0x80] sm:$0x1]  ;;  %1999 = vmatpush1.bf16.msra.mxu1 %v2977_v61  ;;  %2110 = vmatpush1.bf16.msra.mxu0 %v2978_v2 }
  0x6e   : >> { %v1096_v3 = vsel %vm3148_vm2, %v1091_v57, %v1095_v39  ;;  %v757_v4 = vrot.slane %v756_v58, 4  ;;  %v1450_v5 = vrot.slane %v1448_v59, 5  ;;  %v1458_v6 = vshrl.u32 %v2777_v36, 16  ;;  %v2979_v8 = vld [vmem:[%s3949_s1 + $0x64] ss:$8 sps:$4 sm:$0xff]  }
  0x6f   : >> { %v2730_v9 = vcombine.low %v1086_v56, %v1096_v3  ;;  %v767_v10 = vrot.slane %v766_v62, 4  ;;  %v1456_v11 = vrot.slane %v1454_v1, 5  ;;  %v1464_v12 = vshll.u32 %v2778_v47, 16  ;;  %v2981_v13 = vld [vmem:[%s3949_s1 + $0x154] ss:$8 sps:$4 sm:$0xff]   ;;  %2000 = vmatprep.subr.bf16.mxu1 %v2979_v8 }
  0x70   : >> { %v762_v14 = vsel %vm3148_vm2, %v757_v4, %v761_v50  ;;  %v1451_v15 = vor.u32 %v1450_v5, %v1447_v0  ;;  %v1460_v16 = vrot.slane %v1458_v6, 4  ;;  %v402_v17 = vshrl.u32 %v269_v54, 16  ;;  %v2717_v18 = vld [vmem:[%s3136_s24 + $0x90] sm:$0xf]  ;;  %v2718_v19 = vld [vmem:[%s3136_s24 + $0x94] sm:$0xf]  ;;  %2111 = vmatprep.subr.bf16.mxu0 %v2981_v13 }
  0x71   : >> { %1201 = vrot.lane.b32.xlu1 %v2730_v9, %s3090_s25  ;;  %v772_v20 = vsel %vm3148_vm2, %v767_v10, %v771_v63  ;;  %v1466_v21 = vrot.slane %v1464_v12, 5  ;;  %v405_v22 = vshll.u32 %v269_v54, 16  ;;  %v411_v23 = vshll.u32 %v270_v60, 16  ;;  %v2983_v24 = vld [vmem:[%s3949_s1 + $0x60] ss:$8 sps:$4 sm:$0xff]  }
  0x72   : >> { %v2673_v25 = vcombine.low %v762_v14, %v772_v20  ;;  %v1452_v27 = vrot.slane %v1451_v15, 4  ;;  %v1461_v28 = vor.u32 %v1460_v16, %v1456_v11  ;;  %v404_v29 = vrot.slane %v402_v17, 4  ;;  %v2984_v30 = vld [vmem:[%s3949_s1 + $0x150] ss:$8 sps:$4 sm:$0xff]   ;;  %v2985_v31 = vld [vmem:[%s3949_s1 + $0x74] ss:$8 sps:$4 sm:$0xff]   ;;  %2001 = vmatpush1.bf16.msra.mxu1 %v2983_v24 }
  0x73   : >> { %v407_v32 = vrot.slane %v405_v22, 5  ;;  %v3404_v33 = vrot.slane %v411_v23, 5  ;;  %v415_v34 = vshrl.u32 %v270_v60, 16  ;;  %v421_v35 = vshll.u32 %v271_v7, 16  ;;  %v2719_v36 = vld [vmem:[%s3136_s24 + $0x98] sm:$0x1]  ;;  %2112 = vmatpush1.bf16.msra.mxu0 %v2984_v30  ;;  %2002 = vmatprep.subr.bf16.mxu1 %v2985_v31 }
  0x74   : >> { %v2662_v37 = vld [vmem:[%s3136_s24 + $0x9c] sm:$0xf]  ;;  %v2987_v38 = vld [vmem:[%s3949_s1 + $0x164] ss:$8 sps:$4 sm:$0xff]   ;;  %855 = vrot.lane.b32.xlu0 %v2673_v25, %s3090_s25  ;;  %v1457_v39 = vsel %vm3148_vm2, %v1452_v27, %v1456_v11  ;;  %v1462_v40 = vrot.slane %v1461_v28, 4  ;;  %v1098_v41 = vshrl.u32 %v2717_v18, 16 }
  0x75   : >> { %v1101_v42 = vshll.u32 %v2717_v18, 16  ;;  %v2663_v43 = vld [vmem:[%s3136_s24 + $0xa0] sm:$0xf]  ;;  %v408_v44 = vor.u32 %v407_v32, %v404_v29  ;;  %v417_v45 = vrot.slane %v415_v34, 4  ;;  %v423_v46 = vrot.slane %v421_v35, 5  ;;  %2113 = vmatprep.subr.bf16.mxu0 %v2987_v38 }
  0x76   : >> { %v1107_v47 = vshll.u32 %v2718_v19, 16  ;;  %v2989_v48 = vld [vmem:[%s3949_s1 + $0x70] ss:$8 sps:$4 sm:$0xff]   ;;  %v1467_v49 = vsel %vm3148_vm2, %v1462_v40, %v1466_v21  ;;  %v1100_v50 = vrot.slane %v1098_v41, 4  ;;  %v1111_v52 = vshrl.u32 %v2718_v19, 16 }
  0x77   : >> { %v1103_v51 = vrot.slane %v1101_v42, 5  ;;  %v2990_v53 = vld [vmem:[%s3949_s1 + $0x160] ss:$8 sps:$4 sm:$0xff]   ;;  %v2790_v54 = vcombine.low %v1457_v39, %v1467_v49  ;;  %v409_v55 = vrot.slane %v408_v44, 4  ;;  %v418_v56 = vor.u32 %v417_v45, %v3404_v33  ;;  %v2664_v58 = vld [vmem:[%s3136_s24 + $0xa4] sm:$0x1]  ;;  %2003 = vmatpush1.bf16.msra.mxu1 %v2989_v48 }
  0x78   : >> { %v1109_v57 = vrot.slane %v1107_v47, 5  ;;  %v2991_v59 = vld [vmem:[%s3949_s1 + $0x84] ss:$8 sps:$4 sm:$0xff]   ;;  %v2993_v60 = vld [vmem:[%s3949_s1 + $0x174] ss:$8 sps:$4 sm:$0xff]   ;;  %v1113_v62 = vrot.slane %v1111_v52, 4  ;;  %2114 = vmatpush1.bf16.msra.mxu0 %v2990_v53 }
  0x79   : >> { %v1104_v61 = vor.u32 %v1103_v51, %v1100_v50  ;;  %v1117_v63 = vshll.u32 %v2719_v36, 16  ;;  %v774_v0 = vshrl.u32 %v2662_v37, 16  ;;  %v2779_v1 = vld [vmem:[%s3136_s24 + $0xb4] sm:$0xf]  ;;  %1550 = vrot.lane.b32.xlu1 %v2790_v54, %s3090_s25  ;;  %v414_v2 = vsel %vm3148_vm2, %v409_v55, %v3404_v33  ;;  %v2780_v6 = vld [vmem:[%s3136_s24 + $0xb8] sm:$0xf]  ;;  %2004 = vmatprep.subr.bf16.mxu1 %v2991_v59 }
  0x7a   : >> { %v419_v3 = vrot.slane %v418_v56, 4  ;;  %v777_v4 = vshll.u32 %v2662_v37, 16  ;;  %v783_v5 = vshll.u32 %v2663_v43, 16  ;;  %v2995_v7 = vld [vmem:[%s3949_s1 + $0x80] ss:$8 sps:$4 sm:$0xff]   ;;  %v1114_v9 = vor.u32 %v1113_v62, %v1109_v57  ;;  %2115 = vmatprep.subr.bf16.mxu0 %v2993_v60 }
  0x7b   : >> { %v1105_v8 = vrot.slane %v1104_v61, 4  ;;  %v1119_v10 = vrot.slane %v1117_v63, 5  ;;  %v776_v11 = vrot.slane %v774_v0, 4  ;;  %v2996_v12 = vld [vmem:[%s3949_s1 + $0x170] ss:$8 sps:$4 sm:$0xff]   ;;  %v787_v16 = vshrl.u32 %v2663_v43, 16  ;;  %2005 = vmatpush1.bf16.msra.mxu1 %v2995_v7 }
  0x7c   : >> { %v424_v13 = vsel %vm3148_vm2, %v419_v3, %v423_v46  ;;  %v779_v14 = vrot.slane %v777_v4, 5  ;;  %v785_v15 = vrot.slane %v783_v5, 5  ;;  %v2781_v17 = vld [vmem:[%s3136_s24 + $0xbc] sm:$0x1]  ;;  %v1115_v21 = vrot.slane %v1114_v9, 4  ;;  %2116 = vmatpush1.bf16.msra.mxu0 %v2996_v12 }
  0x7d   : >> { %v2997_v18 = vld [vmem:[%s3949_s1 + $0x94] ss:$8 sps:$4 sm:$0xff]   ;;  %v2616_v19 = vcombine.low %v414_v2, %v424_v13  ;;  %v1110_v20 = vsel %vm3148_vm2, %v1105_v8, %v1109_v57  ;;  %v793_v22 = vshll.u32 %v2664_v58, 16  ;;  %v272_v23 = vld [vmem:[%s3136_s24 + $0x90] sm:$0xf]  ;;  %v789_v27 = vrot.slane %v787_v16, 4 }
  0x7e   : >> { %v2999_v24 = vld [vmem:[%s3949_s1 + $0x184] ss:$8 sps:$4 sm:$0xff]   ;;  %v780_v25 = vor.u32 %v779_v14, %v776_v11  ;;  %v1469_v28 = vshrl.u32 %v2779_v1, 16  ;;  %v1472_v29 = vshll.u32 %v2779_v1, 16  ;;  %v273_v30 = vld [vmem:[%s3136_s24 + $0x94] sm:$0xf]  ;;  %v1120_v31 = vsel %vm3148_vm2, %v1115_v21, %v1119_v10  ;;  %2006 = vmatprep.subr.bf16.mxu1 %v2997_v18 }
  0x7f   : >> { %507 = vrot.lane.b32.xlu0 %v2616_v19, %s3090_s25  ;;  %v795_v32 = vrot.slane %v793_v22, 5  ;;  %v1478_v33 = vshll.u32 %v2780_v6, 16  ;;  %v1482_v34 = vshrl.u32 %v2780_v6, 16  ;;  %v3001_v35 = vld [vmem:[%s3949_s1 + $0x90] ss:$8 sps:$4 sm:$0xff]   ;;  %v2731_v36 = vcombine.low %v1110_v20, %v1120_v31  ;;  %2117 = vmatprep.subr.bf16.mxu0 %v2999_v24 }
  0x80   : >> { %v781_v37 = vrot.slane %v780_v25, 4  ;;  %v790_v38 = vor.u32 %v789_v27, %v785_v15  ;;  %v1471_v39 = vrot.slane %v1469_v28, 4  ;;  %v3002_v40 = vld [vmem:[%s3949_s1 + $0x180] ss:$8 sps:$4 sm:$0xff]   ;;  %v3003_v41 = vld [vmem:[%s3949_s1 + $0xa4] ss:$8 sps:$4 sm:$0xff]   ;;  %2007 = vmatpush1.bf16.msra.mxu1 %v3001_v35 }
  0x81   : >> { %v1474_v42 = vrot.slane %v1472_v29, 5  ;;  %v1480_v43 = vrot.slane %v1478_v33, 5  ;;  %v1484_v44 = vrot.slane %v1482_v34, 4  ;;  %v1488_v45 = vshll.u32 %v2781_v17, 16  ;;  %v274_v46 = vld [vmem:[%s3136_s24 + $0x98] sm:$0x1]  ;;  %1203 = vrot.lane.b32.xlu1 %v2731_v36, %s3090_s25  ;;  %2118 = vmatpush1.bf16.msra.mxu0 %v3002_v40 }
  0x82   : >> { %v2720_v47 = vld [vmem:[%s3136_s24 + $0xa8] sm:$0xf]  ;;  %v3005_v48 = vld [vmem:[%s3949_s1 + $0x194] ss:$8 sps:$4 sm:$0xff]   ;;  %v786_v49 = vsel %vm3148_vm2, %v781_v37, %v785_v15  ;;  %v791_v50 = vrot.slane %v790_v38, 4  ;;  %v426_v51 = vshrl.u32 %v272_v23, 16  ;;  %2008 = vmatprep.subr.bf16.mxu1 %v3003_v41 }
  0x83   : >> { %v429_v52 = vshll.u32 %v272_v23, 16  ;;  %v2721_v53 = vld [vmem:[%s3136_s24 + $0xac] sm:$0xf]  ;;  %v3007_v54 = vld [vmem:[%s3949_s1 + $0xa0] ss:$8 sps:$4 sm:$0xff]   ;;  %v1475_v55 = vor.u32 %v1474_v42, %v1471_v39  ;;  %v1485_v56 = vor.u32 %v1484_v44, %v1480_v43  ;;  %v1490_v57 = vrot.slane %v1488_v45, 5  ;;  %2119 = vmatprep.subr.bf16.mxu0 %v3005_v48 }
  0x84   : >> { %v435_v58 = vshll.u32 %v273_v30, 16  ;;  %v3008_v59 = vld [vmem:[%s3949_s1 + $0x190] ss:$8 sps:$4 sm:$0xff]   ;;  %v3009_v60 = vld [vmem:[%s3949_s1 + $0xb4] ss:$8 sps:$4 sm:$0xff]   ;;  %v796_v61 = vsel %vm3148_vm2, %v791_v50, %v795_v32  ;;  %v428_v62 = vrot.slane %v426_v51, 4  ;;  %2009 = vmatpush1.bf16.msra.mxu1 %v3007_v54 }
  0x85   : >> { %v431_v63 = vrot.slane %v429_v52, 5  ;;  %v439_v0 = vshrl.u32 %v273_v30, 16  ;;  %v3011_v1 = vld [vmem:[%s3949_s1 + $0x1a4] ss:$8 sps:$4 sm:$0xff]   ;;  %v2674_v2 = vcombine.low %v786_v49, %v796_v61  ;;  %v1476_v3 = vrot.slane %v1475_v55, 4  ;;  %2120 = vmatpush1.bf16.msra.mxu0 %v3008_v59  ;;  %2010 = vmatprep.subr.bf16.mxu1 %v3009_v60 }
  0x86   : >> { %v1486_v4 = vrot.slane %v1485_v56, 4  ;;  %v437_v5 = vrot.slane %v435_v58, 5  ;;  %v2722_v6 = vld [vmem:[%s3136_s24 + $0xb0] sm:$0x1]  ;;  %v2665_v7 = vld [vmem:[%s3136_s24 + $0xb4] sm:$0xf]  ;;  %2121 = vmatprep.subr.bf16.mxu0 %v3011_v1 }
  0x87   : >> { %v3013_v8 = vld [vmem:[%s3949_s1 + $0xb0] ss:$8 sps:$4 sm:$0xff]   ;;  %v432_v9 = vor.u32 %v431_v63, %v428_v62  ;;  %v441_v10 = vrot.slane %v439_v0, 4  ;;  %v445_v11 = vshll.u32 %v274_v46, 16  ;;  %v1122_v12 = vshrl.u32 %v2720_v47, 16  ;;  %857 = vrot.lane.b32.xlu0 %v2674_v2, %s3090_s25 }
  0x88   : >> { %v2666_v13 = vld [vmem:[%s3136_s24 + $0xb8] sm:$0xf]  ;;  %v3014_v14 = vld [vmem:[%s3949_s1 + $0x1a0] ss:$8 sps:$4 sm:$0xff]   ;;  %v3015_v15 = vld [vmem:[%s3949_s1 + $0xc4] ss:$8 sps:$4 sm:$0xff]   ;;  %v1481_v16 = vsel %vm3148_vm2, %v1476_v3, %v1480_v43  ;;  %v1491_v17 = vsel %vm3148_vm2, %v1486_v4, %v1490_v57  ;;  %2011 = vmatpush1.bf16.msra.mxu1 %v3013_v8 }
  0x89   : >> { %v1125_v18 = vshll.u32 %v2720_v47, 16  ;;  %v1131_v19 = vshll.u32 %v2721_v53, 16  ;;  %v3017_v20 = vld [vmem:[%s3949_s1 + $0x1b4] ss:$8 sps:$4 sm:$0xff]   ;;  %v2791_v21 = vcombine.low %v1481_v16, %v1491_v17  ;;  %v433_v22 = vrot.slane %v432_v9, 4  ;;  %2122 = vmatpush1.bf16.msra.mxu0 %v3014_v14  ;;  %2012 = vmatprep.subr.bf16.mxu1 %v3015_v15 }
  0x8a   : >> { %v442_v23 = vor.u32 %v441_v10, %v437_v5  ;;  %v447_v24 = vrot.slane %v445_v11, 5  ;;  %v1124_v25 = vrot.slane %v1122_v12, 4  ;;  %v1135_v29 = vshrl.u32 %v2721_v53, 16  ;;  %v2667_v30 = vld [vmem:[%s3136_s24 + $0xbc] sm:$0x1]  ;;  %2123 = vmatprep.subr.bf16.mxu0 %v3017_v20 }
  0x8b   : >> { %v1127_v27 = vrot.slane %v1125_v18, 5  ;;  %v1133_v28 = vrot.slane %v1131_v19, 5  ;;  %v2782_v31 = vld [vmem:[%s3136_s24 + $0xcc] sm:$0xf]  ;;  %v3019_v32 = vld [vmem:[%s3949_s1 + $0xc0] ss:$8 sps:$4 sm:$0xff]   ;;  %1552 = vrot.lane.b32.xlu1 %v2791_v21, %s3090_s25  ;;  %v438_v33 = vsel %vm3148_vm2, %v433_v22, %v437_v5 }
  0x8c   : >> { %v443_v34 = vrot.slane %v442_v23, 4  ;;  %v1141_v35 = vshll.u32 %v2722_v6, 16  ;;  %v798_v36 = vshrl.u32 %v2665_v7, 16  ;;  %v3020_v37 = vld [vmem:[%s3949_s1 + $0x1b0] ss:$8 sps:$4 sm:$0xff]   ;;  %v1137_v39 = vrot.slane %v1135_v29, 4  ;;  %2013 = vmatpush1.bf16.msra.mxu1 %v3019_v32 }
  0x8d   : >> { %v1128_v38 = vor.u32 %v1127_v27, %v1124_v25  ;;  %v801_v40 = vshll.u32 %v2665_v7, 16  ;;  %v807_v41 = vshll.u32 %v2666_v13, 16  ;;  %v2783_v42 = vld [vmem:[%s3136_s24 + $0xd0] sm:$0xf]  ;;  %v3021_v43 = vld [vmem:[%s3949_s1 + $0xd4] ss:$8 sps:$4 sm:$0xff]   ;;  %2124 = vmatpush1.bf16.msra.mxu0 %v3020_v37 }
  0x8e   : >> { %v448_v44 = vsel %vm3148_vm2, %v443_v34, %v447_v24  ;;  %v1143_v45 = vrot.slane %v1141_v35, 5  ;;  %v800_v46 = vrot.slane %v798_v36, 4  ;;  %v811_v47 = vshrl.u32 %v2666_v13, 16  ;;  %v3023_v48 = vld [vmem:[%s3949_s1 + $0x1c4] ss:$8 sps:$4 sm:$0xff]   ;;  %2014 = vmatprep.subr.bf16.mxu1 %v3021_v43 }
  0x8f   : >> { %v2617_v49 = vcombine.low %v438_v33, %v448_v44  ;;  %v1129_v50 = vrot.slane %v1128_v38, 4  ;;  %v1138_v51 = vor.u32 %v1137_v39, %v1133_v28  ;;  %v803_v52 = vrot.slane %v801_v40, 5  ;;  %v2784_v53 = vld [vmem:[%s3136_s24 + $0xd4] sm:$0x1]  ;;  %v3025_v54 = vld [vmem:[%s3949_s1 + $0xd0] ss:$8 sps:$4 sm:$0xff]   ;;  %2125 = vmatprep.subr.bf16.mxu0 %v3023_v48 }
  0x90   : >> { %v809_v55 = vrot.slane %v807_v41, 5  ;;  %v813_v56 = vrot.slane %v811_v47, 4  ;;  %v817_v57 = vshll.u32 %v2667_v30, 16  ;;  %v1493_v58 = vshrl.u32 %v2782_v31, 16  ;;  %v275_v59 = vld [vmem:[%s3136_s24 + $0xa8] sm:$0xf]  ;;  %2015 = vmatpush1.bf16.msra.mxu1 %v3025_v54 }
  0x91   : >> { %v3026_v60 = vld [vmem:[%s3949_s1 + $0x1c0] ss:$8 sps:$4 sm:$0xff]   ;;  %509 = vrot.lane.b32.xlu0 %v2617_v49, %s3090_s25  ;;  %v1134_v61 = vsel %vm3148_vm2, %v1129_v50, %v1133_v28  ;;  %v1139_v62 = vrot.slane %v1138_v51, 4  ;;  %v804_v63 = vor.u32 %v803_v52, %v800_v46  ;;  %v1496_v0 = vshll.u32 %v2782_v31, 16  ;;  %v3543_v1 = vld [vmem:[%s3136_s24 + $0xac] sm:$0xf] }
  0x92   : >> { %v3029_v2 = vld [vmem:[%s3949_s1 + $0xe4] ss:$8 sps:$4 sm:$0xff]   ;;  %v814_v3 = vor.u32 %v813_v56, %v809_v55  ;;  %v819_v4 = vrot.slane %v817_v57, 5  ;;  %v1495_v5 = vrot.slane %v1493_v58, 4  ;;  %v1502_v6 = vshll.u32 %v2783_v42, 16  ;;  %2126 = vmatpush1.bf16.msra.mxu0 %v3026_v60  ;;  %v3583_v36 = vpop.permute.xlu0 %845  ;;  %v3036_v46 = vld [vmem:[%s3136_s24 + $0x18] sm:$0xff]  }
  0x93   : >> { %v3031_v7 = vld [vmem:[%s3949_s1 + $0x1d4] ss:$8 sps:$4 sm:$0xff]   ;;  %v1144_v8 = vsel %vm3148_vm2, %v1139_v62, %v1143_v45  ;;  %v805_v9 = vrot.slane %v804_v63, 4  ;;  %v1498_v10 = vrot.slane %v1496_v0, 5  ;;  %v1506_v11 = vshrl.u32 %v2783_v42, 16  ;;  %2016 = vmatprep.subr.bf16.mxu1 %v3029_v2  ;;  %v3027_v43 = vld [vmem:[%s3136_s24 + $0xc] sm:$0xff]  }
  0x94   : >> { %v3554_v12 = vld [vmem:[%s3136_s24 + $0xb0] sm:$0x1]  ;;  %v3033_v13 = vld [vmem:[%s3949_s1 + $0xe0] ss:$8 sps:$4 sm:$0xff]   ;;  %v2732_v14 = vcombine.low %v1134_v61, %v1144_v8  ;;  %v815_v15 = vrot.slane %v814_v3, 4  ;;  %v3559_v16 = vrot.slane %v1502_v6, 5  ;;  %2127 = vmatprep.subr.bf16.mxu0 %v3031_v7 }
  0x95   : >> { %v1512_v17 = vshll.u32 %v2784_v53, 16  ;;  %v3562_v18 = vld [vmem:[%s3136_s24 + $0xc0] sm:$0xf]  ;;  %v3034_v19 = vld [vmem:[%s3949_s1 + $0x1d0] ss:$8 sps:$4 sm:$0xff]   ;;  %v810_v21 = vsel %vm3148_vm2, %v805_v9, %v809_v55  ;;  %v1499_v22 = vor.u32 %v1498_v10, %v1495_v5  ;;  %v1508_v23 = vrot.slane %v1506_v11, 4  ;;  %2017 = vmatpush1.bf16.msra.mxu1 %v3033_v13 }
  0x96   : >> { %v3037_v20 = vld [vmem:[%s3949_s1 + $0xf4] ss:$8 sps:$4 sm:$0xff]   ;;  %v450_v24 = vshrl.u32 %v275_v59, 16  ;;  %v3573_v25 = vld [vmem:[%s3136_s24 + $0xc4] sm:$0xf]  ;;  %1205 = vrot.lane.b32.xlu1 %v2732_v14, %s3090_s25  ;;  %v820_v28 = vsel %vm3148_vm2, %v815_v15, %v819_v4  ;;  %v453_v30 = vshll.u32 %v275_v59, 16  ;;  %2128 = vmatpush1.bf16.msra.mxu0 %v3034_v19 }
  0x97   : >> { %v3039_v27 = vld [vmem:[%s3949_s1 + $0x1e4] ss:$8 sps:$4 sm:$0xff]   ;;  %v1514_v29 = vrot.slane %v1512_v17, 5  ;;  %v459_v31 = vshll.u32 %v3543_v1, 16  ;;  %v2675_v32 = vcombine.low %v810_v21, %v820_v28  ;;  %v1500_v33 = vrot.slane %v1499_v22, 4  ;;  %v3044_v49 = vld [vmem:[%s3136_s24 + $0x3c] sm:$0xff]   ;;  %2018 = vmatprep.subr.bf16.mxu1 %v3037_v20  ;;  %v498_v21 = vpop.permute.xlu1 %497 }
  0x98   : >> { %v1509_v34 = vor.u32 %v1508_v23, %v3559_v16  ;;  %v452_v35 = vrot.slane %v450_v24, 4  ;;  %v3041_v37 = vld [vmem:[%s3949_s1 + $0xf0] ss:$8 sps:$4 sm:$0xff]   ;;  %v455_v38 = vrot.slane %v453_v30, 5  ;;  %v463_v40 = vshrl.u32 %v3543_v1, 16  ;;  %v3028_v44 = vld [vmem:[%s3136_s24] sm:$0xff]   ;;  %2129 = vmatprep.subr.bf16.mxu0 %v3039_v27 }
  0x99   : >> { %v3588_v39 = vrot.slane %v459_v31, 5  ;;  %v469_v41 = vshll.u32 %v3554_v12, 16  ;;  %v3593_v42 = vld [vmem:[%s3136_s24 + $0xc8] sm:$0x1]  ;;  %v3048_v50 = vld [vmem:[%s3136_s24 + $0x18] sm:$0xff]   ;;  %v3049_v51 = vld [vmem:[%s3136_s24 + $0x30] sm:$0xff]   ;;  %859 = vrot.lane.b32.xlu0 %v2675_v32, %s3090_s25  ;;  %v1505_v63 = vsel %vm3148_vm2, %v1500_v33, %v3559_v16  ;;  %2019 = vmatpush1.bf16.msra.mxu1 %v3041_v37 }
  0x9a   : >> { %v3035_v45 = vld [vmem:[%s3136_s24 + $0x24] sm:$0xff]   ;;  %v3050_v52 = vld [vmem:[%s3136_s24 + $0x3c] sm:$0xff]   ;;  %v3051_v53 = vld [vmem:[%s3136_s24 + $0x54] sm:$0xff]   ;;  %v1510_v0 = vrot.slane %v1509_v34, 4  ;;  %v1146_v1 = vshrl.u32 %v3562_v18, 16  ;;  %v1149_v2 = vshll.u32 %v3562_v18, 16  ;;  %v456_v5 = vor.u32 %v455_v38, %v452_v35  ;;  %v1541_v24 = vpop.permute.xlu0 %1540 }
  0x9b   : >> { %v3042_v47 = vld [vmem:[%s3949_s1 + $0x1e0] ss:$8 sps:$4 sm:$0xff]   ;;  %v3052_v54 = vld [vmem:[%s3136_s24 + $0x30] sm:$0xff]   ;;  %v3061_v4 = vld [vmem:[%s3136_s24 + $0x78] sm:$0xff]   ;;  %v465_v6 = vrot.slane %v463_v40, 4  ;;  %v471_v7 = vrot.slane %v469_v41, 5 }
  0x9c   : >> { %v3043_v48 = vld [vmem:[%s3136_s24 + $0x24] sm:$0xff]   ;;  %v3054_v56 = vld [vmem:[%s3136_s24 + $0x54] sm:$0xff]   ;;  %v3055_v57 = vld [vmem:[%s3136_s24 + $0x6c] sm:$0xff]   ;;  %v1155_v8 = vshll.u32 %v3573_v25, 16  ;;  %v1515_v10 = vsel %vm3148_vm2, %v1510_v0, %v1514_v29  ;;  %v1148_v11 = vrot.slane %v1146_v1, 4  ;;  %v1151_v12 = vrot.slane %v1149_v2, 5  ;;  %2130 = vmatpush1.bf16.msra.mxu0 %v3042_v47 }
  0x9d   : >> { %v3053_v55 = vld [vmem:[%s3136_s24 + $0x48] sm:$0xff]   ;;  %v3057_v59 = vld [vmem:[%s3136_s24 + $0x60] sm:$0xff]   ;;  %v3045_v3 = vld [vmem:[%s3949_s1 + $0x1f4] ss:$8 sps:$4 sm:$0xff]   ;;  %v1159_v13 = vshrl.u32 %v3573_v25, 16  ;;  %v2792_v15 = vcombine.low %v1505_v63, %v1515_v10  ;;  %v457_v16 = vrot.slane %v456_v5, 4  ;;  %v466_v17 = vor.u32 %v465_v6, %v3588_v39 }
  0x9e   : >> { %v3056_v58 = vld [vmem:[%s3136_s24 + $0x48] sm:$0xff]   ;;  %v3060_v62 = vld [vmem:[%s3136_s24 + $0x60] sm:$0xff]   ;;  %v1157_v18 = vrot.slane %v1155_v8, 5  ;;  %v3047_v19 = vld [vmem:[%s3949_s1 + $0x1f0] ss:$8 sps:$4 sm:$0xff]   ;;  %v1152_v20 = vor.u32 %v1151_v12, %v1148_v11  ;;  %v1165_v23 = vshll.u32 %v3593_v42, 16  ;;  %2131 = vmatprep.subr.bf16.mxu0 %v3045_v3 }
  0x9f   : >> { %v3058_v60 = vld [vmem:[%s3136_s24 + $0x6c] sm:$0xff]   ;;  %v3059_v61 = vld [vmem:[%s3136_s24 + $0x84] sm:$0xff]   ;;  %v3063_v14 = vld [vmem:[%s3136_s24 + $0x9c] sm:$0xff]   ;;  %v1161_v22 = vrot.slane %v1159_v13, 4  ;;  %1554 = vrot.lane.b32.xlu1 %v2792_v15, %s3090_s25  ;;  %v462_v27 = vsel %vm3148_vm2, %v457_v16, %v3588_v39  ;;  %v467_v28 = vrot.slane %v466_v17, 4  ;;  %597 = vst.msk [vmem:[#allocation2 + $0x8] sm:$0xff] %vm245_vm3, %v3027_v43 }
  0xa0   : >> { %v3062_v9 = vld [vmem:[%s3136_s24 + $0x84] sm:$0xff]   ;;  %v3064_v25 = vld [vmem:[%s3136_s24 + $0x78] sm:$0xff]   ;;  %246 = vst.msk [vmem:[#allocation2] sm:$0xff] %vm245_vm3, %v3028_v44  ;;  %1292 = vst.msk [vmem:[#allocation2 + $0x18] sm:$0xff] %vm245_vm3, %v3035_v45  ;;  %v1153_v29 = vrot.slane %v1152_v20, 4  ;;  %v1167_v31 = vrot.slane %v1165_v23, 5  ;;  %2132 = vmatpush1.bf16.msra.mxu0 %v3047_v19  ;;  %v1194_v38 = vpop.permute.xlu1 %1193 }
  0xa1   : >> { %945 = vst.msk [vmem:[#allocation2 + $0x10] sm:$0xff] %vm245_vm3, %v3036_v46  ;;  %598 = vst.msk [vmem:[#allocation2 + $0x28] sm:$0xff] %vm245_vm3, %v3043_v48  ;;  %v1162_v30 = vor.u32 %v1161_v22, %v1157_v18  ;;  %v472_v32 = vsel %vm3148_vm2, %v467_v28, %v471_v7  ;;  %v3065_v37 = vld [vmem:[%s3136_s24 + $0x90] sm:$0xff]   ;;  %v3066_v45 = vld [vmem:[%s3136_s24 + $0x9c] sm:$0xff]  }
  0xa2   : >> { %1293 = vst.msk [vmem:[#allocation2 + $0x38] sm:$0xff] %vm245_vm3, %v3044_v49  ;;  %247 = vst.msk [vmem:[#allocation2 + $0x20] sm:$0xff] %vm245_vm3, %v3048_v50  ;;  %v2618_v33 = vcombine.low %v462_v27, %v472_v32  ;;  %v1158_v34 = vsel %vm3148_vm2, %v1153_v29, %v1157_v18  ;;  %v848_v40 = vpop.permute.xlu0 %847  ;;  %v3067_v46 = vld [vmem:[%s3136_s24 + $0xb4] sm:$0xff]   ;;  %v3069_v49 = vld [vmem:[%s3136_s24 + $0xa8] sm:$0xff]  }
  0xa3   : >> { %946 = vst.msk [vmem:[#allocation2 + $0x30] sm:$0xff] %vm245_vm3, %v3049_v51  ;;  %599 = vst.msk [vmem:[#allocation2 + $0x48] sm:$0xff] %vm245_vm3, %v3050_v52  ;;  %v1163_v35 = vrot.slane %v1162_v30, 4  ;;  %v3068_v48 = vld [vmem:[%s3136_s24 + $0x90] sm:$0xff]  }
  0xa4   : >> { %1294 = vst.msk [vmem:[#allocation2 + $0x58] sm:$0xff] %vm245_vm3, %v3051_v53  ;;  %248 = vst.msk [vmem:[#allocation2 + $0x40] sm:$0xff] %vm245_vm3, %v3052_v54  ;;  %511 = vrot.lane.b32.xlu0 %v2618_v33, %s3090_s25  ;;  %v3070_v51 = vld [vmem:[%s3136_s24 + $0xb4] sm:$0xff]   ;;  %v3071_v52 = vld [vmem:[%s3136_s24 + $0xcc] sm:$0xff]  }
  0xa5   : >> { %947 = vst.msk [vmem:[#allocation2 + $0x50] sm:$0xff] %vm245_vm3, %v3053_v55  ;;  %600 = vst.msk [vmem:[#allocation2 + $0x68] sm:$0xff] %vm245_vm3, %v3054_v56  ;;  %v3072_v53 = vld [vmem:[%s3136_s24 + $0xa8] sm:$0xff]   ;;  %v3073_v56 = vld [vmem:[%s3136_s24 + $0xc0] sm:$0xff]   ;;  %s2858_s24 = sshll.u32 %s3088_s22, 7  ;;  %s176_s22 = sadd.s32 1, %s3088_s22  }
  0xa6   : >> { %1295 = vst.msk [vmem:[#allocation2 + $0x78] sm:$0xff] %vm245_vm3, %v3055_v57  ;;  %249 = vst.msk [vmem:[#allocation2 + $0x60] sm:$0xff] %vm245_vm3, %v3056_v58  ;;  %s2494_s30 = sshra.s32 %s2858_s24, 3  ;;  %p173_p4 = scmp.ge.s32.totalorder %s176_s22, 2  }
  0xa7   : >> { %948 = vst.msk [vmem:[#allocation2 + $0x70] sm:$0xff] %vm245_vm3, %v3057_v59  ;;  %601 = vst.msk [vmem:[#allocation2 + $0x88] sm:$0xff] %vm245_vm3, %v3058_v60  ;;  %v1543_v26 = vpop.permute.xlu1 %1542  ;;  %s2875_s4 = sshll.u32 %s2494_s30, 2 }
  0xa8   : >> { %1296 = vst.msk [vmem:[#allocation2 + $0x98] sm:$0xff] %vm245_vm3, %v3059_v61  ;;  %250 = vst.msk [vmem:[#allocation2 + $0x80] sm:$0xff] %vm245_vm3, %v3060_v62  ;;  %s3866_s5 = scalar_lea.vmem %s3122_s18, %s2875_s4 }
  0xa9   : >> { %949 = vst.msk [vmem:[#allocation2 + $0x90] sm:$0xff] %vm245_vm3, %v3061_v4  ;;  %602 = vst.msk [vmem:[#allocation2 + $0xa8] sm:$0xff] %vm245_vm3, %v3062_v9 }
  0xaa   : >> { %1297 = vst.msk [vmem:[#allocation2 + $0xb8] sm:$0xff] %vm245_vm3, %v3063_v14  ;;  %251 = vst.msk [vmem:[#allocation2 + $0xa0] sm:$0xff] %vm245_vm3, %v3064_v25 }
  0xab   : >> { %869 = vst.msk [vmem:[#allocation2 + $0x8] sm:$0xff] %vm521_vm4, %v3583_v36  ;;  %522 = vst.msk [vmem:[#allocation2] sm:$0xff] %vm521_vm4, %v498_v21  ;;  %v1168_v36 = vsel %vm3148_vm2, %v1163_v35, %v1167_v31 }
  0xac   : >> { %1564 = vst.msk [vmem:[#allocation2 + $0x18] sm:$0xff] %vm521_vm4, %v1541_v24  ;;  %v2733_v39 = vcombine.low %v1158_v34, %v1168_v36  ;;  %1217 = vst.msk [vmem:[#allocation2 + $0x10] sm:$0xff] %vm521_vm4, %v1194_v38  ;;  %v500_v50 = vpop.permute.xlu0 %499 }
  0xad   : >> { %950 = vst.msk [vmem:[#allocation2 + $0xb0] sm:$0xff] %vm245_vm3, %v3065_v37  ;;  %603 = vst.msk [vmem:[#allocation2 + $0xc8] sm:$0xff] %vm245_vm3, %v3066_v45 }
  0xae   : >> { %1207 = vrot.lane.b32.xlu1 %v2733_v39, %s3090_s25  ;;  %870 = vst.msk [vmem:[#allocation2 + $0x28] sm:$0xff] %vm521_vm4, %v848_v40  ;;  %1565 = vst.msk [vmem:[#allocation2 + $0x38] sm:$0xff] %vm521_vm4, %v1543_v26 }
  0xaf   : >> { %1298 = vst.msk [vmem:[#allocation2 + $0xd8] sm:$0xff] %vm245_vm3, %v3067_v46  ;;  %252 = vst.msk [vmem:[#allocation2 + $0xc0] sm:$0xff] %vm245_vm3, %v3068_v48  ;;  %v1196_v54 = vpop.permute.xlu1 %1195 }
  0xb0   : >> { %523 = vst.msk [vmem:[#allocation2 + $0x20] sm:$0xff] %vm521_vm4, %v500_v50  ;;  %1218 = vst.msk [vmem:[#allocation2 + $0x30] sm:$0xff] %vm521_vm4, %v1196_v54 }
  0xb1   : >> { %951 = vst.msk [vmem:[#allocation2 + $0xd0] sm:$0xff] %vm245_vm3, %v3069_v49  ;;  %604 = vst.msk [vmem:[#allocation2 + $0xe8] sm:$0xff] %vm245_vm3, %v3070_v51 }
  0xb2   : >> { %v1573_v41 = vld [vmem:[#allocation2 + $0x8] sm:$0xff]  ;;  %v1572_v42 = vld [vmem:[#allocation2] sm:$0xff]  ;;  %1299 = vst.msk [vmem:[#allocation2 + $0xf8] sm:$0xff] %vm245_vm3, %v3071_v52  ;;  %253 = vst.msk [vmem:[#allocation2 + $0xe0] sm:$0xff] %vm245_vm3, %v3072_v53 }
  0xb3   : >> { %v1575_v43 = vld [vmem:[#allocation2 + $0x18] sm:$0xff]  ;;  %2020 = vmatprep.mubr.bf16.mxu1 %v1573_v41  ;;  %v1574_v44 = vld [vmem:[#allocation2 + $0x10] sm:$0xff]  ;;  %952 = vst.msk [vmem:[#allocation2 + $0xf0] sm:$0xff] %vm245_vm3, %v3073_v56 }
  0xb4   : >> { %2133 = vmatprep.mubr.bf16.mxu0 %v1575_v43  ;;  %2021 = vmatmul.mubr.bf16.vlgmr.msra.gmra.mrb[0].mxu1 %v1572_v42  ;;  %v850_v57 = vpop.permute.xlu0 %849 }
  0xb5   : >> { %2134 = vmatmul.mubr.bf16.vlgmr.msra.gmra.mrb[0].mxu0 %v1574_v44  ;;  %v1577_v47 = vld [vmem:[#allocation2 + $0x28] sm:$0xff]  ;;  %v1579_v55 = vld [vmem:[#allocation2 + $0x38] sm:$0xff]  ;;  %871 = vst.msk [vmem:[#allocation2 + $0x48] sm:$0xff] %vm521_vm4, %v850_v57 }
  0xb6   : >> { %2030 = vmatprep.mubr.bf16.mxu1 %v1577_v47  ;;  %2143 = vmatprep.mubr.bf16.mxu0 %v1579_v55 }
  0xb7   : >> { %v1576_v58 = vld [vmem:[#allocation2 + $0x20] sm:$0xff]  ;;  %v1545_v59 = vpop.permute.xlu1 %1544  ;;  %v1578_v60 = vld [vmem:[#allocation2 + $0x30] sm:$0xff] }
  0xb8   : >> { %1566 = vst.msk [vmem:[#allocation2 + $0x58] sm:$0xff] %vm521_vm4, %v1545_v59 }
  0xbc   : >> { %2031 = vmatmul.mubr.bf16.gmra.mrb[4].mxu1 %v1576_v58  ;;  %v502_v61 = vpop.permute.xlu0 %501  ;;  %v1581_v62 = vld [vmem:[#allocation2 + $0x48] sm:$0xff] }
  0xbd   : >> { %2144 = vmatmul.mubr.bf16.gmra.mrb[4].mxu0 %v1578_v60  ;;  %524 = vst.msk [vmem:[#allocation2 + $0x40] sm:$0xff] %vm521_vm4, %v502_v61  ;;  %2040 = vmatprep.mubr.bf16.mxu1 %v1581_v62 }
  0xbf   : >> { %v1583_v63 = vld [vmem:[#allocation2 + $0x58] sm:$0xff] }
  0xc0   : >> { %2153 = vmatprep.mubr.bf16.mxu0 %v1583_v63 }
  0xc1   : >> { %v1198_v0 = vpop.permute.xlu1 %1197 }
  0xc2   : >> { %1219 = vst.msk [vmem:[#allocation2 + $0x50] sm:$0xff] %vm521_vm4, %v1198_v0 }
  0xc4   : >> { %v852_v1 = vpop.permute.xlu0 %851  ;;  %v1580_v2 = vld [vmem:[#allocation2 + $0x40] sm:$0xff] }
  0xc5   : >> { %872 = vst.msk [vmem:[#allocation2 + $0x68] sm:$0xff] %vm521_vm4, %v852_v1  ;;  %2041 = vmatmul.mubr.bf16.gmra.mrb[8].mxu1 %v1580_v2 }
  0xc9   : >> { %v1547_v3 = vpop.permute.xlu1 %1546  ;;  %v1582_v4 = vld [vmem:[#allocation2 + $0x50] sm:$0xff] }
  0xca   : >> { %1567 = vst.msk [vmem:[#allocation2 + $0x78] sm:$0xff] %vm521_vm4, %v1547_v3  ;;  %2154 = vmatmul.mubr.bf16.gmra.mrb[8].mxu0 %v1582_v4 }
  0xcc   : >> { %v1585_v5 = vld [vmem:[#allocation2 + $0x68] sm:$0xff] }
  0xcd   : >> { %2050 = vmatprep.mubr.bf16.mxu1 %v1585_v5 }
  0xce   : >> { %v504_v6 = vpop.permute.xlu0 %503 }
  0xcf   : >> { %525 = vst.msk [vmem:[#allocation2 + $0x60] sm:$0xff] %vm521_vm4, %v504_v6 }
  0xd1   : >> { %v1200_v7 = vpop.permute.xlu1 %1199  ;;  %v1587_v8 = vld [vmem:[#allocation2 + $0x78] sm:$0xff] }
  0xd2   : >> { %1220 = vst.msk [vmem:[#allocation2 + $0x70] sm:$0xff] %vm521_vm4, %v1200_v7  ;;  %2163 = vmatprep.mubr.bf16.mxu0 %v1587_v8 }
  0xd6   : >> { %v854_v9 = vpop.permute.xlu0 %853  ;;  %v1584_v10 = vld [vmem:[#allocation2 + $0x60] sm:$0xff] }
  0xd7   : >> { %873 = vst.msk [vmem:[#allocation2 + $0x88] sm:$0xff] %vm521_vm4, %v854_v9  ;;  %2051 = vmatmul.mubr.bf16.gmra.mrb[12].mxu1 %v1584_v10 }
  0xd9   : >> { %v1549_v11 = vpop.permute.xlu1 %1548  ;;  %v1586_v12 = vld [vmem:[#allocation2 + $0x70] sm:$0xff] }
  0xda   : >> { %1568 = vst.msk [vmem:[#allocation2 + $0x98] sm:$0xff] %vm521_vm4, %v1549_v11  ;;  %2164 = vmatmul.mubr.bf16.gmra.mrb[12].mxu0 %v1586_v12 }
  0xde   : >> { %v506_v13 = vpop.permute.xlu0 %505  ;;  %v1589_v14 = vld [vmem:[#allocation2 + $0x88] sm:$0xff] }
  0xdf   : >> { %526 = vst.msk [vmem:[#allocation2 + $0x80] sm:$0xff] %vm521_vm4, %v506_v13  ;;  %2060 = vmatprep.mubr.bf16.mxu1 %v1589_v14 }
  0xe1   : >> { %v1591_v15 = vld [vmem:[#allocation2 + $0x98] sm:$0xff] }
  0xe2   : >> { %2173 = vmatprep.mubr.bf16.mxu0 %v1591_v15 }
  0xe3   : >> { %v1202_v16 = vpop.permute.xlu1 %1201 }
  0xe4   : >> { %1221 = vst.msk [vmem:[#allocation2 + $0x90] sm:$0xff] %vm521_vm4, %v1202_v16 }
  0xe6   : >> { %v856_v17 = vpop.permute.xlu0 %855  ;;  %v1588_v18 = vld [vmem:[#allocation2 + $0x80] sm:$0xff] }
  0xe7   : >> { %874 = vst.msk [vmem:[#allocation2 + $0xa8] sm:$0xff] %vm521_vm4, %v856_v17  ;;  %2061 = vmatmul.mubr.bf16.gmra.mrb[16].mxu1 %v1588_v18 }
  0xeb   : >> { %v1551_v21 = vpop.permute.xlu1 %1550  ;;  %v1590_v19 = vld [vmem:[#allocation2 + $0x90] sm:$0xff] }
  0xec   : >> { %1569 = vst.msk [vmem:[#allocation2 + $0xb8] sm:$0xff] %vm521_vm4, %v1551_v21  ;;  %2174 = vmatmul.mubr.bf16.gmra.mrb[16].mxu0 %v1590_v19 }
  0xee   : >> { %v1593_v20 = vld [vmem:[#allocation2 + $0xa8] sm:$0xff] }
  0xef   : >> { %2070 = vmatprep.mubr.bf16.mxu1 %v1593_v20 }
  0xf1   : >> { %v508_v22 = vpop.permute.xlu0 %507 }
  0xf2   : >> { %527 = vst.msk [vmem:[#allocation2 + $0xa0] sm:$0xff] %vm521_vm4, %v508_v22 }
  0xf3   : >> { %v1204_v23 = vpop.permute.xlu1 %1203  ;;  %v1595_v24 = vld [vmem:[#allocation2 + $0xb8] sm:$0xff] }
  0xf4   : >> { %1222 = vst.msk [vmem:[#allocation2 + $0xb0] sm:$0xff] %vm521_vm4, %v1204_v23  ;;  %2183 = vmatprep.mubr.bf16.mxu0 %v1595_v24 }
  0xf9   : >> { %v858_v25 = vpop.permute.xlu0 %857  ;;  %v1592_v27 = vld [vmem:[#allocation2 + $0xa0] sm:$0xff] }
  0xfa   : >> { %875 = vst.msk [vmem:[#allocation2 + $0xc8] sm:$0xff] %vm521_vm4, %v858_v25  ;;  %2071 = vmatmul.mubr.bf16.gmra.mrb[20].mxu1 %v1592_v27 }
  0xfb   : >> { %v1594_v29 = vld [vmem:[#allocation2 + $0xb0] sm:$0xff] }
  0xfc   : >> { %2184 = vmatmul.mubr.bf16.gmra.mrb[20].mxu0 %v1594_v29 }
  0xfd   : >> { %v1553_v28 = vpop.permute.xlu1 %1552 }
  0xfe   : >> { %1570 = vst.msk [vmem:[#allocation2 + $0xd8] sm:$0xff] %vm521_vm4, %v1553_v28 }
 0x101   : >> { %v1597_v31 = vld [vmem:[#allocation2 + $0xc8] sm:$0xff] }
 0x102   : >> { %2080 = vmatprep.mubr.bf16.mxu1 %v1597_v31 }
 0x103   : >> { %v510_v30 = vpop.permute.xlu0 %509 }
 0x104   : >> { %528 = vst.msk [vmem:[#allocation2 + $0xc0] sm:$0xff] %vm521_vm4, %v510_v30 }
 0x105   : >> { %v1599_v32 = vld [vmem:[#allocation2 + $0xd8] sm:$0xff] }
 0x106   : >> { %2193 = vmatprep.mubr.bf16.mxu0 %v1599_v32 }
 0x108   : >> { %v1206_v33 = vpop.permute.xlu1 %1205 }
 0x109   : >> { %1223 = vst.msk [vmem:[#allocation2 + $0xd0] sm:$0xff] %vm521_vm4, %v1206_v33 }
 0x10b   : >> { %v860_v34 = vpop.permute.xlu0 %859  ;;  %v1596_v35 = vld [vmem:[#allocation2 + $0xc0] sm:$0xff] }
 0x10c   : >> { %876 = vst.msk [vmem:[#allocation2 + $0xe8] sm:$0xff] %vm521_vm4, %v860_v34  ;;  %2081 = vmatmul.mubr.bf16.gmra.mrb[24].mxu1 %v1596_v35 }
 0x110   : >> { %v1598_v36 = vld [vmem:[#allocation2 + $0xd0] sm:$0xff] }
 0x111   : >> { %v1555_v37 = vpop.permute.xlu1 %1554  ;;  %2194 = vmatmul.mubr.bf16.gmra.mrb[24].mxu0 %v1598_v36 }
 0x112   : >> { %1571 = vst.msk [vmem:[#allocation2 + $0xf8] sm:$0xff] %vm521_vm4, %v1555_v37 }
 0x113   : >> { %v1601_v38 = vld [vmem:[#allocation2 + $0xe8] sm:$0xff] }
 0x114   : >> { %2090 = vmatprep.mubr.bf16.mxu1 %v1601_v38 }
 0x116   : >> { %v512_v39 = vpop.permute.xlu0 %511 }
 0x117   : >> { %529 = vst.msk [vmem:[#allocation2 + $0xe0] sm:$0xff] %vm521_vm4, %v512_v39 }
 0x119   : >> { %v1603_v41 = vld [vmem:[#allocation2 + $0xf8] sm:$0xff] }
 0x11a   : >> { %2203 = vmatprep.mubr.bf16.mxu0 %v1603_v41 }
 0x11e   : >> { %v1600_v42 = vld [vmem:[#allocation2 + $0xe0] sm:$0xff] }
 0x11f   : >> { %2091 = vmatmul.mubr.bf16.gmra.mrb[28].mxu1 %v1600_v42 }
 0x120   : >> { %v1208_v40 = vpop.permute.xlu1 %1207 }
 0x121   : >> { %1224 = vst.msk [vmem:[#allocation2 + $0xf0] sm:$0xff] %vm521_vm4, %v1208_v40 }
 0x128   : >> { %v1602_v43 = vld [vmem:[#allocation2 + $0xf0] sm:$0xff] }
 0x129   : >> { %2204 = vmatmul.mubr.bf16.gmra.mrb[28].mxu0 %v1602_v43 }
 0x187   : >> { %v2022_v26 = vpop.f32.mrb[0].mxu1 }
 0x188   : >> { %v2024_v44 = vpop.f32.mrb[1].mxu1  ;;  %v2135_v47 = vpop.f32.mrb[0].mxu0 }
 0x189   : >> { %v2026_v45 = vpop.f32.mrb[2].mxu1  ;;  %v3725_v48 = vadd.f32 %v2135_v47, %v2022_v26  ;;  %v2137_v49 = vpop.f32.mrb[1].mxu0 }
 0x18a   : >> { %v2028_v46 = vpop.f32.mrb[3].mxu1  ;;  %v3727_v50 = vadd.f32 %v2137_v49, %v2024_v44  ;;  %v2139_v51 = vpop.f32.mrb[2].mxu0 }
 0x18b   : >> { %v3729_v52 = vadd.f32 %v2139_v51, %v2026_v45  ;;  %v2141_v53 = vpop.f32.mrb[3].mxu0  ;;  %2230 = vrot.lane.b32.xlu0 %v3725_v48, %s3090_s25 }
 0x18c   : >> { %v3733_v54 = vadd.f32 %v2141_v53, %v2028_v46 }
 0x18d   : >> { %2232 = vrot.lane.b32.xlu1 %v3729_v52, %s3090_s25 }
 0x18f   : >> { %2310 = vrot.lane.b32.xlu0 %v3727_v50, %s3090_s25  ;;  %v2032_v55 = vpop.f32.mrb[4].mxu1 }
 0x190   : >> { %v2034_v56 = vpop.f32.mrb[5].mxu1  ;;  %v2145_v58 = vpop.f32.mrb[4].mxu0 }
 0x191   : >> { %2312 = vrot.lane.b32.xlu1 %v3733_v54, %s3090_s25  ;;  %v2036_v57 = vpop.f32.mrb[6].mxu1  ;;  %v3741_v60 = vadd.f32 %v2145_v58, %v2032_v55  ;;  %v2147_v61 = vpop.f32.mrb[5].mxu0 }
 0x192   : >> { %v2038_v59 = vpop.f32.mrb[7].mxu1  ;;  %v3743_v62 = vadd.f32 %v2147_v61, %v2034_v56  ;;  %v2149_v63 = vpop.f32.mrb[6].mxu0 }
 0x193   : >> { %v3745_v0 = vadd.f32 %v2149_v63, %v2036_v57  ;;  %v2151_v1 = vpop.f32.mrb[7].mxu0  ;;  %2234 = vrot.lane.b32.xlu0 %v3741_v60, %s3090_s25 }
 0x194   : >> { %v3749_v2 = vadd.f32 %v2151_v1, %v2038_v59 }
 0x195   : >> { %2236 = vrot.lane.b32.xlu1 %v3745_v0, %s3090_s25 }
 0x197   : >> { %2314 = vrot.lane.b32.xlu0 %v3743_v62, %s3090_s25 }
 0x198   : >> { %v2042_v3 = vpop.f32.mrb[8].mxu1 }
 0x199   : >> { %2316 = vrot.lane.b32.xlu1 %v3749_v2, %s3090_s25  ;;  %v2044_v4 = vpop.f32.mrb[9].mxu1 }
 0x19a   : >> { %v2046_v5 = vpop.f32.mrb[10].mxu1 }
 0x19b   : >> { %v2048_v6 = vpop.f32.mrb[11].mxu1 }
 0x19d   : >> { %v2155_v7 = vpop.f32.mrb[8].mxu0 }
 0x19e   : >> { %v3757_v8 = vadd.f32 %v2155_v7, %v2042_v3  ;;  %v2157_v9 = vpop.f32.mrb[9].mxu0 }
 0x19f   : >> { %v3759_v10 = vadd.f32 %v2157_v9, %v2044_v4  ;;  %v2159_v11 = vpop.f32.mrb[10].mxu0 }
 0x1a0   : >> { %v3761_v12 = vadd.f32 %v2159_v11, %v2046_v5  ;;  %v2161_v13 = vpop.f32.mrb[11].mxu0  ;;  %2238 = vrot.lane.b32.xlu0 %v3757_v8, %s3090_s25 }
 0x1a1   : >> { %v3765_v14 = vadd.f32 %v2161_v13, %v2048_v6 }
 0x1a2   : >> { %2240 = vrot.lane.b32.xlu1 %v3761_v12, %s3090_s25 }
 0x1a4   : >> { %2318 = vrot.lane.b32.xlu0 %v3759_v10, %s3090_s25 }
 0x1a6   : >> { %2320 = vrot.lane.b32.xlu1 %v3765_v14, %s3090_s25 }
 0x1aa   : >> { %v2052_v15 = vpop.f32.mrb[12].mxu1 }
 0x1ab   : >> { %v2054_v16 = vpop.f32.mrb[13].mxu1 }
 0x1ac   : >> { %v2056_v17 = vpop.f32.mrb[14].mxu1 }
 0x1ad   : >> { %v2165_v18 = vpop.f32.mrb[12].mxu0  ;;  %v2058_v21 = vpop.f32.mrb[15].mxu1 }
 0x1ae   : >> { %v3773_v19 = vadd.f32 %v2165_v18, %v2052_v15  ;;  %v2167_v20 = vpop.f32.mrb[13].mxu0 }
 0x1af   : >> { %v3775_v22 = vadd.f32 %v2167_v20, %v2054_v16  ;;  %v2169_v23 = vpop.f32.mrb[14].mxu0 }
 0x1b0   : >> { %v3777_v24 = vadd.f32 %v2169_v23, %v2056_v17  ;;  %v2171_v25 = vpop.f32.mrb[15].mxu0  ;;  %2242 = vrot.lane.b32.xlu0 %v3773_v19, %s3090_s25 }
 0x1b1   : >> { %v3781_v27 = vadd.f32 %v2171_v25, %v2058_v21 }
 0x1b2   : >> { %2244 = vrot.lane.b32.xlu1 %v3777_v24, %s3090_s25 }
 0x1b4   : >> { %2322 = vrot.lane.b32.xlu0 %v3775_v22, %s3090_s25 }
 0x1b6   : >> { %2324 = vrot.lane.b32.xlu1 %v3781_v27, %s3090_s25 }
 0x1ba   : >> { %v2062_v28 = vpop.f32.mrb[16].mxu1 }
 0x1bb   : >> { %v2064_v29 = vpop.f32.mrb[17].mxu1 }
 0x1bc   : >> { %v2066_v30 = vpop.f32.mrb[18].mxu1 }
 0x1bd   : >> { %v2068_v31 = vpop.f32.mrb[19].mxu1 }
 0x1bf   : >> { %v2175_v32 = vpop.f32.mrb[16].mxu0 }
 0x1c0   : >> { %v3789_v33 = vadd.f32 %v2175_v32, %v2062_v28  ;;  %v2177_v34 = vpop.f32.mrb[17].mxu0 }
 0x1c1   : >> { %v3791_v35 = vadd.f32 %v2177_v34, %v2064_v29  ;;  %v2179_v37 = vpop.f32.mrb[18].mxu0 }
 0x1c2   : >> { %v3793_v36 = vadd.f32 %v2179_v37, %v2066_v30  ;;  %v2181_v38 = vpop.f32.mrb[19].mxu0  ;;  %2246 = vrot.lane.b32.xlu0 %v3789_v33, %s3090_s25 }
 0x1c3   : >> { %v3797_v39 = vadd.f32 %v2181_v38, %v2068_v31  ;;  %v3858_v38 = vld [vmem:[%s3950_s2] ss:$0 sm:$0xff] }
 0x1c4   : >> { %2248 = vrot.lane.b32.xlu1 %v3793_v36, %s3090_s25 }
 0x1c6   : >> { %2326 = vrot.lane.b32.xlu0 %v3791_v35, %s3090_s25 }
 0x1c8   : >> { %2328 = vrot.lane.b32.xlu1 %v3797_v39, %s3090_s25 }
 0x1cd   : >> { %v2072_v40 = vpop.f32.mrb[20].mxu1 }
 0x1ce   : >> { %v2074_v41 = vpop.f32.mrb[21].mxu1 }
 0x1cf   : >> { %v2076_v42 = vpop.f32.mrb[22].mxu1  ;;  %v2185_v43 = vpop.f32.mrb[20].mxu0 }
 0x1d0   : >> { %v2078_v26 = vpop.f32.mrb[23].mxu1  ;;  %v3805_v44 = vadd.f32 %v2185_v43, %v2072_v40  ;;  %v2187_v45 = vpop.f32.mrb[21].mxu0 }
 0x1d1   : >> { %v3807_v46 = vadd.f32 %v2187_v45, %v2074_v41  ;;  %v2189_v47 = vpop.f32.mrb[22].mxu0 }
 0x1d2   : >> { %v3809_v49 = vadd.f32 %v2189_v47, %v2076_v42  ;;  %v2191_v51 = vpop.f32.mrb[23].mxu0  ;;  %2250 = vrot.lane.b32.xlu0 %v3805_v44, %s3090_s25 }
 0x1d3   : >> { %v3813_v53 = vadd.f32 %v2191_v51, %v2078_v26 }
 0x1d4   : >> { %2252 = vrot.lane.b32.xlu1 %v3809_v49, %s3090_s25 }
 0x1d6   : >> { %2330 = vrot.lane.b32.xlu0 %v3807_v46, %s3090_s25 }
 0x1d8   : >> { %2332 = vrot.lane.b32.xlu1 %v3813_v53, %s3090_s25 }
 0x1df   : >> { %v2082_v55 = vpop.f32.mrb[24].mxu1 }
 0x1e0   : >> { %v2084_v56 = vpop.f32.mrb[25].mxu1 }
 0x1e1   : >> { %v2086_v57 = vpop.f32.mrb[26].mxu1 }
 0x1e2   : >> { %v2088_v58 = vpop.f32.mrb[27].mxu1 }
 0x1e4   : >> { %v2195_v59 = vpop.f32.mrb[24].mxu0 }
 0x1e5   : >> { %v3821_v61 = vadd.f32 %v2195_v59, %v2082_v55  ;;  %v2197_v63 = vpop.f32.mrb[25].mxu0 }
 0x1e6   : >> { %v3823_v1 = vadd.f32 %v2197_v63, %v2084_v56  ;;  %v2199_v3 = vpop.f32.mrb[26].mxu0 }
 0x1e7   : >> { %v3825_v4 = vadd.f32 %v2199_v3, %v2086_v57  ;;  %v2201_v5 = vpop.f32.mrb[27].mxu0  ;;  %2254 = vrot.lane.b32.xlu0 %v3821_v61, %s3090_s25 }
 0x1e8   : >> { %v3829_v6 = vadd.f32 %v2201_v5, %v2088_v58 }
 0x1e9   : >> { %2256 = vrot.lane.b32.xlu1 %v3825_v4, %s3090_s25 }
 0x1eb   : >> { %2334 = vrot.lane.b32.xlu0 %v3823_v1, %s3090_s25 }
 0x1ed   : >> { %2336 = vrot.lane.b32.xlu1 %v3829_v6, %s3090_s25 }
 0x1f2   : >> { %v2092_v7 = vpop.f32.mrb[28].mxu1 }
 0x1f3   : >> { %v2094_v9 = vpop.f32.mrb[29].mxu1 }
 0x1f4   : >> { %v2096_v11 = vpop.f32.mrb[30].mxu1 }
 0x1f5   : >> { %v2098_v15 = vpop.f32.mrb[31].mxu1 }
 0x1fc   : >> { %v2205_v13 = vpop.f32.mrb[28].mxu0 }
 0x1fd   : >> { %v3837_v16 = vadd.f32 %v2205_v13, %v2092_v7  ;;  %v2207_v17 = vpop.f32.mrb[29].mxu0  ;;  %v2231_v18 = vpop.permute.xlu0 %2230 }
 0x1fe   : >> { %v3839_v21 = vadd.f32 %v2207_v17, %v2094_v9  ;;  %v2209_v20 = vpop.f32.mrb[30].mxu0  ;;  %v2278_v31 = vmax.f32 %v3725_v48, %v2231_v18 }
 0x1ff   : >> { %v2233_v23 = vpop.permute.xlu1 %2232  ;;  %v3841_v25 = vadd.f32 %v2209_v20, %v2096_v11  ;;  %v2211_v28 = vpop.f32.mrb[31].mxu0  ;;  %2258 = vrot.lane.b32.xlu0 %v3837_v16, %s3090_s25 }
 0x200   : >> { %v3845_v29 = vadd.f32 %v2211_v28, %v2098_v15  ;;  %v2279_v37 = vmax.f32 %v3729_v52, %v2233_v23 }
 0x201   : >> { %2260 = vrot.lane.b32.xlu1 %v3841_v25, %s3090_s25  ;;  %v2311_v30 = vpop.permute.xlu0 %2310 }
 0x202   : >> { %v2358_v32 = vmax.f32 %v3727_v50, %v2311_v30 }
 0x203   : >> { %v2313_v34 = vpop.permute.xlu1 %2312  ;;  %2338 = vrot.lane.b32.xlu0 %v3839_v21, %s3090_s25 }
 0x204   : >> { %v2359_v40 = vmax.f32 %v3733_v54, %v2313_v34  ;;  %v2374_v41 = vmax.f32 %v2278_v31, %v2358_v32 }
 0x205   : >> { %2340 = vrot.lane.b32.xlu1 %v3845_v29, %s3090_s25  ;;  %v2235_v54 = vpop.permute.xlu0 %2234 }
 0x206   : >> { %v2375_v48 = vmax.f32 %v2279_v37, %v2359_v40  ;;  %v2397_v50 = vadd.f32 %v3858_v38, %v2374_v41  ;;  %v2280_v55 = vmax.f32 %v3741_v60, %v2235_v54 }
 0x207   : >> { %v2237_v47 = vpop.permute.xlu1 %2236 }
 0x208   : >> { %v2398_v42 = vadd.f32 %v3858_v38, %v2375_v48  ;;  %v2413_v43 = vmax.f32 %v2397_v50, 0.0  ;;  %v2281_v58 = vmax.f32 %v3745_v0, %v2237_v47 }
 0x209   : >> { %v2315_v51 = vpop.permute.xlu0 %2314 }
 0x20a   : >> { %v2414_v52 = vmax.f32 %v2398_v42, 0.0  ;;  %v2880_v26 = vpack.c.bf16 %v2413_v43, %v2413_v43  ;;  %v2360_v56 = vmax.f32 %v3743_v62, %v2315_v51 }
 0x20b   : >> { %v2317_v57 = vpop.permute.xlu1 %2316 }
 0x20c   : >> { %v2881_v45 = vpack.c.bf16 %v2414_v52, %v2414_v52  ;;  %2499 = vst.msk [vmem:[%s3866_s5] sm:$0xf] %vm2498_vm5, %v2880_v26  ;;  %v2376_v59 = vmax.f32 %v2280_v55, %v2360_v56  ;;  %v2361_v63 = vmax.f32 %v3749_v2, %v2317_v57 }
 0x20e   : >> { %2500 = vst.msk [vmem:[%s3866_s5 + $0x4] sm:$0xf] %vm2498_vm5, %v2881_v45  ;;  %v2399_v3 = vadd.f32 %v3858_v38, %v2376_v59  ;;  %v2377_v5 = vmax.f32 %v2281_v58, %v2361_v63 }
 0x210   : >> { %v2415_v7 = vmax.f32 %v2399_v3, 0.0  ;;  %v2400_v9 = vadd.f32 %v3858_v38, %v2377_v5 }
 0x212   : >> { %v2882_v11 = vpack.c.bf16 %v2415_v7, %v2415_v7  ;;  %v2416_v13 = vmax.f32 %v2400_v9, 0.0  ;;  %v2239_v60 = vpop.permute.xlu0 %2238 }
 0x213   : >> { %v2282_v2 = vmax.f32 %v3757_v8, %v2239_v60 }
 0x214   : >> { %2501 = vst.msk [vmem:[%s3866_s5 + $0x8] sm:$0xf] %vm2498_vm5, %v2882_v11  ;;  %v2883_v15 = vpack.c.bf16 %v2416_v13, %v2416_v13  ;;  %v2241_v62 = vpop.permute.xlu1 %2240 }
 0x215   : >> { %v2283_v20 = vmax.f32 %v3761_v12, %v2241_v62 }
 0x216   : >> { %2502 = vst.msk [vmem:[%s3866_s5 + $0xc] sm:$0xf] %vm2498_vm5, %v2883_v15  ;;  %v2319_v0 = vpop.permute.xlu0 %2318 }
 0x217   : >> { %v2362_v17 = vmax.f32 %v3759_v10, %v2319_v0 }
 0x218   : >> { %v2321_v18 = vpop.permute.xlu1 %2320 }
 0x219   : >> { %v2378_v23 = vmax.f32 %v2282_v2, %v2362_v17  ;;  %v2363_v28 = vmax.f32 %v3765_v14, %v2321_v18 }
 0x21b   : >> { %v2401_v30 = vadd.f32 %v3858_v38, %v2378_v23  ;;  %v2379_v31 = vmax.f32 %v2283_v20, %v2363_v28 }
 0x21d   : >> { %v2417_v32 = vmax.f32 %v2401_v30, 0.0  ;;  %v2402_v34 = vadd.f32 %v3858_v38, %v2379_v31 }
 0x21f   : >> { %v2884_v37 = vpack.c.bf16 %v2417_v32, %v2417_v32  ;;  %v2418_v40 = vmax.f32 %v2402_v34, 0.0 }
 0x221   : >> { %2503 = vst.msk [vmem:[%s3866_s5 + $0x10] sm:$0xf] %vm2498_vm5, %v2884_v37  ;;  %v2885_v41 = vpack.c.bf16 %v2418_v40, %v2418_v40 }
 0x222   : >> { %v2243_v8 = vpop.permute.xlu0 %2242 }
 0x223   : >> { %2504 = vst.msk [vmem:[%s3866_s5 + $0x14] sm:$0xf] %vm2498_vm5, %v2885_v41  ;;  %v2284_v14 = vmax.f32 %v3773_v19, %v2243_v8 }
 0x224   : >> { %v2245_v10 = vpop.permute.xlu1 %2244 }
 0x225   : >> { %v2285_v42 = vmax.f32 %v3777_v24, %v2245_v10 }
 0x226   : >> { %v2323_v12 = vpop.permute.xlu0 %2322 }
 0x227   : >> { %v2364_v48 = vmax.f32 %v3775_v22, %v2323_v12 }
 0x228   : >> { %v2325_v50 = vpop.permute.xlu1 %2324 }
 0x229   : >> { %v2380_v43 = vmax.f32 %v2284_v14, %v2364_v48  ;;  %v2365_v52 = vmax.f32 %v3781_v27, %v2325_v50 }
 0x22b   : >> { %v2403_v26 = vadd.f32 %v3858_v38, %v2380_v43  ;;  %v2381_v45 = vmax.f32 %v2285_v42, %v2365_v52 }
 0x22d   : >> { %v2419_v54 = vmax.f32 %v2403_v26, 0.0  ;;  %v2404_v47 = vadd.f32 %v3858_v38, %v2381_v45 }
 0x22f   : >> { %v2886_v51 = vpack.c.bf16 %v2419_v54, %v2419_v54  ;;  %v2420_v55 = vmax.f32 %v2404_v47, 0.0 }
 0x231   : >> { %2505 = vst.msk [vmem:[%s3866_s5 + $0x18] sm:$0xf] %vm2498_vm5, %v2886_v51  ;;  %v2887_v56 = vpack.c.bf16 %v2420_v55, %v2420_v55 }
 0x233   : >> { %2506 = vst.msk [vmem:[%s3866_s5 + $0x1c] sm:$0xf] %vm2498_vm5, %v2887_v56 }
 0x234   : >> { %v2247_v19 = vpop.permute.xlu0 %2246 }
 0x235   : >> { %v2286_v27 = vmax.f32 %v3789_v33, %v2247_v19 }
 0x236   : >> { %v2249_v22 = vpop.permute.xlu1 %2248 }
 0x237   : >> { %v2287_v59 = vmax.f32 %v3793_v36, %v2249_v22 }
 0x238   : >> { %v2327_v24 = vpop.permute.xlu0 %2326 }
 0x239   : >> { %v2366_v57 = vmax.f32 %v3791_v35, %v2327_v24 }
 0x23a   : >> { %v2329_v58 = vpop.permute.xlu1 %2328 }
 0x23b   : >> { %v2382_v63 = vmax.f32 %v2286_v27, %v2366_v57  ;;  %v2367_v3 = vmax.f32 %v3797_v39, %v2329_v58 }
 0x23d   : >> { %v2405_v5 = vadd.f32 %v3858_v38, %v2382_v63  ;;  %v2383_v7 = vmax.f32 %v2287_v59, %v2367_v3 }
 0x23f   : >> { %v2421_v9 = vmax.f32 %v2405_v5, 0.0  ;;  %v2406_v11 = vadd.f32 %v3858_v38, %v2383_v7 }
 0x241   : >> { %v2888_v13 = vpack.c.bf16 %v2421_v9, %v2421_v9  ;;  %v2422_v15 = vmax.f32 %v2406_v11, 0.0 }
 0x243   : >> { %2507 = vst.msk [vmem:[%s3866_s5 + $0x20] sm:$0xf] %vm2498_vm5, %v2888_v13  ;;  %v2889_v60 = vpack.c.bf16 %v2422_v15, %v2422_v15 }
 0x244   : >> { %v2251_v33 = vpop.permute.xlu0 %2250 }
 0x245   : >> { %2508 = vst.msk [vmem:[%s3866_s5 + $0x24] sm:$0xf] %vm2498_vm5, %v2889_v60  ;;  %v2288_v39 = vmax.f32 %v3805_v44, %v2251_v33 }
 0x246   : >> { %v2253_v35 = vpop.permute.xlu1 %2252 }
 0x247   : >> { %v2289_v2 = vmax.f32 %v3809_v49, %v2253_v35 }
 0x248   : >> { %v2331_v36 = vpop.permute.xlu0 %2330 }
 0x249   : >> { %v2368_v62 = vmax.f32 %v3807_v46, %v2331_v36 }
 0x24a   : >> { %v2333_v0 = vpop.permute.xlu1 %2332 }
 0x24b   : >> { %v2384_v17 = vmax.f32 %v2288_v39, %v2368_v62  ;;  %v2369_v18 = vmax.f32 %v3813_v53, %v2333_v0 }
 0x24d   : >> { %v2407_v20 = vadd.f32 %v3858_v38, %v2384_v17  ;;  %v2385_v23 = vmax.f32 %v2289_v2, %v2369_v18 }
 0x24f   : >> { %v2423_v28 = vmax.f32 %v2407_v20, 0.0  ;;  %v2408_v30 = vadd.f32 %v3858_v38, %v2385_v23 }
 0x251   : >> { %v2890_v31 = vpack.c.bf16 %v2423_v28, %v2423_v28  ;;  %v2424_v32 = vmax.f32 %v2408_v30, 0.0 }
 0x253   : >> { %2509 = vst.msk [vmem:[%s3866_s5 + $0x28] sm:$0xf] %vm2498_vm5, %v2890_v31  ;;  %v2891_v34 = vpack.c.bf16 %v2424_v32, %v2424_v32 }
 0x255   : >> { %2510 = vst.msk [vmem:[%s3866_s5 + $0x2c] sm:$0xf] %vm2498_vm5, %v2891_v34 }
 0x259   : >> { %v2255_v44 = vpop.permute.xlu0 %2254 }
 0x25a   : >> { %v2290_v53 = vmax.f32 %v3821_v61, %v2255_v44 }
 0x25b   : >> { %v2257_v46 = vpop.permute.xlu1 %2256 }
 0x25c   : >> { %v2291_v41 = vmax.f32 %v3825_v4, %v2257_v46 }
 0x25d   : >> { %v2335_v49 = vpop.permute.xlu0 %2334 }
 0x25e   : >> { %v2370_v37 = vmax.f32 %v3823_v1, %v2335_v49 }
 0x25f   : >> { %v2337_v40 = vpop.permute.xlu1 %2336 }
 0x260   : >> { %v2386_v8 = vmax.f32 %v2290_v53, %v2370_v37  ;;  %v2371_v10 = vmax.f32 %v3829_v6, %v2337_v40 }
 0x262   : >> { %v2409_v12 = vadd.f32 %v3858_v38, %v2386_v8  ;;  %v2387_v14 = vmax.f32 %v2291_v41, %v2371_v10 }
 0x264   : >> { %v2425_v48 = vmax.f32 %v2409_v12, 0.0  ;;  %v2410_v50 = vadd.f32 %v3858_v38, %v2387_v14 }
 0x266   : >> { %v2892_v42 = vpack.c.bf16 %v2425_v48, %v2425_v48  ;;  %v2426_v43 = vmax.f32 %v2410_v50, 0.0 }
 0x268   : >> { %2511 = vst.msk [vmem:[%s3866_s5 + $0x30] sm:$0xf] %vm2498_vm5, %v2892_v42  ;;  %v2893_v52 = vpack.c.bf16 %v2426_v43, %v2426_v43 }
 0x26a   : >> { %2512 = vst.msk [vmem:[%s3866_s5 + $0x34] sm:$0xf] %vm2498_vm5, %v2893_v52 }
 0x271   : >> { %v2259_v61 = vpop.permute.xlu0 %2258 }
 0x272   : >> { %v2292_v6 = vmax.f32 %v3837_v16, %v2259_v61 }
 0x273   : >> { %v2261_v1 = vpop.permute.xlu1 %2260 }
 0x274   : >> { %v2293_v54 = vmax.f32 %v3841_v25, %v2261_v1 }
 0x275   : >> { %v2339_v4 = vpop.permute.xlu0 %2338 }
 0x276   : >> { %v2372_v26 = vmax.f32 %v3839_v21, %v2339_v4 }
 0x277   : >> { %v2341_v45 = vpop.permute.xlu1 %2340 }
 0x278   : >> { %v2388_v47 = vmax.f32 %v2292_v6, %v2372_v26  ;;  %v2373_v51 = vmax.f32 %v3845_v29, %v2341_v45 }
 0x27a   : >> { %v2411_v55 = vadd.f32 %v3858_v38, %v2388_v47  ;;  %v2389_v56 = vmax.f32 %v2293_v54, %v2373_v51 }
 0x27c   : >> { %v2427_v19 = vmax.f32 %v2411_v55, 0.0  ;;  %v2412_v22 = vadd.f32 %v3858_v38, %v2389_v56  ;;  %175 = sbr.rel (!%p173_p4) target bundleno = 17 (0x11), region = 74 }
 0x27e   : >> { %v2894_v24 = vpack.c.bf16 %v2427_v19, %v2427_v19  ;;  %v2428_v27 = vmax.f32 %v2412_v22, 0.0 }
 0x280   : >> { %2513 = vst.msk [vmem:[%s3866_s5 + $0x38] sm:$0xf] %vm2498_vm5, %v2894_v24  ;;  %v2895_v57 = vpack.c.bf16 %v2428_v27, %v2428_v27 }
 0x282   : >> { %2514 = vst.msk [vmem:[%s3866_s5 + $0x3c] sm:$0xf] %vm2498_vm5, %v2895_v57 }
 0x283 PF: > { %s13_s12 = sadd.s32 1, %s3084_s12  }
 0x284   : > { %p10_p5 = scmp.ge.s32.totalorder %s13_s12, 4  }
 0x286   :  { %12 = sbr.rel (!%p10_p5) target bundleno = 1 (0x1), region = 85 }

// kernel: cnn_forward.5
= control target key start
LH: loop header
LB: loop body
LE: loop exit
PB: predicated region body
PF: predicated region fallthrough
CT: control target
= control target key end

     0   :  { %s2288_s20 = smov 0   ;;  %s2478_s0 = inlined_call_operand.vmem [shape: bf16[2,16384], index: 0, kind: input, shape index: {}]   ;;  %s2479_s1 = inlined_call_operand.vmem [shape: bf16[16384,128], index: 1, kind: input, shape index: {}]   ;;  %s2480_s2 = inlined_call_operand.vmem [shape: f32[1,128], index: 2, kind: input, shape index: {}]   ;;  %s2481_s3 = inlined_call_operand.vmem [shape: f32[1,128], index: 3, kind: input, shape index: {}]   ;;  %s2482_s4 = inlined_call_operand.<no memory space> [shape: f32[1,1], index: 4, kind: input, shape index: {}]   ;;  %s2483_s5 = inlined_call_operand.vmem [shape: f32[2,1], index: 5, kind: output, shape index: {}]  }
   0x1   :  { %v10_v0 = vstv %s2482_s4 }
   0x2   :  { %11 = vst [vmem:[#allocation3] sm:$0x1] %v10_v0 }
   0x3 LB: > { %s2294_s21 = sadd.s32 4294967295, %s2251_s20   ;;  %p1786_p0 = scmp.ge.s32.totalorder %s2251_s20, 1  ;;  %s2251_s20 = sphi %s2288_s20, %s17_s20  }
   0x4   : > { %p195_p1 = scmp.lt.s32.totalorder %s2251_s20, 9 }
   0x6   : > { %p196_p2 = pnand %p1786_p0, %p195_p1 }
   0x7   : > { %s1787_s4 = sshll.u32 (!%p196_p2), %s2294_s21, 4  ;;  %s1788_s22 = sshll.u32 (!%p196_p2), %s2294_s21, 8 }
   0x8   : > { %199 = sbr.rel (%p196_p2) target bundleno = 563 (0x233), region = 40  ;;  %p223_p3 = scmp.lt.s32.totalorder (!%p196_p2), %s1787_s4, 127 }
   0x9   : > { %p228_p4 = scmp.lt.s32.totalorder (!%p196_p2), %s1788_s22, 2047  ;;  %p1790_p5 = scmp.ne.s32.totalorder (!%p196_p2), %s2294_s21, 0 }
   0xf   : > { %s2485_s4 = smov (!%p223_p3, %s1787_s4), 127  ;;  %s2487_s22 = smov (!%p228_p4, %s1788_s22), 2047 }
  0x10   : > { %s2303_s25 = scalar_lea.vmem %s2478_s0, %s2485_s4  ;;  %s1789_s26 = sshll.u32 %s2487_s22, 2  ;;  %v2253_v1 = vmov (!%p1790_p5), 0.0  }
  0x11   : > { %s2308_s29 = scalar_lea.vmem %s2479_s1, %s1789_s26  ;;  %237 = sbr.rel (%p1790_p5) target bundleno = 24 (0x18), region = 44  ;;  %238 = vst [vmem:[#allocation2] sm:$0x3] (!%p1790_p5), %v2253_v1 }
  0x18 PF: > { %v2111_v2 = vld [vmem:[%s2308_s29 + $0x40] sm:$0xff]   ;;  %v2115_v6 = vld [vmem:[%s2308_s29 + $0x48] sm:$0xff]   ;;  %v2119_v10 = vld [vmem:[%s2308_s29 + $0x50] sm:$0xff]   ;;  %v504_v30 = vlaneseq  ;;  %v2254_v38 = vmov 1966171168   ;;  %p1919_p6 = scmp.ne.s32.totalorder %s2294_s21, 7 }
  0x19   : > { %v2112_v3 = vld [vmem:[%s2308_s29 + $0xc0] sm:$0xff]   ;;  %1925 = vmatprep.subr.bf16.mxu0 %v2111_v2  ;;  %v2116_v7 = vld [vmem:[%s2308_s29 + $0xc8] sm:$0xff]   ;;  %v2120_v11 = vld [vmem:[%s2308_s29 + $0xd0] sm:$0xff]   ;;  %v502_v39 = vunpack.c.l.s4 %v2254_v38  ;;  %vm1726_vm0 = vcmask (!%p1919_p6), 1041408   ;;  %vm1744_vm1 = vcmask (!%p1919_p6), 1024  }
  0x1a   : > { %v2113_v4 = vld [vmem:[%s2308_s29] sm:$0xff]   ;;  %1947 = vmatprep.subr.bf16.mxu1 %v2112_v3  ;;  %v2117_v8 = vld [vmem:[%s2308_s29 + $0x8] sm:$0xff]   ;;  %v2121_v12 = vld [vmem:[%s2308_s29 + $0x10] sm:$0xff]   ;;  %v505_v35 = vshrl.u32 %v504_v30, 7 }
  0x1b   : > { %v2114_v5 = vld [vmem:[%s2308_s29 + $0x80] sm:$0xff]   ;;  %1926 = vmatpush3.bf16.msra.mxu0 %v2113_v4  ;;  %v2118_v9 = vld [vmem:[%s2308_s29 + $0x88] sm:$0xff]   ;;  %v2122_v13 = vld [vmem:[%s2308_s29 + $0x90] sm:$0xff]   ;;  %v503_v42 = vunpack.c.0.s8 %v502_v39 }
  0x1c   : > { %1948 = vmatpush3.bf16.msra.mxu1 %v2114_v5  ;;  %1927 = vmatprep.subr.bf16.mxu0 %v2115_v6  ;;  %v2123_v14 = vld [vmem:[%s2308_s29 + $0x58] sm:$0xff]   ;;  %v2127_v18 = vld [vmem:[%s2308_s29 + $0x60] sm:$0xff]   ;;  %v2131_v22 = vld [vmem:[%s2308_s29 + $0x68] sm:$0xff]  }
  0x1d   : > { %1949 = vmatprep.subr.bf16.mxu1 %v2116_v7  ;;  %v2124_v15 = vld [vmem:[%s2308_s29 + $0xd8] sm:$0xff]   ;;  %v2128_v19 = vld [vmem:[%s2308_s29 + $0xe0] sm:$0xff]   ;;  %v2132_v23 = vld [vmem:[%s2308_s29 + $0xe8] sm:$0xff]   ;;  %v2346_v43 = vsub.s32 %v503_v42, %v505_v35 }
  0x1e   : > { %v2125_v16 = vld [vmem:[%s2308_s29 + $0x18] sm:$0xff]   ;;  %v2129_v20 = vld [vmem:[%s2308_s29 + $0x20] sm:$0xff]   ;;  %v2133_v24 = vld [vmem:[%s2308_s29 + $0x28] sm:$0xff]  }
  0x1f   : > { %1928 = vmatpush3.bf16.msra.mxu0 %v2117_v8  ;;  %v2126_v17 = vld [vmem:[%s2308_s29 + $0x98] sm:$0xff]   ;;  %v2130_v21 = vld [vmem:[%s2308_s29 + $0xa0] sm:$0xff]   ;;  %v2134_v25 = vld [vmem:[%s2308_s29 + $0xa8] sm:$0xff]  }
  0x20   : > { %1950 = vmatpush3.bf16.msra.mxu1 %v2118_v9  ;;  %1929 = vmatprep.subr.bf16.mxu0 %v2119_v10  ;;  %v2135_v26 = vld [vmem:[%s2308_s29 + $0x70] sm:$0xff]   ;;  %v2139_v31 = vld [vmem:[%s2308_s29 + $0x78] sm:$0xff]   ;;  %v240_v36 = vld [vmem:[%s2303_s25] sm:$0xff] }
  0x21   : > { %1951 = vmatprep.subr.bf16.mxu1 %v2120_v11  ;;  %v2136_v27 = vld [vmem:[%s2308_s29 + $0xf0] sm:$0xff]   ;;  %v2140_v32 = vld [vmem:[%s2308_s29 + $0xf8] sm:$0xff]   ;;  %v2144_v37 = vld [vmem:[%s2308_s29 + $0x140] sm:$0xff]   ;;  %v500_v41 = vcombine.high %v240_v36, %v240_v36  ;;  %v507_v44 = vrot.slane %v240_v36, %v2346_v43 }
  0x22   : > { %v2137_v28 = vld [vmem:[%s2308_s29 + $0x30] sm:$0xff]   ;;  %v2141_v33 = vld [vmem:[%s2308_s29 + $0x38] sm:$0xff]   ;;  %v2145_v40 = vld [vmem:[%s2308_s29 + $0x1c0] sm:$0xff]  }
  0x23   : > { %1930 = vmatpush3.bf16.msra.mxu0 %v2121_v12  ;;  %v2138_v29 = vld [vmem:[%s2308_s29 + $0xb0] sm:$0xff]   ;;  %v2142_v34 = vld [vmem:[%s2308_s29 + $0xb8] sm:$0xff]   ;;  %v2350_v45 = vrot.slane %v500_v41, %v2346_v43  ;;  %v515_v46 = vcombine.high %v507_v44, %v507_v44  ;;  %v523_v47 = vrot.slane %v507_v44, %v2346_v43  ;;  %v2146_v50 = vld [vmem:[%s2308_s29 + $0x100] sm:$0xff]  }
  0x24   : > { %1952 = vmatpush3.bf16.msra.mxu1 %v2122_v13  ;;  %1931 = vmatprep.subr.bf16.mxu0 %v2123_v14  ;;  %v2148_v53 = vld [vmem:[%s2308_s29 + $0x148] sm:$0xff]   ;;  %v2147_v55 = vld [vmem:[%s2308_s29 + $0x180] sm:$0xff]   ;;  %v2152_v59 = vld [vmem:[%s2308_s29 + $0x150] sm:$0xff]  }
  0x25   : > { %1953 = vmatprep.subr.bf16.mxu1 %v2124_v15  ;;  %v516_v48 = vcombine.high %v2350_v45, %v2350_v45  ;;  %v537_v49 = vrot.slane %v515_v46, %v2346_v43  ;;  %v545_v52 = vcombine.high %v523_v47, %v523_v47  ;;  %v2149_v56 = vld [vmem:[%s2308_s29 + $0x1c8] sm:$0xff]   ;;  %v2153_v61 = vld [vmem:[%s2308_s29 + $0x1d0] sm:$0xff]   ;;  %v2156_v63 = vld [vmem:[%s2308_s29 + $0x158] sm:$0xff]  }
  0x26   : > { %v2150_v58 = vld [vmem:[%s2308_s29 + $0x108] sm:$0xff]   ;;  %v2154_v62 = vld [vmem:[%s2308_s29 + $0x110] sm:$0xff]   ;;  %v2157_v1 = vld [vmem:[%s2308_s29 + $0x1d8] sm:$0xff]  }
  0x27   : > { %1932 = vmatpush3.bf16.msra.mxu0 %v2125_v16  ;;  %v544_v51 = vrot.slane %v516_v48, %v2346_v43  ;;  %1414 = vmatprep.mubr.bf16.mxu0 %v537_v49  ;;  %v547_v54 = vcombine.high %v537_v49, %v537_v49  ;;  %v2151_v60 = vld [vmem:[%s2308_s29 + $0x188] sm:$0xff]   ;;  %v2155_v0 = vld [vmem:[%s2308_s29 + $0x190] sm:$0xff]   ;;  %v2158_v2 = vld [vmem:[%s2308_s29 + $0x118] sm:$0xff]  }
  0x28   : > { %1954 = vmatpush3.bf16.msra.mxu1 %v2126_v17  ;;  %1933 = vmatprep.subr.bf16.mxu0 %v2127_v18  ;;  %v2160_v3 = vld [vmem:[%s2308_s29 + $0x160] sm:$0xff]   ;;  %v2159_v4 = vld [vmem:[%s2308_s29 + $0x198] sm:$0xff]   ;;  %v2164_v7 = vld [vmem:[%s2308_s29 + $0x168] sm:$0xff]  }
  0x29   : > { %1955 = vmatprep.subr.bf16.mxu1 %v2128_v19  ;;  %v548_v57 = vcombine.high %v544_v51, %v544_v51  ;;  %1454 = vmatprep.mubr.bf16.mxu1 %v547_v54  ;;  %v2161_v5 = vld [vmem:[%s2308_s29 + $0x1e0] sm:$0xff]   ;;  %v2165_v9 = vld [vmem:[%s2308_s29 + $0x1e8] sm:$0xff]   ;;  %v2168_v11 = vld [vmem:[%s2308_s29 + $0x170] sm:$0xff]   ;;  %v530_v19 = vrot.slane %v2350_v45, %v2346_v43 }
  0x2a   : > { %v2162_v6 = vld [vmem:[%s2308_s29 + $0x120] sm:$0xff]   ;;  %v2166_v10 = vld [vmem:[%s2308_s29 + $0x128] sm:$0xff]   ;;  %v2169_v13 = vld [vmem:[%s2308_s29 + $0x1f0] sm:$0xff]  }
  0x2b   : > { %1934 = vmatpush3.bf16.msra.mxu0 %v2129_v20  ;;  %v2163_v8 = vld [vmem:[%s2308_s29 + $0x1a0] sm:$0xff]   ;;  %v2167_v12 = vld [vmem:[%s2308_s29 + $0x1a8] sm:$0xff]   ;;  %v2170_v14 = vld [vmem:[%s2308_s29 + $0x130] sm:$0xff]  }
  0x2c   : > { %1956 = vmatpush3.bf16.msra.mxu1 %v2130_v21  ;;  %1935 = vmatprep.subr.bf16.mxu0 %v2131_v22  ;;  %v2172_v15 = vld [vmem:[%s2308_s29 + $0x178] sm:$0xff]   ;;  %v2171_v16 = vld [vmem:[%s2308_s29 + $0x1b0] sm:$0xff]   ;;  %v2176_v20 = vld [vmem:[%s2308_s29 + $0x240] sm:$0xff]  }
  0x2d   : > { %1957 = vmatprep.subr.bf16.mxu1 %v2132_v23  ;;  %v2173_v17 = vld [vmem:[%s2308_s29 + $0x1f8] sm:$0xff]   ;;  %v2177_v22 = vld [vmem:[%s2308_s29 + $0x2c0] sm:$0xff]   ;;  %v2183_v30 = vld [vmem:[%s2308_s29 + $0x288] sm:$0xff]  }
  0x2e   : > { %v2174_v18 = vld [vmem:[%s2308_s29 + $0x138] sm:$0xff]   ;;  %v2178_v23 = vld [vmem:[%s2308_s29 + $0x200] sm:$0xff]   ;;  %v2196_v41 = vld [vmem:[%s2308_s29 + $0x268] sm:$0xff]  }
  0x2f   : > { %1936 = vmatpush3.bf16.msra.mxu0 %v2133_v24  ;;  %v2175_v21 = vld [vmem:[%s2308_s29 + $0x1b8] sm:$0xff]   ;;  %v546_v24 = vcombine.high %v530_v19, %v530_v19  ;;  %v2193_v39 = vld [vmem:[%s2308_s29 + $0x2e0] sm:$0xff]   ;;  %v2197_v44 = vld [vmem:[%s2308_s29 + $0x2e8] sm:$0xff]  }
  0x30   : > { %1958 = vmatpush3.bf16.msra.mxu1 %v2134_v25  ;;  %1937 = vmatprep.subr.bf16.mxu0 %v2135_v26  ;;  %v2180_v25 = vld [vmem:[%s2308_s29 + $0x248] sm:$0xff]   ;;  %v2179_v26 = vld [vmem:[%s2308_s29 + $0x280] sm:$0xff]   ;;  %v2189_v35 = vld [vmem:[%s2308_s29 + $0x2d8] sm:$0xff]  }
  0x31   : > { %1959 = vmatprep.subr.bf16.mxu1 %v2136_v27  ;;  %v2181_v27 = vld [vmem:[%s2308_s29 + $0x2c8] sm:$0xff]   ;;  %v2190_v36 = vld [vmem:[%s2308_s29 + $0x218] sm:$0xff]   ;;  %v2195_v42 = vld [vmem:[%s2308_s29 + $0x2a0] sm:$0xff]  }
  0x32   : > { %v2191_v38 = vld [vmem:[%s2308_s29 + $0x298] sm:$0xff]   ;;  %v2198_v45 = vld [vmem:[%s2308_s29 + $0x228] sm:$0xff]   ;;  %v2200_v46 = vld [vmem:[%s2308_s29 + $0x270] sm:$0xff]  }
  0x33   : > { %1938 = vmatpush3.bf16.msra.mxu0 %v2137_v28  ;;  %v2182_v28 = vld [vmem:[%s2308_s29 + $0x208] sm:$0xff]  }
  0x34   : > { %1960 = vmatpush3.bf16.msra.mxu1 %v2138_v29  ;;  %1939 = vmatprep.subr.bf16.mxu0 %v2139_v31  ;;  %v2184_v29 = vld [vmem:[%s2308_s29 + $0x250] sm:$0xff]   ;;  %v2199_v48 = vld [vmem:[%s2308_s29 + $0x2a8] sm:$0xff]  }
  0x35   : > { %1961 = vmatprep.subr.bf16.mxu1 %v2140_v32  ;;  %v2185_v31 = vld [vmem:[%s2308_s29 + $0x2d0] sm:$0xff]  }
  0x36   : > { %v2186_v32 = vld [vmem:[%s2308_s29 + $0x210] sm:$0xff]  }
  0x37   : > { %1940 = vmatpush3.bf16.msra.mxu0 %v2141_v33  ;;  %v2188_v33 = vld [vmem:[%s2308_s29 + $0x258] sm:$0xff]  }
  0x38   : > { %1962 = vmatpush3.bf16.msra.mxu1 %v2142_v34  ;;  %1969 = vmatprep.subr.bf16.mxu0 %v2144_v37  ;;  %v2187_v34 = vld [vmem:[%s2308_s29 + $0x290] sm:$0xff]   ;;  %v2192_v37 = vld [vmem:[%s2308_s29 + $0x260] sm:$0xff]  }
  0x39   : > { %1991 = vmatprep.subr.bf16.mxu1 %v2145_v40  ;;  %v2194_v40 = vld [vmem:[%s2308_s29 + $0x220] sm:$0xff]  }
  0x3a   : > { %1415 = vmatmul.mubr.bf16.vlgmr.msra.gmra.mrb[0].mxu0 %v523_v47  ;;  %v241_v47 = vld [vmem:[%s2303_s25 + $0x8] sm:$0xff] }
  0x3b   : > { %1970 = vmatpush3.bf16.msra.mxu0 %v2146_v50  ;;  %1455 = vmatmul.mubr.bf16.vlgmr.msra.gmra.mrb[0].mxu1 %v545_v52  ;;  %v556_v49 = vrot.slane %v241_v47, %v2346_v43  ;;  %v549_v50 = vcombine.high %v241_v47, %v241_v47  ;;  %v2202_v52 = vld [vmem:[%s2308_s29 + $0x230] sm:$0xff]  }
  0x3c   : > { %1971 = vmatprep.subr.bf16.mxu0 %v2148_v53  ;;  %1992 = vmatpush3.bf16.msra.mxu1 %v2147_v55  ;;  %v2204_v55 = vld [vmem:[%s2308_s29 + $0x278] sm:$0xff]  }
  0x3d   : > { %1494 = vmatprep.mubr.bf16.mxu0 %v544_v51  ;;  %1993 = vmatprep.subr.bf16.mxu1 %v2149_v56  ;;  %v2201_v51 = vld [vmem:[%s2308_s29 + $0x2f0] sm:$0xff]   ;;  %v564_v53 = vcombine.high %v556_v49, %v556_v49  ;;  %v2419_v54 = vrot.slane %v549_v50, %v2346_v43 }
  0x3e   : > { %1534 = vmatprep.mubr.bf16.mxu1 %v548_v57  ;;  %v2203_v56 = vld [vmem:[%s2308_s29 + $0x2b0] sm:$0xff]  }
  0x3f   : > { %1972 = vmatpush3.bf16.msra.mxu0 %v2150_v58  ;;  %v586_v57 = vrot.slane %v564_v53, %v2346_v43  ;;  %v565_v58 = vcombine.high %v2419_v54, %v2419_v54 }
  0x40   : > { %1973 = vmatprep.subr.bf16.mxu0 %v2152_v59  ;;  %1994 = vmatpush3.bf16.msra.mxu1 %v2151_v60  ;;  %v2205_v59 = vld [vmem:[%s2308_s29 + $0x2f8] sm:$0xff]  }
  0x41   : > { %1995 = vmatprep.subr.bf16.mxu1 %v2153_v61  ;;  %v2206_v60 = vld [vmem:[%s2308_s29 + $0x238] sm:$0xff]   ;;  %v596_v61 = vcombine.high %v586_v57, %v586_v57 }
  0x43   : > { %1974 = vmatpush3.bf16.msra.mxu0 %v2154_v62  ;;  %v572_v62 = vrot.slane %v556_v49, %v2346_v43 }
  0x44   : > { %1975 = vmatprep.subr.bf16.mxu0 %v2156_v63  ;;  %1996 = vmatpush3.bf16.msra.mxu1 %v2155_v0  ;;  %v2208_v63 = vld [vmem:[%s2308_s29 + $0x340] sm:$0xff]   ;;  %v2207_v0 = vld [vmem:[%s2308_s29 + $0x2b8] sm:$0xff]  }
  0x45   : > { %1997 = vmatprep.subr.bf16.mxu1 %v2157_v1  ;;  %v593_v1 = vrot.slane %v565_v58, %v2346_v43 }
  0x47   : > { %1976 = vmatpush3.bf16.msra.mxu0 %v2158_v2  ;;  %v2209_v2 = vld [vmem:[%s2308_s29 + $0x3c0] sm:$0xff]  }
  0x48   : > { %1977 = vmatprep.subr.bf16.mxu0 %v2160_v3  ;;  %1998 = vmatpush3.bf16.msra.mxu1 %v2159_v4  ;;  %v2210_v3 = vld [vmem:[%s2308_s29 + $0x300] sm:$0xff]   ;;  %v594_v4 = vcombine.high %v572_v62, %v572_v62 }
  0x49   : > { %1999 = vmatprep.subr.bf16.mxu1 %v2161_v5  ;;  %v2212_v5 = vld [vmem:[%s2308_s29 + $0x348] sm:$0xff]  }
  0x4b   : > { %1978 = vmatpush3.bf16.msra.mxu0 %v2162_v6  ;;  %v2211_v6 = vld [vmem:[%s2308_s29 + $0x380] sm:$0xff]  }
  0x4c   : > { %1979 = vmatprep.subr.bf16.mxu0 %v2164_v7  ;;  %2000 = vmatpush3.bf16.msra.mxu1 %v2163_v8  ;;  %v597_v7 = vcombine.high %v593_v1, %v593_v1  ;;  %v2213_v8 = vld [vmem:[%s2308_s29 + $0x3c8] sm:$0xff]  }
  0x4d   : > { %2001 = vmatprep.subr.bf16.mxu1 %v2165_v9  ;;  %v2214_v9 = vld [vmem:[%s2308_s29 + $0x308] sm:$0xff]  }
  0x4f   : > { %1980 = vmatpush3.bf16.msra.mxu0 %v2166_v10  ;;  %v2216_v10 = vld [vmem:[%s2308_s29 + $0x350] sm:$0xff]  }
  0x50   : > { %1981 = vmatprep.subr.bf16.mxu0 %v2168_v11  ;;  %2002 = vmatpush3.bf16.msra.mxu1 %v2167_v12  ;;  %v2215_v11 = vld [vmem:[%s2308_s29 + $0x388] sm:$0xff]   ;;  %v2217_v12 = vld [vmem:[%s2308_s29 + $0x3d0] sm:$0xff]  }
  0x51   : > { %2003 = vmatprep.subr.bf16.mxu1 %v2169_v13  ;;  %v2218_v13 = vld [vmem:[%s2308_s29 + $0x310] sm:$0xff]  }
  0x53   : > { %1982 = vmatpush3.bf16.msra.mxu0 %v2170_v14  ;;  %v2220_v14 = vld [vmem:[%s2308_s29 + $0x358] sm:$0xff]  }
  0x54   : > { %1983 = vmatprep.subr.bf16.mxu0 %v2172_v15  ;;  %2004 = vmatpush3.bf16.msra.mxu1 %v2171_v16  ;;  %v2219_v15 = vld [vmem:[%s2308_s29 + $0x390] sm:$0xff]   ;;  %v2221_v16 = vld [vmem:[%s2308_s29 + $0x3d8] sm:$0xff]  }
  0x55   : > { %2005 = vmatprep.subr.bf16.mxu1 %v2173_v17  ;;  %v2222_v17 = vld [vmem:[%s2308_s29 + $0x318] sm:$0xff]  }
  0x57   : > { %1984 = vmatpush3.bf16.msra.mxu0 %v2174_v18  ;;  %v2224_v18 = vld [vmem:[%s2308_s29 + $0x360] sm:$0xff]  }
  0x58   : > { %2013 = vmatprep.subr.bf16.mxu0 %v2176_v20  ;;  %2006 = vmatpush3.bf16.msra.mxu1 %v2175_v21  ;;  %v2225_v20 = vld [vmem:[%s2308_s29 + $0x3e0] sm:$0xff]  }
  0x59   : > { %2035 = vmatprep.subr.bf16.mxu1 %v2177_v22  ;;  %v2226_v21 = vld [vmem:[%s2308_s29 + $0x320] sm:$0xff]   ;;  %v2228_v22 = vld [vmem:[%s2308_s29 + $0x368] sm:$0xff]  }
  0x5a   : > { %1495 = vmatmul.mubr.bf16.vlgmr.msra.gmra.mrb[4].mxu0 %v530_v19  ;;  %v2223_v19 = vld [vmem:[%s2308_s29 + $0x398] sm:$0xff]  }
  0x5b   : > { %2014 = vmatpush3.bf16.msra.mxu0 %v2178_v23  ;;  %1535 = vmatmul.mubr.bf16.vlgmr.msra.gmra.mrb[4].mxu1 %v546_v24  ;;  %v2227_v23 = vld [vmem:[%s2308_s29 + $0x3a0] sm:$0xff]   ;;  %v2229_v24 = vld [vmem:[%s2308_s29 + $0x3e8] sm:$0xff]  }
  0x5c   : > { %2015 = vmatprep.subr.bf16.mxu0 %v2180_v25  ;;  %2036 = vmatpush3.bf16.msra.mxu1 %v2179_v26  ;;  %v2230_v25 = vld [vmem:[%s2308_s29 + $0x328] sm:$0xff]   ;;  %v2232_v26 = vld [vmem:[%s2308_s29 + $0x370] sm:$0xff]  }
  0x5d   : > { %2037 = vmatprep.subr.bf16.mxu1 %v2181_v27  ;;  %1574 = vmatprep.mubr.bf16.mxu0 %v586_v57  ;;  %v2231_v27 = vld [vmem:[%s2308_s29 + $0x3a8] sm:$0xff]  }
  0x5e   : > { %1614 = vmatprep.mubr.bf16.mxu1 %v596_v61 }
  0x5f   : > { %2016 = vmatpush3.bf16.msra.mxu0 %v2182_v28  ;;  %v2233_v28 = vld [vmem:[%s2308_s29 + $0x3f0] sm:$0xff]  }
  0x60   : > { %2017 = vmatprep.subr.bf16.mxu0 %v2184_v29  ;;  %2038 = vmatpush3.bf16.msra.mxu1 %v2183_v30  ;;  %v2234_v29 = vld [vmem:[%s2308_s29 + $0x330] sm:$0xff]   ;;  %v2236_v30 = vld [vmem:[%s2308_s29 + $0x378] sm:$0xff]  }
  0x61   : > { %2039 = vmatprep.subr.bf16.mxu1 %v2185_v31  ;;  %v2235_v31 = vld [vmem:[%s2308_s29 + $0x3b0] sm:$0xff]  }
  0x63   : > { %2018 = vmatpush3.bf16.msra.mxu0 %v2186_v32  ;;  %v2237_v32 = vld [vmem:[%s2308_s29 + $0x3f8] sm:$0xff]  }
  0x64   : > { %2019 = vmatprep.subr.bf16.mxu0 %v2188_v33  ;;  %2040 = vmatpush3.bf16.msra.mxu1 %v2187_v34  ;;  %v2238_v33 = vld [vmem:[%s2308_s29 + $0x338] sm:$0xff]   ;;  %v579_v34 = vrot.slane %v2419_v54, %v2346_v43 }
  0x65   : > { %2041 = vmatprep.subr.bf16.mxu1 %v2189_v35  ;;  %v2239_v35 = vld [vmem:[%s2308_s29 + $0x3b8] sm:$0xff]  }
  0x67   : > { %2020 = vmatpush3.bf16.msra.mxu0 %v2190_v36  ;;  %v595_v36 = vcombine.high %v579_v34, %v579_v34 }
  0x68   : > { %2021 = vmatprep.subr.bf16.mxu0 %v2192_v37  ;;  %2042 = vmatpush3.bf16.msra.mxu1 %v2191_v38 }
  0x69   : > { %2043 = vmatprep.subr.bf16.mxu1 %v2193_v39 }
  0x6b   : > { %2022 = vmatpush3.bf16.msra.mxu0 %v2194_v40 }
  0x6c   : > { %2023 = vmatprep.subr.bf16.mxu0 %v2196_v41  ;;  %2044 = vmatpush3.bf16.msra.mxu1 %v2195_v42 }
  0x6d   : > { %2045 = vmatprep.subr.bf16.mxu1 %v2197_v44 }
  0x6f   : > { %2024 = vmatpush3.bf16.msra.mxu0 %v2198_v45 }
  0x70   : > { %2025 = vmatprep.subr.bf16.mxu0 %v2200_v46  ;;  %2046 = vmatpush3.bf16.msra.mxu1 %v2199_v48 }
  0x71   : > { %2047 = vmatprep.subr.bf16.mxu1 %v2201_v51 }
  0x73   : > { %2026 = vmatpush3.bf16.msra.mxu0 %v2202_v52 }
  0x74   : > { %2027 = vmatprep.subr.bf16.mxu0 %v2204_v55  ;;  %2048 = vmatpush3.bf16.msra.mxu1 %v2203_v56 }
  0x75   : > { %2049 = vmatprep.subr.bf16.mxu1 %v2205_v59 }
  0x77   : > { %2028 = vmatpush3.bf16.msra.mxu0 %v2206_v60 }
  0x78   : > { %2057 = vmatprep.subr.bf16.mxu0 %v2208_v63  ;;  %2050 = vmatpush3.bf16.msra.mxu1 %v2207_v0 }
  0x79   : > { %2079 = vmatprep.subr.bf16.mxu1 %v2209_v2 }
  0x7a   : > { %1575 = vmatmul.mubr.bf16.vlgmr.msra.gmra.mrb[8].mxu0 %v572_v62 }
  0x7b   : > { %2058 = vmatpush3.bf16.msra.mxu0 %v2210_v3  ;;  %1654 = vmatprep.mubr.bf16.mxu0 %v593_v1 }
  0x7c   : > { %1615 = vmatmul.mubr.bf16.vlgmr.msra.gmra.mrb[8].mxu1 %v594_v4  ;;  %2059 = vmatprep.subr.bf16.mxu0 %v2212_v5 }
  0x7d   : > { %2080 = vmatpush3.bf16.msra.mxu1 %v2211_v6  ;;  %1694 = vmatprep.mubr.bf16.mxu1 %v597_v7 }
  0x7e   : > { %2081 = vmatprep.subr.bf16.mxu1 %v2213_v8 }
  0x7f   : > { %2060 = vmatpush3.bf16.msra.mxu0 %v2214_v9 }
  0x80   : > { %2061 = vmatprep.subr.bf16.mxu0 %v2216_v10 }
  0x81   : > { %2082 = vmatpush3.bf16.msra.mxu1 %v2215_v11 }
  0x82   : > { %2083 = vmatprep.subr.bf16.mxu1 %v2217_v12 }
  0x83   : > { %2062 = vmatpush3.bf16.msra.mxu0 %v2218_v13 }
  0x84   : > { %2063 = vmatprep.subr.bf16.mxu0 %v2220_v14 }
  0x85   : > { %2084 = vmatpush3.bf16.msra.mxu1 %v2219_v15 }
  0x86   : > { %2085 = vmatprep.subr.bf16.mxu1 %v2221_v16 }
  0x87   : > { %2064 = vmatpush3.bf16.msra.mxu0 %v2222_v17 }
  0x88   : > { %2065 = vmatprep.subr.bf16.mxu0 %v2224_v18  ;;  %v239_v18 = vld [vmem:[#allocation2] sm:$0x3] }
  0x89   : > { %2086 = vmatpush3.bf16.msra.mxu1 %v2223_v19 }
  0x8a   : > { %2087 = vmatprep.subr.bf16.mxu1 %v2225_v20 }
  0x8b   : > { %2066 = vmatpush3.bf16.msra.mxu0 %v2226_v21 }
  0x8c   : > { %2067 = vmatprep.subr.bf16.mxu0 %v2228_v22 }
  0x8d   : > { %2088 = vmatpush3.bf16.msra.mxu1 %v2227_v23  ;;  %v1920_v23 = vld [vmem:[%s2480_s2] ss:$0 sm:$0xff] (!%p1919_p6) }
  0x8e   : > { %2089 = vmatprep.subr.bf16.mxu1 %v2229_v24 }
  0x8f   : > { %2068 = vmatpush3.bf16.msra.mxu0 %v2230_v25  ;;  %v1921_v25 = vld [vmem:[%s2481_s3] ss:$0 sm:$0xff] (!%p1919_p6) }
  0x90   : > { %2069 = vmatprep.subr.bf16.mxu0 %v2232_v26 }
  0x91   : > { %2090 = vmatpush3.bf16.msra.mxu1 %v2231_v27 }
  0x92   : > { %2091 = vmatprep.subr.bf16.mxu1 %v2233_v28 }
  0x93   : > { %2070 = vmatpush3.bf16.msra.mxu0 %v2234_v29  ;;  %v1922_v29 = vld [vmem:[#allocation3] ss:$0 sm:$0xff] (!%p1919_p6) }
  0x94   : > { %2071 = vmatprep.subr.bf16.mxu0 %v2236_v30 }
  0x95   : > { %2092 = vmatpush3.bf16.msra.mxu1 %v2235_v31 }
  0x96   : > { %2093 = vmatprep.subr.bf16.mxu1 %v2237_v32 }
  0x97   : > { %2072 = vmatpush3.bf16.msra.mxu0 %v2238_v33 }
  0x99   : > { %2094 = vmatpush3.bf16.msra.mxu1 %v2239_v35 }
  0x9a   : > { %1655 = vmatmul.mubr.bf16.vlgmr.msra.gmra.mrb[12].mxu0 %v579_v34 }
  0x9c   : > { %1695 = vmatmul.mubr.bf16.vlgmr.msra.gmra.mrb[12].mxu1 %v595_v36 }
 0x10d   : > { %v1941_v37 = vpop.f32.mrb[0].mxu0 }
 0x10e   : > { %v1942_v38 = vpop.f32.mrb[1].mxu0  ;;  %v1963_v39 = vpop.f32.mrb[0].mxu1 }
 0x10f   : > { %v1943_v40 = vadd.f32 %v1942_v38, %v1941_v37  ;;  %v1944_v41 = vpop.f32.mrb[2].mxu0  ;;  %v1964_v42 = vpop.f32.mrb[1].mxu1 }
 0x110   : > { %v1945_v44 = vpop.f32.mrb[3].mxu0  ;;  %v1965_v45 = vadd.f32 %v1964_v42, %v1963_v39  ;;  %v1966_v46 = vpop.f32.mrb[2].mxu1 }
 0x111   : > { %v1967_v47 = vpop.f32.mrb[3].mxu1 }
 0x112   : > { %v1457_v48 = vadd.f32 %v1965_v45, %v1943_v40 }
 0x12d   : > { %v1985_v43 = vpop.f32.mrb[4].mxu0 }
 0x12e   : > { %v1986_v49 = vpop.f32.mrb[5].mxu0  ;;  %v2007_v50 = vpop.f32.mrb[4].mxu1 }
 0x12f   : > { %v1987_v51 = vadd.f32 %v1986_v49, %v1985_v43  ;;  %v1988_v52 = vpop.f32.mrb[6].mxu0  ;;  %v2008_v53 = vpop.f32.mrb[5].mxu1 }
 0x130   : > { %v1989_v54 = vpop.f32.mrb[7].mxu0  ;;  %v2009_v56 = vadd.f32 %v2008_v53, %v2007_v50  ;;  %v2010_v57 = vpop.f32.mrb[6].mxu1 }
 0x131   : > { %v1497_v55 = vadd.f32 %v1987_v51, %v1457_v48  ;;  %v2011_v58 = vpop.f32.mrb[7].mxu1 }
 0x133   : > { %v1537_v59 = vadd.f32 %v2009_v56, %v1497_v55 }
 0x14d   : > { %v2029_v60 = vpop.f32.mrb[8].mxu0 }
 0x14e   : > { %v2030_v61 = vpop.f32.mrb[9].mxu0 }
 0x14f   : > { %v2051_v62 = vpop.f32.mrb[8].mxu1  ;;  %v2031_v63 = vadd.f32 %v2030_v61, %v2029_v60  ;;  %v2032_v0 = vpop.f32.mrb[10].mxu0 }
 0x150   : > { %v2052_v1 = vpop.f32.mrb[9].mxu1  ;;  %v2033_v2 = vpop.f32.mrb[11].mxu0 }
 0x151   : > { %v1577_v3 = vadd.f32 %v2031_v63, %v1537_v59  ;;  %v2053_v4 = vadd.f32 %v2052_v1, %v2051_v62  ;;  %v2054_v5 = vpop.f32.mrb[10].mxu1 }
 0x152   : > { %v2055_v6 = vpop.f32.mrb[11].mxu1 }
 0x153   : > { %v1617_v7 = vadd.f32 %v2053_v4, %v1577_v3 }
 0x16d   : > { %v2073_v8 = vpop.f32.mrb[12].mxu0 }
 0x16e   : > { %v2074_v9 = vpop.f32.mrb[13].mxu0 }
 0x16f   : > { %v2095_v10 = vpop.f32.mrb[12].mxu1  ;;  %v2075_v11 = vadd.f32 %v2074_v9, %v2073_v8  ;;  %v2076_v12 = vpop.f32.mrb[14].mxu0 }
 0x170   : > { %v2096_v13 = vpop.f32.mrb[13].mxu1  ;;  %v2077_v14 = vpop.f32.mrb[15].mxu0 }
 0x171   : > { %v1657_v15 = vadd.f32 %v2075_v11, %v1617_v7  ;;  %v2097_v16 = vadd.f32 %v2096_v13, %v2095_v10  ;;  %v2098_v17 = vpop.f32.mrb[14].mxu1  ;;  %1707 = sbr.rel (%p1919_p6) target bundleno = 563 (0x233), region = 48 }
 0x172   : > { %v2099_v19 = vpop.f32.mrb[15].mxu1 }
 0x173   : > { %v1697_v20 = vadd.f32 %v2097_v16, %v1657_v15 }
 0x175   : > { %v1702_v21 = vadd.f32 %v1697_v20, %v239_v18 }
 0x177   : > { %1703 = vst [vmem:[#allocation2] sm:$0x3] %v1702_v21 }
 0x17e   : > { %v1708_v22 = vld [vmem:[#allocation2] sm:$0x3] }
 0x17f   : > { %v1716_v24 = vadd.f32 %v1920_v23, %v1708_v22 }
 0x181   : > { %v1717_v26 = vmax.f32 %v1716_v24, 0.0 }
 0x183   : > { %v1725_v27 = vmul.f32 %v1921_v25, %v1717_v26 }
 0x185   : > { %v1727_v28 = vsel %vm1726_vm0, %v1725_v27, 0.0 }
 0x186   : > { %1728 = vadd.xlane.f32.xlu0 %v1727_v28 }
 0x213   : > { %v1729_v30 = vpop.xlane.xlu0 %1728 }
 0x214   : > { %v1737_v31 = vadd.f32 %v1922_v29, %v1729_v30 }
 0x216   : > { %v1738_v32 = vsub.f32 0.0, %v1737_v31 }
 0x218   : > { %v1739_v33 = vmul.f32 1.442695, %v1738_v32 }
 0x21a   : > { %2241 = vpow2.f32 %v1739_v33 }
 0x224   : > { %v2242_v34 = vpop.eup %2241 }
 0x225   : > { %v1741_v35 = vadd.f32 1.0, %v2242_v34 }
 0x227   : > { %2243 = vrcp.f32 %v1741_v35 }
 0x231   : > { %v2244_v36 = vpop.eup %2243 }
 0x232   : > { %1745 = vst.msk [vmem:[%s2483_s5] sm:$0x3] %vm1744_vm1, %v2244_v36 }
 0x233 PF: > { %s17_s20 = sadd.s32 1, %s2251_s20  }
 0x234   : > { %p14_p7 = scmp.ge.s32.totalorder %s17_s20, 10  }
 0x236   :  { %16 = sbr.rel (!%p14_p7) target bundleno = 3 (0x3), region = 77 }

</bundles_post_ra>
